<compile_context>
chip_gen: v6e
topology: v6e:2x2x1
jax: 0.10.0
libtpu: 0.0.40
codegen_flags: <defaults>
</compile_context>

<pallas_src>
import jax
import jax.numpy as jnp
from jax.experimental import pallas as pl
from jax.experimental.pallas import tpu as pltpu

_VMEM_LIMIT = 48 * 1024 * 1024   # safe on v7x (64 MiB/TC); plenty on v5e/v6e
_FC_TILE_B = 256                 # max batch-row tile for the fused fc kernel
_IMG_TILE_MAX = 8                # max images per conv_pool grid step


def _round_up(a, m):
    return (a + m - 1) // m * m


# ----------------------- kernel 1: conv1 + conv2 + pool --------------------- #
# Per grid step (= IMG_TILE images):
#   p1_ref : (T, 676, 9)  bf16  im2col of the 28x28 input, row index = r*26+c
#   w1_ref : (9, 32)      bf16  conv1 weight, rows ordered k = ky*3+kx
#   b1_ref : (1, 32)      f32
#   w2_ref : (288, 64)    bf16  conv2 weight, row = (ky*3+kx)*32 + cin
#   b2_ref : (1, 64)      f32
#   se_ref : (72, 595)    bf16  one-hot row selection (even pooled columns)
#   so_ref : (72, 595)    bf16  one-hot row selection (odd pooled columns)
#   o_ref  : (T, 72, 128) bf16  pooled output, row = rp*6 + cp//2,
#                               lane = (cp%2)*64 + channel

def _conv_pool_kernel(p1_ref, w1_ref, b1_ref, w2_ref, b2_ref,
                      se_ref, so_ref, o_ref):
    w1 = w1_ref[...]
    b1 = b1_ref[...]
    w2 = w2_ref[...]
    b2 = b2_ref[...]
    se = se_ref[...]
    so = so_ref[...]
    for img in range(o_ref.shape[0]):
        # conv1 + ReLU: (676, 9) @ (9, 32) bf16 MXU dot, f32 accumulation.
        y1 = jnp.dot(p1_ref[img], w1, preferred_element_type=jnp.float32)
        y1 = jnp.maximum(y1 + b1, 0.0)                       # (676, 32) f32

        # conv2: in-VMEM im2col.  Nine contiguous row-shifted slices of y1
        # lane-concatenated into one (622, 288) slab + a single bf16 dot with
        # the (288, 64) weight (replaces nine K=32 dots).  Row j = r*26+c of
        # `acc` is the conv2 output at (r, c) for c <= 23; columns c in
        # {24, 25} hold harmless junk and are never selected by the pool.
        slab = jnp.concatenate(
            [y1[(k // 3) * 26 + (k % 3):(k // 3) * 26 + (k % 3) + 622, :]
             for k in range(9)], axis=-1).astype(jnp.bfloat16)   # (622, 288)
        acc = jnp.dot(slab, w2, preferred_element_type=jnp.float32)
        acc = jnp.maximum(acc + b2, 0.0)                     # (622, 64) f32

        # 2x2 max-pool as an elementwise maximum tree (VPU only, no XLU):
        # vertical pool pairs rows j and j+26, horizontal pool pairs j, j+1.
        v = jnp.maximum(acc[0:596, :], acc[26:622, :])       # (596, 64)
        h = jnp.maximum(v[0:595, :], v[1:596, :])            # (595, 64)
        h = h.astype(jnp.bfloat16)
        # h[52*rp + 2*cp] is the pooled value at (rp, cp); compact the 144
        # rows with two one-hot bf16 selection matmuls (exact) and pair the
        # even/odd pooled columns along lanes -> lane-dense (72, 128) store.
        pe = jnp.dot(se, h, preferred_element_type=jnp.float32)   # cp even
        po = jnp.dot(so, h, preferred_element_type=jnp.float32)   # cp odd
        o_ref[img] = jnp.concatenate([pe, po], axis=-1).astype(o_ref.dtype)


def conv_pool(p1, w1m, b1, w2m, b2, sel_e, sel_o, img_tile):
    n = p1.shape[0]                                   # already padded
    return pl.pallas_call(
        _conv_pool_kernel,
        out_shape=jax.ShapeDtypeStruct((n, 72, 128), jnp.bfloat16),
        grid=(n // img_tile,),
        in_specs=[
            pl.BlockSpec((img_tile, 676, 9), lambda i: (i, 0, 0)),
            pl.BlockSpec((9, 32), lambda i: (0, 0)),          # VMEM-resident
            pl.BlockSpec((1, 32), lambda i: (0, 0)),
            pl.BlockSpec((288, 64), lambda i: (0, 0)),        # VMEM-resident
            pl.BlockSpec((1, 64), lambda i: (0, 0)),
            pl.BlockSpec((72, 595), lambda i: (0, 0)),        # VMEM-resident
            pl.BlockSpec((72, 595), lambda i: (0, 0)),        # VMEM-resident
        ],
        out_specs=pl.BlockSpec((img_tile, 72, 128), lambda i: (i, 0, 0)),
        compiler_params=pltpu.CompilerParams(
            dimension_semantics=("parallel",),        # megacore split on v7x
            vmem_limit_bytes=_VMEM_LIMIT),
    )(p1, w1m, b1, w2m, b2, sel_e, sel_o)


# ---------------------- kernel 2: fc1 + ReLU + fc2 + lsm -------------------- #

def _fc_kernel(x_ref, w1_ref, b1_ref, w2_ref, b2_ref, o_ref):
    # fc1 + ReLU: x arrives bf16 from the conv kernel, weight is bf16,
    # f32 accumulation on the MXU.
    h = jnp.dot(x_ref[...], w1_ref[...], preferred_element_type=jnp.float32)
    h = jnp.maximum(h + b1_ref[...], 0.0)                     # (TB, 128) f32
    # fc2 + numerically stable log_softmax, all f32 (tiny matmul).
    z = jnp.dot(h, w2_ref[...], preferred_element_type=jnp.float32) + b2_ref[...]
    zmax = jnp.max(z, axis=-1, keepdims=True)
    s = z - zmax
    lse = jnp.log(jnp.sum(jnp.exp(s), axis=-1, keepdims=True))
    o_ref[...] = (s - lse).astype(o_ref.dtype)


def fc_head(flat, w1m, b1, w2m, b2):
    m, k = flat.shape
    # >= 2 grid steps whenever the batch allows (v7x megacore), <= _FC_TILE_B.
    tb = min(_FC_TILE_B, max(8, _round_up((m + 1) // 2, 8)))
    mp = _round_up(m, tb)
    if mp != m:
        flat = jnp.pad(flat, ((0, mp - m), (0, 0)))
    out = pl.pallas_call(
        _fc_kernel,
        out_shape=jax.ShapeDtypeStruct((mp, 10), jnp.float32),
        grid=(mp // tb,),
        in_specs=[
            pl.BlockSpec((tb, k), lambda i: (i, 0)),        # bf16 activations
            pl.BlockSpec((k, 128), lambda i: (0, 0)),       # bf16 fc1 weight, resident
            pl.BlockSpec((1, 128), lambda i: (0, 0)),
            pl.BlockSpec((128, 10), lambda i: (0, 0)),
            pl.BlockSpec((1, 10), lambda i: (0, 0)),
        ],
        out_specs=pl.BlockSpec((tb, 10), lambda i: (i, 0)),
        compiler_params=pltpu.CompilerParams(
            dimension_semantics=("parallel",),
            vmem_limit_bytes=_VMEM_LIMIT),
    )(flat, w1m, b1, w2m, b2)
    return out[:m]


# --------------------------- parameter preparation -------------------------- #

def _make_pool_select():
    # Row r = rp*6 + q selects max-tree row 52*rp + 4*q (even pooled column
    # cp = 2q) / 52*rp + 4*q + 2 (odd pooled column cp = 2q+1).  One-hot
    # values are exact in bf16, so the selection matmul is lossless.
    r = jnp.arange(72)
    base = 52 * (r // 6) + 4 * (r % 6)
    sel_e = jnp.zeros((72, 595), jnp.float32).at[r, base].set(1.0)
    sel_o = jnp.zeros((72, 595), jnp.float32).at[r, base + 2].set(1.0)
    return sel_e.astype(jnp.bfloat16), sel_o.astype(jnp.bfloat16)


def prepare_params(raw):
    """One-time weight relayout / casts so the kernels never transpose at runtime."""
    w1, b1, w2, b2, wf1, bf1, wf2, bf2 = raw
    # conv weights: (Cout, Cin, kh, kw) -> rows ordered (ky, kx, cin), chan last.
    w1m = jnp.transpose(w1, (2, 3, 1, 0)).reshape(9, 32).astype(jnp.bfloat16)
    w2m = jnp.transpose(w2, (2, 3, 1, 0)).reshape(288, 64).astype(jnp.bfloat16)
    # fc1 weight permuted so its 9216 input rows follow the (rp, cp, chan)
    # order emitted by the conv kernel's lane-dense (72, 128) output
    # (feature index = rp*768 + cp*64 + chan, identical to the flatten of the
    # old (144, 64) layout), so the NCHW "torch.flatten" transpose disappears.
    wf1m = jnp.transpose(wf1.reshape(128, 64, 12, 12), (2, 3, 1, 0))
    wf1m = wf1m.reshape(9216, 128).astype(jnp.bfloat16)
    wf2m = jnp.transpose(wf2, (1, 0)).astype(jnp.float32)          # (128, 10)
    sel_e, sel_o = _make_pool_select()
    return dict(
        w1m=w1m, b1=b1.reshape(1, 32).astype(jnp.float32),
        w2m=w2m, b2=b2.reshape(1, 64).astype(jnp.float32),
        sel_e=sel_e, sel_o=sel_o,
        wf1m=wf1m, bf1=bf1.reshape(1, 128).astype(jnp.float32),
        wf2m=wf2m, bf2=bf2.reshape(1, 10).astype(jnp.float32))


# --------------------------------- forward ---------------------------------- #

def pt_net_forward(x_nchw, p):
    """PT_Net.forward for NCHW float32 input of shape (N, 1, 28, 28)."""
    n = x_nchw.shape[0]
    x2 = x_nchw[:, 0]                                      # (N, 28, 28), Cin == 1
    # Tiny 9-column im2col for conv1 (12 KB / image of extra HBM in bf16).
    cols = [x2[:, ky:ky + 26, kx:kx + 26]
            for ky in range(3) for kx in range(3)]
    p1 = jnp.stack(cols, axis=-1).reshape(n, 676, 9).astype(jnp.bfloat16)
    # Images per conv grid step: amortize per-step pipeline overhead while
    # keeping >= 2 grid steps whenever the batch allows (v7x megacore).
    img_tile = min(_IMG_TILE_MAX, max(1, (n + 1) // 2))
    n_pad = _round_up(n, img_tile)
    if n_pad != n:
        p1 = jnp.pad(p1, ((0, n_pad - n), (0, 0), (0, 0)))
    pooled = conv_pool(p1, p["w1m"], p["b1"], p["w2m"], p["b2"],
                       p["sel_e"], p["sel_o"], img_tile)
    flat = pooled.reshape(n_pad, 9216)                     # free, row-major, bf16
    out = fc_head(flat, p["wf1m"], p["bf1"], p["wf2m"], p["bf2"])
    return out[:n]


# --------------------------- init + f32 reference --------------------------- #

def init_params(key):
    ks = jax.random.split(key, 8)

    def u(k, shape, fan_in):
        bound = 1.0 / (float(fan_in) ** 0.5)
        return jax.random.uniform(k, shape, jnp.float32, -bound, bound)

    return (u(ks[0], (32, 1, 3, 3), 9), u(ks[1], (32,), 9),
            u(ks[2], (64, 32, 3, 3), 288), u(ks[3], (64,), 288),
            u(ks[4], (128, 9216), 9216), u(ks[5], (128,), 9216),
            u(ks[6], (10, 128), 128), u(ks[7], (10,), 128))


def pt_net_reference(x, raw):
    """Pure-JAX f32 reference of PT_Net.forward (validation only)."""
    w1, b1, w2, b2, wf1, bf1, wf2, bf2 = raw
    dn = ("NCHW", "OIHW", "NCHW")
    y = jax.lax.conv_general_dilated(x, w1, (1, 1), "VALID", dimension_numbers=dn)
    y = jax.nn.relu(y + b1.reshape(1, -1, 1, 1))
    y = jax.lax.conv_general_dilated(y, w2, (1, 1), "VALID", dimension_numbers=dn)
    y = jax.nn.relu(y + b2.reshape(1, -1, 1, 1))
    nb, c, hh, ww = y.shape
    y = y.reshape(nb, c, hh // 2, 2, ww // 2, 2).max(axis=(3, 5))
    flat = y.reshape(nb, -1)                               # torch-style NCHW flatten
    h = jax.nn.relu(flat @ wf1.T + bf1)
    z = h @ wf2.T + bf2
    return jax.nn.log_softmax(z, axis=1)


if __name__ == "__main__":
    key = jax.random.PRNGKey(0)
    kx, kp = jax.random.split(key)
    # fc1 expects 9216 = 64*12*12 features => 28x28 single-channel input.
    x = jax.random.normal(kx, (2, 1, 28, 28), jnp.float32)
    raw = init_params(kp)
    params = prepare_params(raw)

    out = jax.block_until_ready(jax.jit(pt_net_forward)(x, params))
    assert out.shape == (2, 10) and out.dtype == jnp.float32

    # Rows must be valid log-probabilities and match the f32 reference
    # (loose tolerance: conv1/conv2/fc1 matmul inputs are bf16 by design).
    assert jnp.allclose(jnp.sum(jnp.exp(out), axis=1), 1.0, atol=1e-3)
    ref = jax.jit(pt_net_reference)(x, raw)
    assert float(jnp.max(jnp.abs(out - ref))) < 3e-2
    print("KERNEL_OK")
</pallas_src>

<mosaic_0001>
module attributes {stable_mosaic.version = 11 : i64} {
  func.func @_conv_pool_kernel(%arg0: i32, %arg1: memref<1x676x9xbf16, #tpu.memory_space<vmem>>, %arg2: memref<9x32xbf16, #tpu.memory_space<vmem>>, %arg3: memref<1x32xf32, #tpu.memory_space<vmem>>, %arg4: memref<288x64xbf16, #tpu.memory_space<vmem>>, %arg5: memref<1x64xf32, #tpu.memory_space<vmem>>, %arg6: memref<72x595xbf16, #tpu.memory_space<vmem>>, %arg7: memref<72x595xbf16, #tpu.memory_space<vmem>>, %arg8: memref<1x72x128xbf16, #tpu.memory_space<vmem>>) attributes {dimension_semantics = [#tpu.dimension_semantics<parallel>], iteration_bounds = array<i64: 2>, scalar_prefetch = 0 : i64, scratch_operands = 0 : i64, tpu.core_type = #tpu.core_type<tc>, window_params = [{transform_indices = @transform_0, window_bounds = array<i64: 1, 676, 9>}, {pipeline_mode = #tpu.pipeline_mode<synchronous>, transform_indices = @transform_1, window_bounds = array<i64: 9, 32>}, {pipeline_mode = #tpu.pipeline_mode<synchronous>, transform_indices = @transform_2, window_bounds = array<i64: 1, 32>}, {pipeline_mode = #tpu.pipeline_mode<synchronous>, transform_indices = @transform_3, window_bounds = array<i64: 288, 64>}, {pipeline_mode = #tpu.pipeline_mode<synchronous>, transform_indices = @transform_4, window_bounds = array<i64: 1, 64>}, {pipeline_mode = #tpu.pipeline_mode<synchronous>, transform_indices = @transform_5, window_bounds = array<i64: 72, 595>}, {pipeline_mode = #tpu.pipeline_mode<synchronous>, transform_indices = @transform_6, window_bounds = array<i64: 72, 595>}, {transform_indices = @transform_7, window_bounds = array<i64: 1, 72, 128>}]} {
    %c0 = arith.constant 0 : index
    %c0_0 = arith.constant 0 : index
    %0 = vector.load %arg2[%c0, %c0_0] : memref<9x32xbf16, #tpu.memory_space<vmem>>, vector<9x32xbf16>
    %c0_1 = arith.constant 0 : index
    %c0_2 = arith.constant 0 : index
    %1 = vector.load %arg3[%c0_1, %c0_2] : memref<1x32xf32, #tpu.memory_space<vmem>>, vector<1x32xf32>
    %c0_3 = arith.constant 0 : index
    %c0_4 = arith.constant 0 : index
    %2 = vector.load %arg4[%c0_3, %c0_4] : memref<288x64xbf16, #tpu.memory_space<vmem>>, vector<288x64xbf16>
    %c0_5 = arith.constant 0 : index
    %c0_6 = arith.constant 0 : index
    %3 = vector.load %arg5[%c0_5, %c0_6] : memref<1x64xf32, #tpu.memory_space<vmem>>, vector<1x64xf32>
    %c0_7 = arith.constant 0 : index
    %c0_8 = arith.constant 0 : index
    %4 = vector.load %arg6[%c0_7, %c0_8] : memref<72x595xbf16, #tpu.memory_space<vmem>>, vector<72x595xbf16>
    %c0_9 = arith.constant 0 : index
    %c0_10 = arith.constant 0 : index
    %5 = vector.load %arg7[%c0_9, %c0_10] : memref<72x595xbf16, #tpu.memory_space<vmem>>, vector<72x595xbf16>
    %c0_11 = arith.constant 0 : index
    %c0_12 = arith.constant 0 : index
    %c0_13 = arith.constant 0 : index
    %6 = vector.load %arg1[%c0_11, %c0_12, %c0_13] : memref<1x676x9xbf16, #tpu.memory_space<vmem>>, vector<1x676x9xbf16>
    %7 = vector.shape_cast %6 : vector<1x676x9xbf16> to vector<676x9xbf16>
    %cst = arith.constant dense<0.000000e+00> : vector<676x32xf32>
    %8 = tpu.matmul %7, %0, %cst {dimension_numbers = #tpu.dot_dimension_numbers<[1], [0], [0], [1], [0, 0, 1, 1], [], []>} : vector<676x9xbf16>, vector<9x32xbf16>, vector<676x32xf32> -> vector<676x32xf32>
    %9 = vector.broadcast %1 : vector<1x32xf32> to vector<676x32xf32>
    %10 = arith.addf %8, %9 : vector<676x32xf32>
    %cst_14 = arith.constant 0.000000e+00 : f32
    %11 = vector.broadcast %cst_14 : f32 to vector<676x32xf32>
    %12 = arith.maximumf %10, %11 : vector<676x32xf32>
    %13 = vector.extract_strided_slice %12 {offsets = [0, 0], sizes = [622, 32], strides = [1, 1]} : vector<676x32xf32> to vector<622x32xf32>
    %14 = vector.extract_strided_slice %12 {offsets = [1, 0], sizes = [622, 32], strides = [1, 1]} : vector<676x32xf32> to vector<622x32xf32>
    %15 = vector.extract_strided_slice %12 {offsets = [2, 0], sizes = [622, 32], strides = [1, 1]} : vector<676x32xf32> to vector<622x32xf32>
    %16 = vector.extract_strided_slice %12 {offsets = [26, 0], sizes = [622, 32], strides = [1, 1]} : vector<676x32xf32> to vector<622x32xf32>
    %17 = vector.extract_strided_slice %12 {offsets = [27, 0], sizes = [622, 32], strides = [1, 1]} : vector<676x32xf32> to vector<622x32xf32>
    %18 = vector.extract_strided_slice %12 {offsets = [28, 0], sizes = [622, 32], strides = [1, 1]} : vector<676x32xf32> to vector<622x32xf32>
    %19 = vector.extract_strided_slice %12 {offsets = [52, 0], sizes = [622, 32], strides = [1, 1]} : vector<676x32xf32> to vector<622x32xf32>
    %20 = vector.extract_strided_slice %12 {offsets = [53, 0], sizes = [622, 32], strides = [1, 1]} : vector<676x32xf32> to vector<622x32xf32>
    %21 = vector.extract_strided_slice %12 {offsets = [54, 0], sizes = [622, 32], strides = [1, 1]} : vector<676x32xf32> to vector<622x32xf32>
    %22 = tpu.concatenate %13, %14, %15, %16, %17, %18, %19, %20, %21 in 1 : vector<622x32xf32>, vector<622x32xf32>, vector<622x32xf32>, vector<622x32xf32>, vector<622x32xf32>, vector<622x32xf32>, vector<622x32xf32>, vector<622x32xf32>, vector<622x32xf32> -> vector<622x288xf32>
    %23 = arith.truncf %22 : vector<622x288xf32> to vector<622x288xbf16>
    %cst_15 = arith.constant dense<0.000000e+00> : vector<622x64xf32>
    %24 = tpu.matmul %23, %2, %cst_15 {dimension_numbers = #tpu.dot_dimension_numbers<[1], [0], [0], [1], [0, 0, 1, 1], [], []>} : vector<622x288xbf16>, vector<288x64xbf16>, vector<622x64xf32> -> vector<622x64xf32>
    %25 = vector.broadcast %3 : vector<1x64xf32> to vector<622x64xf32>
    %26 = arith.addf %24, %25 : vector<622x64xf32>
    %cst_16 = arith.constant 0.000000e+00 : f32
    %27 = vector.broadcast %cst_16 : f32 to vector<622x64xf32>
    %28 = arith.maximumf %26, %27 : vector<622x64xf32>
    %29 = vector.extract_strided_slice %28 {offsets = [0, 0], sizes = [596, 64], strides = [1, 1]} : vector<622x64xf32> to vector<596x64xf32>
    %30 = vector.extract_strided_slice %28 {offsets = [26, 0], sizes = [596, 64], strides = [1, 1]} : vector<622x64xf32> to vector<596x64xf32>
    %31 = arith.maximumf %29, %30 : vector<596x64xf32>
    %32 = vector.extract_strided_slice %31 {offsets = [0, 0], sizes = [595, 64], strides = [1, 1]} : vector<596x64xf32> to vector<595x64xf32>
    %33 = vector.extract_strided_slice %31 {offsets = [1, 0], sizes = [595, 64], strides = [1, 1]} : vector<596x64xf32> to vector<595x64xf32>
    %34 = arith.maximumf %32, %33 : vector<595x64xf32>
    %35 = arith.truncf %34 : vector<595x64xf32> to vector<595x64xbf16>
    %cst_17 = arith.constant dense<0.000000e+00> : vector<72x64xf32>
    %36 = tpu.matmul %4, %35, %cst_17 {dimension_numbers = #tpu.dot_dimension_numbers<[1], [0], [0], [1], [0, 0, 1, 1], [], []>} : vector<72x595xbf16>, vector<595x64xbf16>, vector<72x64xf32> -> vector<72x64xf32>
    %cst_18 = arith.constant dense<0.000000e+00> : vector<72x64xf32>
    %37 = tpu.matmul %5, %35, %cst_18 {dimension_numbers = #tpu.dot_dimension_numbers<[1], [0], [0], [1], [0, 0, 1, 1], [], []>} : vector<72x595xbf16>, vector<595x64xbf16>, vector<72x64xf32> -> vector<72x64xf32>
    %38 = tpu.concatenate %36, %37 in 1 : vector<72x64xf32>, vector<72x64xf32> -> vector<72x128xf32>
    %39 = arith.truncf %38 : vector<72x128xf32> to vector<72x128xbf16>
    %c0_19 = arith.constant 0 : index
    %c0_20 = arith.constant 0 : index
    %c0_21 = arith.constant 0 : index
    %40 = vector.load %arg8[%c0_19, %c0_20, %c0_21] : memref<1x72x128xbf16, #tpu.memory_space<vmem>>, vector<1x72x128xbf16>
    %41 = vector.shape_cast %40 : vector<1x72x128xbf16> to vector<72x128xbf16>
    %42 = vector.shape_cast %39 : vector<72x128xbf16> to vector<1x72x128xbf16>
    tpu.vector_store %arg8[%c0_19, %c0_20, %c0_21], %42 {strides = array<i32>} : memref<1x72x128xbf16, #tpu.memory_space<vmem>>, vector<1x72x128xbf16>,
    return
  }
  func.func @transform_0(%arg0: i32) -> (i32, i32, i32) {
    %c0_i32 = arith.constant 0 : i32
    %c0_i32_0 = arith.constant 0 : i32
    %c0_i32_1 = arith.constant 0 : i32
    return %arg0, %c0_i32, %c0_i32_0 : i32, i32, i32
  }
  func.func @transform_1(%arg0: i32) -> (i32, i32) {
    %c0_i32 = arith.constant 0 : i32
    %c0_i32_0 = arith.constant 0 : i32
    %c0_i32_1 = arith.constant 0 : i32
    return %c0_i32, %c0_i32_0 : i32, i32
  }
  func.func @transform_2(%arg0: i32) -> (i32, i32) {
    %c0_i32 = arith.constant 0 : i32
    %c0_i32_0 = arith.constant 0 : i32
    %c0_i32_1 = arith.constant 0 : i32
    return %c0_i32, %c0_i32_0 : i32, i32
  }
  func.func @transform_3(%arg0: i32) -> (i32, i32) {
    %c0_i32 = arith.constant 0 : i32
    %c0_i32_0 = arith.constant 0 : i32
    %c0_i32_1 = arith.constant 0 : i32
    return %c0_i32, %c0_i32_0 : i32, i32
  }
  func.func @transform_4(%arg0: i32) -> (i32, i32) {
    %c0_i32 = arith.constant 0 : i32
    %c0_i32_0 = arith.constant 0 : i32
    %c0_i32_1 = arith.constant 0 : i32
    return %c0_i32, %c0_i32_0 : i32, i32
  }
  func.func @transform_5(%arg0: i32) -> (i32, i32) {
    %c0_i32 = arith.constant 0 : i32
    %c0_i32_0 = arith.constant 0 : i32
    %c0_i32_1 = arith.constant 0 : i32
    return %c0_i32, %c0_i32_0 : i32, i32
  }
  func.func @transform_6(%arg0: i32) -> (i32, i32) {
    %c0_i32 = arith.constant 0 : i32
    %c0_i32_0 = arith.constant 0 : i32
    %c0_i32_1 = arith.constant 0 : i32
    return %c0_i32, %c0_i32_0 : i32, i32
  }
  func.func @transform_7(%arg0: i32) -> (i32, i32, i32) {
    %c0_i32 = arith.constant 0 : i32
    %c0_i32_0 = arith.constant 0 : i32
    %c0_i32_1 = arith.constant 0 : i32
    return %arg0, %c0_i32, %c0_i32_0 : i32, i32, i32
  }
}

module attributes {stable_mosaic.version = 11 : i64} {
  func.func @_fc_kernel(%arg0: i32, %arg1: memref<8x9216xbf16, #tpu.memory_space<vmem>>, %arg2: memref<9216x128xbf16, #tpu.memory_space<vmem>>, %arg3: memref<1x128xf32, #tpu.memory_space<vmem>>, %arg4: memref<128x10xf32, #tpu.memory_space<vmem>>, %arg5: memref<1x10xf32, #tpu.memory_space<vmem>>, %arg6: memref<8x10xf32, #tpu.memory_space<vmem>>) attributes {dimension_semantics = [#tpu.dimension_semantics<parallel>], iteration_bounds = array<i64: 1>, scalar_prefetch = 0 : i64, scratch_operands = 0 : i64, tpu.core_type = #tpu.core_type<tc>, window_params = [{transform_indices = @transform_0, window_bounds = array<i64: 8, 9216>}, {pipeline_mode = #tpu.pipeline_mode<synchronous>, transform_indices = @transform_1, window_bounds = array<i64: 9216, 128>}, {pipeline_mode = #tpu.pipeline_mode<synchronous>, transform_indices = @transform_2, window_bounds = array<i64: 1, 128>}, {pipeline_mode = #tpu.pipeline_mode<synchronous>, transform_indices = @transform_3, window_bounds = array<i64: 128, 10>}, {pipeline_mode = #tpu.pipeline_mode<synchronous>, transform_indices = @transform_4, window_bounds = array<i64: 1, 10>}, {transform_indices = @transform_5, window_bounds = array<i64: 8, 10>}]} {
    %c0 = arith.constant 0 : index
    %c0_0 = arith.constant 0 : index
    %0 = vector.load %arg1[%c0, %c0_0] : memref<8x9216xbf16, #tpu.memory_space<vmem>>, vector<8x9216xbf16>
    %c0_1 = arith.constant 0 : index
    %c0_2 = arith.constant 0 : index
    %1 = vector.load %arg2[%c0_1, %c0_2] : memref<9216x128xbf16, #tpu.memory_space<vmem>>, vector<9216x128xbf16>
    %cst = arith.constant dense<0.000000e+00> : vector<8x128xf32>
    %2 = tpu.matmul %0, %1, %cst {dimension_numbers = #tpu.dot_dimension_numbers<[1], [0], [0], [1], [0, 0, 1, 1], [], []>} : vector<8x9216xbf16>, vector<9216x128xbf16>, vector<8x128xf32> -> vector<8x128xf32>
    %c0_3 = arith.constant 0 : index
    %c0_4 = arith.constant 0 : index
    %3 = vector.load %arg3[%c0_3, %c0_4] : memref<1x128xf32, #tpu.memory_space<vmem>>, vector<1x128xf32>
    %4 = vector.broadcast %3 : vector<1x128xf32> to vector<8x128xf32>
    %5 = arith.addf %2, %4 : vector<8x128xf32>
    %cst_5 = arith.constant 0.000000e+00 : f32
    %6 = vector.broadcast %cst_5 : f32 to vector<8x128xf32>
    %7 = arith.maximumf %5, %6 : vector<8x128xf32>
    %c0_6 = arith.constant 0 : index
    %c0_7 = arith.constant 0 : index
    %8 = vector.load %arg4[%c0_6, %c0_7] : memref<128x10xf32, #tpu.memory_space<vmem>>, vector<128x10xf32>
    %cst_8 = arith.constant dense<0.000000e+00> : vector<8x10xf32>
    %9 = tpu.matmul %7, %8, %cst_8 {dimension_numbers = #tpu.dot_dimension_numbers<[1], [0], [0], [1], [0, 0, 1, 1], [], []>} : vector<8x128xf32>, vector<128x10xf32>, vector<8x10xf32> -> vector<8x10xf32>
    %c0_9 = arith.constant 0 : index
    %c0_10 = arith.constant 0 : index
    %10 = vector.load %arg5[%c0_9, %c0_10] : memref<1x10xf32, #tpu.memory_space<vmem>>, vector<1x10xf32>
    %11 = vector.broadcast %10 : vector<1x10xf32> to vector<8x10xf32>
    %12 = arith.addf %9, %11 : vector<8x10xf32>
    %cst_11 = arith.constant dense<0xFF800000> : vector<8xf32>
    %13 = vector.multi_reduction <maximumf>, %12, %cst_11 [1] : vector<8x10xf32> to vector<8xf32>
    %14 = vector.shape_cast %13 : vector<8xf32> to vector<8x1xf32>
    %15 = vector.broadcast %14 : vector<8x1xf32> to vector<8x10xf32>
    %16 = arith.subf %12, %15 : vector<8x10xf32>
    %17 = math.exp %16 : vector<8x10xf32>
    %cst_12 = arith.constant dense<0.000000e+00> : vector<8xf32>
    %18 = vector.multi_reduction <add>, %17, %cst_12 [1] : vector<8x10xf32> to vector<8xf32>
    %19 = vector.shape_cast %18 : vector<8xf32> to vector<8x1xf32>
    %20 = math.log %19 : vector<8x1xf32>
    %21 = vector.broadcast %20 : vector<8x1xf32> to vector<8x10xf32>
    %22 = arith.subf %16, %21 : vector<8x10xf32>
    %c0_13 = arith.constant 0 : index
    %c0_14 = arith.constant 0 : index
    %23 = vector.load %arg6[%c0_13, %c0_14] : memref<8x10xf32, #tpu.memory_space<vmem>>, vector<8x10xf32>
    tpu.vector_store %arg6[%c0_13, %c0_14], %22 {strides = array<i32>} : memref<8x10xf32, #tpu.memory_space<vmem>>, vector<8x10xf32>,
    return
  }
  func.func @transform_0(%arg0: i32) -> (i32, i32) {
    %c0_i32 = arith.constant 0 : i32
    %c0_i32_0 = arith.constant 0 : i32
    return %arg0, %c0_i32 : i32, i32
  }
  func.func @transform_1(%arg0: i32) -> (i32, i32) {
    %c0_i32 = arith.constant 0 : i32
    %c0_i32_0 = arith.constant 0 : i32
    %c0_i32_1 = arith.constant 0 : i32
    return %c0_i32, %c0_i32_0 : i32, i32
  }
  func.func @transform_2(%arg0: i32) -> (i32, i32) {
    %c0_i32 = arith.constant 0 : i32
    %c0_i32_0 = arith.constant 0 : i32
    %c0_i32_1 = arith.constant 0 : i32
    return %c0_i32, %c0_i32_0 : i32, i32
  }
  func.func @transform_3(%arg0: i32) -> (i32, i32) {
    %c0_i32 = arith.constant 0 : i32
    %c0_i32_0 = arith.constant 0 : i32
    %c0_i32_1 = arith.constant 0 : i32
    return %c0_i32, %c0_i32_0 : i32, i32
  }
  func.func @transform_4(%arg0: i32) -> (i32, i32) {
    %c0_i32 = arith.constant 0 : i32
    %c0_i32_0 = arith.constant 0 : i32
    %c0_i32_1 = arith.constant 0 : i32
    return %c0_i32, %c0_i32_0 : i32, i32
  }
  func.func @transform_5(%arg0: i32) -> (i32, i32) {
    %c0_i32 = arith.constant 0 : i32
    %c0_i32_0 = arith.constant 0 : i32
    return %arg0, %c0_i32 : i32, i32
  }
}

</mosaic_0001>

<bundles_post_ra>
// kernel: pt_net_forward.2
= control target key start
LH: loop header
LB: loop body
LE: loop exit
PB: predicated region body
PF: predicated region fallthrough
CT: control target
= control target key end

     0   :  { %12 = vsyncpa [#allocation3], 0  ;;  %s16878_s0 = inlined_call_operand.vmem [shape: bf16[2,676,9], index: 0, kind: input, shape index: {}]   ;;  %s16879_s1 = inlined_call_operand.hbm [shape: bf16[9,32], index: 1, kind: input, shape index: {}]   ;;  %s16880_s2 = inlined_call_operand.hbm [shape: f32[1,32], index: 2, kind: input, shape index: {}]   ;;  %s16881_s3 = inlined_call_operand.vmem [shape: bf16[288,64], index: 3, kind: input, shape index: {}]   ;;  %s16882_s4 = inlined_call_operand.hbm [shape: f32[1,64], index: 4, kind: input, shape index: {}]   ;;  %s16883_s5 = inlined_call_operand.hbm [shape: bf16[72,595], index: 5, kind: input, shape index: {}]   ;;  %s16884_s6 = inlined_call_operand.hbm [shape: bf16[72,595], index: 6, kind: input, shape index: {}]   ;;  %s16885_s7 = inlined_call_operand.vmem [shape: bf16[2,72,128], index: 7, kind: output, shape index: {}]  }
   0x1   :  { %13 = vsyncpa [#allocation5], 0 }
   0x2   :  { %14 = vsyncpa [#allocation8], 0  ;;  %s9779_s24 = smov 0  }
   0x3 LB: > { %s9723_s25 = smov [#allocation4]   ;;  %s9785_s27 = sadd.s32 4294967295, %s9721_s24   ;;  %s9721_s24 = sphi %s9779_s24, %s20_s24  }
   0x4   : > { %s229_s26 = sshll.u32 %s9723_s25, 4  ;;  %p7223_p0 = scmp.ge.s32.totalorder %s9721_s24, 1  ;;  %s230_s26 = int_to_ptr.vmem [resolvable:$true] %s229_s26 }
   0x5   : > { %p203_p1 = scmp.lt.s32.totalorder %s9721_s24, 3  ;;  %p16886_p2 = scmp.eq.s32.totalorder %s9785_s27, 0 }
   0x6   : > { %s9724_s29 = smov [#allocation7]   ;;  %s9725_s9 = smov [#allocation2]  }
   0x7   : > { %p9790_p3 = pnand %p7223_p0, %p203_p1  ;;  %s253_s30 = sshll.u32 %s9724_s29, 4  ;;  %s9796_s30 = int_to_ptr.vmem [resolvable:$true] %s253_s30 }
   0x8   : > { %s215_s10 = sshll.u32 %s9725_s9, 4  ;;  %s9584_s12 = scalar_lea.vmem %s230_s26, 16  ;;  %s9804_s10 = int_to_ptr.vmem [resolvable:$true] %s215_s10 }
   0x9   : > { %s17299_s28 = scalar_select %p9790_p3, 1, 0 }
   0xa   : > { %p8198_p4 = pneg %p9790_p3  ;;  %p9585_p7 = scmp.ne.s32.totalorder %s230_s26, %s9584_s12 }
   0xb   : > { %s9591_s13 = scalar_lea.vmem %s230_s26, 32  ;;  %p9592_p10 = scmp.lt.s32.totalorder %s230_s26, %s230_s26 }
   0xc   : > { %p9800_p5 = pnand %p16886_p2, %p8198_p4  ;;  %p9593_p11 = scmp.lt.s32.totalorder %s9591_s13, %s9584_s12 }
   0xe   : > { %p9808_p6 = pneg %p9800_p5  ;;  %p9594_p12 = por %p9593_p11, %p9592_p10 }
  0x10   : > { %p9587_p8 = pnand %p9585_p7, %p9808_p6 }
  0x12   : > { %p9588_p9 = pneg %p9587_p8 }
  0x14   : > { %p9595_p13 = pnand %p9594_p12, %p9588_p9 }
  0x16   : > { %9598 = shalt.err (!%p9595_p13)
}
  0x17   : > { %8204 = dma.hbm_to_vmem [thread:$0]  (!%p9800_p5), %s16880_s2, 16, %s230_s26, [#allocation5]  }
  0x18   : > { %s9610_s16 = scalar_lea.vmem %s9796_s30, 2880  ;;  %p9618_p7 = scmp.lt.s32.totalorder %s9796_s30, %s9796_s30 }
  0x19   : > { %p9611_p0 = scmp.ne.s32.totalorder %s9796_s30, %s9610_s16  ;;  %p9619_p8 = scmp.lt.s32.totalorder %s9610_s16, %s9610_s16 }
  0x1b   : > { %p9613_p1 = pnand %p9611_p0, %p9808_p6  ;;  %p9620_p9 = por %p9619_p8, %p9618_p7 }
  0x1d   : > { %p9614_p4 = pneg %p9613_p1 }
  0x1f   : > { %p9621_p10 = pnand %p9620_p9, %p9614_p4 }
  0x21   : > { %9624 = shalt.err (!%p9621_p10)
}
  0x22   : > { %s9726_s17 = smov 320   ;;  %s9727_s18 = smov 20  }
  0x23   : > { %8210 = dma.hbm_to_vmem [thread:$0]  (!%p9800_p5), %s16883_s5, 2880, %s9796_s30, [#allocation8], %s9726_s17, %s9726_s17, %s9727_s18  }
  0x24   : > { %s9636_s21 = scalar_lea.vmem %s9804_s10, 128  ;;  %p9644_p0 = scmp.lt.s32.totalorder %s9804_s10, %s9804_s10 }
  0x25   : > { %p9637_p11 = scmp.ne.s32.totalorder %s9804_s10, %s9636_s21  ;;  %p9645_p1 = scmp.lt.s32.totalorder %s9636_s21, %s9636_s21 }
  0x27   : > { %p9639_p12 = pnand %p9637_p11, %p9808_p6  ;;  %p9646_p4 = por %p9645_p1, %p9644_p0 }
  0x29   : > { %p9640_p13 = pneg %p9639_p12 }
  0x2b   : > { %p9647_p7 = pnand %p9646_p4, %p9640_p13 }
  0x2d   : > { %9650 = shalt.err (!%p9647_p7)
}
  0x2e   : > { %s9728_s22 = smov 64   ;;  %s9729_s23 = smov 4  }
  0x2f   : > { %8201 = dma.hbm_to_vmem [thread:$0]  (!%p9800_p5), %s16879_s1, 128, %s9804_s10, [#allocation3], %s9728_s22, %s9728_s22, %s9729_s23  }
  0x30   : > { %s9730_s29 = smov [#allocation6]   ;;  %s9731_s9 = smov [#allocation9]  }
  0x31   : > { %s243_s30 = sshll.u32 %s9730_s29, 4  ;;  %s266_s12 = sshll.u32 %s9731_s9, 4  ;;  %s244_s30 = int_to_ptr.vmem [resolvable:$true] %s243_s30  ;;  %s267_s12 = int_to_ptr.vmem [resolvable:$true] %s266_s12 }
  0x32   : > { %s9662_s13 = scalar_lea.vmem %s244_s30, 16  ;;  %s9669_s14 = scalar_lea.vmem %s244_s30, 32 }
  0x33   : > { %p9663_p8 = scmp.ne.s32.totalorder %s244_s30, %s9662_s13  ;;  %p9670_p11 = scmp.lt.s32.totalorder %s244_s30, %s244_s30 }
  0x34   : > { %p9671_p12 = scmp.lt.s32.totalorder %s9669_s14, %s9662_s13 }
  0x35   : > { %p9665_p9 = pnand %p9663_p8, %p9808_p6 }
  0x36   : > { %p9672_p13 = por %p9671_p12, %p9670_p11 }
  0x37   : > { %p9666_p10 = pneg %p9665_p9 }
  0x39   : > { %p9673_p0 = pnand %p9672_p13, %p9666_p10 }
  0x3b   : > { %9676 = shalt.err (!%p9673_p0)
}
  0x3c   : > { %8207 = dma.hbm_to_vmem [thread:$0]  (!%p9800_p5), %s16882_s4, 16, %s244_s30, [#allocation5]  }
  0x3d   : > { %s9688_s16 = scalar_lea.vmem %s267_s12, 2880  ;;  %p9696_p8 = scmp.lt.s32.totalorder %s267_s12, %s267_s12 }
  0x3e   : > { %p9689_p1 = scmp.ne.s32.totalorder %s267_s12, %s9688_s16  ;;  %p9697_p9 = scmp.lt.s32.totalorder %s9688_s16, %s9688_s16 }
  0x40   : > { %p9691_p4 = pnand %p9689_p1, %p9808_p6  ;;  %p9698_p2 = por %p9697_p9, %p9696_p8 }
  0x42   : > { %p9692_p7 = pneg %p9691_p4 }
  0x44   : > { %p9699_p3 = pnand %p9698_p2, %p9692_p7 }
  0x46   : > { %9702 = shalt.err (!%p9699_p3)
}
  0x47   : > { %8213 = dma.hbm_to_vmem [thread:$0]  (!%p9800_p5), %s16884_s6, 2880, %s267_s12, [#allocation8], %s9726_s17, %s9726_s17, %s9727_s18  }
  0x48   : > { %p17302_p10 = scmp.ne.s32.totalorder %s17299_s28, 0 }
  0x4a   : > { %290 = sbr.rel (%p17302_p10) target bundleno = 1767 (0x6e7), region = 48 }
  0x4f   : > { %p17303_p6 = scmp.eq.s32.totalorder %s9785_s27, 0 }
  0x51   : > { %9708 = dma.done.wait (%p17303_p6), [#allocation3], 128   ;;  %p17304_p11 = pmov %p17303_p6 }
  0x52   : > { %p17305_p2 = pmov %p17303_p6 }
  0x53   : > { %9710 = vsyncadd (%p17304_p11), [#allocation3], 4294967168 }
  0x54   : > { %9712 = dma.done.wait (%p17305_p2), [#allocation5], 32   ;;  %p17306_p3 = pmov %p17305_p2 }
  0x55   : > { %p17307_p12 = pmov %p17305_p2 }
  0x56   : > { %9714 = vsyncadd (%p17306_p3), [#allocation5], 4294967264 }
  0x57   : > { %9716 = dma.done.wait (%p17307_p12), [#allocation8], 5760   ;;  %p17308_p5 = pmov %p17305_p2 }
  0x58   : > { %vm882_vm0 = vcmask 1043456   ;;  %v16889_v0 = vmov 0.0   ;;  %p338_p13 = scmp.lt.s32.totalorder %s9785_s27, 1  ;;  %vm9733_vm1 = vmmov 0   ;;  %vm883_vm2 = vcmask 1044480   ;;  %v9474_v26 = vld [vmem:[%s16881_s3 + $0x88] sm:$0xff]  }
  0x59   : > { %9718 = vsyncadd (%p17308_p5), [#allocation8], 4294961536  ;;  %7778 = vmatprep.subr.bf16.mxu0 %v16889_v0  ;;  %7780 = vmatprep.mubr.msk.bf16.mxu0 %vm9733_vm1, %v16889_v0  ;;  %v16888_v1 = vmov 65535   ;;  %v9438_v4 = vld [vmem:[#allocation2] sm:$0x1f]   ;;  %vm752_vm3 = vcmask 72704  }
  0x5a   : > { %v884_v2 = vsel %vm882_vm0, 4294967295, %v16888_v1  ;;  %s18454_s27 = smov (!%p338_p13, %s9785_s27), 1  ;;  %v9478_v30 = vld [vmem:[%s16881_s3 + $0x38] sm:$0xff]   ;;  %v9735_v31 = vmov 0   ;;  %v9480_v32 = vld [vmem:[%s16881_s3 + $0x30] sm:$0xff]   ;;  %v9481_v34 = vld [vmem:[%s16881_s3 + $0x28] sm:$0xff]  }
  0x5b   : > { %s8176_s28 = smul.u32 340, %s18454_s27  ;;  %v885_v3 = vsel %vm883_vm2, %v884_v2, 0  ;;  %4768 = vmatprep.subr.bf16.mxu1 %v9735_v31  ;;  %v9483_v35 = vld [vmem:[%s16881_s3 + $0x20] sm:$0xff]   ;;  %v9484_v37 = vld [vmem:[%s16881_s3 + $0x18] sm:$0xff]   ;;  %v10017_v39 = vld [vmem:[#allocation4] ss:$0 sm:$0xff] }
  0x5c   : > { %v887_v5 = vand.u32 %v9438_v4, %v885_v3  ;;  %4769 = vmatpush1.bf16.msra.mxu1 %v9478_v30  ;;  %v9486_v40 = vld [vmem:[%s16881_s3 + $0x10] sm:$0xff]   ;;  %v9487_v46 = vld [vmem:[%s16881_s3 + $0x8] sm:$0xff]   ;;  %v9489_v52 = vld [vmem:[%s16881_s3] sm:$0xff]   ;;  %vm1818_vm4 = vcmask 1045504   ;;  %vm1428_vm5 = vcmask 1046528   ;;  %s9736_s22 = smov 64  }
  0x5d   : > { %s9891_s17 = scalar_lea.vmem %s16878_s0, %s8176_s28  ;;  %4770 = vmatprep.subr.bf16.mxu1 %v9735_v31  ;;  %v9490_v2 = vld [vmem:[%s16881_s3 + $0x78] sm:$0xff]   ;;  %s9737_s23 = smov 32   ;;  %vm3713_vm6 = vcmask 1041408   ;;  %vm3321_vm7 = vcmask 1042432   ;;  %vm3949_vm8 = vcmask 261120   ;;  %vm4028_vm9 = vcmask 523264  }
  0x5e   : > { %v9439_v6 = vld [vmem:[%s9891_s17] sm:$0xff]   ;;  %7779 = vmatpush3.bf16.msra.mxu0 %v887_v5  ;;  %v9440_v7 = vld [vmem:[%s9891_s17 + $0x8] sm:$0xff]   ;;  %v9441_v8 = vld [vmem:[%s9891_s17 + $0x10] sm:$0xff]   ;;  %s9738_s10 = smov 96   ;;  %vm4107_vm10 = vcmask 785408   ;;  %vm6455_vm11 = vcmask 1040384  }
  0x5f   : > { %7952 = vmatprep.subr.bf16.mxu0 %v16889_v0  ;;  %v9442_v9 = vld [vmem:[%s9891_s17 + $0x18] sm:$0xff]   ;;  %v9443_v10 = vld [vmem:[%s9891_s17 + $0x20] sm:$0xff]   ;;  %v9444_v11 = vld [vmem:[%s9891_s17 + $0x28] sm:$0xff]   ;;  %vm6439_vm12 = vcmask 678912  }
  0x60   : > { %v9445_v12 = vld [vmem:[%s9891_s17 + $0x30] sm:$0xff]   ;;  %v9446_v13 = vld [vmem:[%s9891_s17 + $0x38] sm:$0xff]   ;;  %v9447_v14 = vld [vmem:[%s9891_s17 + $0x40] sm:$0xff]   ;;  %4771 = vmatpush1.bf16.msra.mxu1 %v9480_v32 }
  0x61   : > { %7781 = vmatmul.mubr.msk.bf16.vlgmr.msra.gmra.mxu0 %vm752_vm3, %v9439_v6  ;;  %v9448_v15 = vld [vmem:[%s9891_s17 + $0x48] sm:$0xff]   ;;  %v9449_v16 = vld [vmem:[%s9891_s17 + $0x50] sm:$0xff]   ;;  %v9450_v17 = vld [vmem:[%s9891_s17 + $0x58] sm:$0xff]   ;;  %4772 = vmatprep.subr.bf16.mxu1 %v9735_v31 }
  0x62   : > { %7784 = vmatprep.mubr.msk.bf16.mxu0 %vm9733_vm1, %v16889_v0  ;;  %v9451_v18 = vld [vmem:[%s9891_s17 + $0x60] sm:$0xff]   ;;  %v9452_v19 = vld [vmem:[%s9891_s17 + $0x68] sm:$0xff]   ;;  %v9453_v20 = vld [vmem:[%s9891_s17 + $0x70] sm:$0xff]   ;;  %7953 = vmatpush3.bf16.msra.mxu0 %v9474_v26 }
  0x63   : > { %v9454_v21 = vld [vmem:[%s9891_s17 + $0x78] sm:$0xff]   ;;  %v9455_v22 = vld [vmem:[%s9891_s17 + $0x80] sm:$0xff]   ;;  %v9456_v23 = vld [vmem:[%s9891_s17 + $0x88] sm:$0xff]   ;;  %7954 = vmatprep.subr.bf16.mxu0 %v16889_v0 }
  0x64   : > { %v9457_v24 = vld [vmem:[%s9891_s17 + $0x90] sm:$0xff]   ;;  %v9458_v25 = vld [vmem:[%s9891_s17 + $0x98] sm:$0xff]   ;;  %v9459_v27 = vld [vmem:[%s9891_s17 + $0xa0] sm:$0xff]   ;;  %4773 = vmatpush1.bf16.msra.mxu1 %v9481_v34 }
  0x65   : > { %v9460_v28 = vld [vmem:[%s9891_s17 + $0xa8] sm:$0xff]   ;;  %v9461_v29 = vld [vmem:[%s9891_s17 + $0xb0] sm:$0xff]   ;;  %v9462_v33 = vld [vmem:[%s9891_s17 + $0xb8] sm:$0xff]   ;;  %4774 = vmatprep.subr.bf16.mxu1 %v9735_v31 }
  0x66   : > { %v9463_v36 = vld [vmem:[%s9891_s17 + $0xc0] sm:$0xff]   ;;  %v9464_v44 = vld [vmem:[%s9891_s17 + $0xc8] sm:$0xff]   ;;  %v9465_v59 = vld [vmem:[%s9891_s17 + $0xd0] sm:$0xff]  }
  0x68   : > { %4775 = vmatpush1.bf16.msra.mxu1 %v9483_v35 }
  0x69   : > { %7785 = vmatmul.mubr.msk.bf16.gmra.mxu0 %vm752_vm3, %v9440_v7  ;;  %4776 = vmatprep.subr.bf16.mxu1 %v9735_v31 }
  0x6a   : > { %7788 = vmatprep.mubr.msk.bf16.mxu0 %vm9733_vm1, %v16889_v0 }
  0x6c   : > { %4777 = vmatpush1.bf16.msra.mxu1 %v9484_v37 }
  0x6d   : > { %4778 = vmatprep.subr.bf16.mxu1 %v9735_v31 }
  0x70   : > { %4779 = vmatpush1.bf16.msra.mxu1 %v9486_v40 }
  0x71   : > { %7789 = vmatmul.mubr.msk.bf16.gmra.mxu0 %vm752_vm3, %v9441_v8  ;;  %4780 = vmatprep.subr.bf16.mxu1 %v9735_v31 }
  0x72   : > { %7792 = vmatprep.mubr.msk.bf16.mxu0 %vm9733_vm1, %v16889_v0 }
  0x74   : > { %4781 = vmatpush1.bf16.msra.mxu1 %v9487_v46 }
  0x75   : > { %4782 = vmatprep.subr.bf16.mxu1 %v9735_v31 }
  0x78   : > { %4783 = vmatpush1.bf16.msra.mxu1 %v9489_v52  ;;  %v9467_v52 = vld [vmem:[%s9891_s17 + $0xe0] sm:$0xff]  }
  0x79   : > { %7793 = vmatmul.mubr.msk.bf16.gmra.mxu0 %vm752_vm3, %v9442_v9  ;;  %4784 = vmatprep.subr.bf16.mxu1 %v9735_v31 }
  0x7a   : > { %7796 = vmatprep.mubr.msk.bf16.mxu0 %vm9733_vm1, %v16889_v0 }
  0x7c   : > { %4785 = vmatpush2.bf16.msra.mxu1 %v9490_v2 }
  0x7d   : > { %4786 = vmatprep.subr.bf16.mxu1 %v9735_v31 }
  0x81   : > { %7797 = vmatmul.mubr.msk.bf16.gmra.mxu0 %vm752_vm3, %v9443_v10 }
  0x82   : > { %7800 = vmatprep.mubr.msk.bf16.mxu0 %vm9733_vm1, %v16889_v0 }
  0x89   : > { %7801 = vmatmul.mubr.msk.bf16.gmra.mxu0 %vm752_vm3, %v9444_v11 }
  0x8a   : > { %7804 = vmatprep.mubr.msk.bf16.mxu0 %vm9733_vm1, %v16889_v0 }
  0x91   : > { %7805 = vmatmul.mubr.msk.bf16.gmra.mxu0 %vm752_vm3, %v9445_v12 }
  0x92   : > { %7808 = vmatprep.mubr.msk.bf16.mxu0 %vm9733_vm1, %v16889_v0 }
  0x99   : > { %7809 = vmatmul.mubr.msk.bf16.gmra.mxu0 %vm752_vm3, %v9446_v13  ;;  %v9492_v13 = vld [vmem:[%s16881_s3 + $0x70] sm:$0xff]  }
  0x9a   : > { %7812 = vmatprep.mubr.msk.bf16.mxu0 %vm9733_vm1, %v16889_v0  ;;  %4787 = vmatpush2.bf16.msra.mxu1 %v9492_v13 }
  0x9b   : > { %4788 = vmatprep.subr.bf16.mxu1 %v9735_v31 }
  0xa1   : > { %7813 = vmatmul.mubr.msk.bf16.gmra.mxu0 %vm752_vm3, %v9447_v14 }
  0xa2   : > { %7816 = vmatprep.mubr.msk.bf16.mxu0 %vm9733_vm1, %v16889_v0 }
  0xa9   : > { %7817 = vmatmul.mubr.msk.bf16.gmra.mxu0 %vm752_vm3, %v9448_v15 }
  0xaa   : > { %7820 = vmatprep.mubr.msk.bf16.mxu0 %vm9733_vm1, %v16889_v0 }
  0xb1   : > { %7821 = vmatmul.mubr.msk.bf16.gmra.mxu0 %vm752_vm3, %v9449_v16 }
  0xb2   : > { %7824 = vmatprep.mubr.msk.bf16.mxu0 %vm9733_vm1, %v16889_v0 }
  0xb9   : > { %7825 = vmatmul.mubr.msk.bf16.gmra.mxu0 %vm752_vm3, %v9450_v17 }
  0xba   : > { %7828 = vmatprep.mubr.msk.bf16.mxu0 %vm9733_vm1, %v16889_v0 }
  0xc1   : > { %7829 = vmatmul.mubr.msk.bf16.gmra.mxu0 %vm752_vm3, %v9451_v18  ;;  %v9466_v18 = vld [vmem:[%s9891_s17 + $0xd8] sm:$0xff]  }
  0xc2   : > { %7832 = vmatprep.mubr.msk.bf16.mxu0 %vm9733_vm1, %v16889_v0 }
  0xc9   : > { %7833 = vmatmul.mubr.msk.bf16.gmra.mxu0 %vm752_vm3, %v9452_v19 }
  0xca   : > { %7836 = vmatprep.mubr.msk.bf16.mxu0 %vm9733_vm1, %v16889_v0 }
  0xd1   : > { %7837 = vmatmul.mubr.msk.bf16.gmra.mxu0 %vm752_vm3, %v9453_v20 }
  0xd2   : > { %7840 = vmatprep.mubr.msk.bf16.mxu0 %vm9733_vm1, %v16889_v0 }
  0xd9   : > { %7841 = vmatmul.mubr.msk.bf16.gmra.mxu0 %vm752_vm3, %v9454_v21 }
  0xda   : > { %7844 = vmatprep.mubr.msk.bf16.mxu0 %vm9733_vm1, %v16889_v0 }
  0xe1   : > { %7845 = vmatmul.mubr.msk.bf16.gmra.mxu0 %vm752_vm3, %v9455_v22  ;;  %v9493_v22 = vld [vmem:[%s16881_s3 + $0x68] sm:$0xff]  }
  0xe2   : > { %7848 = vmatprep.mubr.msk.bf16.mxu0 %vm9733_vm1, %v16889_v0  ;;  %4789 = vmatpush2.bf16.msra.mxu1 %v9493_v22 }
  0xe3   : > { %4790 = vmatprep.subr.bf16.mxu1 %v9735_v31 }
  0xe9   : > { %7849 = vmatmul.mubr.msk.bf16.gmra.mxu0 %vm752_vm3, %v9456_v23  ;;  %v9494_v23 = vld [vmem:[%s16881_s3 + $0x80] sm:$0xff]  }
  0xea   : > { %7852 = vmatprep.mubr.msk.bf16.mxu0 %vm9733_vm1, %v16889_v0  ;;  %7955 = vmatpush3.bf16.msra.mxu0 %v9494_v23 }
  0xf1   : > { %7853 = vmatmul.mubr.msk.bf16.gmra.mxu0 %vm752_vm3, %v9457_v24 }
  0xf2   : > { %7856 = vmatprep.mubr.msk.bf16.mxu0 %vm9733_vm1, %v16889_v0 }
  0xf9   : > { %7857 = vmatmul.mubr.msk.bf16.gmra.mxu0 %vm752_vm3, %v9458_v25 }
  0xfa   : > { %7860 = vmatprep.mubr.msk.bf16.mxu0 %vm9733_vm1, %v16889_v0 }
 0x101   : > { %7861 = vmatmul.mubr.msk.bf16.gmra.mxu0 %vm752_vm3, %v9459_v27 }
 0x102   : > { %7864 = vmatprep.mubr.msk.bf16.mxu0 %vm9733_vm1, %v16889_v0 }
 0x109   : > { %7865 = vmatmul.mubr.msk.bf16.gmra.mxu0 %vm752_vm3, %v9460_v28 }
 0x10a   : > { %7868 = vmatprep.mubr.msk.bf16.mxu0 %vm9733_vm1, %v16889_v0 }
 0x111   : > { %7869 = vmatmul.mubr.msk.bf16.gmra.mxu0 %vm752_vm3, %v9461_v29 }
 0x112   : > { %7872 = vmatprep.mubr.msk.bf16.mxu0 %vm9733_vm1, %v16889_v0 }
 0x119   : > { %7873 = vmatmul.mubr.msk.bf16.gmra.mxu0 %vm752_vm3, %v9462_v33 }
 0x11a   : > { %7876 = vmatprep.mubr.msk.bf16.mxu0 %vm9733_vm1, %v16889_v0 }
 0x121   : > { %v923_v38 = vpop.f32.mrf.mxu0  ;;  %7877 = vmatmul.mubr.msk.bf16.gmra.mxu0 %vm752_vm3, %v9463_v36 }
 0x122   : > { %7880 = vmatprep.mubr.msk.bf16.mxu0 %vm9733_vm1, %v16889_v0  ;;  %v924_v42 = vadd.f32 %v10017_v39, %v923_v38 }
 0x123   : > { %v7782_v41 = vpop.f32.mrf.mxu0 }
 0x124   : > { %v10033_v49 = vmax.f32 %v924_v42, 0.0  ;;  %v9495_v41 = vld [vmem:[%s16881_s3 + $0x60] sm:$0xff]  }
 0x125   : > { %v926_v43 = vpop.f32.mrf.mxu0  ;;  %4791 = vmatpush2.bf16.msra.mxu1 %v9495_v41 }
 0x126   : > { %v927_v45 = vadd.f32 %v10017_v39, %v926_v43  ;;  %v1819_v57 = vrot.slane %v10033_v49, 2  ;;  %v1429_v60 = vrot.slane %v10033_v49, 1  ;;  %4792 = vmatprep.subr.bf16.mxu1 %v9735_v31 }
 0x127   : > { %v7783_v47 = vpop.f32.mrf.mxu0 }
 0x128   : > { %v10031_v48 = vmax.f32 %v927_v45, 0.0 }
 0x129   : > { %v931_v50 = vpop.f32.mrf.mxu0  ;;  %7881 = vmatmul.mubr.msk.bf16.gmra.mxu0 %vm752_vm3, %v9464_v44 }
 0x12a   : > { %v932_v51 = vadd.f32 %v10017_v39, %v931_v50  ;;  %7884 = vmatprep.mubr.msk.bf16.mxu0 %vm9733_vm1, %v16889_v0  ;;  %v1820_v53 = vrot.slane %v10031_v48, 2  ;;  %v1430_v55 = vrot.slane %v10031_v48, 1 }
 0x12b   : > { %v7786_v54 = vpop.f32.mrf.mxu0 }
 0x12c   : > { %v10045_v56 = vmax.f32 %v932_v51, 0.0  ;;  %v1821_v4 = vsel %vm1818_vm4, %v1819_v57, %v1820_v53  ;;  %v1431_v7 = vsel %vm1428_vm5, %v1429_v60, %v1430_v55 }
 0x12d   : > { %v934_v58 = vpop.f32.mrf.mxu0 }
 0x12e   : > { %17309 = vst [vmem:[#allocation13_spill] sm:$0xff] %v10045_v56  ;;  %v1432_v61 = vrot.slane %v10045_v56, 1  ;;  %v1822_v62 = vrot.slane %v10045_v56, 2  ;;  %v935_v63 = vadd.f32 %v10017_v39, %v934_v58 }
 0x12f   : > { %v7787_v3 = vpop.f32.mrf.mxu0 }
 0x130   : > { %v10058_v5 = vmax.f32 %v935_v63, 0.0  ;;  %v1823_v6 = vsel %vm1818_vm4, %v1820_v53, %v1822_v62  ;;  %v1433_v8 = vsel %vm1428_vm5, %v1430_v55, %v1432_v61 }
 0x131   : > { %v939_v9 = vpop.f32.mrf.mxu0  ;;  %7885 = vmatmul.mubr.msk.bf16.gmra.mxu0 %vm752_vm3, %v9465_v59  ;;  %v8253_v10 = vpack.i.bf16 %v1823_v6, %v1821_v4  ;;  %v8248_v11 = vpack.i.bf16 %v1433_v8, %v1431_v7 }
 0x132   : > { %v940_v12 = vadd.f32 %v10017_v39, %v939_v9  ;;  %7888 = vmatprep.mubr.msk.bf16.mxu0 %vm9733_vm1, %v16889_v0  ;;  %v1434_v16 = vrot.slane %v10058_v5, 1  ;;  %v1824_v25 = vrot.slane %v10058_v5, 2  ;;  %v2687_v33 = vrot.slane %v10058_v5, 4 }
 0x133   : > { %8254 = vrot.lane.b32.xlu1 %v8253_v10, %s9736_s22  ;;  %8249 = vrot.lane.b32.xlu0 %v8248_v11, %s9737_s23  ;;  %v7790_v14 = vpop.f32.mrf.mxu0  ;;  %v2452_v58 = vrot.slane %v10058_v5, 3 }
 0x134   : > { %v10073_v15 = vmax.f32 %v940_v12, 0.0  ;;  %v1435_v27 = vsel %vm1428_vm5, %v1432_v61, %v1434_v16  ;;  %v1825_v40 = vsel %vm1818_vm4, %v1822_v62, %v1824_v25  ;;  %v9496_v62 = vld [vmem:[%s16881_s3 + $0x58] sm:$0xff]  }
 0x135   : > { %v942_v17 = vpop.f32.mrf.mxu0  ;;  %4793 = vmatpush2.bf16.msra.mxu1 %v9496_v62 }
 0x136   : > { %17310 = vst [vmem:[#allocation14_spill] sm:$0xff] %v10073_v15  ;;  %v943_v19 = vadd.f32 %v10017_v39, %v942_v17  ;;  %v1436_v20 = vrot.slane %v10073_v15, 1  ;;  %v1826_v21 = vrot.slane %v10073_v15, 2  ;;  %v2688_v29 = vrot.slane %v10073_v15, 4  ;;  %4794 = vmatprep.subr.bf16.mxu1 %v9735_v31 }
 0x137   : > { %v7791_v24 = vpop.f32.mrf.mxu0  ;;  %v2453_v45 = vrot.slane %v10073_v15, 3 }
 0x138   : > { %v10088_v26 = vmax.f32 %v943_v19, 0.0  ;;  %v1437_v28 = vsel %vm1428_vm5, %v1434_v16, %v1436_v20  ;;  %v1827_v35 = vsel %vm1818_vm4, %v1824_v25, %v1826_v21  ;;  %v2689_v43 = vsel %vm882_vm0, %v2687_v33, %v2688_v29 }
 0x139   : > { %v947_v30 = vpop.f32.mrf.mxu0  ;;  %7889 = vmatmul.mubr.msk.bf16.gmra.mxu0 %vm752_vm3, %v9466_v18  ;;  %v8258_v32 = vpack.i.bf16 %v1437_v28, %v1435_v27  ;;  %v8263_v50 = vpack.i.bf16 %v1827_v35, %v1825_v40  ;;  %v10135_v3 = vsel %vm883_vm2, %v2452_v58, %v2453_v45  ;;  %v9468_v27 = vld [vmem:[%s9891_s17 + $0xe8] sm:$0xff]  }
 0x13a   : > { %17311 = vst [vmem:[#allocation15_spill] sm:$0xff] %v10088_v26  ;;  %v948_v34 = vadd.f32 %v10017_v39, %v947_v30  ;;  %v2690_v36 = vrot.slane %v10088_v26, 4  ;;  %7892 = vmatprep.mubr.msk.bf16.mxu0 %vm9733_vm1, %v16889_v0  ;;  %v1828_v37 = vrot.slane %v10088_v26, 2  ;;  %v2455_v46 = vrot.slane %v10088_v26, 3  ;;  %17314 = vst [vmem:[#allocation18_spill] sm:$0xff] %v10135_v3 }
 0x13b   : > { %8259 = vrot.lane.b32.xlu1 %v8258_v32, %s9737_s23  ;;  %v7794_v38 = vpop.f32.mrf.mxu0  ;;  %v1438_v53 = vrot.slane %v10088_v26, 1  ;;  %v9497_v32 = vld [vmem:[%s16881_s3 + $0x50] sm:$0xff]  }
 0x13c   : > { %v10107_v42 = vmax.f32 %v948_v34, 0.0  ;;  %v2691_v44 = vsel %vm882_vm0, %v2688_v29, %v2690_v36  ;;  %v10117_v55 = vsel %vm1818_vm4, %v1826_v21, %v1828_v37  ;;  %v10142_v9 = vsel %vm883_vm2, %v2453_v45, %v2455_v46  ;;  %4795 = vmatpush2.bf16.msra.mxu1 %v9497_v32 }
 0x13d   : > { %v950_v47 = vpop.f32.mrf.mxu0  ;;  %v8268_v51 = vpack.i.bf16 %v2691_v44, %v2689_v43  ;;  %v8273_v6 = vpack.i.bf16 %v10117_v55, %v1827_v35  ;;  %v1439_v7 = vsel %vm1428_vm5, %v1436_v20, %v1438_v53  ;;  %17315 = vst [vmem:[#allocation19_spill] sm:$0xff] %v10142_v9  ;;  %4796 = vmatprep.subr.bf16.mxu1 %v9735_v31 }
 0x13e   : > { %17312 = vst [vmem:[#allocation16_spill] sm:$0xff] %v10107_v42  ;;  %v951_v54 = vadd.f32 %v10017_v39, %v950_v47  ;;  %v1440_v57 = vrot.slane %v10107_v42, 1  ;;  %v2692_v60 = vrot.slane %v10107_v42, 4  ;;  %v1830_v61 = vrot.slane %v10107_v42, 2 }
 0x13f   : > { %8264 = vrot.lane.b32.xlu1 %v8263_v50, %s9736_s22  ;;  %8269 = vrot.lane.b32.xlu0 %v8268_v51, %s9737_s23  ;;  %v7795_v59 = vpop.f32.mrf.mxu0  ;;  %v2457_v8 = vrot.slane %v10107_v42, 3  ;;  %v3714_v10 = vrot.slane %v10107_v42, 6  ;;  %v3322_v18 = vrot.slane %v10107_v42, 5 }
 0x140   : > { %v10129_v63 = vmax.f32 %v951_v54, 0.0  ;;  %v1441_v2 = vsel %vm1428_vm5, %v1438_v53, %v1440_v57  ;;  %v10150_v13 = vsel %vm1818_vm4, %v1828_v37, %v1830_v61  ;;  %v2693_v17 = vsel %vm882_vm0, %v2690_v36, %v2692_v60 }
 0x141   : > { %v955_v4 = vpop.f32.mrf.mxu0  ;;  %7893 = vmatmul.mubr.msk.bf16.gmra.mxu0 %vm752_vm3, %v9467_v52  ;;  %v8278_v16 = vpack.i.bf16 %v1441_v2, %v1439_v7  ;;  %v8283_v28 = vpack.i.bf16 %v10150_v13, %v10117_v55  ;;  %v10170_v30 = vsel %vm883_vm2, %v2455_v46, %v2457_v8  ;;  %v9498_v55 = vld [vmem:[%s16881_s3 + $0x48] sm:$0xff]  }
 0x142   : > { %17313 = vst [vmem:[#allocation17_spill] sm:$0xff] %v10129_v63  ;;  %v956_v11 = vadd.f32 %v10017_v39, %v955_v4  ;;  %v2694_v12 = vrot.slane %v10129_v63, 4  ;;  %7896 = vmatprep.mubr.msk.bf16.mxu0 %vm9733_vm1, %v16889_v0  ;;  %v1832_v19 = vrot.slane %v10129_v63, 2  ;;  %v3715_v20 = vrot.slane %v10129_v63, 6  ;;  %17317 = vst [vmem:[#allocation21_spill] sm:$0xff] %v10170_v30  ;;  %4797 = vmatpush2.bf16.msra.mxu1 %v9498_v55 }
 0x143   : > { %8274 = vrot.lane.b32.xlu1 %v8273_v6, %s9738_s10  ;;  %v7798_v14 = vpop.f32.mrf.mxu0  ;;  %v3323_v23 = vrot.slane %v10129_v63, 5  ;;  %v1442_v29 = vrot.slane %v10129_v63, 1  ;;  %v2459_v36 = vrot.slane %v10129_v63, 3  ;;  %4798 = vmatprep.subr.bf16.mxu1 %v9735_v31 }
 0x144   : > { %v10158_v21 = vmax.f32 %v956_v11, 0.0  ;;  %v10161_v22 = vsel %vm882_vm0, %v2692_v60, %v2694_v12  ;;  %v10178_v35 = vsel %vm1818_vm4, %v1830_v61, %v1832_v19  ;;  %v10192_v47 = vsel %vm3713_vm6, %v3714_v10, %v3715_v20 }
 0x145   : > { %v958_v24 = vpop.f32.mrf.mxu0  ;;  %v8288_v25 = vpack.i.bf16 %v10161_v22, %v2693_v17  ;;  %v3324_v45 = vsel %vm3321_vm7, %v3322_v18, %v3323_v23  ;;  %17319 = vst [vmem:[#allocation23_spill] sm:$0xff] %v10192_v47  ;;  %v8293_v52 = vpack.i.bf16 %v10178_v35, %v10150_v13  ;;  %v10201_v54 = vsel %vm1428_vm5, %v1440_v57, %v1442_v29 }
 0x146   : > { %17316 = vst [vmem:[#allocation20_spill] sm:$0xff] %v10158_v21  ;;  %v959_v33 = vadd.f32 %v10017_v39, %v958_v24  ;;  %v3325_v34 = vrot.slane %v10158_v21, 5  ;;  %v3717_v37 = vrot.slane %v10158_v21, 6  ;;  %v2696_v40 = vrot.slane %v10158_v21, 4 }
 0x147   : > { %8279 = vrot.lane.b32.xlu1 %v8278_v16, %s9737_s23  ;;  %8289 = vrot.lane.b32.xlu0 %v8288_v25, %s9737_s23  ;;  %v7799_v38 = vpop.f32.mrf.mxu0  ;;  %v1444_v41 = vrot.slane %v10158_v21, 1  ;;  %v1834_v43 = vrot.slane %v10158_v21, 2  ;;  %v10221_v2 = vsel %vm883_vm2, %v2457_v8, %v2459_v36  ;;  %v2461_v6 = vrot.slane %v10158_v21, 3  ;;  %v9469_v8 = vld [vmem:[%s9891_s17 + $0xf0] sm:$0xff]  }
 0x148   : > { %v10187_v44 = vmax.f32 %v959_v33, 0.0  ;;  %v3326_v46 = vsel %vm3321_vm7, %v3323_v23, %v3325_v34  ;;  %v2697_v53 = vsel %vm882_vm0, %v2694_v12, %v2696_v40  ;;  %17320 = vst [vmem:[#allocation24_spill] sm:$0xff] %v10221_v2  ;;  %v10226_v4 = vsel %vm3713_vm6, %v3715_v20, %v3717_v37 }
 0x149   : > { %v963_v50 = vpop.f32.mrf.mxu0  ;;  %7897 = vmatmul.mubr.msk.bf16.gmra.mxu0 %vm752_vm3, %v9468_v27  ;;  %v8303_v51 = vpack.i.bf16 %v3326_v46, %v3324_v45  ;;  %v10211_v60 = vsel %vm1428_vm5, %v1442_v29, %v1444_v41  ;;  %v10214_v61 = vsel %vm1818_vm4, %v1832_v19, %v1834_v43  ;;  %17321 = vst [vmem:[#allocation25_spill] sm:$0xff] %v10226_v4  ;;  %v9499_v19 = vld [vmem:[%s16881_s3 + $0x40] sm:$0xff]  }
 0x14a   : > { %17318 = vst [vmem:[#allocation22_spill] sm:$0xff] %v10187_v44  ;;  %v964_v58 = vadd.f32 %v10017_v39, %v963_v50  ;;  %v2698_v59 = vrot.slane %v10187_v44, 4  ;;  %7900 = vmatprep.mubr.msk.bf16.mxu0 %vm9733_vm1, %v16889_v0  ;;  %v3327_v62 = vrot.slane %v10187_v44, 5  ;;  %v1836_v11 = vrot.slane %v10187_v44, 2  ;;  %4799 = vmatpush2.bf16.msra.mxu1 %v9499_v19 }
 0x14b   : > { %8284 = vrot.lane.b32.xlu1 %v8283_v28, %s9736_s22  ;;  %8304 = vrot.lane.b32.xlu0 %v8303_v51, %s9738_s10  ;;  %v7802_v57 = vpop.f32.mrf.mxu0  ;;  %v1446_v12 = vrot.slane %v10187_v44, 1  ;;  %v8298_v16 = vpack.i.bf16 %v2697_v53, %v10161_v22  ;;  %v8308_v17 = vpack.i.bf16 %v10211_v60, %v10201_v54  ;;  %v8313_v18 = vpack.i.bf16 %v10214_v61, %v10178_v35 }
 0x14c   : > { %v10229_v7 = vmax.f32 %v964_v58, 0.0  ;;  %v2699_v10 = vsel %vm882_vm0, %v2696_v40, %v2698_v59  ;;  %v3328_v31 = vsel %vm3321_vm7, %v3325_v34, %v3327_v62  ;;  %v10255_v29 = vsel %vm883_vm2, %v2459_v36, %v2461_v6 }
 0x14d   : > { %v966_v13 = vpop.f32.mrf.mxu0  ;;  %v8318_v14 = vpack.i.bf16 %v2699_v10, %v2697_v53  ;;  %17323 = vst [vmem:[#allocation27_spill] sm:$0xff] %v10255_v29  ;;  %v10261_v38 = vsel %vm1818_vm4, %v1834_v43, %v1836_v11  ;;  %v10264_v40 = vsel %vm1428_vm5, %v1444_v41, %v1446_v12  ;;  %v2463_v50 = vrot.slane %v10187_v44, 3 }
 0x14e   : > { %17322 = vst [vmem:[#allocation26_spill] sm:$0xff] %v10229_v7  ;;  %v967_v20 = vadd.f32 %v10017_v39, %v966_v13  ;;  %v2700_v23 = vrot.slane %v10229_v7, 4  ;;  %v3329_v24 = vrot.slane %v10229_v7, 5  ;;  %v1448_v27 = vrot.slane %v10229_v7, 1 }
 0x14f   : > { %8294 = vrot.lane.b32.xlu1 %v8293_v52, %s9738_s10  ;;  %8319 = vrot.lane.b32.xlu0 %v8318_v14, %s9737_s23  ;;  %v7803_v25 = vpop.f32.mrf.mxu0  ;;  %v1838_v28 = vrot.slane %v10229_v7, 2  ;;  %v8323_v54 = vpack.i.bf16 %v10261_v38, %v10214_v61  ;;  %v3719_v58 = vrot.slane %v10187_v44, 6 }
 0x150   : > { %v10257_v32 = vmax.f32 %v967_v20, 0.0  ;;  %v2701_v33 = vsel %vm882_vm0, %v2698_v59, %v2700_v23  ;;  %v3330_v46 = vsel %vm3321_vm7, %v3327_v62, %v3329_v24  ;;  %v10269_v36 = vsel %vm1428_vm5, %v1446_v12, %v1448_v27  ;;  %v9470_v12 = vld [vmem:[%s9891_s17 + $0xf8] sm:$0xff]  }
 0x151   : > { %v971_v45 = vpop.f32.mrf.mxu0  ;;  %7901 = vmatmul.mubr.msk.bf16.gmra.mxu0 %vm752_vm3, %v9469_v8  ;;  %v8328_v34 = vpack.i.bf16 %v2701_v33, %v2699_v10  ;;  %v10278_v52 = vsel %vm1818_vm4, %v1836_v11, %v1838_v28  ;;  %v3721_v59 = vrot.slane %v10229_v7, 6  ;;  %v8333_v57 = vpack.i.bf16 %v3330_v46, %v3328_v31 }
 0x152   : > { %17324 = vst [vmem:[#allocation28_spill] sm:$0xff] %v10257_v32  ;;  %v972_v51 = vadd.f32 %v10017_v39, %v971_v45  ;;  %7904 = vmatprep.mubr.msk.bf16.mxu0 %vm9733_vm1, %v16889_v0  ;;  %v2702_v41 = vrot.slane %v10257_v32, 4  ;;  %v3331_v43 = vrot.slane %v10257_v32, 5  ;;  %v1840_v55 = vrot.slane %v10257_v32, 2 }
 0x153   : > { %8299 = vrot.lane.b32.xlu1 %v8298_v16, %s9736_s22  ;;  %8329 = vrot.lane.b32.xlu0 %v8328_v34, %s9736_s22  ;;  %v7806_v53 = vpop.f32.mrf.mxu0  ;;  %v1450_v10 = vrot.slane %v10257_v32, 1  ;;  %v8338_v13 = vpack.i.bf16 %v10269_v36, %v10264_v40  ;;  %v10302_v16 = vsel %vm883_vm2, %v2461_v6, %v2463_v50  ;;  %v10317_v34 = vsel %vm3713_vm6, %v3717_v37, %v3719_v58 }
 0x154   : > { %v10287_v60 = vmax.f32 %v972_v51, 0.0  ;;  %v2703_v62 = vsel %vm882_vm0, %v2700_v23, %v2702_v41  ;;  %v10295_v14 = vsel %vm3321_vm7, %v3329_v24, %v3331_v43  ;;  %17326 = vst [vmem:[#allocation30_spill] sm:$0xff] %v10302_v16  ;;  %v10308_v25 = vsel %vm1818_vm4, %v1838_v28, %v1840_v55  ;;  %17327 = vst [vmem:[#allocation31_spill] sm:$0xff] %v10317_v34 }
 0x155   : > { %v974_v11 = vpop.f32.mrf.mxu0  ;;  %v8348_v31 = vpack.i.bf16 %v2703_v62, %v2701_v33  ;;  %v10328_v51 = vsel %vm3713_vm6, %v3719_v58, %v3721_v59  ;;  %v17337_v21 = vrot.slane %v10257_v32, 3 }
 0x156   : > { %17325 = vst [vmem:[#allocation29_spill] sm:$0xff] %v10287_v60  ;;  %v975_v19 = vadd.f32 %v10017_v39, %v974_v11  ;;  %v2704_v20 = vrot.slane %v10287_v60, 4  ;;  %v3333_v23 = vrot.slane %v10287_v60, 5  ;;  %v1452_v45 = vrot.slane %v10287_v60, 1  ;;  %17329 = vst [vmem:[#allocation33_spill] sm:$0xff] %v10328_v51 }
 0x157   : > { %8309 = vrot.lane.b32.xlu1 %v8308_v17, %s9737_s23  ;;  %8334 = vrot.lane.b32.xlu0 %v8333_v57, %s9738_s10  ;;  %v7807_v24 = vpop.f32.mrf.mxu0  ;;  %v1842_v6 = vrot.slane %v10287_v60, 2  ;;  %v10325_v17 = vsel %vm1428_vm5, %v1448_v27, %v1450_v10  ;;  %v3723_v57 = vrot.slane %v10257_v32, 6  ;;  %v16891_v11 = vrot.slane %v10287_v60, 6 }
 0x158   : > { %v10319_v46 = vmax.f32 %v975_v19, 0.0  ;;  %v10322_v28 = vsel %vm882_vm0, %v2702_v41, %v2704_v20  ;;  %v3334_v53 = vsel %vm3321_vm7, %v3331_v43, %v3333_v23  ;;  %v10341_v58 = vsel %vm1428_vm5, %v1450_v10, %v1452_v45 }
 0x159   : > { %v979_v33 = vpop.f32.mrf.mxu0  ;;  %7905 = vmatmul.mubr.msk.bf16.gmra.mxu0 %vm752_vm3, %v9470_v12  ;;  %v10344_v43 = vsel %vm1818_vm4, %v1840_v55, %v1842_v6  ;;  %v8358_v19 = vpack.i.bf16 %v10322_v28, %v2703_v62  ;;  %v8363_v55 = vpack.i.bf16 %v3334_v53, %v10295_v14  ;;  %v10374_v14 = vsel %vm3713_vm6, %v3723_v57, %v16891_v11 }
 0x15a   : > { %17328 = vst [vmem:[#allocation32_spill] sm:$0xff] %v10319_v46  ;;  %v980_v41 = vadd.f32 %v10017_v39, %v979_v33  ;;  %7908 = vmatprep.mubr.msk.bf16.mxu0 %vm9733_vm1, %v16889_v0  ;;  %v2706_v27 = vrot.slane %v10319_v46, 4  ;;  %v3335_v24 = vrot.slane %v10319_v46, 5  ;;  %v1844_v33 = vrot.slane %v10319_v46, 2  ;;  %17332 = vst [vmem:[#allocation36_spill] sm:$0xff] %v10374_v14 }
 0x15b   : > { %8314 = vrot.lane.b32.xlu1 %v8313_v18, %s9736_s22  ;;  %8349 = vrot.lane.b32.xlu0 %v8348_v31, %s9737_s23  ;;  %v7810_v12 = vpop.f32.mrf.mxu0  ;;  %v1454_v35 = vrot.slane %v10319_v46, 1  ;;  %v9471_v18 = vld [vmem:[%s9891_s17 + $0x100] sm:$0xff]   ;;  %v3727_v11 = vrot.slane %v10319_v46, 6  ;;  %v17347_v14 = vpack.i.bf16 %v10341_v58, %v10325_v17  ;;  %v17349_v58 = vrot.slane %v10257_v32, 3 }
 0x15c   : > { %v10356_v1 = vmax.f32 %v980_v41, 0.0  ;;  %v10360_v22 = vsel %vm882_vm0, %v2704_v20, %v2706_v27  ;;  %v10369_v12 = vsel %vm3713_vm6, %v3721_v59, %v3723_v57  ;;  %v10380_v10 = vsel %vm1818_vm4, %v1842_v6, %v1844_v33 }
 0x15d   : > { %v982_v61 = vpop.f32.mrf.mxu0  ;;  %17331 = vst [vmem:[#allocation35_spill] sm:$0xff] %v10369_v12  ;;  %v8378_v31 = vpack.i.bf16 %v10360_v22, %v10322_v28  ;;  %v10387_v57 = vsel %vm3321_vm7, %v3333_v23, %v3335_v24  ;;  %v9473_v12 = vld [vmem:[%s9891_s17 + $0x110] sm:$0xff]  }
 0x15e   : > { %17330 = vst [vmem:[#allocation34_spill] sm:$0xff] %v10356_v1  ;;  %v983_v20 = vadd.f32 %v10017_v39, %v982_v61  ;;  %v2708_v53 = vrot.slane %v10356_v1, 4  ;;  %v3337_v41 = vrot.slane %v10356_v1, 5  ;;  %v1456_v61 = vrot.slane %v10356_v1, 1 }
 0x15f   : > { %8324 = vrot.lane.b32.xlu1 %v8323_v54, %s9738_s10  ;;  %8359 = vrot.lane.b32.xlu0 %v8358_v19, %s9736_s22  ;;  %v7811_v59 = vpop.f32.mrf.mxu0  ;;  %v1846_v62 = vrot.slane %v10356_v1, 2  ;;  %v10397_v54 = vsel %vm1428_vm5, %v1452_v45, %v1454_v35 }
 0x160   : > { %v10391_v37 = vmax.f32 %v983_v20, 0.0  ;;  %v10394_v6 = vsel %vm882_vm0, %v2706_v27, %v2708_v53  ;;  %v10403_v23 = vsel %vm3321_vm7, %v3335_v24, %v3337_v41  ;;  %v10408_v20 = vsel %vm1428_vm5, %v1454_v35, %v1456_v61 }
 0x161   : > { %v987_v59 = vpop.f32.mrf.mxu0  ;;  %7909 = vmatmul.mubr.msk.bf16.gmra.mxu0 %vm752_vm3, %v9471_v18  ;;  %v2465_v27 = vrot.slane %v10229_v7, 3  ;;  %v10417_v24 = vsel %vm1818_vm4, %v1844_v33, %v1846_v62  ;;  %v8393_v33 = vpack.i.bf16 %v10403_v23, %v10387_v57 }
 0x162   : > { %17333 = vst [vmem:[#allocation37_spill] sm:$0xff] %v10391_v37  ;;  %v988_v45 = vadd.f32 %v10017_v39, %v987_v59  ;;  %7912 = vmatprep.mubr.msk.bf16.mxu0 %vm9733_vm1, %v16889_v0  ;;  %v2710_v19 = vrot.slane %v10391_v37, 4  ;;  %v3339_v18 = vrot.slane %v10391_v37, 5  ;;  %v8388_v59 = vpack.i.bf16 %v10394_v6, %v10360_v22 }
 0x163   : > { %8339 = vrot.lane.b32.xlu1 %v8338_v13, %s9737_s23  ;;  %8364 = vrot.lane.b32.xlu0 %v8363_v55, %s9738_s10  ;;  %v7814_v35 = vpop.f32.mrf.mxu0  ;;  %v1848_v28 = vrot.slane %v10391_v37, 2  ;;  %v1458_v36 = vrot.slane %v10391_v37, 1  ;;  %v9472_v55 = vld [vmem:[%s9891_s17 + $0x108] sm:$0xff]   ;;  %v10448_v57 = vsel %vm883_vm2, %v2463_v50, %v2465_v27  ;;  %v17392_v3 = vrot.slane %v10391_v37, 3 }
 0x164   : > { %v10429_v8 = vmax.f32 %v988_v45, 0.0  ;;  %v10434_v40 = vsel %vm882_vm0, %v2708_v53, %v2710_v19  ;;  %v10441_v35 = vsel %vm3321_vm7, %v3337_v41, %v3339_v18  ;;  %17335 = vst [vmem:[#allocation39_spill] sm:$0xff] %v10448_v57  ;;  %v17336_v41 = vpack.i.bf16 %v10278_v52, %v10261_v38 }
 0x165   : > { %v990_v13 = vpop.f32.mrf.mxu0  ;;  %v10454_v7 = vsel %vm1818_vm4, %v1846_v62, %v1848_v28  ;;  %v10468_v62 = vsel %vm883_vm2, %v2465_v27, %v17337_v21  ;;  %v2469_v57 = vrot.slane %v10287_v60, 3 }
 0x166   : > { %17334 = vst [vmem:[#allocation38_spill] sm:$0xff] %v10429_v8  ;;  %v991_v53 = vadd.f32 %v10017_v39, %v990_v13  ;;  %v2712_v23 = vrot.slane %v10429_v8, 4  ;;  %v3341_v0 = vrot.slane %v10429_v8, 5  ;;  %v1460_v13 = vrot.slane %v10429_v8, 1  ;;  %17338 = vst [vmem:[#allocation40_spill] sm:$0xff] %v10468_v62 }
 0x167   : > { %8344 = vrot.lane.b32.xlu1 %v17336_v41, %s9736_s22  ;;  %8379 = vrot.lane.b32.xlu0 %v8378_v31, %s9737_s23  ;;  %v7815_v45 = vpop.f32.mrf.mxu0  ;;  %v1850_v22 = vrot.slane %v10429_v8, 2  ;;  %v10476_v31 = vsel %vm1428_vm5, %v1456_v61, %v1458_v36 }
 0x168   : > { %v10470_v44 = vmax.f32 %v991_v53, 0.0  ;;  %v10473_v38 = vsel %vm882_vm0, %v2710_v19, %v2712_v23  ;;  %v10481_v50 = vsel %vm3321_vm7, %v3339_v18, %v3341_v0  ;;  %v10486_v27 = vsel %vm1428_vm5, %v1458_v36, %v1460_v13 }
 0x169   : > { %v995_v41 = vpop.f32.mrf.mxu0  ;;  %7913 = vmatmul.mubr.msk.bf16.gmra.mxu0 %vm752_vm3, %v9472_v55  ;;  %v17340_v19 = vrot.slane %v10287_v60, 6  ;;  %v17342_v45 = vmov 0.0   ;;  %v10499_v21 = vsel %vm1818_vm4, %v1848_v28, %v1850_v22  ;;  %v17343_v36 = vpack.i.bf16 %v10308_v25, %v10278_v52 }
 0x16a   : > { %17339 = vst [vmem:[#allocation41_spill] sm:$0xff] %v10470_v44  ;;  %v996_v61 = vadd.f32 %v10017_v39, %v995_v41  ;;  %7916 = vmatprep.mubr.msk.bf16.mxu0 %vm9733_vm1, %v17342_v45  ;;  %v2714_v18 = vrot.slane %v10470_v44, 4  ;;  %v3343_v55 = vrot.slane %v10470_v44, 5  ;;  %v8418_v41 = vpack.i.bf16 %v10473_v38, %v10434_v40 }
 0x16b   : > { %v10491_v53 = vsel %vm3713_vm6, %v17340_v19, %v3727_v11  ;;  %8354 = vrot.lane.b32.xlu1 %v17343_v36, %s9738_s10  ;;  %8389 = vrot.lane.b32.xlu0 %v8388_v59, %s9736_s22  ;;  %v7818_v19 = vpop.f32.mrf.mxu0  ;;  %v1852_v62 = vrot.slane %v10470_v44, 2  ;;  %v1462_v52 = vrot.slane %v10470_v44, 1  ;;  %v17345_v36 = vrot.slane %v10356_v1, 6 }
 0x16c   : > { %17341 = vst [vmem:[#allocation42_spill] sm:$0xff] %v10491_v53  ;;  %v10511_v63 = vmax.f32 %v996_v61, 0.0  ;;  %v10514_v28 = vsel %vm882_vm0, %v2712_v23, %v2714_v18  ;;  %v10528_v61 = vsel %vm3321_vm7, %v3341_v0, %v3343_v55  ;;  %v17360_v53 = vpack.i.bf16 %v10380_v10, %v10344_v43 }
 0x16d   : > { %v10520_v59 = vsel %vm3713_vm6, %v3727_v11, %v17345_v36  ;;  %v998_v19 = vpop.f32.mrf.mxu0  ;;  %v10536_v36 = vsel %vm1818_vm4, %v1850_v22, %v1852_v62  ;;  %v10555_v17 = vsel %vm1428_vm5, %v1460_v13, %v1462_v52 }
 0x16e   : > { %17344 = vst [vmem:[#allocation43_spill] sm:$0xff] %v10511_v63  ;;  %17346 = vst [vmem:[#allocation44_spill] sm:$0xff] %v10520_v59  ;;  %v999_v60 = vadd.f32 %v10017_v39, %v998_v19  ;;  %v2716_v16 = vrot.slane %v10511_v63, 4  ;;  %v3345_v11 = vrot.slane %v10511_v63, 5  ;;  %v1464_v19 = vrot.slane %v10511_v63, 1 }
 0x16f   : > { %8369 = vrot.lane.b32.xlu1 %v17347_v14, %s9737_s23  ;;  %8394 = vrot.lane.b32.xlu0 %v8393_v33, %s9738_s10  ;;  %v7819_v0 = vpop.f32.mrf.mxu0  ;;  %v1854_v42 = vrot.slane %v10511_v63, 2  ;;  %v10560_v14 = vsel %vm883_vm2, %v17349_v58, %v2469_v57 }
 0x170   : > { %v10549_v22 = vmax.f32 %v999_v60, 0.0  ;;  %v10552_v34 = vsel %vm882_vm0, %v2714_v18, %v2716_v16  ;;  %17350 = vst [vmem:[#allocation46_spill] sm:$0xff] %v10560_v14  ;;  %v10564_v0 = vsel %vm3321_vm7, %v3343_v55, %v3345_v11  ;;  %v3731_v18 = vrot.slane %v10391_v37, 6 }
 0x171   : > { %v1003_v33 = vpop.f32.mrf.mxu0  ;;  %7917 = vmatmul.mubr.msk.bf16.gmra.mxu0 %vm752_vm3, %v9473_v12  ;;  %v10575_v12 = vsel %vm1428_vm5, %v1462_v52, %v1464_v19  ;;  %v10578_v55 = vsel %vm1818_vm4, %v1852_v62, %v1854_v42  ;;  %v17351_v60 = vpack.i.bf16 %v10344_v43, %v10308_v25  ;;  %v17353_v62 = vrot.slane %v10319_v46, 3 }
 0x172   : > { %17348 = vst [vmem:[#allocation45_spill] sm:$0xff] %v10549_v22  ;;  %v1004_v13 = vadd.f32 %v10017_v39, %v1003_v33  ;;  %7920 = vmatprep.mubr.msk.bf16.mxu0 %vm9733_vm1, %v17342_v45  ;;  %v2718_v58 = vrot.slane %v10549_v22, 4  ;;  %v17352_v33 = vpack.i.bf16 %v10434_v40, %v10394_v6  ;;  %v3347_v52 = vrot.slane %v10549_v22, 5 }
 0x173   : > { %8374 = vrot.lane.b32.xlu1 %v17351_v60, %s9736_s22  ;;  %v7822_v23 = vpop.f32.mrf.mxu0  ;;  %v1856_v32 = vrot.slane %v10549_v22, 2  ;;  %v10595_v14 = vsel %vm883_vm2, %v2469_v57, %v17353_v62  ;;  %v1466_v40 = vrot.slane %v10549_v22, 1  ;;  %v17356_v57 = vrot.slane %v10356_v1, 6 }
 0x174   : > { %8409 = vrot.lane.b32.xlu0 %v17352_v33, %s9737_s23  ;;  %17354 = vst [vmem:[#allocation47_spill] sm:$0xff] %v10595_v14  ;;  %v10597_v25 = vmax.f32 %v1004_v13, 0.0  ;;  %v10602_v6 = vsel %vm882_vm0, %v2716_v16, %v2718_v58  ;;  %v9475_v33 = vld [vmem:[%s9891_s17 + $0x118] sm:$0xff]   ;;  %v17358_v62 = vrot.slane %v10429_v8, 6 }
 0x175   : > { %v1006_v23 = vpop.f32.mrf.mxu0  ;;  %v10613_v13 = vsel %vm3713_vm6, %v17356_v57, %v3731_v18  ;;  %v10624_v29 = vsel %vm1818_vm4, %v1854_v42, %v1856_v32  ;;  %v10644_v43 = vsel %vm1428_vm5, %v1464_v19, %v1466_v40 }
 0x176   : > { %17355 = vst [vmem:[#allocation48_spill] sm:$0xff] %v10597_v25  ;;  %17357 = vst [vmem:[#allocation49_spill] sm:$0xff] %v10613_v13  ;;  %v10618_v16 = vsel %vm3713_vm6, %v3731_v18, %v17358_v62  ;;  %v1007_v60 = vadd.f32 %v10017_v39, %v1006_v23  ;;  %v2720_v14 = vrot.slane %v10597_v25, 4  ;;  %v3349_v59 = vrot.slane %v10597_v25, 5 }
 0x177   : > { %17359 = vst [vmem:[#allocation50_spill] sm:$0xff] %v10618_v16  ;;  %8384 = vrot.lane.b32.xlu1 %v17360_v53, %s9738_s10  ;;  %v7823_v57 = vpop.f32.mrf.mxu0  ;;  %v10634_v23 = vsel %vm3321_vm7, %v3345_v11, %v3347_v52  ;;  %v1468_v62 = vrot.slane %v10597_v25, 1  ;;  %v1858_v51 = vrot.slane %v10597_v25, 2  ;;  %v17362_v53 = vpack.i.bf16 %v10408_v20, %v10397_v54 }
 0x178   : > { %8419 = vrot.lane.b32.xlu0 %v8418_v41, %s9736_s22  ;;  %v10638_v42 = vmax.f32 %v1007_v60, 0.0  ;;  %v10641_v2 = vsel %vm882_vm0, %v2718_v58, %v2720_v14  ;;  %v10650_v11 = vsel %vm3321_vm7, %v3347_v52, %v3349_v59  ;;  %v3735_v60 = vrot.slane %v10470_v44, 6 }
 0x179   : > { %v1011_v41 = vpop.f32.mrf.mxu0  ;;  %7921 = vmatmul.mubr.msk.bf16.gmra.mxu0 %vm752_vm3, %v9475_v33  ;;  %v10661_v33 = vsel %vm1428_vm5, %v1466_v40, %v1468_v62  ;;  %v10664_v52 = vsel %vm1818_vm4, %v1856_v32, %v1858_v51  ;;  %v2473_v32 = vrot.slane %v10356_v1, 3  ;;  %v17365_v58 = vrot.slane %v10429_v8, 6 }
 0x17a   : > { %17361 = vst [vmem:[#allocation51_spill] sm:$0xff] %v10638_v42  ;;  %v1012_v18 = vadd.f32 %v10017_v39, %v1011_v41  ;;  %7924 = vmatprep.mubr.msk.bf16.mxu0 %vm9733_vm1, %v17342_v45  ;;  %v2722_v19 = vrot.slane %v10638_v42, 4  ;;  %v17363_v41 = vpack.i.bf16 %v10481_v50, %v10441_v35  ;;  %v3351_v40 = vrot.slane %v10638_v42, 5 }
 0x17b   : > { %8399 = vrot.lane.b32.xlu1 %v17362_v53, %s9737_s23  ;;  %v7826_v57 = vpop.f32.mrf.mxu0  ;;  %v1860_v13 = vrot.slane %v10638_v42, 2  ;;  %v1470_v35 = vrot.slane %v10638_v42, 1  ;;  %v9476_v53 = vld [vmem:[%s9891_s17 + $0x120] sm:$0xff]   ;;  %v17367_v54 = vrot.slane %v10511_v63, 6 }
 0x17c   : > { %8424 = vrot.lane.b32.xlu0 %v17363_v41, %s9738_s10  ;;  %v10679_v16 = vmax.f32 %v1012_v18, 0.0  ;;  %v10684_v20 = vsel %vm882_vm0, %v2720_v14, %v2722_v19  ;;  %v10695_v18 = vsel %vm3713_vm6, %v17365_v58, %v3735_v60  ;;  %v17369_v41 = vpack.i.bf16 %v10417_v24, %v10380_v10 }
 0x17d   : > { %v1014_v50 = vpop.f32.mrf.mxu0  ;;  %17366 = vst [vmem:[#allocation53_spill] sm:$0xff] %v10695_v18  ;;  %v10700_v14 = vsel %vm3713_vm6, %v3735_v60, %v17367_v54  ;;  %v10706_v57 = vsel %vm1818_vm4, %v1858_v51, %v1860_v13  ;;  %v17370_v58 = vpack.i.bf16 %v10514_v28, %v10473_v38  ;;  %v17374_v18 = vrot.slane %v10319_v46, 3  ;;  %v9477_v54 = vld [vmem:[%s9891_s17 + $0x128] sm:$0xff]  }
 0x17e   : > { %17364 = vst [vmem:[#allocation52_spill] sm:$0xff] %v10679_v16  ;;  %17368 = vst [vmem:[#allocation54_spill] sm:$0xff] %v10700_v14  ;;  %v1015_v1 = vadd.f32 %v10017_v39, %v1014_v50  ;;  %v2724_v30 = vrot.slane %v10679_v16, 4  ;;  %v3353_v15 = vrot.slane %v10679_v16, 5  ;;  %v10719_v50 = vsel %vm3321_vm7, %v3349_v59, %v3351_v40 }
 0x17f   : > { %8404 = vrot.lane.b32.xlu1 %v17369_v41, %s9736_s22  ;;  %v7827_v60 = vpop.f32.mrf.mxu0  ;;  %v1472_v51 = vrot.slane %v10679_v16, 1  ;;  %v1862_v26 = vrot.slane %v10679_v16, 2  ;;  %v10729_v41 = vsel %vm1428_vm5, %v1468_v62, %v1470_v35  ;;  %v3739_v14 = vrot.slane %v10549_v22, 6 }
 0x180   : > { %8439 = vrot.lane.b32.xlu0 %v17370_v58, %s9737_s23  ;;  %v10723_v47 = vmax.f32 %v1015_v1, 0.0  ;;  %v10726_v10 = vsel %vm882_vm0, %v2722_v19, %v2724_v30  ;;  %v10735_v59 = vsel %vm3321_vm7, %v3351_v40, %v3353_v15  ;;  %v17377_v46 = vrot.slane %v10391_v37, 3 }
 0x181   : > { %v1019_v58 = vpop.f32.mrf.mxu0  ;;  %7925 = vmatmul.mubr.msk.bf16.gmra.mxu0 %vm752_vm3, %v9476_v53  ;;  %v10740_v1 = vsel %vm1428_vm5, %v1470_v35, %v1472_v51  ;;  %v10749_v40 = vsel %vm1818_vm4, %v1860_v13, %v1862_v26  ;;  %v17372_v35 = vpack.i.bf16 %v10454_v7, %v10417_v24  ;;  %v10765_v13 = vsel %vm883_vm2, %v17374_v18, %v2473_v32 }
 0x182   : > { %17371 = vst [vmem:[#allocation55_spill] sm:$0xff] %v10723_v47  ;;  %v1020_v62 = vadd.f32 %v10017_v39, %v1019_v58  ;;  %7928 = vmatprep.mubr.msk.bf16.mxu0 %vm9733_vm1, %v17342_v45  ;;  %v2726_v38 = vrot.slane %v10723_v47, 4  ;;  %v3355_v53 = vrot.slane %v10723_v47, 5  ;;  %v17373_v58 = vpack.i.bf16 %v10552_v34, %v10514_v28  ;;  %17375 = vst [vmem:[#allocation56_spill] sm:$0xff] %v10765_v13 }
 0x183   : > { %8414 = vrot.lane.b32.xlu1 %v17372_v35, %s9738_s10  ;;  %v7830_v60 = vpop.f32.mrf.mxu0  ;;  %v1864_v19 = vrot.slane %v10723_v47, 2  ;;  %v17379_v18 = vpack.i.bf16 %v10486_v27, %v10476_v31  ;;  %v17381_v35 = vrot.slane %v10511_v63, 6 }
 0x184   : > { %8449 = vrot.lane.b32.xlu0 %v17373_v58, %s9736_s22  ;;  %v10768_v24 = vmax.f32 %v1020_v62, 0.0  ;;  %v1474_v60 = vrot.slane %v10723_v47, 1  ;;  %v10777_v4 = vsel %vm882_vm0, %v2724_v30, %v2726_v38  ;;  %v10784_v62 = vsel %vm883_vm2, %v2473_v32, %v17377_v46 }
 0x185   : > { %v1022_v58 = vpop.f32.mrf.mxu0  ;;  %17378 = vst [vmem:[#allocation58_spill] sm:$0xff] %v10784_v62  ;;  %v10790_v9 = vsel %vm3321_vm7, %v3353_v15, %v3355_v53  ;;  %v17380_v46 = vpack.i.bf16 %v10564_v0, %v10528_v61  ;;  %v10809_v62 = vsel %vm3713_vm6, %v17381_v35, %v3739_v14  ;;  %v10835_v35 = vld [vmem:[#allocation4] ss:$0 sm:$0xff] }
 0x186   : > { %17376 = vst [vmem:[#allocation57_spill] sm:$0xff] %v10768_v24  ;;  %v1023_v13 = vadd.f32 %v10017_v39, %v1022_v58  ;;  %v2728_v28 = vrot.slane %v10768_v24, 4  ;;  %v3357_v30 = vrot.slane %v10768_v24, 5  ;;  %v10802_v39 = vsel %vm1818_vm4, %v1862_v26, %v1864_v19  ;;  %17382 = vst [vmem:[#allocation59_spill] sm:$0xff] %v10809_v62 }
 0x187   : > { %8429 = vrot.lane.b32.xlu1 %v17379_v18, %s9737_s23  ;;  %v7831_v32 = vpop.f32.mrf.mxu0  ;;  %v1476_v58 = vrot.slane %v10768_v24, 1  ;;  %v1866_v15 = vrot.slane %v10768_v24, 2  ;;  %v10817_v61 = vsel %vm1428_vm5, %v1472_v51, %v1474_v60  ;;  %v17385_v26 = vrot.slane %v10597_v25, 6 }
 0x188   : > { %8454 = vrot.lane.b32.xlu0 %v17380_v46, %s9738_s10  ;;  %v10811_v31 = vmax.f32 %v1023_v13, 0.0  ;;  %v10814_v27 = vsel %vm882_vm0, %v2726_v38, %v2728_v28  ;;  %17384 = vst [vmem:[#allocation61_spill] sm:$0xff] %v10817_v61  ;;  %v10826_v46 = vsel %vm3321_vm7, %v3355_v53, %v3357_v30  ;;  %v2477_v51 = vrot.slane %v10429_v8, 3 }
 0x189   : > { %v10822_v0 = vsel %vm3713_vm6, %v3739_v14, %v17385_v26  ;;  %v1027_v18 = vpop.f32.mrf.mxu0  ;;  %7929 = vmatmul.mubr.msk.bf16.gmra.mxu0 %vm752_vm3, %v9477_v54  ;;  %v10829_v13 = vsel %vm1428_vm5, %v1474_v60, %v1476_v58  ;;  %v10832_v38 = vsel %vm1818_vm4, %v1864_v19, %v1866_v15  ;;  %v17389_v19 = vpack.i.bf16 %v10499_v21, %v10454_v7 }
 0x18a   : > { %17383 = vst [vmem:[#allocation60_spill] sm:$0xff] %v10811_v31  ;;  %17386 = vst [vmem:[#allocation62_spill] sm:$0xff] %v10822_v0  ;;  %v1028_v32 = vadd.f32 %v10835_v35, %v1027_v18  ;;  %7932 = vmatprep.mubr.msk.bf16.mxu0 %vm9733_vm1, %v17342_v45  ;;  %v2730_v54 = vrot.slane %v10811_v31, 4  ;;  %v3359_v53 = vrot.slane %v10811_v31, 5  ;;  %v17390_v60 = vpack.i.bf16 %v10602_v6, %v10552_v34 }
 0x18b   : > { %17387 = vst [vmem:[#allocation63_spill] sm:$0xff] %v10829_v13  ;;  %17388 = vst [vmem:[#allocation64_spill] sm:$0xff] %v10832_v38  ;;  %8434 = vrot.lane.b32.xlu1 %v17389_v19, %s9736_s22  ;;  %v7834_v26 = vpop.f32.mrf.mxu0  ;;  %v1868_v8 = vrot.slane %v10811_v31, 2  ;;  %v10878_v7 = vsel %vm883_vm2, %v17392_v3, %v2477_v51 }
 0x18c   : > { %8469 = vrot.lane.b32.xlu0 %v17390_v60, %s9737_s23  ;;  %v10859_v56 = vmax.f32 %v1028_v32, 0.0  ;;  %v9479_v26 = vld [vmem:[%s9891_s17 + $0x130] sm:$0xff]   ;;  %v10869_v14 = vsel %vm882_vm0, %v2728_v28, %v2730_v54  ;;  %v10872_v18 = vsel %vm3321_vm7, %v3357_v30, %v3359_v53  ;;  %v1478_v32 = vrot.slane %v10811_v31, 1  ;;  %17393 = vst [vmem:[#allocation66_spill] sm:$0xff] %v10878_v7 }
 0x18d   : > { %v1030_v60 = vpop.f32.mrf.mxu0  ;;  %v10884_v0 = vsel %vm1818_vm4, %v1866_v15, %v1868_v8  ;;  %v17394_v28 = vpack.i.bf16 %v10536_v36, %v10499_v21  ;;  %v17395_v30 = vpack.i.bf16 %v10641_v2, %v10602_v6  ;;  %v3743_v15 = vrot.slane %v10638_v42, 6 }
 0x18e   : > { %17391 = vst [vmem:[#allocation65_spill] sm:$0xff] %v10859_v56  ;;  %v1031_v34 = vadd.f32 %v10835_v35, %v1030_v60  ;;  %v2732_v62 = vrot.slane %v10859_v56, 4  ;;  %v3361_v19 = vrot.slane %v10859_v56, 5  ;;  %v1480_v60 = vrot.slane %v10859_v56, 1 }
 0x18f   : > { %8444 = vrot.lane.b32.xlu1 %v17394_v28, %s9738_s10  ;;  %v7835_v3 = vpop.f32.mrf.mxu0  ;;  %v1870_v37 = vrot.slane %v10859_v56, 2  ;;  %v3745_v6 = vrot.slane %v10679_v16, 6  ;;  %v17400_v16 = vrot.slane %v10470_v44, 3 }
 0x190   : > { %8479 = vrot.lane.b32.xlu0 %v17395_v30, %s9736_s22  ;;  %v10898_v61 = vmax.f32 %v1031_v34, 0.0  ;;  %v10903_v28 = vsel %vm882_vm0, %v2730_v54, %v2732_v62  ;;  %v10908_v3 = vsel %vm3321_vm7, %v3359_v53, %v3361_v19  ;;  %v10913_v34 = vsel %vm1428_vm5, %v1476_v58, %v1478_v32 }
 0x191   : > { %v1035_v30 = vpop.f32.mrf.mxu0  ;;  %7933 = vmatmul.mubr.msk.bf16.gmra.mxu0 %vm752_vm3, %v9479_v26  ;;  %17397 = vst [vmem:[#allocation68_spill] sm:$0xff] %v10913_v34  ;;  %v10916_v42 = vsel %vm1428_vm5, %v1478_v32, %v1480_v60  ;;  %v10924_v21 = vsel %vm1818_vm4, %v1868_v8, %v1870_v37  ;;  %v17398_v58 = vpack.i.bf16 %v10575_v12, %v10555_v17  ;;  %v17402_v8 = vrot.slane %v10597_v25, 6 }
 0x192   : > { %17396 = vst [vmem:[#allocation67_spill] sm:$0xff] %v10898_v61  ;;  %v1036_v54 = vadd.f32 %v10835_v35, %v1035_v30  ;;  %7936 = vmatprep.mubr.msk.bf16.mxu0 %vm9733_vm1, %v17342_v45  ;;  %v2734_v26 = vrot.slane %v10898_v61, 4  ;;  %v3363_v53 = vrot.slane %v10898_v61, 5  ;;  %v17399_v32 = vpack.i.bf16 %v10650_v11, %v10634_v23 }
 0x193   : > { %8459 = vrot.lane.b32.xlu1 %v17398_v58, %s9737_s23  ;;  %v7838_v30 = vpop.f32.mrf.mxu0  ;;  %v10939_v38 = vsel %vm883_vm2, %v2477_v51, %v17400_v16  ;;  %v10944_v13 = vsel %vm3713_vm6, %v17402_v8, %v3743_v15  ;;  %v1872_v23 = vrot.slane %v10898_v61, 2  ;;  %v10952_v11 = vsel %vm3713_vm6, %v3743_v15, %v3745_v6 }
 0x194   : > { %8484 = vrot.lane.b32.xlu0 %v17399_v32, %s9738_s10  ;;  %17401 = vst [vmem:[#allocation69_spill] sm:$0xff] %v10939_v38  ;;  %17403 = vst [vmem:[#allocation70_spill] sm:$0xff] %v10944_v13  ;;  %v10946_v17 = vmax.f32 %v1036_v54, 0.0  ;;  %v9482_v32 = vld [vmem:[%s9891_s17 + $0x138] sm:$0xff]   ;;  %v10956_v16 = vsel %vm882_vm0, %v2732_v62, %v2734_v26  ;;  %v1482_v30 = vrot.slane %v10898_v61, 1  ;;  %v10966_v15 = vsel %vm3321_vm7, %v3361_v19, %v3363_v53 }
 0x195   : > { %17405 = vst [vmem:[#allocation72_spill] sm:$0xff] %v10952_v11  ;;  %v1038_v58 = vpop.f32.mrf.mxu0  ;;  %v17406_v62 = vpack.i.bf16 %v10578_v55, %v10536_v36  ;;  %v17407_v54 = vpack.i.bf16 %v10684_v20, %v10641_v2  ;;  %v3747_v61 = vrot.slane %v10723_v47, 6 }
 0x196   : > { %17404 = vst [vmem:[#allocation71_spill] sm:$0xff] %v10946_v17  ;;  %v1039_v8 = vadd.f32 %v10835_v35, %v1038_v58  ;;  %v2736_v12 = vrot.slane %v10946_v17, 4  ;;  %v3365_v7 = vrot.slane %v10946_v17, 5  ;;  %v1484_v58 = vrot.slane %v10946_v17, 1 }
 0x197   : > { %8464 = vrot.lane.b32.xlu1 %v17406_v62, %s9736_s22  ;;  %v7839_v51 = vpop.f32.mrf.mxu0  ;;  %v1874_v38 = vrot.slane %v10946_v17, 2  ;;  %v10987_v62 = vsel %vm1818_vm4, %v1870_v37, %v1872_v23  ;;  %v11023_v11 = vsel %vm3713_vm6, %v3745_v6, %v3747_v61 }
 0x198   : > { %8499 = vrot.lane.b32.xlu0 %v17407_v54, %s9737_s23  ;;  %v10982_v34 = vmax.f32 %v1039_v8, 0.0  ;;  %v10992_v54 = vsel %vm882_vm0, %v2734_v26, %v2736_v12  ;;  %v10995_v19 = vsel %vm3321_vm7, %v3363_v53, %v3365_v7  ;;  %v10998_v8 = vsel %vm1428_vm5, %v1480_v60, %v1482_v30  ;;  %17413 = vst [vmem:[#allocation76_spill] sm:$0xff] %v11023_v11 }
 0x199   : > { %v1043_v51 = vpop.f32.mrf.mxu0  ;;  %7937 = vmatmul.mubr.msk.bf16.gmra.mxu0 %vm752_vm3, %v9482_v32  ;;  %17409 = vst [vmem:[#allocation74_spill] sm:$0xff] %v10998_v8  ;;  %v11001_v13 = vsel %vm1428_vm5, %v1482_v30, %v1484_v58  ;;  %v11009_v36 = vsel %vm1818_vm4, %v1872_v23, %v1874_v38  ;;  %v17411_v60 = vpack.i.bf16 %v10624_v29, %v10578_v55  ;;  %v2481_v23 = vrot.slane %v10511_v63, 3 }
 0x19a   : > { %17408 = vst [vmem:[#allocation73_spill] sm:$0xff] %v10982_v34  ;;  %17410 = vst [vmem:[#allocation75_spill] sm:$0xff] %v11001_v13  ;;  %v1044_v37 = vadd.f32 %v10835_v35, %v1043_v51  ;;  %7940 = vmatprep.mubr.msk.bf16.mxu0 %vm9733_vm1, %v17342_v45  ;;  %v2738_v32 = vrot.slane %v10982_v34, 4  ;;  %v3367_v26 = vrot.slane %v10982_v34, 5  ;;  %v17412_v53 = vpack.i.bf16 %v10726_v10, %v10684_v20  ;;  %v9485_v51 = vld [vmem:[%s9891_s17 + $0x140] sm:$0xff]  }
 0x19b   : > { %8474 = vrot.lane.b32.xlu1 %v17411_v60, %s9738_s10  ;;  %v7842_v30 = vpop.f32.mrf.mxu0  ;;  %v1876_v2 = vrot.slane %v10982_v34, 2  ;;  %v1486_v60 = vrot.slane %v10982_v34, 1  ;;  %v17415_v20 = vrot.slane %v10768_v24, 6  ;;  %v17417_v63 = vpack.i.bf16 %v10661_v33, %v10644_v43 }
 0x19c   : > { %8509 = vrot.lane.b32.xlu0 %v17412_v53, %s9736_s22  ;;  %v11026_v47 = vmax.f32 %v1044_v37, 0.0  ;;  %v11029_v55 = vsel %vm882_vm0, %v2736_v12, %v2738_v32  ;;  %v17418_v37 = vpack.i.bf16 %v10735_v59, %v10719_v50  ;;  %v17428_v11 = vrot.slane %v10768_v24, 6 }
 0x19d   : > { %v11035_v53 = vsel %vm3713_vm6, %v3747_v61, %v17415_v20  ;;  %v1046_v30 = vpop.f32.mrf.mxu0  ;;  %v11049_v20 = vsel %vm3321_vm7, %v3365_v7, %v3367_v26  ;;  %v11072_v43 = vsel %vm1818_vm4, %v1874_v38, %v1876_v2  ;;  %v11075_v33 = vsel %vm1428_vm5, %v1484_v58, %v1486_v60 }
 0x19e   : > { %17414 = vst [vmem:[#allocation77_spill] sm:$0xff] %v11026_v47  ;;  %17416 = vst [vmem:[#allocation78_spill] sm:$0xff] %v11035_v53  ;;  %v1047_v34 = vadd.f32 %v10835_v35, %v1046_v30  ;;  %v2740_v61 = vrot.slane %v11026_v47, 4  ;;  %v3369_v17 = vrot.slane %v11026_v47, 5  ;;  %v16942_v6 = vrot.slane %v11026_v47, 1 }
 0x19f   : > { %8489 = vrot.lane.b32.xlu1 %v17417_v63, %s9737_s23  ;;  %v7843_v12 = vpop.f32.mrf.mxu0  ;;  %v1878_v7 = vrot.slane %v11026_v47, 2  ;;  %17420 = vst [vmem:[#allocation80_spill] sm:$0xff] %v11075_v33  ;;  %v3751_v38 = vrot.slane %v10811_v31, 6 }
 0x1a0   : > { %8514 = vrot.lane.b32.xlu0 %v17418_v37, %s9738_s10  ;;  %v11066_v13 = vmax.f32 %v1047_v34, 0.0  ;;  %v11069_v63 = vsel %vm882_vm0, %v2738_v32, %v2740_v61  ;;  %v11079_v59 = vsel %vm3321_vm7, %v3367_v26, %v3369_v17  ;;  %v11084_v34 = vsel %vm1428_vm5, %v1486_v60, %v16942_v6  ;;  %v9488_v32 = vld [vmem:[%s9891_s17 + $0x148] sm:$0xff]  }
 0x1a1   : > { %v1051_v50 = vpop.f32.mrf.mxu0  ;;  %7941 = vmatmul.mubr.msk.bf16.gmra.mxu0 %vm752_vm3, %v9485_v51  ;;  %v11094_v51 = vsel %vm1818_vm4, %v1876_v2, %v1878_v7  ;;  %v17421_v60 = vpack.i.bf16 %v10664_v52, %v10624_v29  ;;  %v17422_v12 = vpack.i.bf16 %v10777_v4, %v10726_v10  ;;  %v17423_v2 = vrot.slane %v10470_v44, 3 }
 0x1a2   : > { %17419 = vst [vmem:[#allocation79_spill] sm:$0xff] %v11066_v13  ;;  %v1052_v37 = vadd.f32 %v10835_v35, %v1051_v50  ;;  %7944 = vmatprep.mubr.msk.bf16.mxu0 %vm9733_vm1, %v17342_v45  ;;  %v2742_v58 = vrot.slane %v11066_v13, 4  ;;  %v3371_v26 = vrot.slane %v11066_v13, 5  ;;  %v1880_v44 = vrot.slane %v11066_v13, 2 }
 0x1a3   : > { %8494 = vrot.lane.b32.xlu1 %v17421_v60, %s9736_s22  ;;  %v7846_v50 = vpop.f32.mrf.mxu0  ;;  %v11111_v6 = vsel %vm883_vm2, %v17423_v2, %v2481_v23  ;;  %v17426_v29 = vrot.slane %v10549_v22, 3  ;;  %v11139_v53 = vsel %vm3713_vm6, %v17428_v11, %v3751_v38 }
 0x1a4   : > { %8529 = vrot.lane.b32.xlu0 %v17422_v12, %s9737_s23  ;;  %17424 = vst [vmem:[#allocation81_spill] sm:$0xff] %v11111_v6  ;;  %v11114_v60 = vmax.f32 %v1052_v37, 0.0  ;;  %v11119_v12 = vsel %vm882_vm0, %v2740_v61, %v2742_v58  ;;  %v1490_v37 = vrot.slane %v11066_v13, 1  ;;  %v11134_v50 = vsel %vm3321_vm7, %v3369_v17, %v3371_v26  ;;  %17429 = vst [vmem:[#allocation84_spill] sm:$0xff] %v11139_v53 }
 0x1a5   : > { %v8255_v8 = vpop.permute.xlu1 %8254  ;;  %v8250_v30 = vpop.permute.xlu0 %8249  ;;  %v11131_v10 = vsel %vm883_vm2, %v2481_v23, %v17426_v29  ;;  %v17430_v13 = vpack.i.bf16 %v10706_v57, %v10664_v52  ;;  %v17431_v23 = vpack.i.bf16 %v10814_v27, %v10777_v4  ;;  %v11164_v17 = vsel %vm1818_vm4, %v1878_v7, %v1880_v44 }
 0x1a6   : > { %17425 = vst [vmem:[#allocation82_spill] sm:$0xff] %v11114_v60  ;;  %17427 = vst [vmem:[#allocation83_spill] sm:$0xff] %v11131_v10  ;;  %v8252_v61 = vunpack.i.h.bf16 %v8250_v30  ;;  %v8251_v31 = vunpack.i.l.bf16 %v8250_v30  ;;  %v1054_v6 = vpop.f32.mrf.mxu0  ;;  %v2744_v30 = vrot.slane %v11114_v60, 4  ;;  %v3373_v11 = vrot.slane %v11114_v60, 5 }
 0x1a7   : > { %v1055_v2 = vadd.f32 %v10835_v35, %v1054_v6  ;;  %8504 = vrot.lane.b32.xlu1 %v17430_v13, %s9738_s10  ;;  %v8257_v29 = vunpack.i.h.bf16 %v8255_v8  ;;  %v8256_v24 = vunpack.i.l.bf16 %v8255_v8  ;;  %v16953_v10 = vrot.slane %v11114_v60, 1  ;;  %17433 = vst [vmem:[#allocation86_spill] sm:$0xff] %v11164_v17  ;;  %v17460_v17 = vld [vmem:[#allocation61_spill] sm:$0xff] }
 0x1a8   : > { %8539 = vrot.lane.b32.xlu0 %v17431_v23, %s9736_s22  ;;  %v7847_v6 = vpop.f32.mrf.mxu0  ;;  %v1882_v52 = vrot.slane %v11114_v60, 2  ;;  %v3951_v13 = vsel %vm3949_vm8, %v10031_v48, %v8252_v61  ;;  %v3950_v4 = vsel %vm3949_vm8, %v10033_v49, %v8251_v31  ;;  %v11169_v8 = vsel %vm882_vm0, %v2742_v58, %v2744_v30 }
 0x1a9   : > { %v11160_v23 = vmax.f32 %v1055_v2, 0.0  ;;  %7945 = vmatmul.mubr.msk.bf16.gmra.mxu0 %vm752_vm3, %v9488_v32  ;;  %v11172_v6 = vsel %vm3321_vm7, %v3371_v26, %v3373_v11  ;;  %v17434_v48 = vrot.slane %v11026_v47, 1  ;;  %v17436_v31 = vrot.slane %v10859_v56, 6 }
 0x1aa   : > { %v1059_v33 = vpop.f32.mrf.mxu0  ;;  %7948 = vmatprep.mubr.msk.bf16.mxu0 %vm9733_vm1, %v17342_v45  ;;  %v17438_v58 = vpack.i.bf16 %v10740_v1, %v10729_v41  ;;  %v17439_v26 = vpack.i.bf16 %v10826_v46, %v10790_v9  ;;  %v11197_v61 = vsel %vm1428_vm5, %v1490_v37, %v16953_v10  ;;  %v11206_v41 = vsel %vm4028_vm9, %v3951_v13, %v8257_v29 }
 0x1ab   : > { %17432 = vst [vmem:[#allocation85_spill] sm:$0xff] %v11160_v23  ;;  %v11177_v49 = vsel %vm1428_vm5, %v17434_v48, %v1490_v37  ;;  %v11182_v7 = vsel %vm3713_vm6, %v3751_v38, %v17436_v31  ;;  %v1060_v32 = vadd.f32 %v10835_v35, %v1059_v33  ;;  %v2746_v2 = vrot.slane %v11160_v23, 4  ;;  %17440 = vst [vmem:[#allocation89_spill] sm:$0xff] %v11197_v61  ;;  %v9491_v37 = vld [vmem:[%s9891_s17 + $0x150] ss:$0 sps:$4 sm:$0x33]  }
 0x1ac   : > { %17435 = vst [vmem:[#allocation87_spill] sm:$0xff] %v11177_v49  ;;  %17437 = vst [vmem:[#allocation88_spill] sm:$0xff] %v11182_v7  ;;  %8519 = vrot.lane.b32.xlu1 %v17438_v58, %s9737_s23  ;;  %8544 = vrot.lane.b32.xlu0 %v17439_v26, %s9738_s10  ;;  %v11200_v38 = vsel %vm1818_vm4, %v1880_v44, %v1882_v52  ;;  %v7850_v33 = vpop.f32.mrf.mxu0  ;;  %v11203_v48 = vsel %vm4028_vm9, %v3950_v4, %v8256_v24  ;;  %v16954_v1 = vrot.slane %v11160_v23, 2  ;;  %v17458_v61 = vld [vmem:[#allocation19_spill] sm:$0xff]  ;;  %s8177_s17 = smul.u32 36, %s18454_s27 }
 0x1ad   : > { %17441 = vst [vmem:[#allocation90_spill] sm:$0xff] %v11200_v38  ;;  %v11211_v46 = vmax.f32 %v1060_v32, 0.0  ;;  %v8260_v31 = vpop.permute.xlu1 %8259  ;;  %v3375_v4 = vrot.slane %v11160_v23, 5  ;;  %v11220_v58 = vsel %vm882_vm0, %v2744_v30, %v2746_v2  ;;  %v17444_v24 = vpack.i.bf16 %v10749_v40, %v10706_v57 }
 0x1ae   : > { %v8262_v29 = vunpack.i.h.bf16 %v8260_v31  ;;  %v1062_v13 = vpop.f32.mrf.mxu0  ;;  %17443 = vst [vmem:[#allocation92_spill] sm:$0xff] %v11220_v58  ;;  %v8261_v33 = vunpack.i.l.bf16 %v8260_v31  ;;  %v17445_v44 = vpack.i.bf16 %v10869_v14, %v10814_v27  ;;  %v11240_v31 = vsel %vm1818_vm4, %v1882_v52, %v16954_v1  ;;  %s347_s21 = scalar_lea.vmem %s16885_s7, %s8177_s17 }
 0x1af   : > { %17442 = vst [vmem:[#allocation91_spill] sm:$0xff] %v11211_v46  ;;  %v1063_v9 = vadd.f32 %v10835_v35, %v1062_v13  ;;  %v2748_v30 = vrot.slane %v11211_v46, 4  ;;  %v3377_v32 = vrot.slane %v11211_v46, 5  ;;  %17446 = vst [vmem:[#allocation93_spill] sm:$0xff] %v11240_v31  ;;  %v1494_v13 = vrot.slane %v11160_v23, 1 }
 0x1b0   : > { %8524 = vrot.lane.b32.xlu1 %v17444_v24, %s9736_s22  ;;  %8559 = vrot.lane.b32.xlu0 %v17445_v44, %s9737_s23  ;;  %v7851_v10 = vpop.f32.mrf.mxu0  ;;  %v11248_v27 = vsel %vm3949_vm8, %v10058_v5, %v8262_v29  ;;  %v11258_v1 = vsel %vm3321_vm7, %v3373_v11, %v3375_v4  ;;  %v17451_v29 = vld [vmem:[#allocation13_spill] sm:$0xff]  ;;  %v17452_v11 = vpack.i.bf16 %v10802_v39, %v10749_v40 }
 0x1b1   : > { %v11250_v44 = vmax.f32 %v1063_v9, 0.0  ;;  %v11252_v26 = vpop.permute.xlu1 %8264  ;;  %v8270_v10 = vpop.permute.xlu0 %8269  ;;  %7949 = vmatmul.mubr.msk.bf16.gmra.mxu0 %vm752_vm3, %v9491_v37  ;;  %17448 = vst [vmem:[#allocation95_spill] sm:$0xff] %v11258_v1  ;;  %v11263_v5 = vsel %vm882_vm0, %v2746_v2, %v2748_v30  ;;  %v11266_v9 = vsel %vm3321_vm7, %v3375_v4, %v3377_v32  ;;  %v3952_v37 = vsel %vm3949_vm8, %v17451_v29, %v8261_v33 }
 0x1b2   : > { %v8272_v57 = vunpack.i.h.bf16 %v8270_v10  ;;  %v8271_v53 = vunpack.i.l.bf16 %v8270_v10  ;;  %v1067_v24 = vpop.f32.mrf.mxu0  ;;  %7956 = vmatprep.mubr.msk.bf16.mxu0 %vm9733_vm1, %v17342_v45  ;;  %17449 = vst [vmem:[#allocation96_spill] sm:$0xff] %v11263_v5  ;;  %17450 = vst [vmem:[#allocation97_spill] sm:$0xff] %v11266_v9  ;;  %v17453_v10 = vpack.i.bf16 %v10903_v28, %v10869_v14  ;;  %v8267_v7 = vunpack.i.h.bf16 %v11252_v26 }
 0x1b3   : > { %17447 = vst [vmem:[#allocation94_spill] sm:$0xff] %v11250_v44  ;;  %v1068_v52 = vadd.f32 %v10835_v35, %v1067_v24  ;;  %v2750_v2 = vrot.slane %v11250_v44, 4  ;;  %v8266_v33 = vunpack.i.l.bf16 %v11252_v26  ;;  %v17454_v29 = vrot.slane %v11114_v60, 1  ;;  %v17457_v60 = vld [vmem:[#allocation18_spill] sm:$0xff] }
 0x1b4   : > { %8534 = vrot.lane.b32.xlu1 %v17452_v11, %s9738_s10  ;;  %8569 = vrot.lane.b32.xlu0 %v17453_v10, %s9736_s22  ;;  %v7854_v24 = vpop.f32.mrf.mxu0  ;;  %v3379_v38 = vrot.slane %v11250_v44, 5  ;;  %v17459_v10 = vld [vmem:[#allocation63_spill] sm:$0xff]  ;;  %v4032_v9 = vsel %vm4028_vm9, %v11248_v27, %v8267_v7 }
 0x1b5   : > { %v11287_v40 = vsel %vm1428_vm5, %v17454_v29, %v1494_v13  ;;  %v11290_v47 = vmax.f32 %v1068_v52, 0.0  ;;  %v8275_v14 = vpop.permute.xlu1 %8274  ;;  %v11299_v29 = vsel %vm3949_vm8, %v17457_v60, %v8271_v53  ;;  %v11303_v52 = vsel %vm3949_vm8, %v17458_v61, %v8272_v57 }
 0x1b6   : > { %17455 = vst [vmem:[#allocation13_spill] sm:$0xff] %v11287_v40  ;;  %v8277_v26 = vunpack.i.h.bf16 %v8275_v14  ;;  %v8276_v24 = vunpack.i.l.bf16 %v8275_v14  ;;  %v1070_v49 = vpop.f32.mrf.mxu0  ;;  %v17461_v58 = vpack.i.bf16 %v17459_v10, %v17460_v17  ;;  %v17462_v14 = vpack.i.bf16 %v10908_v3, %v10872_v18 }
 0x1b7   : > { %17456 = vst [vmem:[#allocation98_spill] sm:$0xff] %v11290_v47  ;;  %v1071_v11 = vadd.f32 %v10835_v35, %v1070_v49  ;;  %v11315_v4 = vsel %vm882_vm0, %v2748_v30, %v2750_v2  ;;  %v2752_v53 = vrot.slane %v11290_v47, 4  ;;  %v11333_v3 = vsel %vm3321_vm7, %v3377_v32, %v3379_v38 }
 0x1b8   : > { %8549 = vrot.lane.b32.xlu1 %v17461_v58, %s9737_s23  ;;  %8574 = vrot.lane.b32.xlu0 %v17462_v14, %s9738_s10  ;;  %17463 = vst [vmem:[#allocation18_spill] sm:$0xff] %v11315_v4  ;;  %v7855_v61 = vpop.f32.mrf.mxu0  ;;  %v11321_v49 = vsel %vm4107_vm10, %v11203_v48, %v8276_v24  ;;  %v11325_v17 = vsel %vm4107_vm10, %v11206_v41, %v8277_v26  ;;  %v17464_v58 = vrot.slane %v11211_v46, 1  ;;  %17466 = vst [vmem:[#allocation63_spill] sm:$0xff] %v11333_v3  ;;  %v17468_v14 = vld [vmem:[#allocation25_spill] sm:$0xff] }
 0x1b9   : > { %v11335_v30 = vmax.f32 %v1071_v11, 0.0  ;;  %v8280_v57 = vpop.permute.xlu1 %8279  ;;  %v8290_v10 = vpop.permute.xlu0 %8289  ;;  %v17469_v61 = vld [vmem:[#allocation23_spill] sm:$0xff]  ;;  %v11342_v41 = vsel %vm882_vm0, %v2750_v2, %v2752_v53  ;;  %v1886_v26 = vrot.slane %v11211_v46, 2  ;;  %v17471_v11 = vrot.slane %v11290_v47, 5  ;;  %v17486_v3 = vld [vmem:[#allocation33_spill] sm:$0xff] }
 0x1ba   : > { %v11330_v18 = vsel %vm1428_vm5, %v1494_v13, %v17464_v58  ;;  %v17470_v48 = vpack.c.bf16 %v17468_v14, %v17469_v61  ;;  %v8282_v24 = vunpack.i.h.bf16 %v8280_v57  ;;  %v8281_v58 = vunpack.i.l.bf16 %v8280_v57  ;;  %v1075_v60 = vpop.f32.mrf.mxu0 }
 0x1bb   : > { %17465 = vst [vmem:[#allocation19_spill] sm:$0xff] %v11330_v18  ;;  %17467 = vst [vmem:[#allocation61_spill] sm:$0xff] %v11335_v30  ;;  %v8291_v32 = vunpack.i.l.bf16 %v8290_v10  ;;  %v11351_v14 = vsel %vm3321_vm7, %v3379_v38, %v17471_v11  ;;  %v8292_v61 = vunpack.i.h.bf16 %v8290_v10  ;;  %v1076_v2 = vadd.f32 %v10835_v35, %v1075_v60  ;;  %v17476_v11 = vld [vmem:[#allocation15_spill] sm:$0xff]  ;;  %v17483_v18 = vld [vmem:[#allocation24_spill] sm:$0xff] }
 0x1bc   : > { %7957 = vmatmul.mubr.msk.bf16.vlgmr.msra.gmra.mxu0 %vm3949_vm8, %v17470_v48  ;;  %17472 = vst [vmem:[#allocation25_spill] sm:$0xff] %v11351_v14  ;;  %v17473_v48 = vld [vmem:[#allocation64_spill] sm:$0xff]  ;;  %v17475_v57 = vpack.i.bf16 %v10956_v16, %v10903_v28  ;;  %v4031_v13 = vsel %vm4028_vm9, %v3952_v37, %v8266_v33  ;;  %v7858_v38 = vpop.f32.mrf.mxu0  ;;  %v3955_v28 = vsel %vm3949_vm8, %v17476_v11, %v8282_v24  ;;  %v17480_v24 = vrot.slane %v11160_v23, 2  ;;  %v17487_v14 = vld [vmem:[#allocation31_spill] sm:$0xff] }
 0x1bd   : > { %7960 = vmatprep.mubr.msk.bf16.mxu0 %vm9733_vm1, %v17342_v45  ;;  %v17474_v1 = vpack.i.bf16 %v17473_v48, %v10802_v39  ;;  %v8285_v37 = vpop.permute.xlu1 %8284  ;;  %v11376_v33 = vpop.permute.xlu0 %8304  ;;  %v17478_v38 = vld [vmem:[#allocation14_spill] sm:$0xff]  ;;  %v17479_v39 = vld [vmem:[#allocation21_spill] sm:$0xff]  ;;  %v17482_v11 = vrot.slane %v11250_v44, 2  ;;  %v11400_v27 = vsel %vm3949_vm8, %v17483_v18, %v8292_v61  ;;  %v17488_v4 = vpack.c.bf16 %v17486_v3, %v17487_v14  ;;  %v17489_v14 = vld [vmem:[#allocation68_spill] sm:$0xff] }
 0x1be   : > { %8589 = vrot.lane.b32.xlu0 %v17475_v57, %s9737_s23  ;;  %v11374_v57 = vmax.f32 %v1076_v2, 0.0  ;;  %v3954_v60 = vsel %vm3949_vm8, %v17478_v38, %v8281_v58  ;;  %v11386_v10 = vsel %vm3949_vm8, %v17479_v39, %v8291_v32  ;;  %v1078_v40 = vpop.f32.mrf.mxu0  ;;  %v11391_v2 = vsel %vm1818_vm4, %v17480_v24, %v1886_v26 }
 0x1bf   : > { %8554 = vrot.lane.b32.xlu1 %v17474_v1, %s9736_s22  ;;  %v2754_v1 = vrot.slane %v11335_v30, 4  ;;  %17481 = vst [vmem:[#allocation64_spill] sm:$0xff] %v11391_v2  ;;  %v11396_v7 = vsel %vm1818_vm4, %v1886_v26, %v17482_v11  ;;  %v8286_v58 = vunpack.i.l.bf16 %v8285_v37  ;;  %v1079_v38 = vadd.f32 %v10835_v35, %v1078_v40 }
 0x1c0   : > { %17477 = vst [vmem:[#allocation23_spill] sm:$0xff] %v11374_v57  ;;  %v17484_v32 = vpack.i.bf16 %v10884_v0, %v17473_v48  ;;  %v17485_v39 = vpack.i.bf16 %v10992_v54, %v10956_v16  ;;  %v2756_v26 = vrot.slane %v11374_v57, 4  ;;  %v8287_v24 = vunpack.i.h.bf16 %v8285_v37  ;;  %v7859_v61 = vpop.f32.mrf.mxu0 }
 0x1c1   : > { %v8307_v11 = vunpack.i.h.bf16 %v11376_v33  ;;  %v8306_v18 = vunpack.i.l.bf16 %v11376_v33  ;;  %v11415_v40 = vsel %vm882_vm0, %v2752_v53, %v2754_v1  ;;  %v11417_v23 = vmax.f32 %v1079_v38, 0.0  ;;  %v8295_v48 = vpop.permute.xlu1 %8294 }
 0x1c2   : > { %8599 = vrot.lane.b32.xlu0 %v17485_v39, %s9736_s22  ;;  %v1498_v33 = vrot.slane %v11250_v44, 1  ;;  %v8297_v39 = vunpack.i.h.bf16 %v8295_v48  ;;  %v8296_v53 = vunpack.i.l.bf16 %v8295_v48  ;;  %v1083_v38 = vpop.f32.mrf.mxu0  ;;  %v11431_v5 = vsel %vm882_vm0, %v2754_v1, %v2756_v26 }
 0x1c3   : > { %8564 = vrot.lane.b32.xlu1 %v17484_v32, %s9738_s10  ;;  %v8320_v32 = vpop.permute.xlu0 %8319  ;;  %v17490_v16 = vpack.i.bf16 %v10916_v42, %v17489_v14  ;;  %v17491_v48 = vpack.i.bf16 %v10995_v19, %v10966_v15  ;;  %v11443_v37 = vsel %vm4028_vm9, %v3954_v60, %v8286_v58  ;;  %v16985_v2 = vrot.slane %v11417_v23, 4 }
 0x1c4   : > { %7961 = vmatmul.mubr.msk.bf16.gmra.mxu0 %vm3949_vm8, %v17488_v4  ;;  %v8321_v61 = vunpack.i.l.bf16 %v8320_v32  ;;  %v8322_v3 = vunpack.i.h.bf16 %v8320_v32  ;;  %v1084_v4 = vadd.f32 %v10835_v35, %v1083_v38  ;;  %v7862_v1 = vpop.f32.mrf.mxu0  ;;  %v11447_v32 = vsel %vm4028_vm9, %v3955_v28, %v8287_v24  ;;  %v17493_v24 = vld [vmem:[#allocation27_spill] sm:$0xff] }
 0x1c5   : > { %7964 = vmatprep.mubr.msk.bf16.mxu0 %vm9733_vm1, %v17342_v45  ;;  %v8300_v14 = vpop.permute.xlu1 %8299  ;;  %v11454_v15 = vsel %vm4107_vm10, %v4031_v13, %v8296_v53  ;;  %v11457_v19 = vsel %vm4107_vm10, %v4032_v9, %v8297_v39  ;;  %v17492_v28 = vrot.slane %v11211_v46, 1  ;;  %v17494_v53 = vld [vmem:[#allocation30_spill] sm:$0xff] }
 0x1c6   : > { %8604 = vrot.lane.b32.xlu0 %v17491_v48, %s9738_s10  ;;  %v11468_v48 = vsel %vm3949_vm8, %v17493_v24, %v8321_v61  ;;  %v8302_v1 = vunpack.i.h.bf16 %v8300_v14  ;;  %v8301_v38 = vunpack.i.l.bf16 %v8300_v14  ;;  %v1086_v13 = vpop.f32.mrf.mxu0  ;;  %v11472_v9 = vsel %vm3949_vm8, %v17494_v53, %v8322_v3 }
 0x1c7   : > { %8579 = vrot.lane.b32.xlu1 %v17490_v16, %s9737_s23  ;;  %v3383_v16 = vrot.slane %v11335_v30, 5  ;;  %v8330_v31 = vpop.permute.xlu0 %8329  ;;  %v11464_v58 = vsel %vm1428_vm5, %v17492_v28, %v1498_v33  ;;  %v11474_v39 = vmax.f32 %v1084_v4, 0.0  ;;  %v17496_v28 = vpack.i.bf16 %v10924_v21, %v10884_v0 }
 0x1c8   : > { %v8331_v42 = vunpack.i.l.bf16 %v8330_v31  ;;  %v8332_v60 = vunpack.i.h.bf16 %v8330_v31  ;;  %v17497_v61 = vpack.i.bf16 %v11029_v55, %v10992_v54  ;;  %v11487_v14 = vsel %vm882_vm0, %v2756_v26, %v16985_v2  ;;  %v7863_v3 = vpop.f32.mrf.mxu0 }
 0x1c9   : > { %17495 = vst [vmem:[#allocation15_spill] sm:$0xff] %v11474_v39  ;;  %v4264_v4 = vsel %vm4028_vm9, %v11299_v29, %v8301_v38  ;;  %v4265_v31 = vsel %vm4028_vm9, %v11303_v52, %v8302_v1  ;;  %v17498_v24 = vrot.slane %v11290_v47, 1  ;;  %v1087_v53 = vadd.f32 %v10835_v35, %v1086_v13  ;;  %v17500_v3 = vld [vmem:[#allocation35_spill] sm:$0xff] }
 0x1ca   : > { %8619 = vrot.lane.b32.xlu0 %v17497_v61, %s9737_s23  ;;  %v17499_v61 = vld [vmem:[#allocation36_spill] sm:$0xff]  ;;  %v4342_v29 = vsel %vm4107_vm10, %v4264_v4, %v8306_v18  ;;  %v4343_v52 = vsel %vm4107_vm10, %v4265_v31, %v8307_v11  ;;  %v16990_v38 = vrot.slane %v11374_v57, 5  ;;  %v1091_v46 = vpop.f32.mrf.mxu0  ;;  %v17503_v11 = vpack.i.bf16 %v11069_v63, %v11029_v55 }
 0x1cb   : > { %8584 = vrot.lane.b32.xlu1 %v17496_v28, %s9736_s22  ;;  %v11498_v54 = vsel %vm1428_vm5, %v1498_v33, %v17498_v24  ;;  %v8310_v28 = vpop.permute.xlu1 %8309  ;;  %v8335_v26 = vpop.permute.xlu0 %8334  ;;  %v17501_v2 = vpack.c.bf16 %v17499_v61, %v17500_v3  ;;  %v4266_v33 = vsel %vm4028_vm9, %v11386_v10, %v8331_v42  ;;  %v4421_v18 = vpack.c.bf16 %v4343_v52, %v4342_v29 }
 0x1cc   : > { %v8337_v1 = vunpack.i.h.bf16 %v8335_v26  ;;  %v8336_v0 = vunpack.i.l.bf16 %v8335_v26  ;;  %v8312_v24 = vunpack.i.h.bf16 %v8310_v28  ;;  %v4267_v10 = vsel %vm4028_vm9, %v11400_v27, %v8332_v60  ;;  %v7866_v26 = vpop.f32.mrf.mxu0 }
 0x1cd   : > { %7965 = vmatmul.mubr.msk.bf16.gmra.mxu0 %vm3949_vm8, %v17501_v2  ;;  %v17502_v2 = vpack.i.bf16 %v10987_v62, %v10924_v21  ;;  %v1890_v42 = vrot.slane %v11290_v47, 2  ;;  %v8311_v4 = vunpack.i.l.bf16 %v8310_v28  ;;  %v1092_v31 = vadd.f32 %v10835_v35, %v1091_v46  ;;  %4800 = vmatprep.mubr.bf16.mxu1 %v4421_v18 }
 0x1ce   : > { %7968 = vmatprep.mubr.msk.bf16.mxu0 %vm9733_vm1, %v17342_v45  ;;  %8629 = vrot.lane.b32.xlu0 %v17503_v11, %s9736_s22  ;;  %v4344_v61 = vsel %vm4107_vm10, %v4266_v33, %v8336_v0  ;;  %v4345_v21 = vsel %vm4107_vm10, %v4267_v10, %v8337_v1  ;;  %v17504_v29 = vrot.slane %v11290_v47, 5  ;;  %v11538_v46 = vsel %vm3321_vm7, %v3383_v16, %v16990_v38  ;;  %v1094_v1 = vpop.f32.mrf.mxu0 }
 0x1cf   : > { %8594 = vrot.lane.b32.xlu1 %v17502_v2, %s9738_s10  ;;  %v8315_v3 = vpop.permute.xlu1 %8314  ;;  %v8350_v2 = vpop.permute.xlu0 %8349  ;;  %v4424_v13 = vpack.c.bf16 %v4345_v21, %v4344_v61  ;;  %v17505_v60 = vpack.c.bf16 %v11325_v17, %v11321_v49  ;;  %v17506_v33 = vrot.slane %v11250_v44, 2  ;;  %v11548_v18 = vmax.f32 %v1087_v53, 0.0  ;;  %v17509_v61 = vld [vmem:[#allocation74_spill] sm:$0xff]  ;;  %v17511_v21 = vld [vmem:[#allocation17_spill] sm:$0xff] }
 0x1d0   : > { %v11533_v27 = vsel %vm3321_vm7, %v17504_v29, %v3383_v16  ;;  %v8316_v0 = vunpack.i.l.bf16 %v8315_v3  ;;  %v8352_v28 = vunpack.i.h.bf16 %v8350_v2  ;;  %v8351_v52 = vunpack.i.l.bf16 %v8350_v2  ;;  %v17508_v16 = vld [vmem:[#allocation75_spill] sm:$0xff]  ;;  %v17512_v29 = vld [vmem:[#allocation16_spill] sm:$0xff] }
 0x1d1   : > { %4801 = vmatmul.mubr.bf16.vlgmr.msra.gmra.mxu1 %v17505_v60  ;;  %v11546_v11 = vsel %vm1818_vm4, %v17506_v33, %v1890_v42  ;;  %17507 = vst [vmem:[#allocation14_spill] sm:$0xff] %v11548_v18  ;;  %v8317_v10 = vunpack.i.h.bf16 %v8315_v3  ;;  %v1095_v26 = vadd.f32 %v10835_v35, %v1094_v1  ;;  %v17510_v49 = vpack.i.bf16 %v17508_v16, %v17509_v61  ;;  %v17515_v1 = vld [vmem:[#allocation39_spill] sm:$0xff] }
 0x1d2   : > { %4808 = vmatprep.mubr.bf16.mxu1 %v4424_v13  ;;  %v16989_v17 = vrot.slane %v11335_v30, 2  ;;  %v3957_v2 = vsel %vm3949_vm8, %v17511_v21, %v8312_v24  ;;  %v3956_v60 = vsel %vm3949_vm8, %v17512_v29, %v8311_v4  ;;  %v11560_v33 = vmax.f32 %v1092_v31, 0.0  ;;  %v7867_v13 = vpop.f32.mrf.mxu0  ;;  %v17516_v24 = vld [vmem:[#allocation44_spill] sm:$0xff]  ;;  %v17517_v21 = vld [vmem:[#allocation42_spill] sm:$0xff] }
 0x1d3   : > { %8609 = vrot.lane.b32.xlu1 %v17510_v49, %s9737_s23  ;;  %v17514_v53 = vpack.i.bf16 %v11079_v59, %v11049_v20  ;;  %v16988_v3 = vrot.slane %v11474_v39, 4  ;;  %v11569_v16 = vsel %vm3949_vm8, %v17515_v1, %v8351_v52  ;;  %v8325_v61 = vpop.permute.xlu1 %8324  ;;  %v8360_v49 = vpop.permute.xlu0 %8359  ;;  %v17518_v55 = vpack.c.bf16 %v17516_v24, %v17517_v21  ;;  %v17519_v31 = vld [vmem:[#allocation40_spill] sm:$0xff]  ;;  %v17527_v20 = vld [vmem:[#allocation67_spill] sm:$0xff] }
 0x1d4   : > { %17513 = vst [vmem:[#allocation21_spill] sm:$0xff] %v11560_v33  ;;  %v11582_v59 = vsel %vm1818_vm4, %v1890_v42, %v16989_v17  ;;  %v11586_v52 = vsel %vm3949_vm8, %v17519_v31, %v8352_v28  ;;  %v8327_v29 = vunpack.i.h.bf16 %v8325_v61  ;;  %v1099_v13 = vpop.f32.mrf.mxu0  ;;  %v11593_v1 = vmax.f32 %v1095_v26, 0.0 }
 0x1d5   : > { %8634 = vrot.lane.b32.xlu0 %v17514_v53, %s9738_s10  ;;  %7969 = vmatmul.mubr.msk.bf16.gmra.mxu0 %vm3949_vm8, %v17518_v55  ;;  %v8326_v53 = vunpack.i.l.bf16 %v8325_v61  ;;  %v11591_v55 = vsel %vm4028_vm9, %v3956_v60, %v8316_v0  ;;  %v8362_v24 = vunpack.i.h.bf16 %v8360_v49  ;;  %v8361_v21 = vunpack.i.l.bf16 %v8360_v49 }
 0x1d6   : > { %7972 = vmatprep.mubr.msk.bf16.mxu0 %vm9733_vm1, %v17342_v45  ;;  %17520 = vst [vmem:[#allocation24_spill] sm:$0xff] %v11593_v1  ;;  %v17521_v42 = vpack.i.bf16 %v11009_v36, %v10987_v62  ;;  %v11600_v28 = vsel %vm4028_vm9, %v3957_v2, %v8317_v10  ;;  %v1100_v61 = vadd.f32 %v10835_v35, %v1099_v13  ;;  %v7870_v0 = vpop.f32.mrf.mxu0  ;;  %v17523_v60 = vrot.slane %v11417_v23, 4 }
 0x1d7   : > { %v17522_v31 = vpack.i.bf16 %v11119_v12, %v11069_v63  ;;  %v17524_v10 = vrot.slane %v10597_v25, 3  ;;  %v17525_v2 = vrot.slane %v10549_v22, 3  ;;  %v8340_v63 = vpop.permute.xlu1 %8339  ;;  %v8365_v13 = vpop.permute.xlu0 %8364  ;;  %v17526_v0 = vld [vmem:[#allocation51_spill] sm:$0xff]  ;;  %v17528_v4 = vpack.c.bf16 %v11457_v19, %v11454_v15 }
 0x1d8   : > { %8614 = vrot.lane.b32.xlu1 %v17521_v42, %s9736_s22  ;;  %v11614_v62 = vsel %vm882_vm0, %v17523_v60, %v16988_v3  ;;  %v4112_v42 = vsel %vm4107_vm10, %v11443_v37, %v8326_v53  ;;  %v16993_v26 = vrot.slane %v17526_v0, 3  ;;  %v3755_v60 = vrot.slane %v17527_v20, 6  ;;  %v1102_v38 = vpop.f32.mrf.mxu0  ;;  %v17530_v15 = vld [vmem:[#allocation71_spill] sm:$0xff] }
 0x1d9   : > { %8649 = vrot.lane.b32.xlu0 %v17522_v31, %s9737_s23  ;;  %v11621_v49 = vsel %vm883_vm2, %v17525_v2, %v17524_v10  ;;  %v4113_v31 = vsel %vm4107_vm10, %v11447_v32, %v8327_v29  ;;  %4809 = vmatmul.mubr.bf16.gmra.mxu1 %v17528_v4  ;;  %v8342_v3 = vunpack.i.h.bf16 %v8340_v63  ;;  %v8341_v17 = vunpack.i.l.bf16 %v8340_v63  ;;  %v17548_v20 = vld [vmem:[#allocation47_spill] sm:$0xff] }
 0x1da   : > { %v8367_v10 = vunpack.i.h.bf16 %v8365_v13  ;;  %v8366_v2 = vunpack.i.l.bf16 %v8365_v13  ;;  %v1103_v44 = vadd.f32 %v10835_v35, %v1102_v38  ;;  %v17529_v37 = vpack.i.bf16 %v11072_v43, %v11009_v36  ;;  %v7871_v38 = vpop.f32.mrf.mxu0 }
 0x1db   : > { %v4268_v32 = vsel %vm4028_vm9, %v11468_v48, %v8361_v21  ;;  %v4269_v29 = vsel %vm4028_vm9, %v11472_v9, %v8362_v24  ;;  %v11642_v4 = vmax.f32 %v1100_v61, 0.0  ;;  %v17532_v53 = vpack.i.bf16 %v11169_v8, %v11119_v12  ;;  %v8345_v21 = vpop.permute.xlu1 %8344  ;;  %v8380_v13 = vpop.permute.xlu0 %8379  ;;  %v17533_v9 = vld [vmem:[#allocation50_spill] sm:$0xff]  ;;  %v17534_v24 = vld [vmem:[#allocation49_spill] sm:$0xff] }
 0x1dc   : > { %8624 = vrot.lane.b32.xlu1 %v17529_v37, %s9738_s10  ;;  %v4346_v63 = vsel %vm4107_vm10, %v4268_v32, %v8366_v2  ;;  %v4347_v36 = vsel %vm4107_vm10, %v4269_v29, %v8367_v10  ;;  %v17535_v37 = vpack.c.bf16 %v17533_v9, %v17534_v24  ;;  %v4426_v19 = vpack.c.bf16 %v4113_v31, %v4112_v42  ;;  %v17538_v32 = vld [vmem:[#allocation22_spill] sm:$0xff]  ;;  %v1107_v9 = vpop.f32.mrf.mxu0 }
 0x1dd   : > { %17531 = vst [vmem:[#allocation33_spill] sm:$0xff] %v11642_v4  ;;  %8659 = vrot.lane.b32.xlu0 %v17532_v53, %s9736_s22  ;;  %v4427_v61 = vpack.c.bf16 %v4347_v36, %v4346_v63  ;;  %v17536_v12 = vrot.slane %v10597_v25, 3  ;;  %v1502_v10 = vrot.slane %v11335_v30, 1  ;;  %v3959_v29 = vsel %vm3949_vm8, %v17538_v32, %v8342_v3  ;;  %v17539_v53 = vld [vmem:[#allocation20_spill] sm:$0xff]  ;;  %v17547_v25 = vld [vmem:[#allocation46_spill] sm:$0xff] }
 0x1de   : > { %7973 = vmatmul.mubr.msk.bf16.gmra.mxu0 %vm3949_vm8, %v17535_v37  ;;  %v3958_v38 = vsel %vm3949_vm8, %v17539_v53, %v8341_v17  ;;  %v17540_v42 = vrot.slane %v10859_v56, 6  ;;  %v17541_v63 = vrot.slane %v17530_v15, 6  ;;  %v11680_v24 = vmax.f32 %v1103_v44, 0.0  ;;  %v17543_v17 = vld [vmem:[#allocation80_spill] sm:$0xff]  ;;  %v7874_v44 = vpop.f32.mrf.mxu0 }
 0x1df   : > { %v11661_v2 = vsel %vm883_vm2, %v17536_v12, %v16993_v26  ;;  %7976 = vmatprep.mubr.msk.bf16.mxu0 %vm9733_vm1, %v17342_v45  ;;  %v8382_v3 = vunpack.i.h.bf16 %v8380_v13  ;;  %v8381_v37 = vunpack.i.l.bf16 %v8380_v13  ;;  %4816 = vmatprep.mubr.bf16.mxu1 %v4427_v61  ;;  %v17544_v12 = vpack.i.bf16 %v11084_v34, %v17543_v17  ;;  %v8355_v61 = vpop.permute.xlu1 %8354 }
 0x1e0   : > { %17537 = vst [vmem:[#allocation31_spill] sm:$0xff] %v11661_v2  ;;  %v11673_v31 = vsel %vm3713_vm6, %v17540_v42, %v3755_v60  ;;  %v11678_v36 = vsel %vm3713_vm6, %v3755_v60, %v17541_v63  ;;  %17542 = vst [vmem:[#allocation68_spill] sm:$0xff] %v11680_v24  ;;  %v16997_v32 = vrot.slane %v11374_v57, 1  ;;  %v8347_v53 = vunpack.i.h.bf16 %v8345_v21  ;;  %v8390_v63 = vpop.permute.xlu0 %8389  ;;  %v1110_v26 = vpop.f32.mrf.mxu0  ;;  %v17573_v24 = vld [vmem:[#allocation97_spill] sm:$0xff] }
 0x1e1   : > { %8639 = vrot.lane.b32.xlu1 %v17544_v12, %s9737_s23  ;;  %v8346_v42 = vunpack.i.l.bf16 %v8345_v21  ;;  %v1108_v48 = vadd.f32 %v10835_v35, %v1107_v9  ;;  %v17545_v60 = vpack.i.bf16 %v11172_v6, %v11134_v50  ;;  %v3387_v13 = vrot.slane %v11417_v23, 5  ;;  %4817 = vmatmul.mubr.bf16.gmra.mxu1 %v4426_v19 }
 0x1e2   : > { %v17546_v17 = vrot.slane %v11290_v47, 1  ;;  %v11703_v21 = vsel %vm1428_vm5, %v1502_v10, %v16997_v32  ;;  %v16998_v50 = vrot.slane %v11474_v39, 5  ;;  %v8357_v6 = vunpack.i.h.bf16 %v8355_v61  ;;  %v17555_v32 = vld [vmem:[#allocation53_spill] sm:$0xff] }
 0x1e3   : > { %8664 = vrot.lane.b32.xlu0 %v17545_v60, %s9738_s10  ;;  %v8356_v9 = vunpack.i.l.bf16 %v8355_v61  ;;  %v8392_v60 = vunpack.i.h.bf16 %v8390_v63  ;;  %v8391_v44 = vunpack.i.l.bf16 %v8390_v63  ;;  %v11708_v34 = vsel %vm3949_vm8, %v17547_v25, %v8381_v37  ;;  %v17551_v63 = vld [vmem:[#allocation92_spill] sm:$0xff]  ;;  %v7875_v37 = vpop.f32.mrf.mxu0 }
 0x1e4   : > { %v11698_v12 = vsel %vm1428_vm5, %v17546_v17, %v1502_v10  ;;  %v11712_v17 = vsel %vm3949_vm8, %v17548_v20, %v8382_v3  ;;  %v1111_v56 = vadd.f32 %v10835_v35, %v1110_v26  ;;  %v17549_v10 = vpack.i.bf16 %v11094_v51, %v11072_v43  ;;  %v8370_v3 = vpop.permute.xlu1 %8369 }
 0x1e5   : > { %v11720_v61 = vmax.f32 %v1108_v48, 0.0  ;;  %v17552_v25 = vpack.i.bf16 %v17551_v63, %v11169_v8  ;;  %v11727_v20 = vsel %vm4028_vm9, %v3958_v38, %v8346_v42  ;;  %v11730_v35 = vsel %vm4028_vm9, %v3959_v29, %v8347_v53  ;;  %v8395_v48 = vpop.permute.xlu0 %8394  ;;  %v1115_v37 = vpop.f32.mrf.mxu0 }
 0x1e6   : > { %8644 = vrot.lane.b32.xlu1 %v17549_v10, %s9736_s22  ;;  %v17553_v26 = vrot.slane %v11374_v57, 5  ;;  %v17554_v10 = vld [vmem:[#allocation54_spill] sm:$0xff]  ;;  %v4270_v8 = vsel %vm4028_vm9, %v11569_v16, %v8391_v44  ;;  %v4271_v38 = vsel %vm4028_vm9, %v11586_v52, %v8392_v60  ;;  %v11750_v53 = vsel %vm3321_vm7, %v3387_v13, %v16998_v50 }
 0x1e7   : > { %17550 = vst [vmem:[#allocation27_spill] sm:$0xff] %v11720_v61  ;;  %8679 = vrot.lane.b32.xlu0 %v17552_v25, %s9737_s23  ;;  %v17556_v19 = vpack.c.bf16 %v17554_v10, %v17555_v32  ;;  %v8397_v42 = vunpack.i.h.bf16 %v8395_v48  ;;  %v8396_v25 = vunpack.i.l.bf16 %v8395_v48  ;;  %v4114_v32 = vsel %vm4107_vm10, %v11591_v55, %v8356_v9  ;;  %v17558_v44 = vld [vmem:[#allocation86_spill] sm:$0xff]  ;;  %v11772_v9 = vld [vmem:[#allocation4] ss:$0 sm:$0xff]  ;;  %v17562_v48 = vld [vmem:[#allocation96_spill] sm:$0xff] }
 0x1e8   : > { %v11735_v43 = vsel %vm3321_vm7, %v17553_v26, %v3387_v13  ;;  %v4115_v16 = vsel %vm4107_vm10, %v11600_v28, %v8357_v6  ;;  %v11758_v52 = vmax.f32 %v1111_v56, 0.0  ;;  %v8372_v60 = vunpack.i.h.bf16 %v8370_v3  ;;  %v8375_v50 = vpop.permute.xlu1 %8374 }
 0x1e9   : > { %7977 = vmatmul.mubr.msk.bf16.gmra.mxu0 %vm3949_vm8, %v17556_v19  ;;  %v17559_v13 = vpack.i.bf16 %v17558_v44, %v11094_v51  ;;  %v17560_v19 = vrot.slane %v11374_v57, 2  ;;  %v17561_v26 = vrot.slane %v11335_v30, 2  ;;  %v2762_v28 = vrot.slane %v11548_v18, 4  ;;  %v7878_v51 = vpop.f32.mrf.mxu0  ;;  %v17564_v30 = vld [vmem:[#allocation73_spill] sm:$0xff] }
 0x1ea   : > { %7980 = vmatprep.mubr.msk.bf16.mxu0 %vm9733_vm1, %v17342_v45  ;;  %17557 = vst [vmem:[#allocation30_spill] sm:$0xff] %v11758_v52  ;;  %v8371_v6 = vunpack.i.l.bf16 %v8370_v3  ;;  %v1116_v56 = vadd.f32 %v11772_v9, %v1115_v37  ;;  %v17563_v10 = vpack.i.bf16 %v17562_v48, %v17551_v63  ;;  %v4349_v29 = vsel %vm4107_vm10, %v4271_v38, %v8397_v42  ;;  %v17566_v38 = vld [vmem:[#allocation28_spill] sm:$0xff]  ;;  %v17571_v63 = vld [vmem:[#allocation26_spill] sm:$0xff] }
 0x1eb   : > { %8654 = vrot.lane.b32.xlu1 %v17559_v13, %s9738_s10  ;;  %v11769_v55 = vsel %vm1818_vm4, %v17561_v26, %v17560_v19  ;;  %v4348_v13 = vsel %vm4107_vm10, %v4270_v8, %v8396_v25  ;;  %v8410_v19 = vpop.permute.xlu0 %8409  ;;  %v4429_v52 = vpack.c.bf16 %v4115_v16, %v4114_v32  ;;  %v3759_v61 = vrot.slane %v17564_v30, 6  ;;  %v1118_v22 = vpop.f32.mrf.mxu0  ;;  %v17567_v32 = vld [vmem:[#allocation89_spill] sm:$0xff]  ;;  %v17568_v16 = vld [vmem:[#allocation87_spill] sm:$0xff] }
 0x1ec   : > { %8689 = vrot.lane.b32.xlu0 %v17563_v10, %s9736_s22  ;;  %v4430_v26 = vpack.c.bf16 %v4349_v29, %v4348_v13  ;;  %v8412_v37 = vunpack.i.h.bf16 %v8410_v19  ;;  %v8411_v47 = vunpack.i.l.bf16 %v8410_v19  ;;  %v17565_v10 = vrot.slane %v11474_v39, 4  ;;  %v17570_v13 = vld [vmem:[#allocation77_spill] sm:$0xff]  ;;  %v8385_v2 = vpop.permute.xlu1 %8384 }
 0x1ed   : > { %v3961_v29 = vsel %vm3949_vm8, %v17566_v38, %v8372_v60  ;;  %v8376_v42 = vunpack.i.l.bf16 %v8375_v50  ;;  %v1119_v25 = vadd.f32 %v11772_v9, %v1118_v22  ;;  %v17569_v51 = vpack.i.bf16 %v17567_v32, %v17568_v16  ;;  %v17574_v60 = vld [vmem:[#allocation95_spill] sm:$0xff]  ;;  %v7879_v22 = vpop.f32.mrf.mxu0  ;;  %v17576_v16 = vld [vmem:[#allocation62_spill] sm:$0xff] }
 0x1ee   : > { %v11789_v8 = vsel %vm882_vm0, %v17565_v10, %v2762_v28  ;;  %4824 = vmatprep.mubr.bf16.mxu1 %v4430_v26  ;;  %v3960_v3 = vsel %vm3949_vm8, %v17571_v63, %v8371_v6  ;;  %v11801_v30 = vmax.f32 %v1116_v56, 0.0  ;;  %v8377_v10 = vunpack.i.h.bf16 %v8375_v50  ;;  %v17586_v63 = vld [vmem:[#allocation90_spill] sm:$0xff] }
 0x1ef   : > { %8669 = vrot.lane.b32.xlu1 %v17569_v51, %s9737_s23  ;;  %v17575_v38 = vpack.i.bf16 %v17573_v24, %v17574_v60  ;;  %4825 = vmatmul.mubr.bf16.gmra.mxu1 %v4429_v52  ;;  %v8420_v32 = vpop.permute.xlu0 %8419  ;;  %v17577_v51 = vld [vmem:[#allocation59_spill] sm:$0xff]  ;;  %v17579_v50 = vrot.slane %v17530_v15, 6  ;;  %v17581_v24 = vrot.slane %v17570_v13, 6  ;;  %v17583_v60 = vld [vmem:[#allocation56_spill] sm:$0xff]  ;;  %v1123_v6 = vpop.f32.mrf.mxu0  ;;  %v17587_v26 = vpack.i.bf16 %v17586_v63, %v17558_v44 }
 0x1f0   : > { %17572 = vst [vmem:[#allocation36_spill] sm:$0xff] %v11801_v30  ;;  %v17578_v19 = vpack.c.bf16 %v17576_v16, %v17577_v51  ;;  %v8387_v16 = vunpack.i.h.bf16 %v8385_v2  ;;  %v8386_v51 = vunpack.i.l.bf16 %v8385_v2  ;;  %v17588_v2 = vld [vmem:[#allocation18_spill] sm:$0xff]  ;;  %v17590_v44 = vrot.slane %v11417_v23, 2 }
 0x1f1   : > { %8694 = vrot.lane.b32.xlu0 %v17575_v38, %s9738_s10  ;;  %v11817_v56 = vsel %vm3713_vm6, %v17579_v50, %v3759_v61  ;;  %v11822_v52 = vsel %vm3713_vm6, %v3759_v61, %v17581_v24  ;;  %v11827_v38 = vsel %vm3949_vm8, %v17583_v60, %v8411_v47  ;;  %v11835_v50 = vmax.f32 %v1119_v25, 0.0 }
 0x1f2   : > { %7981 = vmatmul.mubr.msk.bf16.gmra.mxu0 %vm3949_vm8, %v17578_v19  ;;  %17580 = vst [vmem:[#allocation35_spill] sm:$0xff] %v11817_v56  ;;  %17582 = vst [vmem:[#allocation75_spill] sm:$0xff] %v11822_v52  ;;  %v17584_v19 = vld [vmem:[#allocation58_spill] sm:$0xff]  ;;  %v8422_v61 = vunpack.i.h.bf16 %v8420_v32  ;;  %v8421_v24 = vunpack.i.l.bf16 %v8420_v32  ;;  %v11842_v47 = vsel %vm4028_vm9, %v3960_v3, %v8376_v42  ;;  %v17589_v60 = vpack.i.bf16 %v17588_v2, %v17562_v48  ;;  %v8400_v42 = vpop.permute.xlu1 %8399  ;;  %v17594_v52 = vld [vmem:[#allocation93_spill] sm:$0xff] }
 0x1f3   : > { %v11831_v22 = vsel %vm3949_vm8, %v17584_v19, %v8412_v37  ;;  %7984 = vmatprep.mubr.msk.bf16.mxu0 %vm9733_vm1, %v17342_v45  ;;  %17585 = vst [vmem:[#allocation74_spill] sm:$0xff] %v11835_v50  ;;  %8674 = vrot.lane.b32.xlu1 %v17587_v26, %s9736_s22  ;;  %v1124_v37 = vadd.f32 %v11772_v9, %v1123_v6  ;;  %v7882_v19 = vpop.f32.mrf.mxu0  ;;  %v17591_v26 = vrot.slane %v11374_v57, 2  ;;  %v8425_v6 = vpop.permute.xlu0 %8424  ;;  %v8402_v50 = vunpack.i.h.bf16 %v8400_v42 }
 0x1f4   : > { %v11850_v25 = vsel %vm4028_vm9, %v3961_v29, %v8377_v10  ;;  %v4116_v48 = vsel %vm4107_vm10, %v11727_v20, %v8386_v51  ;;  %v17592_v29 = vrot.slane %v11560_v33, 4  ;;  %v17593_v19 = vld [vmem:[#allocation52_spill] sm:$0xff]  ;;  %v8401_v15 = vunpack.i.l.bf16 %v8400_v42 }
 0x1f5   : > { %8709 = vrot.lane.b32.xlu0 %v17589_v60, %s9737_s23  ;;  %v11859_v3 = vsel %vm1818_vm4, %v17591_v26, %v17590_v44  ;;  %v4117_v60 = vsel %vm4107_vm10, %v11730_v35, %v8387_v16  ;;  %v2489_v32 = vrot.slane %v17593_v19, 3  ;;  %v8427_v30 = vunpack.i.h.bf16 %v8425_v6  ;;  %v1126_v26 = vpop.f32.mrf.mxu0 }
 0x1f6   : > { %v11868_v10 = vsel %vm882_vm0, %v2762_v28, %v17592_v29  ;;  %v8426_v44 = vunpack.i.l.bf16 %v8425_v6  ;;  %v1127_v56 = vadd.f32 %v11772_v9, %v1126_v26  ;;  %v17595_v20 = vpack.i.bf16 %v17594_v52, %v17586_v63  ;;  %v17598_v26 = vld [vmem:[#allocation55_spill] sm:$0xff] }
 0x1f7   : > { %v4272_v35 = vsel %vm4028_vm9, %v11708_v34, %v8421_v24  ;;  %v4273_v28 = vsel %vm4028_vm9, %v11712_v17, %v8422_v61  ;;  %v11882_v51 = vmax.f32 %v1124_v37, 0.0  ;;  %v17597_v42 = vpack.i.bf16 %v11342_v41, %v17588_v2  ;;  %v7883_v6 = vpop.f32.mrf.mxu0  ;;  %v8405_v24 = vpop.permute.xlu1 %8404  ;;  %v17599_v17 = vld [vmem:[#allocation72_spill] sm:$0xff]  ;;  %v17600_v61 = vld [vmem:[#allocation70_spill] sm:$0xff]  ;;  %v17610_v2 = vld [vmem:[#allocation25_spill] sm:$0xff] }
 0x1f8   : > { %8684 = vrot.lane.b32.xlu1 %v17595_v20, %s9738_s10  ;;  %v4350_v63 = vsel %vm4107_vm10, %v4272_v35, %v8426_v44  ;;  %v4351_v29 = vsel %vm4107_vm10, %v4273_v28, %v8427_v30  ;;  %v8440_v20 = vpop.permute.xlu0 %8439  ;;  %v17601_v19 = vpack.c.bf16 %v17599_v17, %v17600_v61  ;;  %v4432_v16 = vpack.c.bf16 %v4117_v60, %v4116_v48  ;;  %v17602_v6 = vld [vmem:[#allocation32_spill] sm:$0xff]  ;;  %v17603_v30 = vld [vmem:[#allocation29_spill] sm:$0xff] }
 0x1f9   : > { %17596 = vst [vmem:[#allocation17_spill] sm:$0xff] %v11882_v51  ;;  %8719 = vrot.lane.b32.xlu0 %v17597_v42, %s9736_s22  ;;  %v4433_v37 = vpack.c.bf16 %v4351_v29, %v4350_v63  ;;  %v1506_v42 = vrot.slane %v11417_v23, 1  ;;  %v3963_v44 = vsel %vm3949_vm8, %v17602_v6, %v8402_v50  ;;  %v3962_v35 = vsel %vm3949_vm8, %v17603_v30, %v8401_v15  ;;  %v1131_v34 = vpop.f32.mrf.mxu0  ;;  %v17607_v50 = vld [vmem:[#allocation19_spill] sm:$0xff]  ;;  %v17608_v17 = vld [vmem:[#allocation13_spill] sm:$0xff] }
 0x1fa   : > { %7985 = vmatmul.mubr.msk.bf16.gmra.mxu0 %vm3949_vm8, %v17601_v19  ;;  %v8441_v28 = vunpack.i.l.bf16 %v8440_v20  ;;  %v17604_v19 = vrot.slane %v17526_v0, 3  ;;  %v11909_v60 = vmax.f32 %v1127_v56, 0.0  ;;  %v8406_v63 = vunpack.i.l.bf16 %v8405_v24  ;;  %v17611_v51 = vld [vmem:[#allocation63_spill] sm:$0xff] }
 0x1fb   : > { %7988 = vmatprep.mubr.msk.bf16.mxu0 %vm9733_vm1, %v17342_v45  ;;  %v8442_v29 = vunpack.i.h.bf16 %v8440_v20  ;;  %4832 = vmatprep.mubr.bf16.mxu1 %v4433_v37  ;;  %v17609_v61 = vpack.i.bf16 %v17607_v50, %v17608_v17  ;;  %v17017_v15 = vrot.slane %v11474_v39, 1  ;;  %v8407_v6 = vunpack.i.h.bf16 %v8405_v24  ;;  %v7886_v56 = vpop.f32.mrf.mxu0  ;;  %v8415_v17 = vpop.permute.xlu1 %8414 }
 0x1fc   : > { %v11907_v48 = vsel %vm883_vm2, %v17604_v19, %v2489_v32  ;;  %17606 = vst [vmem:[#allocation39_spill] sm:$0xff] %v11909_v60  ;;  %v1132_v30 = vadd.f32 %v11772_v9, %v1131_v34  ;;  %v17612_v19 = vpack.i.bf16 %v17610_v2, %v17611_v51  ;;  %4833 = vmatmul.mubr.bf16.gmra.mxu1 %v4432_v16  ;;  %v17613_v20 = vrot.slane %v17598_v26, 3  ;;  %v17617_v2 = vld [vmem:[#allocation79_spill] sm:$0xff] }
 0x1fd   : > { %17605 = vst [vmem:[#allocation16_spill] sm:$0xff] %v11907_v48  ;;  %8699 = vrot.lane.b32.xlu1 %v17609_v61, %s9737_s23  ;;  %v3391_v50 = vrot.slane %v11548_v18, 5  ;;  %v8450_v61 = vpop.permute.xlu0 %8449  ;;  %v17615_v24 = vrot.slane %v11374_v57, 1  ;;  %v11935_v51 = vsel %vm1428_vm5, %v1506_v42, %v17017_v15  ;;  %v8416_v60 = vunpack.i.l.bf16 %v8415_v17  ;;  %v1134_v57 = vpop.f32.mrf.mxu0  ;;  %v17620_v15 = vld [vmem:[#allocation64_spill] sm:$0xff] }
 0x1fe   : > { %8724 = vrot.lane.b32.xlu0 %v17612_v19, %s9738_s10  ;;  %v11924_v37 = vsel %vm883_vm2, %v2489_v32, %v17613_v20  ;;  %v3763_v19 = vrot.slane %v17617_v2, 6  ;;  %v17618_v32 = vld [vmem:[#allocation66_spill] sm:$0xff]  ;;  %v8417_v20 = vunpack.i.h.bf16 %v8415_v17  ;;  %v8451_v0 = vunpack.i.l.bf16 %v8450_v61 }
 0x1ff   : > { %17614 = vst [vmem:[#allocation44_spill] sm:$0xff] %v11924_v37  ;;  %v11930_v34 = vsel %vm1428_vm5, %v17615_v24, %v1506_v42  ;;  %v11941_v56 = vsel %vm3949_vm8, %v17618_v32, %v8441_v28  ;;  %v17619_v37 = vld [vmem:[#allocation69_spill] sm:$0xff]  ;;  %v8452_v48 = vunpack.i.h.bf16 %v8450_v61  ;;  %v1135_v42 = vadd.f32 %v11772_v9, %v1134_v57 }
 0x200   : > { %17616 = vst [vmem:[#allocation42_spill] sm:$0xff] %v11930_v34  ;;  %v11945_v24 = vsel %vm3949_vm8, %v17619_v37, %v8442_v29  ;;  %v17621_v16 = vpack.i.bf16 %v17620_v15, %v17594_v52  ;;  %v11953_v2 = vsel %vm4028_vm9, %v3962_v35, %v8406_v63  ;;  %v11955_v28 = vmax.f32 %v1132_v30, 0.0  ;;  %v7887_v29 = vpop.f32.mrf.mxu0  ;;  %v8430_v35 = vpop.permute.xlu1 %8429  ;;  %v17625_v30 = vld [vmem:[#allocation78_spill] sm:$0xff] }
 0x201   : > { %v17623_v17 = vpack.i.bf16 %v11415_v40, %v11342_v41  ;;  %v11962_v37 = vsel %vm4028_vm9, %v3963_v44, %v8407_v6  ;;  %v17624_v52 = vrot.slane %v11474_v39, 5  ;;  %v8455_v63 = vpop.permute.xlu0 %8454  ;;  %v4274_v41 = vsel %vm4028_vm9, %v11827_v38, %v8451_v0 }
 0x202   : > { %8704 = vrot.lane.b32.xlu1 %v17621_v16, %s9736_s22  ;;  %17622 = vst [vmem:[#allocation40_spill] sm:$0xff] %v11955_v28  ;;  %v17626_v16 = vld [vmem:[#allocation76_spill] sm:$0xff]  ;;  %v17628_v44 = vrot.slane %v11560_v33, 5  ;;  %v8457_v28 = vunpack.i.h.bf16 %v8455_v63  ;;  %v8456_v34 = vunpack.i.l.bf16 %v8455_v63  ;;  %v4119_v0 = vsel %vm4107_vm10, %v11850_v25, %v8417_v20 }
 0x203   : > { %8739 = vrot.lane.b32.xlu0 %v17623_v17, %s9737_s23  ;;  %v11969_v61 = vsel %vm3321_vm7, %v17624_v52, %v3391_v50  ;;  %v17627_v32 = vpack.c.bf16 %v17625_v30, %v17626_v16  ;;  %v17629_v17 = vrot.slane %v17570_v13, 6  ;;  %v17630_v52 = vld [vmem:[#allocation82_spill] sm:$0xff]  ;;  %v1139_v30 = vpop.f32.mrf.mxu0  ;;  %v4118_v16 = vsel %vm4107_vm10, %v11842_v47, %v8416_v60 }
 0x204   : > { %v11980_v6 = vsel %vm3321_vm7, %v3391_v50, %v17628_v44  ;;  %v11994_v38 = vmax.f32 %v1135_v42, 0.0  ;;  %v8432_v50 = vunpack.i.h.bf16 %v8430_v35  ;;  %v4275_v63 = vsel %vm4028_vm9, %v11831_v22, %v8452_v48 }
 0x205   : > { %7989 = vmatmul.mubr.msk.bf16.gmra.mxu0 %vm3949_vm8, %v17627_v32  ;;  %v11985_v29 = vsel %vm3713_vm6, %v17629_v17, %v3763_v19  ;;  %v17632_v32 = vpack.i.bf16 %v11396_v7, %v17620_v15  ;;  %v1898_v44 = vrot.slane %v11474_v39, 2  ;;  %v8431_v47 = vunpack.i.l.bf16 %v8430_v35  ;;  %v7890_v20 = vpop.f32.mrf.mxu0  ;;  %v8435_v15 = vpop.permute.xlu1 %8434 }
 0x206   : > { %7992 = vmatprep.mubr.msk.bf16.mxu0 %vm9733_vm1, %v17342_v45  ;;  %17631 = vst [vmem:[#allocation50_spill] sm:$0xff] %v11994_v38  ;;  %v1140_v60 = vadd.f32 %v11772_v9, %v1139_v30  ;;  %v17633_v25 = vpack.i.bf16 %v11431_v5, %v11415_v40  ;;  %v4352_v42 = vsel %vm4107_vm10, %v4274_v41, %v8456_v34  ;;  %v17634_v22 = vrot.slane %v17630_v52, 6  ;;  %v17636_v41 = vld [vmem:[#allocation37_spill] sm:$0xff] }
 0x207   : > { %8714 = vrot.lane.b32.xlu1 %v17632_v32, %s9738_s10  ;;  %v4353_v17 = vsel %vm4107_vm10, %v4275_v63, %v8457_v28  ;;  %v8470_v32 = vpop.permute.xlu0 %8469  ;;  %v4435_v38 = vpack.c.bf16 %v4119_v0, %v4118_v16  ;;  %v2766_v35 = vrot.slane %v11593_v1, 4  ;;  %v1142_v40 = vpop.f32.mrf.mxu0  ;;  %v17635_v34 = vrot.slane %v11417_v23, 2 }
 0x208   : > { %8749 = vrot.lane.b32.xlu0 %v17633_v25, %s9736_s22  ;;  %v4436_v57 = vpack.c.bf16 %v4353_v17, %v4352_v42  ;;  %v12013_v48 = vsel %vm3713_vm6, %v3763_v19, %v17634_v22  ;;  %v8472_v30 = vunpack.i.h.bf16 %v8470_v32  ;;  %v8471_v13 = vunpack.i.l.bf16 %v8470_v32  ;;  %v17638_v42 = vld [vmem:[#allocation34_spill] sm:$0xff] }
 0x209   : > { %v12021_v28 = vsel %vm1818_vm4, %v17635_v34, %v1898_v44  ;;  %v3965_v16 = vsel %vm3949_vm8, %v17636_v41, %v8432_v50  ;;  %v8436_v0 = vunpack.i.l.bf16 %v8435_v15  ;;  %v1143_v19 = vadd.f32 %v11772_v9, %v1142_v40  ;;  %v7891_v40 = vpop.f32.mrf.mxu0  ;;  %v17641_v34 = vld [vmem:[#allocation88_spill] sm:$0xff] }
 0x20a   : > { %4840 = vmatprep.mubr.bf16.mxu1 %v4436_v57  ;;  %v17637_v63 = vpack.i.bf16 %v11498_v54, %v11464_v58  ;;  %v17023_v20 = vrot.slane %v11548_v18, 2  ;;  %v3964_v17 = vsel %vm3949_vm8, %v17638_v42, %v8431_v47  ;;  %v12033_v32 = vmax.f32 %v1140_v60, 0.0  ;;  %v8445_v58 = vpop.permute.xlu1 %8444  ;;  %v17642_v41 = vld [vmem:[#allocation84_spill] sm:$0xff] }
 0x20b   : > { %v8437_v22 = vunpack.i.h.bf16 %v8435_v15  ;;  %v17640_v50 = vpack.i.bf16 %v11538_v46, %v11533_v27  ;;  %4841 = vmatmul.mubr.bf16.gmra.mxu1 %v4435_v38  ;;  %v8480_v54 = vpop.permute.xlu0 %8479  ;;  %v17644_v60 = vrot.slane %v11560_v33, 4  ;;  %v17022_v38 = vrot.slane %v11642_v4, 4  ;;  %v17645_v15 = vld [vmem:[#allocation81_spill] sm:$0xff] }
 0x20c   : > { %8729 = vrot.lane.b32.xlu1 %v17637_v63, %s9737_s23  ;;  %17639 = vst [vmem:[#allocation49_spill] sm:$0xff] %v12033_v32  ;;  %v17643_v63 = vpack.c.bf16 %v17641_v34, %v17642_v41  ;;  %v12055_v46 = vsel %vm1818_vm4, %v1898_v44, %v17023_v20  ;;  %v12060_v42 = vsel %vm3949_vm8, %v17645_v15, %v8471_v13  ;;  %v8447_v34 = vunpack.i.h.bf16 %v8445_v58 }
 0x20d   : > { %8754 = vrot.lane.b32.xlu0 %v17640_v50, %s9738_s10  ;;  %v12050_v27 = vsel %vm882_vm0, %v17644_v60, %v2766_v35  ;;  %v17646_v50 = vld [vmem:[#allocation83_spill] sm:$0xff]  ;;  %v8446_v41 = vunpack.i.l.bf16 %v8445_v58  ;;  %v12068_v60 = vmax.f32 %v1143_v19, 0.0  ;;  %v8482_v44 = vunpack.i.h.bf16 %v8480_v54 }
 0x20e   : > { %7993 = vmatmul.mubr.msk.bf16.gmra.mxu0 %vm3949_vm8, %v17643_v63  ;;  %v12064_v40 = vsel %vm3949_vm8, %v17646_v50, %v8472_v30  ;;  %v1147_v63 = vpop.f32.mrf.mxu0  ;;  %v8481_v47 = vunpack.i.l.bf16 %v8480_v54  ;;  %v17648_v57 = vpack.i.bf16 %v11546_v11, %v11396_v7  ;;  %v12075_v13 = vsel %vm4028_vm9, %v3964_v17, %v8436_v0 }
 0x20f   : > { %7996 = vmatprep.mubr.msk.bf16.mxu0 %vm9733_vm1, %v17342_v45  ;;  %17647 = vst [vmem:[#allocation22_spill] sm:$0xff] %v12068_v60  ;;  %v1148_v30 = vadd.f32 %v11772_v9, %v1147_v63  ;;  %v17649_v58 = vpack.i.bf16 %v11487_v14, %v11431_v5  ;;  %v12083_v19 = vsel %vm4028_vm9, %v3965_v16, %v8437_v22  ;;  %v8485_v0 = vpop.permute.xlu0 %8484  ;;  %v17650_v16 = vld [vmem:[#allocation57_spill] sm:$0xff] }
 0x210   : > { %8734 = vrot.lane.b32.xlu1 %v17648_v57, %s9736_s22  ;;  %v7894_v15 = vpop.f32.mrf.mxu0  ;;  %v8460_v57 = vpop.permute.xlu1 %8459  ;;  %v4120_v17 = vsel %vm4107_vm10, %v11953_v2, %v8446_v41  ;;  %v4121_v50 = vsel %vm4107_vm10, %v11962_v37, %v8447_v34  ;;  %v12096_v5 = vsel %vm882_vm0, %v2766_v35, %v17022_v38  ;;  %v2493_v22 = vrot.slane %v17650_v16, 3  ;;  %v17652_v34 = vld [vmem:[#allocation85_spill] sm:$0xff] }
 0x211   : > { %8769 = vrot.lane.b32.xlu0 %v17649_v58, %s9737_s23  ;;  %v8462_v63 = vunpack.i.h.bf16 %v8460_v57  ;;  %v8461_v58 = vunpack.i.l.bf16 %v8460_v57  ;;  %v8487_v15 = vunpack.i.h.bf16 %v8485_v0  ;;  %v8486_v54 = vunpack.i.l.bf16 %v8485_v0 }
 0x212   : > { %v1150_v7 = vpop.f32.mrf.mxu0  ;;  %v17651_v2 = vpack.i.bf16 %v11582_v59, %v11546_v11  ;;  %v4276_v37 = vsel %vm4028_vm9, %v11941_v56, %v8481_v47  ;;  %v4277_v35 = vsel %vm4028_vm9, %v11945_v24, %v8482_v44  ;;  %v3767_v41 = vrot.slane %v17652_v34, 6 }
 0x213   : > { %v1151_v25 = vadd.f32 %v11772_v9, %v1150_v7  ;;  %v12109_v38 = vmax.f32 %v1148_v30, 0.0  ;;  %v17654_v57 = vpack.i.bf16 %v11614_v62, %v11487_v14  ;;  %v4354_v0 = vsel %vm4107_vm10, %v4276_v37, %v8486_v54  ;;  %v8500_v47 = vpop.permute.xlu0 %8499  ;;  %v17658_v54 = vld [vmem:[#allocation41_spill] sm:$0xff]  ;;  %v17659_v37 = vld [vmem:[#allocation38_spill] sm:$0xff] }
 0x214   : > { %8744 = vrot.lane.b32.xlu1 %v17651_v2, %s9738_s10  ;;  %v7895_v7 = vpop.f32.mrf.mxu0  ;;  %v4355_v11 = vsel %vm4107_vm10, %v4277_v35, %v8487_v15  ;;  %v17655_v2 = vld [vmem:[#allocation91_spill] sm:$0xff]  ;;  %v12118_v56 = vpop.permute.xlu1 %8464  ;;  %v17656_v24 = vpack.c.bf16 %v11678_v36, %v11673_v31  ;;  %v4438_v30 = vpack.c.bf16 %v4121_v50, %v4120_v17  ;;  %v12129_v15 = vsel %vm3949_vm8, %v17658_v54, %v8462_v63 }
 0x215   : > { %17653 = vst [vmem:[#allocation20_spill] sm:$0xff] %v12109_v38  ;;  %8779 = vrot.lane.b32.xlu0 %v17654_v57, %s9736_s22  ;;  %v4439_v44 = vpack.c.bf16 %v4355_v11, %v4354_v0  ;;  %v17657_v57 = vld [vmem:[#allocation60_spill] sm:$0xff]  ;;  %v12133_v35 = vsel %vm3949_vm8, %v17659_v37, %v8461_v58  ;;  %v8501_v20 = vunpack.i.l.bf16 %v8500_v47  ;;  %v17660_v31 = vrot.slane %v17598_v26, 3 }
 0x216   : > { %7997 = vmatmul.mubr.msk.bf16.gmra.mxu0 %vm3949_vm8, %v17656_v24  ;;  %v17025_v7 = vrot.slane %v17657_v57, 3  ;;  %v1155_v38 = vpop.f32.mrf.mxu0  ;;  %v12142_v17 = vmax.f32 %v1151_v25, 0.0  ;;  %v8502_v50 = vunpack.i.h.bf16 %v8500_v47  ;;  %v17662_v58 = vpack.i.bf16 %v11703_v21, %v11698_v12 }
 0x217   : > { %8000 = vmatprep.mubr.msk.bf16.mxu0 %vm9733_vm1, %v17342_v45  ;;  %v12140_v36 = vsel %vm883_vm2, %v17660_v31, %v2493_v22  ;;  %v1156_v63 = vadd.f32 %v11772_v9, %v1155_v38  ;;  %4848 = vmatprep.mubr.bf16.mxu1 %v4439_v44  ;;  %v17663_v0 = vrot.slane %v17630_v52, 6  ;;  %v17664_v24 = vpack.i.bf16 %v11750_v53, %v11735_v43  ;;  %v8510_v43 = vpop.permute.xlu0 %8509 }
 0x218   : > { %17661 = vst [vmem:[#allocation80_spill] sm:$0xff] %v12142_v17  ;;  %8759 = vrot.lane.b32.xlu1 %v17662_v58, %s9737_s23  ;;  %v7898_v25 = vpop.f32.mrf.mxu0  ;;  %4849 = vmatmul.mubr.bf16.gmra.mxu1 %v4438_v30  ;;  %v17665_v38 = vrot.slane %v17655_v2, 6  ;;  %v1510_v12 = vrot.slane %v11548_v18, 1  ;;  %v3395_v44 = vrot.slane %v11593_v1, 5  ;;  %v8467_v54 = vunpack.i.h.bf16 %v12118_v56  ;;  %v8475_v31 = vpop.permute.xlu1 %8474 }
 0x219   : > { %v12152_v11 = vsel %vm3713_vm6, %v17663_v0, %v3767_v41  ;;  %8784 = vrot.lane.b32.xlu0 %v17664_v24, %s9738_s10  ;;  %v8466_v37 = vunpack.i.l.bf16 %v12118_v56  ;;  %v12171_v53 = vsel %vm883_vm2, %v2493_v22, %v17025_v7  ;;  %v12176_v30 = vsel %vm3949_vm8, %v11621_v49, %v8501_v20 }
 0x21a   : > { %v12161_v47 = vsel %vm3713_vm6, %v3767_v41, %v17665_v38  ;;  %v8477_v58 = vunpack.i.h.bf16 %v8475_v31  ;;  %v8476_v0 = vunpack.i.l.bf16 %v8475_v31  ;;  %v8511_v24 = vunpack.i.l.bf16 %v8510_v43  ;;  %v1158_v25 = vpop.f32.mrf.mxu0  ;;  %v17666_v38 = vld [vmem:[#allocation31_spill] sm:$0xff] }
 0x21b   : > { %v12180_v56 = vsel %vm3949_vm8, %v17666_v38, %v8502_v50  ;;  %v12182_v14 = vmax.f32 %v1156_v63, 0.0  ;;  %v8512_v21 = vunpack.i.h.bf16 %v8510_v43  ;;  %v17668_v22 = vpack.i.bf16 %v11769_v55, %v11582_v59  ;;  %v8515_v49 = vpop.permute.xlu0 %8514 }
 0x21c   : > { %v1159_v20 = vadd.f32 %v11772_v9, %v1158_v25  ;;  %v17669_v31 = vpack.i.bf16 %v11789_v8, %v11614_v62  ;;  %v7899_v50 = vpop.f32.mrf.mxu0  ;;  %v17670_v63 = vrot.slane %v11474_v39, 1  ;;  %v17671_v38 = vrot.slane %v11560_v33, 1  ;;  %v8490_v7 = vpop.permute.xlu1 %8489  ;;  %v17673_v62 = vld [vmem:[#allocation75_spill] sm:$0xff] }
 0x21d   : > { %17667 = vst [vmem:[#allocation46_spill] sm:$0xff] %v12182_v14  ;;  %8764 = vrot.lane.b32.xlu1 %v17668_v22, %s9736_s22  ;;  %v17672_v22 = vrot.slane %v11560_v33, 5  ;;  %v4122_v41 = vsel %vm4107_vm10, %v12075_v13, %v8476_v0  ;;  %v8492_v14 = vunpack.i.h.bf16 %v8490_v7  ;;  %v8491_v17 = vunpack.i.l.bf16 %v8490_v7 }
 0x21e   : > { %8799 = vrot.lane.b32.xlu0 %v17669_v31, %s9737_s23  ;;  %v12198_v43 = vsel %vm1428_vm5, %v17670_v63, %v1510_v12  ;;  %v12203_v59 = vsel %vm1428_vm5, %v1510_v12, %v17671_v38  ;;  %v17674_v31 = vld [vmem:[#allocation35_spill] sm:$0xff]  ;;  %v4278_v63 = vsel %vm4028_vm9, %v12060_v42, %v8511_v24  ;;  %v4123_v12 = vsel %vm4107_vm10, %v12083_v19, %v8477_v58  ;;  %v17678_v58 = vld [vmem:[#allocation68_spill] sm:$0xff] }
 0x21f   : > { %v12208_v25 = vsel %vm3321_vm7, %v17672_v22, %v3395_v44  ;;  %v17675_v50 = vpack.c.bf16 %v17673_v62, %v17674_v31  ;;  %v17676_v38 = vrot.slane %v11642_v4, 5  ;;  %v8517_v60 = vunpack.i.h.bf16 %v8515_v49  ;;  %v1163_v31 = vpop.f32.mrf.mxu0 }
 0x220   : > { %v8516_v62 = vunpack.i.l.bf16 %v8515_v49  ;;  %v1164_v42 = vadd.f32 %v11772_v9, %v1163_v31  ;;  %v17677_v13 = vpack.i.bf16 %v11859_v3, %v11769_v55  ;;  %v4279_v19 = vsel %vm4028_vm9, %v12064_v40, %v8512_v21  ;;  %v12246_v40 = vpop.permute.xlu1 %8494  ;;  %v8530_v21 = vpop.permute.xlu0 %8529 }
 0x221   : > { %8001 = vmatmul.mubr.msk.bf16.gmra.mxu0 %vm3949_vm8, %v17675_v50  ;;  %v12223_v22 = vsel %vm3321_vm7, %v3395_v44, %v17676_v38  ;;  %v1902_v44 = vrot.slane %v11560_v33, 2  ;;  %v2770_v7 = vrot.slane %v17678_v58, 4  ;;  %v12236_v0 = vmax.f32 %v1159_v20, 0.0  ;;  %v7902_v49 = vpop.f32.mrf.mxu0 }
 0x222   : > { %8004 = vmatprep.mubr.msk.bf16.mxu0 %vm9733_vm1, %v17342_v45  ;;  %8774 = vrot.lane.b32.xlu1 %v17677_v13, %s9738_s10  ;;  %v17680_v24 = vpack.i.bf16 %v11868_v10, %v11789_v8  ;;  %v4356_v50 = vsel %vm4107_vm10, %v4278_v63, %v8516_v62  ;;  %v4357_v55 = vsel %vm4107_vm10, %v4279_v19, %v8517_v60  ;;  %v17682_v63 = vld [vmem:[#allocation43_spill] sm:$0xff] }
 0x223   : > { %17679 = vst [vmem:[#allocation47_spill] sm:$0xff] %v12236_v0  ;;  %v4442_v31 = vpack.c.bf16 %v4357_v55, %v4356_v50  ;;  %v4441_v13 = vpack.c.bf16 %v4123_v12, %v4122_v41  ;;  %v4045_v8 = vsel %vm4028_vm9, %v12133_v35, %v8466_v37  ;;  %v12258_v60 = vsel %vm3949_vm8, %v17682_v63, %v8491_v17  ;;  %v1166_v62 = vpop.f32.mrf.mxu0 }
 0x224   : > { %8809 = vrot.lane.b32.xlu0 %v17680_v24, %s9736_s22  ;;  %v17681_v24 = vld [vmem:[#allocation45_spill] sm:$0xff]  ;;  %v4046_v19 = vsel %vm4028_vm9, %v12129_v15, %v8467_v54  ;;  %v17683_v41 = vrot.slane %v11548_v18, 2  ;;  %v12267_v50 = vmax.f32 %v1164_v42, 0.0  ;;  %v8532_v35 = vunpack.i.h.bf16 %v8530_v21 }
 0x225   : > { %v12254_v49 = vsel %vm3949_vm8, %v17681_v24, %v8492_v14  ;;  %v8531_v37 = vunpack.i.l.bf16 %v8530_v21  ;;  %4856 = vmatprep.mubr.bf16.mxu1 %v4442_v31  ;;  %v17685_v14 = vld [vmem:[#allocation42_spill] sm:$0xff]  ;;  %v17687_v17 = vrot.slane %v11642_v4, 4  ;;  %v1167_v54 = vadd.f32 %v11772_v9, %v1166_v62  ;;  %v7903_v21 = vpop.f32.mrf.mxu0 }
 0x226   : > { %v12265_v12 = vsel %vm1818_vm4, %v17683_v41, %v1902_v44  ;;  %17684 = vst [vmem:[#allocation92_spill] sm:$0xff] %v12267_v50  ;;  %v17686_v55 = vpack.i.bf16 %v11935_v51, %v17685_v14  ;;  %v17688_v42 = vpack.i.bf16 %v11980_v6, %v11969_v61  ;;  %4857 = vmatmul.mubr.bf16.gmra.mxu1 %v4441_v13  ;;  %v17689_v31 = vld [vmem:[#allocation94_spill] sm:$0xff]  ;;  %v17692_v6 = vld [vmem:[#allocation27_spill] sm:$0xff] }
 0x227   : > { %v12276_v24 = vsel %vm882_vm0, %v17687_v17, %v2770_v7  ;;  %v3771_v63 = vrot.slane %v17689_v31, 6  ;;  %v17690_v51 = vld [vmem:[#allocation98_spill] sm:$0xff]  ;;  %v8540_v17 = vpop.permute.xlu0 %8539  ;;  %v17691_v15 = vpack.c.bf16 %v12013_v48, %v11985_v29  ;;  %v1171_v38 = vpop.f32.mrf.mxu0  ;;  %v17693_v29 = vld [vmem:[#allocation16_spill] sm:$0xff]  ;;  %v12312_v41 = vmax.f32 %v1167_v54, 0.0 }
 0x228   : > { %8789 = vrot.lane.b32.xlu1 %v17686_v55, %s9737_s23  ;;  %8814 = vrot.lane.b32.xlu0 %v17688_v42, %s9738_s10  ;;  %v8505_v55 = vpop.permute.xlu1 %8504  ;;  %v8541_v20 = vunpack.i.l.bf16 %v8540_v17  ;;  %v12301_v48 = vsel %vm3949_vm8, %v17693_v29, %v8531_v37  ;;  %v8542_v61 = vunpack.i.h.bf16 %v8540_v17  ;;  %v1172_v13 = vadd.f32 %v11772_v9, %v1171_v38 }
 0x229   : > { %8005 = vmatmul.mubr.msk.bf16.gmra.mxu0 %vm3949_vm8, %v17691_v15  ;;  %v8507_v42 = vunpack.i.h.bf16 %v8505_v55  ;;  %v8506_v21 = vunpack.i.l.bf16 %v8505_v55  ;;  %v17694_v15 = vld [vmem:[#allocation44_spill] sm:$0xff]  ;;  %v17695_v55 = vpack.i.bf16 %v12021_v28, %v11859_v3  ;;  %17696 = vst [vmem:[#allocation54_spill] sm:$0xff] %v12312_v41  ;;  %v17697_v14 = vpack.i.bf16 %v12050_v27, %v11868_v10  ;;  %v7906_v37 = vpop.f32.mrf.mxu0  ;;  %v17700_v3 = vld [vmem:[#allocation65_spill] sm:$0xff] }
 0x22a   : > { %8008 = vmatprep.mubr.msk.bf16.mxu0 %vm9733_vm1, %v17342_v45  ;;  %v12305_v62 = vsel %vm3949_vm8, %v17694_v15, %v8532_v35  ;;  %v17698_v29 = vrot.slane %v17655_v2, 6  ;;  %v17699_v38 = vrot.slane %v17690_v51, 6  ;;  %v2497_v15 = vrot.slane %v17700_v3, 3 }
 0x22b   : > { %v4124_v41 = vsel %vm4107_vm10, %v4045_v8, %v8506_v21  ;;  %v4125_v10 = vsel %vm4107_vm10, %v4046_v19, %v8507_v42  ;;  %v1174_v31 = vpop.f32.mrf.mxu0  ;;  %v4280_v2 = vsel %vm4028_vm9, %v12176_v30, %v8541_v20  ;;  %v12343_v8 = vmax.f32 %v1172_v13, 0.0 }
 0x22c   : > { %8794 = vrot.lane.b32.xlu1 %v17695_v55, %s9736_s22  ;;  %8829 = vrot.lane.b32.xlu0 %v17697_v14, %s9737_s23  ;;  %v12321_v35 = vsel %vm3713_vm6, %v17698_v29, %v3771_v63  ;;  %v12326_v17 = vsel %vm3713_vm6, %v3771_v63, %v17699_v38  ;;  %v8520_v54 = vpop.permute.xlu1 %8519  ;;  %v8545_v55 = vpop.permute.xlu0 %8544  ;;  %v17701_v14 = vrot.slane %v11593_v1, 2  ;;  %v17702_v29 = vrot.slane %v17692_v6, 4 }
 0x22d   : > { %v8522_v63 = vunpack.i.h.bf16 %v8520_v54  ;;  %v8547_v38 = vunpack.i.h.bf16 %v8545_v55  ;;  %v8546_v0 = vunpack.i.l.bf16 %v8545_v55  ;;  %17703 = vst [vmem:[#allocation53_spill] sm:$0xff] %v12343_v8  ;;  %v8521_v19 = vunpack.i.l.bf16 %v8520_v54  ;;  %v7907_v55 = vpop.f32.mrf.mxu0 }
 0x22e   : > { %v12334_v37 = vsel %vm1818_vm4, %v1902_v44, %v17701_v14  ;;  %v12339_v50 = vsel %vm882_vm0, %v2770_v7, %v17702_v29  ;;  %v1175_v42 = vadd.f32 %v11772_v9, %v1174_v31  ;;  %v17704_v44 = vpack.i.bf16 %v12055_v46, %v12021_v28  ;;  %v17706_v31 = vld [vmem:[#allocation67_spill] sm:$0xff] }
 0x22f   : > { %v4281_v7 = vsel %vm4028_vm9, %v12180_v56, %v8542_v61  ;;  %v17705_v21 = vpack.i.bf16 %v12096_v5, %v12050_v27  ;;  %v4358_v30 = vsel %vm4107_vm10, %v4280_v2, %v8546_v0  ;;  %v4444_v13 = vpack.c.bf16 %v4125_v10, %v4124_v41  ;;  %v17708_v41 = vld [vmem:[#allocation51_spill] sm:$0xff] }
 0x230   : > { %8804 = vrot.lane.b32.xlu1 %v17704_v44, %s9738_s10  ;;  %v4359_v20 = vsel %vm4107_vm10, %v4281_v7, %v8547_v38  ;;  %v17035_v54 = vrot.slane %v17706_v31, 3  ;;  %v12359_v14 = vpop.permute.xlu1 %8524  ;;  %v8560_v28 = vpop.permute.xlu0 %8559  ;;  %v17707_v29 = vpack.c.bf16 %v12161_v47, %v12152_v11  ;;  %v4464_v27 = vpack.c.bf16 %v12326_v17, %v12321_v35  ;;  %v17710_v17 = vld [vmem:[#allocation48_spill] sm:$0xff] }
 0x231   : > { %8839 = vrot.lane.b32.xlu0 %v17705_v21, %s9736_s22  ;;  %v4445_v56 = vpack.c.bf16 %v4359_v20, %v4358_v30  ;;  %v8833_v2 = vpack.i.bf16 %v12334_v37, %v12265_v12  ;;  %v1514_v0 = vrot.slane %v11593_v1, 1  ;;  %v12372_v61 = vsel %vm3949_vm8, %v17708_v41, %v8522_v63  ;;  %v1179_v38 = vpop.f32.mrf.mxu0 }
 0x232   : > { %8009 = vmatmul.mubr.msk.bf16.gmra.mxu0 %vm3949_vm8, %v17707_v29  ;;  %v8561_v10 = vunpack.i.l.bf16 %v8560_v28  ;;  %v8868_v11 = vpack.i.bf16 %v12339_v50, %v12276_v24  ;;  %v17709_v47 = vrot.slane %v17657_v57, 3  ;;  %v12385_v44 = vsel %vm3949_vm8, %v17710_v17, %v8521_v19 }
 0x233   : > { %8012 = vmatprep.mubr.msk.bf16.mxu0 %vm9733_vm1, %v17342_v45  ;;  %v12387_v7 = vmax.f32 %v1175_v42, 0.0  ;;  %v8562_v63 = vunpack.i.h.bf16 %v8560_v28  ;;  %v1180_v21 = vadd.f32 %v11772_v9, %v1179_v38  ;;  %4864 = vmatprep.mubr.bf16.mxu1 %v4445_v56  ;;  %v17712_v55 = vpack.i.bf16 %v12203_v59, %v12198_v43  ;;  %v7910_v19 = vpop.f32.mrf.mxu0 }
 0x234   : > { %v12381_v35 = vsel %vm883_vm2, %v17709_v47, %v2497_v15  ;;  %v17713_v20 = vpack.i.bf16 %v12223_v22, %v12208_v25  ;;  %4865 = vmatmul.mubr.bf16.gmra.mxu1 %v4444_v13  ;;  %v12402_v42 = vsel %vm883_vm2, %v2497_v15, %v17035_v54  ;;  %v17034_v28 = vrot.slane %v11642_v4, 1  ;;  %v8535_v56 = vpop.permute.xlu1 %8534  ;;  %v8570_v25 = vpop.permute.xlu0 %8569 }
 0x235   : > { %17711 = vst [vmem:[#allocation86_spill] sm:$0xff] %v12387_v7  ;;  %8819 = vrot.lane.b32.xlu1 %v17712_v55, %s9737_s23  ;;  %v3399_v29 = vrot.slane %v17678_v58, 5  ;;  %v12409_v59 = vsel %vm3949_vm8, %v12140_v36, %v8561_v10  ;;  %v17714_v22 = vrot.slane %v11560_v33, 1  ;;  %v17033_v41 = vrot.slane %v17692_v6, 5  ;;  %v1182_v55 = vpop.f32.mrf.mxu0 }
 0x236   : > { %8844 = vrot.lane.b32.xlu0 %v17713_v20, %s9738_s10  ;;  %v8537_v15 = vunpack.i.h.bf16 %v8535_v56  ;;  %v8536_v38 = vunpack.i.l.bf16 %v8535_v56  ;;  %v8572_v47 = vunpack.i.h.bf16 %v8570_v25  ;;  %v8571_v17 = vunpack.i.l.bf16 %v8570_v25  ;;  %v17718_v56 = vld [vmem:[#allocation61_spill] sm:$0xff] }
 0x237   : > { %v1515_v13 = vsel %vm1428_vm5, %v17714_v22, %v1514_v0  ;;  %v12417_v20 = vsel %vm3949_vm8, %v12171_v53, %v8562_v63  ;;  %v12419_v19 = vmax.f32 %v1180_v21, 0.0  ;;  %v17716_v36 = vpack.i.bf16 %v12265_v12, %v12055_v46  ;;  %v7911_v63 = vpop.f32.mrf.mxu0 }
 0x238   : > { %v17717_v10 = vunpack.i.l.bf16 %v12246_v40  ;;  %v3775_v30 = vrot.slane %v17718_v56, 6  ;;  %v1183_v25 = vadd.f32 %v11772_v9, %v1182_v55  ;;  %v17719_v53 = vpack.i.bf16 %v12276_v24, %v12096_v5  ;;  %v8550_v55 = vpop.permute.xlu1 %8549 }
 0x239   : > { %17715 = vst [vmem:[#allocation96_spill] sm:$0xff] %v12419_v19  ;;  %8824 = vrot.lane.b32.xlu1 %v17716_v36, %s9736_s22  ;;  %v1517_v46 = vsel %vm1428_vm5, %v1514_v0, %v17034_v28  ;;  %v17720_v12 = vrot.slane %v11642_v4, 5  ;;  %v4282_v5 = vsel %vm4028_vm9, %v12301_v48, %v8571_v17  ;;  %v4283_v24 = vsel %vm4028_vm9, %v12305_v62, %v8572_v47  ;;  %v1187_v43 = vpop.f32.mrf.mxu0 }
 0x23a   : > { %v4047_v22 = vsel %vm4028_vm9, %v12258_v60, %v17717_v10  ;;  %8859 = vrot.lane.b32.xlu0 %v17719_v53, %s9737_s23  ;;  %v17721_v60 = vunpack.i.h.bf16 %v12246_v40  ;;  %v8575_v10 = vpop.permute.xlu0 %8574  ;;  %8013 = vmatmul.mubr.msk.bf16.gmra.mxu0 %vm3949_vm8, %v4464_v27  ;;  %v3402_v0 = vsel %vm3321_vm7, %v3399_v29, %v17033_v41  ;;  %v17722_v53 = vld [vmem:[#allocation23_spill] sm:$0xff]  ;;  %v8552_v48 = vunpack.i.h.bf16 %v8550_v55 }
 0x23b   : > { %v3400_v21 = vsel %vm3321_vm7, %v17720_v12, %v3399_v29  ;;  %v3777_v63 = vrot.slane %v17722_v53, 6  ;;  %v8577_v40 = vunpack.i.h.bf16 %v8575_v10  ;;  %v8576_v12 = vunpack.i.l.bf16 %v8575_v10  ;;  %8016 = vmatprep.mubr.msk.bf16.mxu0 %vm9733_vm1, %v17342_v45 }
 0x23c   : > { %v4048_v36 = vsel %vm4028_vm9, %v12254_v49, %v17721_v60  ;;  %v4126_v49 = vsel %vm4107_vm10, %v4047_v22, %v8536_v38  ;;  %v8551_v27 = vunpack.i.l.bf16 %v8550_v55  ;;  %v17723_v62 = vrot.slane %v17690_v51, 6  ;;  %v7914_v38 = vpop.f32.mrf.mxu0  ;;  %v12472_v55 = vpop.permute.xlu1 %8554 }
 0x23d   : > { %v4127_v60 = vsel %vm4107_vm10, %v4048_v36, %v8537_v15  ;;  %8834 = vrot.lane.b32.xlu1 %v8833_v2, %s9738_s10  ;;  %v1906_v47 = vrot.slane %v11642_v4, 2  ;;  %v1188_v17 = vadd.f32 %v11772_v9, %v1187_v43  ;;  %v4360_v15 = vsel %vm4107_vm10, %v4282_v5, %v8576_v12 }
 0x23e   : > { %v3776_v29 = vsel %vm3713_vm6, %v17723_v62, %v3775_v30  ;;  %8869 = vrot.lane.b32.xlu0 %v8868_v11, %s9736_s22  ;;  %v4361_v22 = vsel %vm4107_vm10, %v4283_v24, %v8577_v40  ;;  %v3778_v36 = vsel %vm3713_vm6, %v3775_v30, %v3777_v63  ;;  %v12470_v2 = vmax.f32 %v1183_v25, 0.0  ;;  %v8590_v10 = vpop.permute.xlu0 %8589  ;;  %v1190_v11 = vpop.f32.mrf.mxu0  ;;  %v17726_v25 = vld [vmem:[#allocation30_spill] sm:$0xff] }
 0x23f   : > { %v4448_v62 = vpack.c.bf16 %v4361_v22, %v4360_v15  ;;  %v8848_v41 = vpack.i.bf16 %v1517_v46, %v1515_v13  ;;  %v8873_v28 = vpack.i.bf16 %v3402_v0, %v3400_v21  ;;  %v8592_v43 = vunpack.i.h.bf16 %v8590_v10  ;;  %v17727_v46 = vld [vmem:[#allocation52_spill] sm:$0xff] }
 0x240   : > { %17724 = vst [vmem:[#allocation28_spill] sm:$0xff] %v12470_v2  ;;  %v8591_v54 = vunpack.i.l.bf16 %v8590_v10  ;;  %v4447_v38 = vpack.c.bf16 %v4127_v60, %v4126_v49  ;;  %v17725_v5 = vrot.slane %v11593_v1, 2  ;;  %v1191_v40 = vadd.f32 %v11772_v9, %v1190_v11  ;;  %v7915_v49 = vpop.f32.mrf.mxu0 }
 0x241   : > { %4872 = vmatprep.mubr.bf16.mxu1 %v4448_v62  ;;  %8849 = vrot.lane.b32.xlu1 %v8848_v41, %s9737_s23  ;;  %v4467_v30 = vpack.c.bf16 %v3778_v36, %v3776_v29  ;;  %v2774_v12 = vrot.slane %v17726_v25, 4  ;;  %v17037_v15 = vrot.slane %v17678_v58, 2  ;;  %v12483_v13 = vsel %vm3949_vm8, %v17598_v26, %v8552_v48  ;;  %v17729_v41 = vld [vmem:[#allocation36_spill] sm:$0xff]  ;;  %v12495_v36 = vpop.permute.xlu1 %8564 }
 0x242   : > { %v1907_v24 = vsel %vm1818_vm4, %v17725_v5, %v1906_v47  ;;  %v12487_v21 = vsel %vm3949_vm8, %v17727_v46, %v8551_v27  ;;  %v12489_v0 = vmax.f32 %v1188_v17, 0.0  ;;  %8874 = vrot.lane.b32.xlu0 %v8873_v28, %s9738_s10  ;;  %4873 = vmatmul.mubr.bf16.gmra.mxu1 %v4447_v38  ;;  %v17036_v60 = vrot.slane %v17729_v41, 4  ;;  %v8600_v26 = vpop.permute.xlu0 %8599  ;;  %v1195_v11 = vpop.f32.mrf.mxu0  ;;  %v17733_v46 = vld [vmem:[#allocation73_spill] sm:$0xff] }
 0x243   : > { %8017 = vmatmul.mubr.msk.bf16.gmra.mxu0 %vm3949_vm8, %v4467_v30  ;;  %v8853_v48 = vpack.i.bf16 %v1907_v24, %v12334_v37  ;;  %v17730_v27 = vrot.slane %v17692_v6, 4  ;;  %v12504_v28 = vsel %vm3949_vm8, %v12381_v35, %v8591_v54  ;;  %v12508_v10 = vsel %vm3949_vm8, %v12402_v42, %v8592_v43  ;;  %v17732_v42 = vld [vmem:[#allocation71_spill] sm:$0xff] }
 0x244   : > { %17728 = vst [vmem:[#allocation89_spill] sm:$0xff] %v12489_v0  ;;  %v8601_v62 = vunpack.i.l.bf16 %v8600_v26  ;;  %v12513_v38 = vsel %vm1818_vm4, %v1906_v47, %v17037_v15  ;;  %8020 = vmatprep.mubr.msk.bf16.mxu0 %vm9733_vm1, %v17342_v45  ;;  %v12517_v37 = vmax.f32 %v1191_v40, 0.0  ;;  %v12524_v35 = vsel %vm882_vm0, %v2774_v12, %v17036_v60  ;;  %v7918_v30 = vpop.f32.mrf.mxu0 }
 0x245   : > { %v2775_v17 = vsel %vm882_vm0, %v17730_v27, %v2774_v12  ;;  %8854 = vrot.lane.b32.xlu1 %v8853_v48, %s9736_s22  ;;  %v2501_v43 = vrot.slane %v17732_v42, 3  ;;  %v8602_v47 = vunpack.i.h.bf16 %v8600_v26  ;;  %v3779_v40 = vrot.slane %v11417_v23, 6 }
 0x246   : > { %17731 = vst [vmem:[#allocation87_spill] sm:$0xff] %v12517_v37  ;;  %v8888_v54 = vpack.i.bf16 %v2775_v17, %v12339_v50  ;;  %v1196_v27 = vadd.f32 %v11772_v9, %v1195_v11  ;;  %v8580_v50 = vpop.permute.xlu1 %8579  ;;  %v8605_v48 = vpop.permute.xlu0 %8604  ;;  %v8863_v29 = vpack.i.bf16 %v12513_v38, %v1907_v24  ;;  %v8898_v12 = vpack.i.bf16 %v12524_v35, %v2775_v17 }
 0x247   : > { %v17039_v22 = vrot.slane %v11474_v39, 6  ;;  %v8582_v60 = vunpack.i.h.bf16 %v8580_v50  ;;  %v8607_v15 = vunpack.i.h.bf16 %v8605_v48  ;;  %v8606_v26 = vunpack.i.l.bf16 %v8605_v48  ;;  %v1198_v30 = vpop.f32.mrf.mxu0 }
 0x248   : > { %8889 = vrot.lane.b32.xlu0 %v8888_v54, %s9737_s23  ;;  %v4284_v5 = vsel %vm4028_vm9, %v12409_v59, %v8601_v62  ;;  %v8581_v49 = vunpack.i.l.bf16 %v8580_v50  ;;  %v3780_v11 = vsel %vm3713_vm6, %v3777_v63, %v3779_v40  ;;  %v1518_v17 = vrot.slane %v17678_v58, 1 }
 0x249   : > { %8864 = vrot.lane.b32.xlu1 %v8863_v29, %s9738_s10  ;;  %v3782_v24 = vsel %vm3713_vm6, %v3779_v40, %v17039_v22  ;;  %v8566_v54 = vunpack.i.l.bf16 %v12495_v36  ;;  %v7919_v48 = vpop.f32.mrf.mxu0  ;;  %v4285_v59 = vsel %vm4028_vm9, %v12417_v20, %v8602_v47  ;;  %v4362_v62 = vsel %vm4107_vm10, %v4284_v5, %v8606_v26 }
 0x24a   : > { %v4470_v37 = vpack.c.bf16 %v3782_v24, %v3780_v11  ;;  %v12550_v29 = vpop.permute.xlu1 %8584  ;;  %v17734_v63 = vrot.slane %v17706_v31, 3  ;;  %v8620_v40 = vpop.permute.xlu0 %8619  ;;  %v4363_v22 = vsel %vm4107_vm10, %v4285_v59, %v8607_v15  ;;  %v17735_v0 = vrot.slane %v11642_v4, 1  ;;  %v12582_v59 = vld [vmem:[#allocation4] ss:$0 sm:$0xff] }
 0x24b   : > { %v17042_v24 = vrot.slane %v17692_v6, 1  ;;  %v12560_v20 = vmax.f32 %v1196_v27, 0.0  ;;  %v12564_v5 = vsel %vm3949_vm8, %v17657_v57, %v8582_v60  ;;  %v1199_v47 = vadd.f32 %v11772_v9, %v1198_v30  ;;  %v1203_v48 = vpop.f32.mrf.mxu0 }
 0x24c   : > { %8899 = vrot.lane.b32.xlu0 %v8898_v12, %s9736_s22  ;;  %v2502_v50 = vsel %vm883_vm2, %v17734_v63, %v2501_v43  ;;  %v1519_v11 = vsel %vm1428_vm5, %v17735_v0, %v1518_v17  ;;  %v17737_v12 = vrot.slane %v17733_v46, 3  ;;  %8021 = vmatmul.mubr.msk.bf16.gmra.mxu0 %vm3949_vm8, %v4470_v37  ;;  %v12573_v15 = vsel %vm3949_vm8, %v17650_v16, %v8581_v49 }
 0x24d   : > { %17736 = vst [vmem:[#allocation26_spill] sm:$0xff] %v12560_v20  ;;  %v4451_v0 = vpack.c.bf16 %v4363_v22, %v4362_v62  ;;  %v1521_v27 = vsel %vm1428_vm5, %v1518_v17, %v17042_v24  ;;  %v3403_v57 = vrot.slane %v17726_v25, 5  ;;  %8024 = vmatprep.mubr.msk.bf16.mxu0 %vm9733_vm1, %v17342_v45  ;;  %v8622_v9 = vunpack.i.h.bf16 %v8620_v40  ;;  %v7922_v37 = vpop.f32.mrf.mxu0 }
 0x24e   : > { %v2504_v26 = vsel %vm883_vm2, %v2501_v43, %v17737_v12  ;;  %v8621_v60 = vunpack.i.l.bf16 %v8620_v40  ;;  %v8878_v43 = vpack.i.bf16 %v1521_v27, %v1519_v11  ;;  %v17041_v30 = vrot.slane %v17729_v41, 5  ;;  %v12596_v11 = vpop.permute.xlu1 %8594  ;;  %v12598_v12 = vpop.permute.xlu0 %8629 }
 0x24f   : > { %v1204_v16 = vadd.f32 %v12582_v59, %v1203_v48  ;;  %4880 = vmatprep.mubr.bf16.mxu1 %v4451_v0  ;;  %v17738_v22 = vrot.slane %v17692_v6, 5  ;;  %v17739_v17 = vunpack.i.l.bf16 %v12359_v14  ;;  %v17740_v63 = vunpack.i.h.bf16 %v12359_v14  ;;  %v1206_v37 = vpop.f32.mrf.mxu0 }
 0x250   : > { %v12600_v48 = vmax.f32 %v1199_v47, 0.0  ;;  %8879 = vrot.lane.b32.xlu1 %v8878_v43, %s9737_s23  ;;  %v3406_v0 = vsel %vm3321_vm7, %v3403_v57, %v17041_v30  ;;  %v12616_v43 = vsel %vm3949_vm8, %v2504_v26, %v8622_v9  ;;  %v17745_v9 = vrot.slane %v17678_v58, 2 }
 0x251   : > { %v3404_v49 = vsel %vm3321_vm7, %v17738_v22, %v3403_v57  ;;  %v4049_v62 = vsel %vm4028_vm9, %v12385_v44, %v17739_v17  ;;  %v4050_v40 = vsel %vm4028_vm9, %v12372_v61, %v17740_v63  ;;  %v17742_v44 = vunpack.i.h.bf16 %v12495_v36  ;;  %v7923_v36 = vpop.f32.mrf.mxu0 }
 0x252   : > { %17741 = vst [vmem:[#allocation97_spill] sm:$0xff] %v12600_v48  ;;  %v4128_v27 = vsel %vm4107_vm10, %v4049_v62, %v8566_v54  ;;  %v8903_v17 = vpack.i.bf16 %v3406_v0, %v3404_v49  ;;  %v12613_v63 = vsel %vm3949_vm8, %v2502_v50, %v8621_v60  ;;  %v1910_v57 = vrot.slane %v17692_v6, 2  ;;  %v17743_v54 = vld [vmem:[#allocation74_spill] sm:$0xff] }
 0x253   : > { %v4129_v14 = vsel %vm4107_vm10, %v4050_v40, %v17742_v44  ;;  %v2778_v62 = vrot.slane %v17743_v54, 4  ;;  %v12620_v30 = vmax.f32 %v1204_v16, 0.0  ;;  %v8610_v40 = vpop.permute.xlu1 %8609  ;;  %v3783_v49 = vrot.slane %v11548_v18, 6  ;;  %v8635_v44 = vpop.permute.xlu0 %8634 }
 0x254   : > { %v4450_v47 = vpack.c.bf16 %v4129_v14, %v4128_v27  ;;  %8904 = vrot.lane.b32.xlu0 %v8903_v17, %s9738_s10  ;;  %v1911_v60 = vsel %vm1818_vm4, %v17745_v9, %v1910_v57  ;;  %v17746_v27 = vrot.slane %v17729_v41, 4  ;;  %v1211_v14 = vpop.f32.mrf.mxu0  ;;  %v17747_v17 = vld [vmem:[#allocation17_spill] sm:$0xff]  ;;  %v1207_v61 = vadd.f32 %v12582_v59, %v1206_v37 }
 0x255   : > { %17744 = vst [vmem:[#allocation95_spill] sm:$0xff] %v12620_v30  ;;  %v8883_v22 = vpack.i.bf16 %v1911_v60, %v12513_v38  ;;  %v8612_v24 = vunpack.i.h.bf16 %v8610_v40  ;;  %v8611_v50 = vunpack.i.l.bf16 %v8610_v40  ;;  %v1212_v9 = vadd.f32 %v12582_v59, %v1211_v14 }
 0x256   : > { %4881 = vmatmul.mubr.bf16.gmra.mxu1 %v4450_v47  ;;  %v2779_v16 = vsel %vm882_vm0, %v17746_v27, %v2778_v62  ;;  %v17748_v0 = vrot.slane %v11474_v39, 6  ;;  %v7926_v30 = vpop.f32.mrf.mxu0  ;;  %v8632_v48 = vunpack.i.h.bf16 %v12598_v12  ;;  %v8631_v47 = vunpack.i.l.bf16 %v12598_v12 }
 0x257   : > { %v8918_v26 = vpack.i.bf16 %v2779_v16, %v12524_v35  ;;  %8884 = vrot.lane.b32.xlu1 %v8883_v22, %s9736_s22  ;;  %v17749_v38 = vrot.slane %v11560_v33, 6  ;;  %v17750_v37 = vrot.slane %v17726_v25, 2  ;;  %v12654_v14 = vpop.permute.xlu1 %8614  ;;  %v8636_v30 = vunpack.i.l.bf16 %v8635_v44  ;;  %v17752_v22 = vld [vmem:[#allocation77_spill] sm:$0xff]  ;;  %v8650_v20 = vpop.permute.xlu0 %8649 }
 0x258   : > { %v3784_v27 = vsel %vm3713_vm6, %v17748_v0, %v3783_v49  ;;  %v17751_v36 = vrot.slane %v17747_v17, 4  ;;  %v1214_v2 = vpop.f32.mrf.mxu0  ;;  %v12662_v19 = vmax.f32 %v1207_v61, 0.0  ;;  %v17757_v61 = vrot.slane %v17692_v6, 1 }
 0x259   : > { %8919 = vrot.lane.b32.xlu0 %v8918_v26, %s9737_s23  ;;  %v3786_v35 = vsel %vm3713_vm6, %v3783_v49, %v17749_v38  ;;  %v12652_v40 = vsel %vm1818_vm4, %v1910_v57, %v17750_v37  ;;  %v2505_v26 = vrot.slane %v17752_v22, 3  ;;  %v8637_v49 = vunpack.i.h.bf16 %v8635_v44 }
 0x25a   : > { %v4473_v0 = vpack.c.bf16 %v3786_v35, %v3784_v27  ;;  %v12659_v12 = vsel %vm882_vm0, %v2778_v62, %v17751_v36  ;;  %17753 = vst [vmem:[#allocation62_spill] sm:$0xff] %v12662_v19  ;;  %v8893_v38 = vpack.i.bf16 %v12652_v40, %v1911_v60  ;;  %v12668_v37 = vsel %vm3949_vm8, %v17706_v31, %v8612_v24  ;;  %v7927_v36 = vpop.f32.mrf.mxu0  ;;  %v17755_v60 = vld [vmem:[#allocation79_spill] sm:$0xff] }
 0x25b   : > { %v8928_v57 = vpack.i.bf16 %v12659_v12, %v2779_v16  ;;  %v12672_v27 = vsel %vm3949_vm8, %v17700_v3, %v8611_v50  ;;  %v12674_v62 = vmax.f32 %v1212_v9, 0.0  ;;  %v4286_v31 = vsel %vm4028_vm9, %v12504_v28, %v8631_v47  ;;  %v12685_v50 = vpop.permute.xlu1 %8624  ;;  %v12695_v28 = vpop.permute.xlu0 %8659 }
 0x25c   : > { %8025 = vmatmul.mubr.msk.bf16.gmra.mxu0 %vm3949_vm8, %v4473_v0  ;;  %8894 = vrot.lane.b32.xlu1 %v8893_v38, %s9738_s10  ;;  %v1522_v24 = vrot.slane %v17726_v25, 1  ;;  %v17052_v3 = vrot.slane %v17729_v41, 1  ;;  %v17756_v44 = vrot.slane %v17733_v46, 3  ;;  %v8651_v35 = vunpack.i.l.bf16 %v8650_v20  ;;  %v1219_v47 = vpop.f32.mrf.mxu0 }
 0x25d   : > { %17754 = vst [vmem:[#allocation59_spill] sm:$0xff] %v12674_v62  ;;  %8929 = vrot.lane.b32.xlu0 %v8928_v57, %s9736_s22  ;;  %v4287_v0 = vsel %vm4028_vm9, %v12508_v10, %v8632_v48  ;;  %v4364_v38 = vsel %vm4107_vm10, %v4286_v31, %v8636_v30  ;;  %8028 = vmatprep.mubr.msk.bf16.mxu0 %vm9733_vm1, %v17342_v45  ;;  %v3407_v31 = vrot.slane %v17743_v54, 5  ;;  %v17051_v16 = vrot.slane %v17747_v17, 5 }
 0x25e   : > { %v2506_v9 = vsel %vm883_vm2, %v17756_v44, %v2505_v26  ;;  %v1215_v57 = vadd.f32 %v12582_v59, %v1214_v2  ;;  %v4365_v36 = vsel %vm4107_vm10, %v4287_v0, %v8637_v49  ;;  %v1523_v44 = vsel %vm1428_vm5, %v17757_v61, %v1522_v24  ;;  %v7930_v62 = vpop.f32.mrf.mxu0 }
 0x25f   : > { %v1525_v10 = vsel %vm1428_vm5, %v1522_v24, %v17052_v3  ;;  %v4454_v48 = vpack.c.bf16 %v4365_v36, %v4364_v38  ;;  %v8652_v19 = vunpack.i.h.bf16 %v8650_v20  ;;  %v17758_v2 = vrot.slane %v17755_v60, 3  ;;  %v8640_v38 = vpop.permute.xlu1 %8639 }
 0x260   : > { %v8908_v30 = vpack.i.bf16 %v1525_v10, %v1523_v44  ;;  %v17759_v0 = vunpack.i.l.bf16 %v12472_v55  ;;  %v17760_v7 = vunpack.i.h.bf16 %v12472_v55  ;;  %v17761_v20 = vrot.slane %v17729_v41, 5  ;;  %v12729_v44 = vpop.permute.xlu0 %8664 }
 0x261   : > { %v2508_v49 = vsel %vm883_vm2, %v2505_v26, %v17758_v2  ;;  %4888 = vmatprep.mubr.bf16.mxu1 %v4454_v48  ;;  %v3410_v62 = vsel %vm3321_vm7, %v3407_v31, %v17051_v16  ;;  %v12734_v10 = vmax.f32 %v1215_v57, 0.0 }
 0x262   : > { %v4051_v61 = vsel %vm4028_vm9, %v12487_v21, %v17759_v0  ;;  %v4052_v24 = vsel %vm4028_vm9, %v12483_v13, %v17760_v7  ;;  %8909 = vrot.lane.b32.xlu1 %v8908_v30, %s9737_s23  ;;  %v3408_v26 = vsel %vm3321_vm7, %v17761_v20, %v3407_v31  ;;  %v17762_v21 = vunpack.i.l.bf16 %v12596_v11  ;;  %v1222_v7 = vpop.f32.mrf.mxu0 }
 0x263   : > { %v12732_v13 = vsel %vm3949_vm8, %v2506_v9, %v8651_v35  ;;  %17763 = vst [vmem:[#allocation56_spill] sm:$0xff] %v12734_v10  ;;  %v8933_v48 = vpack.i.bf16 %v3410_v62, %v3408_v26  ;;  %v17764_v30 = vunpack.i.h.bf16 %v12596_v11  ;;  %v3787_v31 = vrot.slane %v11593_v1, 6  ;;  %v17765_v35 = vld [vmem:[#allocation39_spill] sm:$0xff]  ;;  %v12748_v26 = vpop.permute.xlu1 %8644 }
 0x264   : > { %v4130_v55 = vsel %vm4107_vm10, %v4051_v61, %v17762_v21  ;;  %v3789_v20 = vrot.slane %v11642_v4, 6  ;;  %v1914_v61 = vrot.slane %v17729_v41, 2  ;;  %v7931_v21 = vpop.f32.mrf.mxu0  ;;  %v12743_v36 = vsel %vm3949_vm8, %v2508_v49, %v8652_v19 }
 0x265   : > { %v4131_v2 = vsel %vm4107_vm10, %v4052_v24, %v17764_v30  ;;  %8934 = vrot.lane.b32.xlu0 %v8933_v48, %s9738_s10  ;;  %v1220_v9 = vadd.f32 %v12582_v59, %v1219_v47  ;;  %v2782_v57 = vrot.slane %v17765_v35, 4  ;;  %v8642_v11 = vunpack.i.h.bf16 %v8640_v38  ;;  %v12757_v48 = vpop.permute.xlu0 %8679 }
 0x266   : > { %v4453_v0 = vpack.c.bf16 %v4131_v2, %v4130_v55  ;;  %v17766_v24 = vrot.slane %v11560_v33, 6  ;;  %v3790_v55 = vsel %vm3713_vm6, %v3787_v31, %v3789_v20  ;;  %v17767_v30 = vrot.slane %v17726_v25, 2  ;;  %v1227_v47 = vpop.f32.mrf.mxu0 }
 0x267   : > { %v8641_v49 = vunpack.i.l.bf16 %v8640_v38  ;;  %v8661_v10 = vunpack.i.l.bf16 %v12695_v28  ;;  %v12768_v4 = vmax.f32 %v1220_v9, 0.0  ;;  %v12775_v2 = vpop.permute.xlu1 %8654  ;;  %v1223_v9 = vadd.f32 %v12582_v59, %v1222_v7 }
 0x268   : > { %4889 = vmatmul.mubr.bf16.gmra.mxu1 %v4453_v0  ;;  %v3788_v62 = vsel %vm3713_vm6, %v17766_v24, %v3787_v31  ;;  %v1915_v19 = vsel %vm1818_vm4, %v17767_v30, %v1914_v61  ;;  %v17768_v0 = vrot.slane %v17747_v17, 4  ;;  %v8626_v24 = vunpack.i.l.bf16 %v12685_v50  ;;  %v7934_v30 = vpop.f32.mrf.mxu0 }
 0x269   : > { %v4476_v21 = vpack.c.bf16 %v3790_v55, %v3788_v62  ;;  %v8913_v16 = vpack.i.bf16 %v1915_v19, %v12652_v40  ;;  %v8662_v31 = vunpack.i.h.bf16 %v12695_v28  ;;  %17769 = vst [vmem:[#allocation58_spill] sm:$0xff] %v12768_v4  ;;  %v8667_v40 = vunpack.i.h.bf16 %v12729_v44  ;;  %v17770_v55 = vld [vmem:[#allocation40_spill] sm:$0xff] }
 0x26a   : > { %v2783_v3 = vsel %vm882_vm0, %v17768_v0, %v2782_v57  ;;  %v17059_v62 = vrot.slane %v17743_v54, 2  ;;  %v17060_v0 = vrot.slane %v17770_v55, 4  ;;  %v12784_v28 = vsel %vm3949_vm8, %v17732_v42, %v8641_v49  ;;  %v12792_v30 = vpop.f32.mrf.mxu0 }
 0x26b   : > { %v8948_v38 = vpack.i.bf16 %v2783_v3, %v12659_v12  ;;  %8029 = vmatmul.mubr.msk.bf16.gmra.mxu0 %vm3949_vm8, %v4476_v21  ;;  %8914 = vrot.lane.b32.xlu1 %v8913_v16, %s9736_s22  ;;  %v12780_v12 = vsel %vm3949_vm8, %v17733_v46, %v8642_v11  ;;  %v8666_v16 = vunpack.i.l.bf16 %v12729_v44  ;;  %v12790_v21 = vpop.permute.xlu0 %8689  ;;  %v3791_v4 = vrot.slane %v17678_v58, 6  ;;  %v12814_v44 = vpop.permute.xlu1 %8669 }
 0x26c   : > { %8032 = vmatprep.mubr.msk.bf16.mxu0 %vm9733_vm1, %v17342_v45  ;;  %v12797_v46 = vsel %vm1818_vm4, %v1914_v61, %v17059_v62  ;;  %v12802_v42 = vsel %vm882_vm0, %v2782_v57, %v17060_v0  ;;  %v7935_v1 = vpop.f32.mrf.mxu0  ;;  %v8682_v61 = vunpack.i.h.bf16 %v12757_v48  ;;  %v8681_v62 = vunpack.i.l.bf16 %v12757_v48 }
 0x26d   : > { %8949 = vrot.lane.b32.xlu0 %v8948_v38, %s9737_s23  ;;  %v8923_v11 = vpack.i.bf16 %v12797_v46, %v1915_v19  ;;  %v8958_v49 = vpack.i.bf16 %v12802_v42, %v2783_v3  ;;  %v2509_v38 = vrot.slane %v17630_v52, 3  ;;  %v3793_v0 = vrot.slane %v17692_v6, 6 }
 0x26e   : > { %v1228_v3 = vadd.f32 %v12582_v59, %v1227_v47  ;;  %v3792_v19 = vsel %vm3713_vm6, %v3789_v20, %v3791_v4  ;;  %v4288_v1 = vsel %vm4028_vm9, %v12613_v63, %v8661_v10  ;;  %v1526_v7 = vrot.slane %v17743_v54, 1  ;;  %v1235_v57 = vpop.f32.mrf.mxu0 }
 0x26f   : > { %8924 = vrot.lane.b32.xlu1 %v8923_v11, %s9738_s10  ;;  %v12823_v48 = vpop.permute.xlu0 %8694  ;;  %v3794_v58 = vsel %vm3713_vm6, %v3791_v4, %v3793_v0  ;;  %v4289_v11 = vsel %vm4028_vm9, %v12616_v43, %v8662_v31  ;;  %v17070_v47 = vrot.slane %v17747_v17, 1  ;;  %v17771_v63 = vrot.slane %v17729_v41, 1 }
 0x270   : > { %v4479_v20 = vpack.c.bf16 %v3794_v58, %v3792_v19  ;;  %v4367_v33 = vsel %vm4107_vm10, %v4289_v11, %v8667_v40  ;;  %v3411_v8 = vrot.slane %v17765_v35, 5  ;;  %v7938_v18 = vpop.f32.mrf.mxu0  ;;  %v17069_v43 = vrot.slane %v17770_v55, 5  ;;  %v12845_v40 = vpop.permute.xlu1 %8674 }
 0x271   : > { %8959 = vrot.lane.b32.xlu0 %v8958_v49, %s9736_s22  ;;  %v4366_v49 = vsel %vm4107_vm10, %v4288_v1, %v8666_v16  ;;  %v1527_v10 = vsel %vm1428_vm5, %v17771_v63, %v1526_v7  ;;  %v1529_v4 = vsel %vm1428_vm5, %v1526_v7, %v17070_v47  ;;  %v17772_v31 = vunpack.i.l.bf16 %v12550_v29 }
 0x272   : > { %v4457_v39 = vpack.c.bf16 %v4367_v33, %v4366_v49  ;;  %v8938_v16 = vpack.i.bf16 %v1529_v4, %v1527_v10  ;;  %v17773_v19 = vrot.slane %v17747_v17, 5  ;;  %v17774_v33 = vunpack.i.h.bf16 %v12550_v29  ;;  %v12858_v49 = vpop.f32.mrf.mxu0 }
 0x273   : > { %v4053_v58 = vsel %vm4028_vm9, %v12573_v15, %v17772_v31  ;;  %8033 = vmatmul.mubr.msk.bf16.gmra.mxu0 %vm3949_vm8, %v4479_v20  ;;  %v12856_v11 = vpop.permute.xlu0 %8709  ;;  %v12860_v15 = vmax.f32 %v1223_v9, 0.0  ;;  %v17776_v20 = vrot.slane %v17755_v60, 3  ;;  %v3414_v29 = vsel %vm3321_vm7, %v3411_v8, %v17069_v43 }
 0x274   : > { %v3412_v18 = vsel %vm3321_vm7, %v17773_v19, %v3411_v8  ;;  %v4054_v7 = vsel %vm4028_vm9, %v12564_v5, %v17774_v33  ;;  %v4132_v1 = vsel %vm4107_vm10, %v4053_v58, %v8626_v24  ;;  %4896 = vmatprep.mubr.bf16.mxu1 %v4457_v39  ;;  %v17777_v10 = vunpack.i.h.bf16 %v12685_v50  ;;  %8036 = vmatprep.mubr.msk.bf16.mxu0 %vm9733_vm1, %v17342_v45  ;;  %v7939_v58 = vpop.f32.mrf.mxu0  ;;  %v17780_v33 = vld [vmem:[#allocation50_spill] sm:$0xff] }
 0x275   : > { %17775 = vst [vmem:[#allocation90_spill] sm:$0xff] %v12860_v15  ;;  %v2510_v63 = vsel %vm883_vm2, %v17776_v20, %v2509_v38  ;;  %v17778_v24 = vrot.slane %v17652_v34, 3  ;;  %8939 = vrot.lane.b32.xlu1 %v8938_v16, %s9737_s23  ;;  %v8963_v39 = vpack.i.bf16 %v3414_v29, %v3412_v18  ;;  %v12883_v50 = vmax.f32 %v1228_v3, 0.0  ;;  %v12887_v20 = vpop.permute.xlu1 %8684 }
 0x276   : > { %v4133_v5 = vsel %vm4107_vm10, %v4054_v7, %v17777_v10  ;;  %v12877_v4 = vsel %vm3949_vm8, %v2510_v63, %v8681_v62  ;;  %v1918_v19 = vrot.slane %v17747_v17, 2  ;;  %v2786_v7 = vrot.slane %v17780_v33, 4  ;;  %v12896_v3 = vpop.f32.mrf.mxu0 }
 0x277   : > { %v2512_v9 = vsel %vm883_vm2, %v2509_v38, %v17778_v24  ;;  %v4456_v31 = vpack.c.bf16 %v4133_v5, %v4132_v1  ;;  %17779 = vst [vmem:[#allocation18_spill] sm:$0xff] %v12883_v50  ;;  %8964 = vrot.lane.b32.xlu0 %v8963_v39, %s9738_s10  ;;  %v8692_v16 = vunpack.i.h.bf16 %v12790_v21  ;;  %v12894_v18 = vpop.permute.xlu0 %8719  ;;  %v1231_v1 = vadd.f32 %v12582_v59, %v12792_v30 }
 0x278   : > { %v12881_v8 = vsel %vm3949_vm8, %v2512_v9, %v8682_v61  ;;  %v1236_v61 = vadd.f32 %v12582_v59, %v1235_v57  ;;  %v17781_v63 = vrot.slane %v17743_v54, 2  ;;  %v17782_v10 = vrot.slane %v17770_v55, 4  ;;  %v7942_v58 = vpop.f32.mrf.mxu0 }
 0x279   : > { %4897 = vmatmul.mubr.bf16.gmra.mxu1 %v4456_v31  ;;  %v8672_v24 = vunpack.i.h.bf16 %v12814_v44  ;;  %v8671_v39 = vunpack.i.l.bf16 %v12814_v44  ;;  %v3795_v30 = vrot.slane %v17726_v25, 6  ;;  %v17074_v62 = vrot.slane %v17729_v41, 6  ;;  %v17784_v44 = vld [vmem:[#allocation91_spill] sm:$0xff] }
 0x27a   : > { %v1919_v29 = vsel %vm1818_vm4, %v17781_v63, %v1918_v19  ;;  %v2787_v5 = vsel %vm882_vm0, %v17782_v10, %v2786_v7  ;;  %v12910_v31 = vmax.f32 %v1236_v61, 0.0  ;;  %v17075_v63 = vrot.slane %v17765_v35, 2  ;;  %v12916_v10 = vpop.permute.xlu1 %8699  ;;  %v12926_v47 = vpop.f32.mrf.mxu0 }
 0x27b   : > { %v8943_v9 = vpack.i.bf16 %v1919_v29, %v12797_v46  ;;  %v8978_v57 = vpack.i.bf16 %v2787_v5, %v12802_v42  ;;  %v8691_v43 = vunpack.i.l.bf16 %v12790_v21  ;;  %v8697_v46 = vunpack.i.h.bf16 %v12823_v48  ;;  %v12924_v58 = vpop.permute.xlu0 %8724 }
 0x27c   : > { %17783 = vst [vmem:[#allocation93_spill] sm:$0xff] %v12910_v31  ;;  %v8696_v42 = vunpack.i.l.bf16 %v12823_v48  ;;  %v2513_v61 = vrot.slane %v17784_v44, 3  ;;  %v3796_v38 = vsel %vm3713_vm6, %v3793_v0, %v3795_v30  ;;  %v3798_v21 = vsel %vm3713_vm6, %v3795_v30, %v17074_v62  ;;  %v7943_v30 = vpop.f32.mrf.mxu0 }
 0x27d   : > { %8944 = vrot.lane.b32.xlu1 %v8943_v9, %s9736_s22  ;;  %8979 = vrot.lane.b32.xlu0 %v8978_v57, %s9737_s23  ;;  %v12937_v9 = vsel %vm1818_vm4, %v1918_v19, %v17075_v63  ;;  %v17785_v48 = vrot.slane %v12033_v32, 4  ;;  %v12944_v50 = vmax.f32 %v1231_v1, 0.0  ;;  %v12948_v15 = vsel %vm3949_vm8, %v17755_v60, %v8672_v24  ;;  %v17787_v60 = vld [vmem:[#allocation94_spill] sm:$0xff] }
 0x27e   : > { %v4482_v0 = vpack.c.bf16 %v3798_v21, %v3796_v38  ;;  %v8953_v25 = vpack.i.bf16 %v12937_v9, %v1919_v29  ;;  %v12953_v62 = vsel %vm3949_vm8, %v17752_v22, %v8671_v39  ;;  %v12958_v1 = vpop.permute.xlu1 %8704  ;;  %v4290_v29 = vsel %vm4028_vm9, %v12732_v13, %v8691_v43 }
 0x27f   : > { %v12942_v57 = vsel %vm882_vm0, %v2786_v7, %v17785_v48  ;;  %17786 = vst [vmem:[#allocation55_spill] sm:$0xff] %v12944_v50  ;;  %v1530_v22 = vrot.slane %v17765_v35, 1  ;;  %v17076_v24 = vrot.slane %v17770_v55, 1  ;;  %v12967_v39 = vpop.permute.xlu0 %8739  ;;  %v17788_v21 = vrot.slane %v17652_v34, 3 }
 0x280   : > { %v8988_v63 = vpack.i.bf16 %v12942_v57, %v2787_v5  ;;  %8037 = vmatmul.mubr.msk.bf16.gmra.mxu0 %vm3949_vm8, %v4482_v0  ;;  %v12969_v5 = vpop.f32.mrf.mxu0  ;;  %v4291_v0 = vsel %vm4028_vm9, %v12743_v36, %v8692_v16  ;;  %v4368_v13 = vsel %vm4107_vm10, %v4290_v29, %v8696_v42  ;;  %v1239_v43 = vadd.f32 %v12582_v59, %v12858_v49 }
 0x281   : > { %8954 = vrot.lane.b32.xlu1 %v8953_v25, %s9738_s10  ;;  %v2514_v48 = vsel %vm883_vm2, %v17788_v21, %v2513_v61  ;;  %v8711_v25 = vunpack.i.l.bf16 %v12856_v11  ;;  %8040 = vmatprep.mubr.msk.bf16.mxu0 %vm9733_vm1, %v17342_v45  ;;  %v4369_v30 = vsel %vm4107_vm10, %v4291_v0, %v8697_v46  ;;  %v1533_v21 = vsel %vm1428_vm5, %v1530_v22, %v17076_v24 }
 0x282   : > { %8989 = vrot.lane.b32.xlu0 %v8988_v63, %s9736_s22  ;;  %v17789_v63 = vrot.slane %v17747_v17, 1  ;;  %v7946_v7 = vpop.f32.mrf.mxu0  ;;  %v8712_v36 = vunpack.i.h.bf16 %v12856_v11  ;;  %v4460_v16 = vpack.c.bf16 %v4369_v30, %v4368_v13  ;;  %v3415_v29 = vrot.slane %v17780_v33, 5  ;;  %v12992_v38 = vpop.permute.xlu1 %8714 }
 0x283   : > { %v17790_v49 = vrot.slane %v17787_v60, 3  ;;  %v17077_v0 = vrot.slane %v12033_v32, 5  ;;  %v17792_v7 = vunpack.i.h.bf16 %v12654_v14  ;;  %v1244_v24 = vadd.f32 %v12582_v59, %v12896_v3 }
 0x284   : > { %v1531_v19 = vsel %vm1428_vm5, %v17789_v63, %v1530_v22  ;;  %v17791_v63 = vunpack.i.l.bf16 %v12654_v14  ;;  %v13008_v13 = vpop.f32.mrf.mxu0  ;;  %4904 = vmatprep.mubr.bf16.mxu1 %v4460_v16  ;;  %v17798_v3 = vrot.slane %v17729_v41, 6  ;;  %v17809_v6 = vrot.slane %v17747_v17, 6 }
 0x285   : > { %v8968_v42 = vpack.i.bf16 %v1533_v21, %v1531_v19  ;;  %v2516_v46 = vsel %vm883_vm2, %v2513_v61, %v17790_v49  ;;  %v4056_v11 = vsel %vm4028_vm9, %v12668_v37, %v17792_v7  ;;  %v13006_v19 = vpop.permute.xlu0 %8749  ;;  %v17793_v61 = vrot.slane %v17770_v55, 5 }
 0x286   : > { %v4055_v22 = vsel %vm4028_vm9, %v12672_v27, %v17791_v63  ;;  %v17794_v27 = vunpack.i.l.bf16 %v12775_v2  ;;  %v17795_v49 = vunpack.i.h.bf16 %v12775_v2  ;;  %v13022_v63 = vsel %vm3949_vm8, %v2514_v48, %v8711_v25  ;;  %v7947_v30 = vpop.f32.mrf.mxu0 }
 0x287   : > { %8969 = vrot.lane.b32.xlu1 %v8968_v42, %s9737_s23  ;;  %v3416_v21 = vsel %vm3321_vm7, %v17793_v61, %v3415_v29  ;;  %v13024_v7 = vmax.f32 %v1239_v43, 0.0  ;;  %v3418_v16 = vsel %vm3321_vm7, %v3415_v29, %v17077_v0  ;;  %v17080_v2 = vrot.slane %v17747_v17, 6  ;;  %v17797_v29 = vld [vmem:[#allocation22_spill] sm:$0xff] }
 0x288   : > { %v4134_v14 = vsel %vm4107_vm10, %v4055_v22, %v17794_v27  ;;  %v4135_v37 = vsel %vm4107_vm10, %v4056_v11, %v17795_v49  ;;  %v8993_v61 = vpack.i.bf16 %v3418_v16, %v3416_v21  ;;  %v3799_v22 = vrot.slane %v17743_v54, 6  ;;  %v13033_v11 = vpop.permute.xlu1 %8729  ;;  %v13043_v27 = vpop.f32.mrf.mxu0 }
 0x289   : > { %17796 = vst [vmem:[#allocation72_spill] sm:$0xff] %v13024_v7  ;;  %v4459_v42 = vpack.c.bf16 %v4135_v37, %v4134_v14  ;;  %v13036_v48 = vsel %vm3949_vm8, %v2516_v46, %v8712_v36  ;;  %v1922_v43 = vrot.slane %v17770_v55, 2  ;;  %v2790_v30 = vrot.slane %v17797_v29, 4  ;;  %v13041_v21 = vpop.permute.xlu0 %8754 }
 0x28a   : > { %8994 = vrot.lane.b32.xlu0 %v8993_v61, %s9738_s10  ;;  %v3800_v14 = vsel %vm3713_vm6, %v17798_v3, %v3799_v22  ;;  %v3802_v36 = vsel %vm3713_vm6, %v3799_v22, %v17080_v2  ;;  %v8702_v46 = vunpack.i.h.bf16 %v12916_v10  ;;  %v8701_v49 = vunpack.i.l.bf16 %v12916_v10  ;;  %v7950_v3 = vpop.f32.mrf.mxu0 }
 0x28b   : > { %4905 = vmatmul.mubr.bf16.gmra.mxu1 %v4459_v42  ;;  %v13054_v37 = vmax.f32 %v1244_v24, 0.0  ;;  %v4485_v16 = vpack.c.bf16 %v3802_v36, %v3800_v14  ;;  %v17800_v42 = vrot.slane %v17765_v35, 2  ;;  %v17801_v61 = vrot.slane %v12033_v32, 4 }
 0x28c   : > { %v13066_v24 = vpop.permute.xlu1 %8734  ;;  %v8722_v14 = vunpack.i.h.bf16 %v12894_v18  ;;  %v1247_v36 = vadd.f32 %v12582_v59, %v12926_v47  ;;  %v1262_v22 = vpop.f32.mrf.mxu0  ;;  %v13088_v3 = vsel %vm3949_vm8, %v17630_v52, %v8701_v49  ;;  %v17087_v54 = vrot.slane %v17770_v55, 6 }
 0x28d   : > { %17799 = vst [vmem:[#allocation70_spill] sm:$0xff] %v13054_v37  ;;  %v1923_v25 = vsel %vm1818_vm4, %v17800_v42, %v1922_v43  ;;  %v2791_v0 = vsel %vm882_vm0, %v17801_v61, %v2790_v30  ;;  %8041 = vmatmul.mubr.msk.bf16.gmra.mxu0 %vm3949_vm8, %v4485_v16  ;;  %v17802_v61 = vld [vmem:[#allocation20_spill] sm:$0xff]  ;;  %v13074_v7 = vpop.permute.xlu0 %8769  ;;  %v8727_v16 = vunpack.i.h.bf16 %v12924_v58  ;;  %v3419_v17 = vrot.slane %v17797_v29, 5 }
 0x28e   : > { %v8973_v2 = vpack.i.bf16 %v1923_v25, %v12937_v9  ;;  %v9008_v10 = vpack.i.bf16 %v2791_v0, %v12942_v57  ;;  %v8721_v9 = vunpack.i.l.bf16 %v12894_v18  ;;  %v13081_v57 = vsel %vm3949_vm8, %v17652_v34, %v8702_v46  ;;  %8044 = vmatprep.mubr.msk.bf16.mxu0 %vm9733_vm1, %v17342_v45  ;;  %v7951_v46 = vpop.f32.mrf.mxu0 }
 0x28f   : > { %v17803_v18 = vrot.slane %v17780_v33, 2  ;;  %v17804_v22 = vrot.slane %v17802_v61, 4  ;;  %v13103_v42 = vmax.f32 %v1247_v36, 0.0 }
 0x290   : > { %8974 = vrot.lane.b32.xlu1 %v8973_v2, %s9736_s22  ;;  %9009 = vrot.lane.b32.xlu0 %v9008_v10, %s9737_s23  ;;  %v8726_v10 = vunpack.i.l.bf16 %v12924_v58  ;;  %v13107_v47 = vpop.permute.xlu1 %8744  ;;  %v13115_v46 = vpop.f32.mrf.mxu0 }
 0x291   : > { %v13093_v2 = vsel %vm1818_vm4, %v1922_v43, %v17803_v18  ;;  %v13098_v34 = vsel %vm882_vm0, %v2790_v30, %v17804_v22  ;;  %17805 = vst [vmem:[#allocation32_spill] sm:$0xff] %v13103_v42  ;;  %v8742_v30 = vunpack.i.h.bf16 %v12967_v39  ;;  %v8741_v22 = vunpack.i.l.bf16 %v12967_v39  ;;  %v13113_v31 = vpop.permute.xlu0 %8779 }
 0x292   : > { %v8983_v52 = vpack.i.bf16 %v13093_v2, %v1923_v25  ;;  %v9018_v49 = vpack.i.bf16 %v13098_v34, %v2791_v0  ;;  %v3863_v58 = vrot.slane %v13103_v42, 6  ;;  %v17806_v0 = vrot.slane %v17690_v51, 3 }
 0x293   : > { %v17807_v25 = vrot.slane %v17787_v60, 3  ;;  %v1252_v43 = vadd.f32 %v12582_v59, %v12969_v5  ;;  %v3803_v39 = vrot.slane %v17765_v35, 6  ;;  %v4293_v5 = vsel %vm4028_vm9, %v12881_v8, %v8722_v14 }
 0x294   : > { %8984 = vrot.lane.b32.xlu1 %v8983_v52, %s9738_s10  ;;  %9019 = vrot.lane.b32.xlu0 %v9018_v49, %s9736_s22  ;;  %v4292_v52 = vsel %vm4028_vm9, %v12877_v4, %v8721_v9  ;;  %v7958_v49 = vpop.f32.mrf.mxu0  ;;  %v13141_v18 = vpop.permute.xlu1 %8759  ;;  %v4371_v4 = vsel %vm4107_vm10, %v4293_v5, %v8727_v16  ;;  %v1534_v9 = vrot.slane %v17780_v33, 1  ;;  %v17810_v14 = vrot.slane %v13054_v37, 6 }
 0x295   : > { %v2518_v36 = vsel %vm883_vm2, %v17807_v25, %v17806_v0  ;;  %v13133_v41 = vmax.f32 %v1252_v43, 0.0  ;;  %v3804_v0 = vsel %vm3713_vm6, %v17809_v6, %v3803_v39  ;;  %v4370_v25 = vsel %vm4107_vm10, %v4292_v52, %v8726_v10  ;;  %v13149_v49 = vpop.permute.xlu0 %8784 }
 0x296   : > { %v3806_v50 = vsel %vm3713_vm6, %v3803_v39, %v17087_v54  ;;  %v17090_v43 = vrot.slane %v12033_v32, 1  ;;  %v13151_v6 = vpop.f32.mrf.mxu0  ;;  %v13157_v10 = vsel %vm3713_vm6, %v17810_v14, %v3863_v58  ;;  %v4463_v54 = vpack.c.bf16 %v4371_v4, %v4370_v25 }
 0x297   : > { %17808 = vst [vmem:[#allocation29_spill] sm:$0xff] %v13133_v41  ;;  %17811 = vst [vmem:[#allocation19_spill] sm:$0xff] %v13157_v10  ;;  %v17091_v52 = vrot.slane %v13133_v41, 6  ;;  %v4488_v39 = vpack.c.bf16 %v3806_v50, %v3804_v0  ;;  %v17812_v16 = vrot.slane %v17770_v55, 1  ;;  %v17092_v0 = vrot.slane %v17802_v61, 5 }
 0x298   : > { %v1537_v35 = vsel %vm1428_vm5, %v1534_v9, %v17090_v43  ;;  %v7959_v8 = vpop.f32.mrf.mxu0  ;;  %v17814_v25 = vunpack.i.l.bf16 %v12748_v26  ;;  %4912 = vmatprep.mubr.bf16.mxu1 %v4463_v54  ;;  %v17818_v54 = vrot.slane %v17718_v56, 3  ;;  %v3807_v42 = vrot.slane %v17780_v33, 6 }
 0x299   : > { %v1535_v5 = vsel %vm1428_vm5, %v17812_v16, %v1534_v9  ;;  %v13170_v14 = vsel %vm3713_vm6, %v3863_v58, %v17091_v52  ;;  %8045 = vmatmul.mubr.msk.bf16.gmra.mxu0 %vm3949_vm8, %v4488_v39  ;;  %v13178_v16 = vpop.permute.xlu1 %8764  ;;  %v17815_v8 = vrot.slane %v12033_v32, 5  ;;  %v17816_v39 = vunpack.i.h.bf16 %v12748_v26 }
 0x29a   : > { %17813 = vst [vmem:[#allocation13_spill] sm:$0xff] %v13170_v14  ;;  %v8998_v50 = vpack.i.bf16 %v1537_v35, %v1535_v5  ;;  %v4057_v4 = vsel %vm4028_vm9, %v12784_v28, %v17814_v25  ;;  %v17817_v5 = vunpack.i.l.bf16 %v12887_v20  ;;  %v13192_v28 = vpop.permute.xlu0 %8799  ;;  %v13194_v25 = vpop.f32.mrf.mxu0  ;;  %v17819_v52 = vrot.slane %v17690_v51, 3  ;;  %8048 = vmatprep.mubr.msk.bf16.mxu0 %vm9733_vm1, %v17342_v45 }
 0x29b   : > { %v3420_v58 = vsel %vm3321_vm7, %v17815_v8, %v3419_v17  ;;  %v4058_v35 = vsel %vm4028_vm9, %v12780_v12, %v17816_v39  ;;  %v3422_v26 = vsel %vm3321_vm7, %v3419_v17, %v17092_v0  ;;  %v17820_v12 = vunpack.i.h.bf16 %v12887_v20 }
 0x29c   : > { %v4136_v43 = vsel %vm4107_vm10, %v4057_v4, %v17817_v5  ;;  %v2520_v8 = vsel %vm883_vm2, %v17819_v52, %v17818_v54  ;;  %8999 = vrot.lane.b32.xlu1 %v8998_v50, %s9737_s23  ;;  %v13212_v39 = vsel %vm3949_vm8, %v2518_v36, %v8741_v22  ;;  %v9023_v52 = vpack.i.bf16 %v3422_v26, %v3420_v58  ;;  %v7962_v50 = vpop.f32.mrf.mxu0 }
 0x29d   : > { %v4137_v4 = vsel %vm4107_vm10, %v4058_v35, %v17820_v12  ;;  %v13215_v5 = vsel %vm3949_vm8, %v2520_v8, %v8742_v30  ;;  %v1255_v17 = vadd.f32 %v12582_v59, %v13008_v13  ;;  %v1926_v20 = vrot.slane %v12033_v32, 2  ;;  %v17821_v35 = vld [vmem:[#allocation80_spill] sm:$0xff]  ;;  %v13222_v0 = vpop.permute.xlu1 %8774 }
 0x29e   : > { %v4462_v54 = vpack.c.bf16 %v4137_v4, %v4136_v43  ;;  %v2794_v12 = vrot.slane %v17821_v35, 4  ;;  %9024 = vrot.lane.b32.xlu0 %v9023_v52, %s9738_s10  ;;  %v1260_v43 = vadd.f32 %v12582_v59, %v13043_v27  ;;  %v13230_v58 = vpop.permute.xlu0 %8809  ;;  %v13232_v13 = vpop.f32.mrf.mxu0  ;;  %v17824_v26 = vrot.slane %v17780_v33, 2 }
 0x29f   : > { %17822 = vst [vmem:[#allocation25_spill] sm:$0xff] %v13232_v13  ;;  %v13234_v8 = vmax.f32 %v1255_v17, 0.0  ;;  %v17825_v52 = vrot.slane %v17802_v61, 4  ;;  %v8732_v50 = vunpack.i.h.bf16 %v13033_v11  ;;  %v8731_v27 = vunpack.i.l.bf16 %v13033_v11 }
 0x2a0   : > { %4913 = vmatmul.mubr.bf16.gmra.mxu1 %v4462_v54  ;;  %v1927_v4 = vsel %vm1818_vm4, %v17824_v26, %v1926_v20  ;;  %v13246_v9 = vmax.f32 %v1260_v43, 0.0  ;;  %v7963_v17 = vpop.f32.mrf.mxu0  ;;  %v8752_v30 = vunpack.i.h.bf16 %v13006_v19  ;;  %v8751_v36 = vunpack.i.l.bf16 %v13006_v19 }
 0x2a1   : > { %17823 = vst [vmem:[#allocation63_spill] sm:$0xff] %v13234_v8  ;;  %v2795_v54 = vsel %vm882_vm0, %v17825_v52, %v2794_v12  ;;  %v9003_v22 = vpack.i.bf16 %v1927_v4, %v13093_v2  ;;  %v3867_v26 = vrot.slane %v13234_v8, 6  ;;  %v13252_v52 = vpop.permute.xlu1 %8789  ;;  %v8757_v2 = vunpack.i.h.bf16 %v13041_v21 }
 0x2a2   : > { %v9038_v59 = vpack.i.bf16 %v2795_v54, %v13098_v34  ;;  %17826 = vst [vmem:[#allocation66_spill] sm:$0xff] %v13246_v9  ;;  %v8756_v11 = vunpack.i.l.bf16 %v13041_v21  ;;  %v3869_v34 = vrot.slane %v13246_v9, 6  ;;  %v13260_v17 = vpop.permute.xlu0 %8814  ;;  %v13262_v19 = vpop.f32.mrf.mxu0  ;;  %v17828_v10 = vrot.slane %v13133_v41, 6  ;;  %v17831_v21 = vld [vmem:[#allocation46_spill] sm:$0xff] }
 0x2a3   : > { %9004 = vrot.lane.b32.xlu1 %v9003_v22, %s9736_s22  ;;  %17827 = vst [vmem:[#allocation69_spill] sm:$0xff] %v13262_v19  ;;  %v17830_v22 = vrot.slane %v17770_v55, 6  ;;  %v13276_v43 = vsel %vm3949_vm8, %v17787_v60, %v8732_v50  ;;  %v13280_v19 = vsel %vm3949_vm8, %v17784_v44, %v8731_v27  ;;  %v17834_v13 = vrot.slane %v17797_v29, 2 }
 0x2a4   : > { %9039 = vrot.lane.b32.xlu0 %v9038_v59, %s9737_s23  ;;  %v13267_v14 = vsel %vm3713_vm6, %v17828_v10, %v3867_v26  ;;  %v13283_v41 = vsel %vm3713_vm6, %v3867_v26, %v3869_v34  ;;  %v17833_v10 = vrot.slane %v12033_v32, 6  ;;  %v17835_v44 = vrot.slane %v17831_v21, 4 }
 0x2a5   : > { %17829 = vst [vmem:[#allocation64_spill] sm:$0xff] %v13267_v14  ;;  %v3808_v59 = vsel %vm3713_vm6, %v17830_v22, %v3807_v42  ;;  %17832 = vst [vmem:[#allocation78_spill] sm:$0xff] %v13283_v41  ;;  %v7966_v22 = vpop.f32.mrf.mxu0  ;;  %v13293_v60 = vsel %vm1818_vm4, %v1926_v20, %v17834_v13  ;;  %v13300_v27 = vpop.permute.xlu1 %8794  ;;  %v17838_v26 = vunpack.i.l.bf16 %v12845_v40  ;;  %v17839_v37 = vunpack.i.h.bf16 %v12845_v40 }
 0x2a6   : > { %v3810_v55 = vsel %vm3713_vm6, %v3807_v42, %v17833_v10  ;;  %v13298_v50 = vsel %vm882_vm0, %v2794_v12, %v17835_v44  ;;  %v9013_v34 = vpack.i.bf16 %v13293_v60, %v1927_v4  ;;  %v13308_v10 = vpop.permute.xlu0 %8829  ;;  %v4294_v12 = vsel %vm4028_vm9, %v13022_v63, %v8751_v36 }
 0x2a7   : > { %v4491_v33 = vpack.c.bf16 %v3810_v55, %v3808_v59  ;;  %v9048_v55 = vpack.i.bf16 %v13298_v50, %v2795_v54  ;;  %v13306_v59 = vpop.f32.mrf.mxu1  ;;  %v4295_v22 = vsel %vm4028_vm9, %v13036_v48, %v8752_v30  ;;  %v13317_v44 = vpop.f32.mrf.mxu0  ;;  %v4372_v54 = vsel %vm4107_vm10, %v4294_v12, %v8756_v11 }
 0x2a8   : > { %17836 = vst [vmem:[#allocation76_spill] sm:$0xff] %v13317_v44  ;;  %9014 = vrot.lane.b32.xlu1 %v9013_v34, %s9738_s10  ;;  %v4373_v13 = vsel %vm4107_vm10, %v4295_v22, %v8757_v2  ;;  %v2521_v63 = vrot.slane %v17722_v53, 3  ;;  %v8772_v36 = vunpack.i.h.bf16 %v13074_v7  ;;  %v17105_v30 = vrot.slane %v17802_v61, 1 }
 0x2a9   : > { %8049 = vmatmul.mubr.msk.bf16.gmra.mxu0 %vm3949_vm8, %v4491_v33  ;;  %9049 = vrot.lane.b32.xlu0 %v9048_v55, %s9736_s22  ;;  %v1538_v33 = vrot.slane %v17797_v29, 1  ;;  %v4804_v42 = vpop.f32.mrf.mxu1  ;;  %v4466_v48 = vpack.c.bf16 %v4373_v13, %v4372_v54  ;;  %v7967_v34 = vpop.f32.mrf.mxu0  ;;  %v17837_v2 = vrot.slane %v12033_v32, 1  ;;  %v8771_v54 = vunpack.i.l.bf16 %v13074_v7 }
 0x2aa   : > { %8052 = vmatprep.mubr.msk.bf16.mxu0 %vm9733_vm1, %v17342_v45  ;;  %v13330_v55 = vpop.permute.xlu1 %8804  ;;  %v3423_v42 = vrot.slane %v17821_v35, 5  ;;  %v13340_v13 = vpop.permute.xlu0 %8839  ;;  %v4060_v4 = vsel %vm4028_vm9, %v12948_v15, %v17839_v37  ;;  %v17841_v7 = vrot.slane %v17802_v61, 5  ;;  %v17842_v9 = vrot.slane %v17831_v21, 5 }
 0x2ab   : > { %v1539_v12 = vsel %vm1428_vm5, %v17837_v2, %v1538_v33  ;;  %v13338_v20 = vpop.f32.mrf.mxu1  ;;  %4920 = vmatprep.mubr.bf16.mxu1 %v4466_v48  ;;  %v1541_v34 = vsel %vm1428_vm5, %v1538_v33, %v17105_v30  ;;  %v4059_v2 = vsel %vm4028_vm9, %v12953_v62, %v17838_v26  ;;  %v13354_v11 = vpop.f32.mrf.mxu0  ;;  %v17843_v30 = vunpack.i.l.bf16 %v12992_v38 }
 0x2ac   : > { %17840 = vst [vmem:[#allocation82_spill] sm:$0xff] %v13354_v11  ;;  %v9028_v22 = vpack.i.bf16 %v1541_v34, %v1539_v12  ;;  %v3424_v48 = vsel %vm3321_vm7, %v17841_v7, %v3423_v42  ;;  %v3426_v33 = vsel %vm3321_vm7, %v3423_v42, %v17842_v9  ;;  %v17844_v15 = vrot.slane %v17718_v56, 3 }
 0x2ad   : > { %v4138_v62 = vsel %vm4107_vm10, %v4059_v2, %v17843_v30  ;;  %v4807_v26 = vpop.f32.mrf.mxu1  ;;  %v9053_v12 = vpack.i.bf16 %v3426_v33, %v3424_v48  ;;  %v17845_v34 = vunpack.i.h.bf16 %v12992_v38  ;;  %v7970_v8 = vpop.f32.mrf.mxu0  ;;  %v17846_v9 = vrot.slane %v11417_v23, 3 }
 0x2ae   : > { %v2522_v37 = vsel %vm883_vm2, %v17844_v15, %v2521_v63  ;;  %v13372_v14 = vpop.permute.xlu1 %8819  ;;  %9029 = vrot.lane.b32.xlu1 %v9028_v22, %s9737_s23  ;;  %v3811_v2 = vrot.slane %v17797_v29, 6  ;;  %v3813_v26 = vrot.slane %v17802_v61, 6  ;;  %v13382_v48 = vpop.permute.xlu0 %8844 }
 0x2af   : > { %v4139_v7 = vsel %vm4107_vm10, %v4060_v4, %v17845_v34  ;;  %v2524_v42 = vsel %vm883_vm2, %v2521_v63, %v17846_v9  ;;  %v13380_v15 = vpop.f32.mrf.mxu1  ;;  %v13385_v38 = vsel %vm3949_vm8, %v2522_v37, %v8771_v54  ;;  %9054 = vrot.lane.b32.xlu0 %v9053_v12, %s9738_s10  ;;  %v1930_v4 = vrot.slane %v17802_v61, 2  ;;  %v17847_v63 = vld [vmem:[#allocation47_spill] sm:$0xff]  ;;  %v13393_v33 = vpop.f32.mrf.mxu0 }
 0x2b0   : > { %v4465_v30 = vpack.c.bf16 %v4139_v7, %v4138_v62  ;;  %v13388_v8 = vsel %vm3949_vm8, %v2524_v42, %v8772_v36  ;;  %v2798_v22 = vrot.slane %v17847_v63, 4  ;;  %17848 = vst [vmem:[#allocation37_spill] sm:$0xff] %v13393_v33  ;;  %v17849_v62 = vrot.slane %v12033_v32, 6 }
 0x2b1   : > { %v3814_v7 = vsel %vm3713_vm6, %v3811_v2, %v3813_v26  ;;  %v8762_v54 = vunpack.i.h.bf16 %v13141_v18  ;;  %v8761_v36 = vunpack.i.l.bf16 %v13141_v18  ;;  %v4812_v37 = vpop.f32.mrf.mxu1  ;;  %v17850_v42 = vrot.slane %v17797_v29, 2  ;;  %v7971_v32 = vpop.f32.mrf.mxu0 }
 0x2b2   : > { %4921 = vmatmul.mubr.bf16.gmra.mxu1 %v4465_v30  ;;  %v3812_v34 = vsel %vm3713_vm6, %v17849_v62, %v3811_v2  ;;  %v17851_v30 = vrot.slane %v17831_v21, 4  ;;  %v13408_v62 = vpop.permute.xlu1 %8824  ;;  %v8746_v2 = vunpack.i.l.bf16 %v13107_v47  ;;  %v17113_v37 = vrot.slane %v17821_v35, 2 }
 0x2b3   : > { %v4494_v9 = vpack.c.bf16 %v3814_v7, %v3812_v34  ;;  %v1931_v40 = vsel %vm1818_vm4, %v17850_v42, %v1930_v4  ;;  %v13414_v34 = vpop.f32.mrf.mxu1  ;;  %v13416_v7 = vpop.permute.xlu0 %8859  ;;  %v8782_v42 = vunpack.i.h.bf16 %v13113_v31  ;;  %v8781_v12 = vunpack.i.l.bf16 %v13113_v31 }
 0x2b4   : > { %v2799_v41 = vsel %vm882_vm0, %v17851_v30, %v2798_v22  ;;  %v9033_v33 = vpack.i.bf16 %v1931_v40, %v13293_v60  ;;  %17852 = vst [vmem:[#allocation34_spill] sm:$0xff] %v13416_v7  ;;  %v8787_v32 = vunpack.i.h.bf16 %v13149_v49  ;;  %v17853_v30 = vld [vmem:[#allocation92_spill] sm:$0xff]  ;;  %v13423_v11 = vpop.f32.mrf.mxu0  ;;  %v13429_v60 = vsel %vm3949_vm8, %v17718_v56, %v8762_v54  ;;  %v17858_v56 = vld [vmem:[#allocation15_spill] sm:$0xff] }
 0x2b5   : > { %v9068_v18 = vpack.i.bf16 %v2799_v41, %v13298_v50  ;;  %8053 = vmatmul.mubr.msk.bf16.gmra.mxu0 %vm3949_vm8, %v4494_v9  ;;  %17854 = vst [vmem:[#allocation88_spill] sm:$0xff] %v13423_v11  ;;  %17855 = vst [vmem:[#allocation84_spill] sm:$0xff] %v13429_v60  ;;  %v13433_v50 = vsel %vm3949_vm8, %v17690_v51, %v8761_v36  ;;  %v8786_v31 = vunpack.i.l.bf16 %v13149_v49  ;;  %v4815_v29 = vpop.f32.mrf.mxu1  ;;  %v2525_v54 = vrot.slane %v17858_v56, 3  ;;  %v17861_v60 = vld [vmem:[#allocation14_spill] sm:$0xff] }
 0x2b6   : > { %9034 = vrot.lane.b32.xlu1 %v9033_v33, %s9736_s22  ;;  %17856 = vst [vmem:[#allocation81_spill] sm:$0xff] %v13433_v50  ;;  %v13439_v9 = vsel %vm1818_vm4, %v1930_v4, %v17113_v37  ;;  %v17857_v33 = vrot.slane %v17853_v30, 4  ;;  %8056 = vmatprep.mubr.msk.bf16.mxu0 %vm9733_vm1, %v17342_v45  ;;  %v8802_v51 = vunpack.i.h.bf16 %v13192_v28  ;;  %v3815_v49 = vrot.slane %v17821_v35, 6  ;;  %v7974_v36 = vpop.f32.mrf.mxu0  ;;  %v13451_v11 = vpop.permute.xlu1 %8834 }
 0x2b7   : > { %9069 = vrot.lane.b32.xlu0 %v9068_v18, %s9737_s23  ;;  %17859 = vst [vmem:[#allocation83_spill] sm:$0xff] %v13451_v11  ;;  %v9043_v4 = vpack.i.bf16 %v13439_v9, %v1931_v40  ;;  %v8801_v37 = vunpack.i.l.bf16 %v13192_v28  ;;  %v13459_v44 = vpop.permute.xlu0 %8869  ;;  %v4296_v36 = vsel %vm4028_vm9, %v13212_v39, %v8781_v12  ;;  %v4297_v40 = vsel %vm4028_vm9, %v13215_v5, %v8782_v42 }
 0x2b8   : > { %v13444_v18 = vsel %vm882_vm0, %v2798_v22, %v17857_v33  ;;  %v3817_v22 = vrot.slane %v17831_v21, 6  ;;  %v13457_v33 = vpop.f32.mrf.mxu1  ;;  %17860 = vst [vmem:[#allocation57_spill] sm:$0xff] %v13459_v44  ;;  %v3816_v7 = vsel %vm3713_vm6, %v3813_v26, %v3815_v49  ;;  %v13467_v11 = vpop.f32.mrf.mxu0  ;;  %v4374_v28 = vsel %vm4107_vm10, %v4296_v36, %v8786_v31 }
 0x2b9   : > { %v9078_v29 = vpack.i.bf16 %v13444_v18, %v2799_v41  ;;  %17862 = vst [vmem:[#allocation85_spill] sm:$0xff] %v13467_v11  ;;  %v4375_v26 = vsel %vm4107_vm10, %v4297_v40, %v8787_v32  ;;  %v1542_v50 = vrot.slane %v17821_v35, 1  ;;  %v17118_v5 = vrot.slane %v17831_v21, 1 }
 0x2ba   : > { %9044 = vrot.lane.b32.xlu1 %v9043_v4, %s9738_s10  ;;  %v3818_v41 = vsel %vm3713_vm6, %v3815_v49, %v3817_v22  ;;  %v4820_v39 = vpop.f32.mrf.mxu1  ;;  %v4469_v44 = vpack.c.bf16 %v4375_v26, %v4374_v28  ;;  %v3427_v42 = vrot.slane %v17847_v63, 5  ;;  %v7975_v4 = vpop.f32.mrf.mxu0  ;;  %v17117_v31 = vrot.slane %v17853_v30, 5 }
 0x2bb   : > { %9079 = vrot.lane.b32.xlu0 %v9078_v29, %s9736_s22  ;;  %v4497_v12 = vpack.c.bf16 %v3818_v41, %v3816_v7  ;;  %v13479_v11 = vpop.permute.xlu1 %8849  ;;  %v17863_v29 = vrot.slane %v17802_v61, 1  ;;  %v17864_v32 = vunpack.i.l.bf16 %v12958_v1  ;;  %v17865_v7 = vunpack.i.h.bf16 %v12958_v1  ;;  %v13495_v28 = vpop.permute.xlu0 %8874 }
 0x2bc   : > { %v13493_v41 = vpop.f32.mrf.mxu1  ;;  %4928 = vmatprep.mubr.bf16.mxu1 %v4469_v44  ;;  %v1545_v39 = vsel %vm1428_vm5, %v1542_v50, %v17118_v5  ;;  %v17868_v44 = vunpack.i.h.bf16 %v13107_v47  ;;  %v17122_v61 = vrot.slane %v17847_v63, 2 }
 0x2bd   : > { %v1543_v49 = vsel %vm1428_vm5, %v17863_v29, %v1542_v50  ;;  %v4061_v36 = vsel %vm4028_vm9, %v13088_v3, %v17864_v32  ;;  %v4062_v40 = vsel %vm4028_vm9, %v13081_v57, %v17865_v7  ;;  %8057 = vmatmul.mubr.msk.bf16.gmra.mxu0 %vm3949_vm8, %v4497_v12  ;;  %v17866_v3 = vrot.slane %v17831_v21, 5  ;;  %v13506_v57 = vpop.f32.mrf.mxu0 }
 0x2be   : > { %v4140_v4 = vsel %vm4107_vm10, %v4061_v36, %v8746_v2  ;;  %17867 = vst [vmem:[#allocation60_spill] sm:$0xff] %v13506_v57  ;;  %v9058_v32 = vpack.i.bf16 %v1545_v39, %v1543_v49  ;;  %v3430_v12 = vsel %vm3321_vm7, %v3427_v42, %v17117_v31  ;;  %v4141_v7 = vsel %vm4107_vm10, %v4062_v40, %v17868_v44  ;;  %v4823_v50 = vpop.f32.mrf.mxu1 }
 0x2bf   : > { %v3428_v1 = vsel %vm3321_vm7, %v17866_v3, %v3427_v42  ;;  %8060 = vmatprep.mubr.msk.bf16.mxu0 %vm9733_vm1, %v17342_v45  ;;  %v17869_v3 = vrot.slane %v11417_v23, 3  ;;  %v17870_v36 = vrot.slane %v17861_v60, 3  ;;  %v4468_v26 = vpack.c.bf16 %v4141_v7, %v4140_v4  ;;  %v7978_v29 = vpop.f32.mrf.mxu0  ;;  %v13523_v42 = vpop.permute.xlu1 %8854  ;;  %v17871_v50 = vld [vmem:[#allocation54_spill] sm:$0xff] }
 0x2c0   : > { %v9083_v39 = vpack.i.bf16 %v3430_v12, %v3428_v1  ;;  %9059 = vrot.lane.b32.xlu1 %v9058_v32, %s9737_s23  ;;  %v1934_v44 = vrot.slane %v17831_v21, 2  ;;  %v8811_v1 = vunpack.i.l.bf16 %v13230_v58  ;;  %v3819_v4 = vrot.slane %v17847_v63, 6  ;;  %v13539_v29 = vld [vmem:[#allocation6] ss:$0 sm:$0xff] }
 0x2c1   : > { %v2526_v2 = vsel %vm883_vm2, %v17869_v3, %v2525_v54  ;;  %v2528_v49 = vsel %vm883_vm2, %v2525_v54, %v17870_v36  ;;  %v2802_v3 = vrot.slane %v17871_v50, 4  ;;  %4929 = vmatmul.mubr.bf16.gmra.mxu1 %v4468_v26  ;;  %v8812_v54 = vunpack.i.h.bf16 %v13230_v58  ;;  %v13543_v32 = vpop.f32.mrf.mxu0 }
 0x2c2   : > { %v13526_v47 = vsel %vm3949_vm8, %v2526_v2, %v8801_v37  ;;  %v13529_v40 = vsel %vm3949_vm8, %v2528_v49, %v8802_v51  ;;  %9084 = vrot.lane.b32.xlu0 %v9083_v39, %s9738_s10  ;;  %v17123_v37 = vrot.slane %v17853_v30, 6  ;;  %v13541_v51 = vpop.permute.xlu0 %8889  ;;  %17872 = vst [vmem:[#allocation41_spill] sm:$0xff] %v13543_v32  ;;  %v17873_v12 = vrot.slane %v17821_v35, 2  ;;  %v13553_v49 = vpop.f32.mrf.mxu1  ;;  %v17876_v32 = vld [vmem:[#allocation53_spill] sm:$0xff] }
 0x2c3   : > { %v17874_v26 = vrot.slane %v17853_v30, 4  ;;  %v8792_v58 = vunpack.i.h.bf16 %v13252_v52  ;;  %v8791_v36 = vunpack.i.l.bf16 %v13252_v52  ;;  %17875 = vst [vmem:[#allocation38_spill] sm:$0xff] %v13553_v49  ;;  %v3820_v5 = vsel %vm3713_vm6, %v3817_v22, %v3819_v4  ;;  %v7979_v35 = vpop.f32.mrf.mxu0 }
 0x2c4   : > { %v1935_v7 = vsel %vm1818_vm4, %v17873_v12, %v1934_v44  ;;  %v3822_v12 = vsel %vm3713_vm6, %v3819_v4, %v17123_v37  ;;  %v17121_v52 = vrot.slane %v17876_v32, 4  ;;  %v4803_v57 = vadd.f32 %v13539_v29, %v13306_v59 }
 0x2c5   : > { %v2803_v2 = vsel %vm882_vm0, %v17874_v26, %v2802_v3  ;;  %v9063_v39 = vpack.i.bf16 %v1935_v7, %v13439_v9  ;;  %v4500_v26 = vpack.c.bf16 %v3822_v12, %v3820_v5  ;;  %v4828_v9 = vpop.f32.mrf.mxu1  ;;  %v8776_v49 = vunpack.i.l.bf16 %v13222_v0  ;;  %v13573_v5 = vpop.permute.xlu1 %8864 }
 0x2c6   : > { %v9098_v31 = vpack.i.bf16 %v2803_v2, %v13444_v18  ;;  %v8777_v18 = vunpack.i.h.bf16 %v13222_v0  ;;  %v8817_v22 = vunpack.i.h.bf16 %v13260_v17  ;;  %v8816_v35 = vunpack.i.l.bf16 %v13260_v17  ;;  %v13575_v4 = vpop.f32.mrf.mxu0 }
 0x2c7   : > { %9064 = vrot.lane.b32.xlu1 %v9063_v39, %s9736_s22  ;;  %17877 = vst [vmem:[#allocation31_spill] sm:$0xff] %v13575_v4  ;;  %v13579_v59 = vsel %vm3949_vm8, %v11417_v23, %v8792_v58  ;;  %8061 = vmatmul.mubr.msk.bf16.gmra.mxu0 %vm3949_vm8, %v4500_v26  ;;  %v13585_v0 = vsel %vm1818_vm4, %v1934_v44, %v17122_v61  ;;  %v13595_v39 = vpop.f32.mrf.mxu1  ;;  %v17880_v61 = vld [vmem:[#allocation24_spill] sm:$0xff]  ;;  %v17884_v37 = vrot.slane %v17853_v30, 5 }
 0x2c8   : > { %9099 = vrot.lane.b32.xlu0 %v9098_v31, %s9737_s23  ;;  %v13590_v31 = vsel %vm882_vm0, %v2802_v3, %v17121_v52  ;;  %v13593_v17 = vadd.f32 %v13115_v46, %v4803_v57  ;;  %v13599_v23 = vsel %vm3949_vm8, %v17722_v53, %v8791_v36  ;;  %v9073_v58 = vpack.i.bf16 %v13585_v0, %v1935_v7  ;;  %v13606_v3 = vpop.permute.xlu0 %8899  ;;  %v7982_v26 = vpop.f32.mrf.mxu0  ;;  %v17878_v57 = vld [vmem:[#allocation21_spill] sm:$0xff] }
 0x2c9   : > { %v9108_v12 = vpack.i.bf16 %v13590_v31, %v2803_v2  ;;  %8064 = vmatprep.mubr.msk.bf16.mxu0 %vm9733_vm1, %v17342_v45  ;;  %v2529_v9 = vrot.slane %v17878_v57, 3  ;;  %v4298_v53 = vsel %vm4028_vm9, %v13385_v38, %v8811_v1  ;;  %v4299_v7 = vsel %vm4028_vm9, %v13388_v8, %v8812_v54  ;;  %v4831_v36 = vpop.f32.mrf.mxu1 }
 0x2ca   : > { %v8831_v2 = vunpack.i.l.bf16 %v13308_v10  ;;  %v4376_v44 = vsel %vm4107_vm10, %v4298_v53, %v8816_v35  ;;  %v4377_v26 = vsel %vm4107_vm10, %v4299_v7, %v8817_v22  ;;  %v1546_v46 = vrot.slane %v17847_v63, 1  ;;  %v13620_v52 = vpop.f32.mrf.mxu0  ;;  %v13637_v7 = vpop.permute.xlu1 %8879 }
 0x2cb   : > { %9074 = vrot.lane.b32.xlu1 %v9073_v58, %s9738_s10  ;;  %17879 = vst [vmem:[#allocation75_spill] sm:$0xff] %v13620_v52  ;;  %v4472_v1 = vpack.c.bf16 %v4377_v26, %v4376_v44  ;;  %v17124_v8 = vrot.slane %v17853_v30, 1  ;;  %v3431_v54 = vrot.slane %v17871_v50, 5  ;;  %v17881_v58 = vrot.slane %v17831_v21, 1 }
 0x2cc   : > { %9109 = vrot.lane.b32.xlu0 %v9108_v12, %s9736_s22  ;;  %v17882_v35 = vunpack.i.l.bf16 %v13066_v24  ;;  %v17883_v53 = vunpack.i.h.bf16 %v13066_v24  ;;  %v7983_v26 = vpop.f32.mrf.mxu0 }
 0x2cd   : > { %v1547_v12 = vsel %vm1428_vm5, %v17881_v58, %v1546_v46  ;;  %4936 = vmatprep.mubr.bf16.mxu1 %v4472_v1  ;;  %v1549_v58 = vsel %vm1428_vm5, %v1546_v46, %v17124_v8  ;;  %v3432_v38 = vsel %vm3321_vm7, %v17884_v37, %v3431_v54  ;;  %v4806_v1 = vadd.f32 %v13539_v29, %v13338_v20  ;;  %v13652_v26 = vpop.permute.xlu0 %8904 }
 0x2ce   : > { %v4063_v22 = vsel %vm4028_vm9, %v13280_v19, %v17882_v35  ;;  %v4064_v44 = vsel %vm4028_vm9, %v13276_v43, %v17883_v53  ;;  %v9088_v24 = vpack.i.bf16 %v1549_v58, %v1547_v12  ;;  %v17885_v35 = vrot.slane %v17876_v32, 5  ;;  %v13654_v46 = vpop.f32.mrf.mxu0 }
 0x2cf   : > { %v4142_v36 = vsel %vm4107_vm10, %v4063_v22, %v8776_v49  ;;  %v4143_v19 = vsel %vm4107_vm10, %v4064_v44, %v8777_v18  ;;  %17886 = vst [vmem:[#allocation35_spill] sm:$0xff] %v13654_v46  ;;  %v17887_v37 = vrot.slane %v17861_v60, 3  ;;  %v8832_v18 = vunpack.i.h.bf16 %v13308_v10  ;;  %v13661_v22 = vpop.f32.mrf.mxu1 }
 0x2d0   : > { %v3434_v43 = vsel %vm3321_vm7, %v3431_v54, %v17885_v35  ;;  %v4471_v53 = vpack.c.bf16 %v4143_v19, %v4142_v36  ;;  %9089 = vrot.lane.b32.xlu1 %v9088_v24, %s9737_s23  ;;  %v13668_v20 = vadd.f32 %v13151_v6, %v4806_v1  ;;  %v3823_v36 = vrot.slane %v17871_v50, 6  ;;  %v7986_v58 = vpop.f32.mrf.mxu0 }
 0x2d1   : > { %v2530_v49 = vsel %vm883_vm2, %v17887_v37, %v2529_v9  ;;  %v9113_v12 = vpack.i.bf16 %v3434_v43, %v3432_v38  ;;  %v3825_v44 = vrot.slane %v17876_v32, 6  ;;  %v17888_v19 = vrot.slane %v17880_v61, 3  ;;  %v17889_v38 = vld [vmem:[#allocation86_spill] sm:$0xff]  ;;  %v4836_v6 = vpop.f32.mrf.mxu1 }
 0x2d2   : > { %v13664_v54 = vsel %vm3949_vm8, %v2530_v49, %v8831_v2  ;;  %4937 = vmatmul.mubr.bf16.gmra.mxu1 %v4471_v53  ;;  %v1938_v2 = vrot.slane %v17853_v30, 2  ;;  %v2806_v35 = vrot.slane %v17889_v38, 4  ;;  %v4811_v24 = vadd.f32 %v13539_v29, %v13380_v15  ;;  %v13686_v49 = vpop.permute.xlu1 %8884 }
 0x2d3   : > { %v2532_v10 = vsel %vm883_vm2, %v2529_v9, %v17888_v19  ;;  %9114 = vrot.lane.b32.xlu0 %v9113_v12, %s9738_s10  ;;  %v17890_v43 = vrot.slane %v17853_v30, 6  ;;  %v3826_v1 = vsel %vm3713_vm6, %v3823_v36, %v3825_v44  ;;  %v8822_v37 = vunpack.i.h.bf16 %v13372_v14  ;;  %v13688_v12 = vpop.permute.xlu0 %8919  ;;  %v13701_v21 = vpop.f32.mrf.mxu1 }
 0x2d4   : > { %v8821_v9 = vunpack.i.l.bf16 %v13372_v14  ;;  %v17891_v19 = vrot.slane %v17847_v63, 2  ;;  %v17892_v6 = vrot.slane %v17876_v32, 4  ;;  %17894 = vst [vmem:[#allocation43_spill] sm:$0xff] %v13701_v21  ;;  %v13704_v14 = vsel %vm3949_vm8, %v2532_v10, %v8832_v18 }
 0x2d5   : > { %v3824_v53 = vsel %vm3713_vm6, %v17890_v43, %v3823_v36  ;;  %v13697_v43 = vadd.f32 %v13194_v25, %v4811_v24  ;;  %v13699_v36 = vpop.f32.mrf.mxu0  ;;  %v8841_v25 = vunpack.i.l.bf16 %v13340_v13  ;;  %v17127_v24 = vrot.slane %v17871_v50, 2  ;;  %v4839_v46 = vpop.f32.mrf.mxu1 }
 0x2d6   : > { %v4503_v58 = vpack.c.bf16 %v3826_v1, %v3824_v53  ;;  %v1939_v15 = vsel %vm1818_vm4, %v17891_v19, %v1938_v2  ;;  %v2807_v8 = vsel %vm882_vm0, %v17892_v6, %v2806_v35  ;;  %17893 = vst [vmem:[#allocation45_spill] sm:$0xff] %v13699_v36  ;;  %v8842_v6 = vunpack.i.h.bf16 %v13340_v13 }
 0x2d7   : > { %v9093_v1 = vpack.i.bf16 %v1939_v15, %v13585_v0  ;;  %v9128_v19 = vpack.i.bf16 %v2807_v8, %v13590_v31  ;;  %v7987_v36 = vpop.f32.mrf.mxu0  ;;  %v13719_v0 = vsel %vm3949_vm8, %v17861_v60, %v8822_v37  ;;  %v17895_v31 = vld [vmem:[#allocation96_spill] sm:$0xff]  ;;  %v4814_v13 = vadd.f32 %v13539_v29, %v13414_v34  ;;  %v13751_v18 = vpop.permute.xlu0 %8929 }
 0x2d8   : > { %8065 = vmatmul.mubr.msk.bf16.gmra.mxu0 %vm3949_vm8, %v4503_v58  ;;  %v17128_v10 = vrot.slane %v17895_v31, 4  ;;  %v13724_v58 = vpop.permute.xlu1 %8894  ;;  %v13729_v46 = vsel %vm3949_vm8, %v17858_v56, %v8821_v9  ;;  %v13735_v60 = vsel %vm1818_vm4, %v1938_v2, %v17127_v24  ;;  %v8846_v34 = vunpack.i.l.bf16 %v13382_v48  ;;  %v17897_v9 = vld [vmem:[#allocation25_spill] sm:$0xff]  ;;  %17898 = vst [vmem:[#allocation98_spill] sm:$0xff] %v13751_v18  ;;  %v13778_v21 = vpop.f32.mrf.mxu1 }
 0x2d9   : > { %9094 = vrot.lane.b32.xlu1 %v9093_v1, %s9736_s22  ;;  %9129 = vrot.lane.b32.xlu0 %v9128_v19, %s9737_s23  ;;  %v8847_v1 = vunpack.i.h.bf16 %v13382_v48  ;;  %v13739_v37 = vpop.f32.mrf.mxu0  ;;  %v9103_v19 = vpack.i.bf16 %v13735_v60, %v1939_v15  ;;  %v13749_v36 = vadd.f32 %v17897_v9, %v4814_v13  ;;  %v3827_v53 = vrot.slane %v17889_v38, 6  ;;  %v17899_v15 = vld [vmem:[#allocation33_spill] sm:$0xff]  ;;  %v17901_v9 = vld [vmem:[#allocation68_spill] sm:$0xff]  ;;  %17903 = vst [vmem:[#allocation44_spill] sm:$0xff] %v13778_v21 }
 0x2da   : > { %8068 = vmatprep.mubr.msk.bf16.mxu0 %vm9733_vm1, %v17342_v45  ;;  %17896 = vst [vmem:[#allocation42_spill] sm:$0xff] %v13739_v37  ;;  %v13746_v56 = vsel %vm882_vm0, %v2806_v35, %v17128_v10  ;;  %v17130_v48 = vrot.slane %v17895_v31, 6  ;;  %v2533_v37 = vrot.slane %v17899_v15, 3  ;;  %v17900_v35 = vld [vmem:[#allocation34_spill] sm:$0xff] }
 0x2db   : > { %v9138_v2 = vpack.i.bf16 %v13746_v56, %v2807_v8  ;;  %v7990_v63 = vpop.f32.mrf.mxu0  ;;  %v8862_v10 = vunpack.i.h.bf16 %v17900_v35  ;;  %v8861_v13 = vunpack.i.l.bf16 %v17900_v35  ;;  %v3828_v8 = vsel %vm3713_vm6, %v3825_v44, %v3827_v53 }
 0x2dc   : > { %v3830_v24 = vsel %vm3713_vm6, %v3827_v53, %v17130_v48  ;;  %v4300_v63 = vsel %vm4028_vm9, %v13526_v47, %v8841_v25  ;;  %v13776_v44 = vpop.permute.xlu1 %8909  ;;  %v1550_v48 = vrot.slane %v17871_v50, 1  ;;  %v17132_v47 = vrot.slane %v17876_v32, 1 }
 0x2dd   : > { %9104 = vrot.lane.b32.xlu1 %v9103_v19, %s9738_s10  ;;  %9139 = vrot.lane.b32.xlu0 %v9138_v2, %s9736_s22  ;;  %v4301_v19 = vsel %vm4028_vm9, %v13529_v40, %v8842_v6  ;;  %v13771_v4 = vpop.f32.mrf.mxu0  ;;  %v4506_v18 = vpack.c.bf16 %v3830_v24, %v3828_v8  ;;  %v4378_v52 = vsel %vm4107_vm10, %v4300_v63, %v8846_v34  ;;  %v3435_v40 = vrot.slane %v17889_v38, 5  ;;  %v17905_v34 = vld [vmem:[#allocation81_spill] sm:$0xff]  ;;  %v17907_v63 = vld [vmem:[#allocation84_spill] sm:$0xff] }
 0x2de   : > { %17902 = vst [vmem:[#allocation16_spill] sm:$0xff] %v13771_v4  ;;  %v4379_v2 = vsel %vm4107_vm10, %v4301_v19, %v8847_v1  ;;  %v17133_v25 = vrot.slane %v17895_v31, 5  ;;  %v17904_v24 = vunpack.i.l.bf16 %v13178_v16  ;;  %v17906_v8 = vunpack.i.h.bf16 %v13178_v16 }
 0x2df   : > { %v4475_v53 = vpack.c.bf16 %v4379_v2, %v4378_v52  ;;  %v7991_v6 = vpop.f32.mrf.mxu0  ;;  %v4819_v19 = vadd.f32 %v13539_v29, %v13457_v33  ;;  %v13795_v2 = vpop.permute.xlu0 %8934  ;;  %v17910_v16 = vrot.slane %v17876_v32, 5 }
 0x2e0   : > { %8069 = vmatmul.mubr.msk.bf16.gmra.mxu0 %vm3949_vm8, %v4506_v18  ;;  %v4065_v1 = vsel %vm4028_vm9, %v17905_v34, %v17904_v24  ;;  %v4066_v52 = vsel %vm4028_vm9, %v17907_v63, %v17906_v8  ;;  %17908 = vst [vmem:[#allocation65_spill] sm:$0xff] %v13795_v2  ;;  %v4844_v6 = vpop.f32.mrf.mxu1  ;;  %v17909_v18 = vrot.slane %v17853_v30, 1  ;;  %v1553_v24 = vsel %vm1428_vm5, %v1550_v48, %v17132_v47 }
 0x2e1   : > { %4944 = vmatprep.mubr.bf16.mxu1 %v4475_v53  ;;  %v3436_v34 = vsel %vm3321_vm7, %v17910_v16, %v3435_v40  ;;  %v17911_v8 = vunpack.i.l.bf16 %v13330_v55  ;;  %v13809_v63 = vpop.f32.mrf.mxu0  ;;  %v3438_v53 = vsel %vm3321_vm7, %v3435_v40, %v17133_v25  ;;  %8072 = vmatprep.mubr.msk.bf16.mxu0 %vm9733_vm1, %v17342_v45 }
 0x2e2   : > { %v1551_v35 = vsel %vm1428_vm5, %v17909_v18, %v1550_v48  ;;  %17912 = vst [vmem:[#allocation67_spill] sm:$0xff] %v13809_v63  ;;  %v17913_v18 = vunpack.i.h.bf16 %v13330_v55  ;;  %v17914_v48 = vld [vmem:[#allocation69_spill] sm:$0xff]  ;;  %v13822_v16 = vpop.f32.mrf.mxu1  ;;  %v17918_v55 = vrot.slane %v17901_v9, 3 }
 0x2e3   : > { %v4144_v33 = vsel %vm4107_vm10, %v4065_v1, %v17911_v8  ;;  %v9118_v6 = vpack.i.bf16 %v1553_v24, %v1551_v35  ;;  %v13818_v47 = vadd.f32 %v17914_v48, %v4819_v19  ;;  %17916 = vst [vmem:[#allocation48_spill] sm:$0xff] %v13822_v16  ;;  %v17917_v35 = vrot.slane %v17880_v61, 3  ;;  %v7994_v25 = vpop.f32.mrf.mxu0  ;;  %v13837_v1 = vpop.permute.xlu1 %8914 }
 0x2e4   : > { %v4145_v30 = vsel %vm4107_vm10, %v4066_v52, %v17913_v18  ;;  %v9143_v8 = vpack.i.bf16 %v3438_v53, %v3436_v34  ;;  %v2536_v52 = vsel %vm883_vm2, %v2533_v37, %v17918_v55  ;;  %v1942_v48 = vrot.slane %v17876_v32, 2  ;;  %17919 = vst [vmem:[#allocation61_spill] sm:$0xff] %v13837_v1  ;;  %v4847_v63 = vpop.f32.mrf.mxu1 }
 0x2e5   : > { %17915 = vst [vmem:[#allocation51_spill] sm:$0xff] %v13818_v47  ;;  %v2534_v24 = vsel %vm883_vm2, %v17917_v35, %v2533_v37  ;;  %v4474_v40 = vpack.c.bf16 %v4145_v30, %v4144_v33  ;;  %9119 = vrot.lane.b32.xlu1 %v9118_v6, %s9737_s23  ;;  %v17134_v18 = vmax.f32 %v13818_v47, 0.0  ;;  %v17920_v34 = vmax.f32 %v13749_v36, 0.0  ;;  %v17921_v37 = vld [vmem:[#allocation28_spill] sm:$0xff]  ;;  %v13848_v6 = vpop.permute.xlu0 %8949  ;;  %v13850_v53 = vpop.f32.mrf.mxu0  ;;  %v17924_v35 = vld [vmem:[#allocation83_spill] sm:$0xff] }
 0x2e6   : > { %v13832_v19 = vsel %vm3949_vm8, %v2534_v24, %v8861_v13  ;;  %v13842_v25 = vsel %vm3949_vm8, %v2536_v52, %v8862_v10  ;;  %9144 = vrot.lane.b32.xlu0 %v9143_v8, %s9738_s10  ;;  %v2810_v13 = vrot.slane %v17921_v37, 4  ;;  %v4822_v33 = vadd.f32 %v13539_v29, %v13493_v41  ;;  %17922 = vst [vmem:[#allocation23_spill] sm:$0xff] %v13848_v6 }
 0x2e7   : > { %v5611_v30 = vrot.slane %v17920_v34, 2  ;;  %4945 = vmatmul.mubr.bf16.gmra.mxu1 %v4474_v40  ;;  %17923 = vst [vmem:[#allocation52_spill] sm:$0xff] %v13850_v53  ;;  %v5612_v63 = vrot.slane %v17134_v18, 2  ;;  %v17925_v55 = vrot.slane %v17871_v50, 2  ;;  %v17926_v52 = vrot.slane %v17895_v31, 4  ;;  %v17927_v34 = vld [vmem:[#allocation76_spill] sm:$0xff]  ;;  %v7995_v18 = vpop.f32.mrf.mxu0  ;;  %v13879_v21 = vpop.permute.xlu1 %8924 }
 0x2e8   : > { %v13864_v4 = vadd.f32 %v17927_v34, %v4822_v33  ;;  %v8852_v53 = vunpack.i.h.bf16 %v13479_v11  ;;  %v8851_v50 = vunpack.i.l.bf16 %v13479_v11  ;;  %17932 = vst [vmem:[#allocation77_spill] sm:$0xff] %v13879_v21  ;;  %v13890_v33 = vpop.f32.mrf.mxu1  ;;  %v8876_v21 = vunpack.i.l.bf16 %v13495_v28 }
 0x2e9   : > { %v1943_v8 = vsel %vm1818_vm4, %v17925_v55, %v1942_v48  ;;  %v2811_v41 = vsel %vm882_vm0, %v17926_v52, %v2810_v13  ;;  %v5613_v24 = vsel %vm1818_vm4, %v5611_v30, %v5612_v63  ;;  %v3831_v55 = vrot.slane %v17921_v37, 6  ;;  %v17931_v52 = vld [vmem:[#allocation89_spill] sm:$0xff]  ;;  %17936 = vst [vmem:[#allocation91_spill] sm:$0xff] %v13890_v33 }
 0x2ea   : > { %v9123_v40 = vpack.i.bf16 %v1943_v8, %v13735_v60  ;;  %17928 = vst [vmem:[#allocation71_spill] sm:$0xff] %v13864_v4  ;;  %v9158_v10 = vpack.i.bf16 %v2811_v41, %v13746_v56  ;;  %v17929_v60 = vmax.f32 %v13593_v17, 0.0  ;;  %v17933_v30 = vld [vmem:[#allocation57_spill] sm:$0xff]  ;;  %v17934_v17 = vrot.slane %v17895_v31, 6  ;;  %v4852_v47 = vpop.f32.mrf.mxu1 }
 0x2eb   : > { %v8872_v56 = vunpack.i.h.bf16 %v17933_v30  ;;  %v8871_v11 = vunpack.i.l.bf16 %v17933_v30  ;;  %v17937_v18 = vmax.f32 %v13864_v4, 0.0  ;;  %v17938_v30 = vrot.slane %v17931_v52, 6 }
 0x2ec   : > { %v13873_v16 = vmax.f32 %v17929_v60, %v5613_v24  ;;  %9124 = vrot.lane.b32.xlu1 %v9123_v40, %s9736_s22  ;;  %9159 = vrot.lane.b32.xlu0 %v9158_v10, %s9737_s23  ;;  %v3832_v24 = vsel %vm3713_vm6, %v17934_v17, %v3831_v55  ;;  %v13888_v60 = vpop.f32.mrf.mxu0  ;;  %v17939_v6 = vrot.slane %v17889_v38, 2  ;;  %v13905_v40 = vpop.permute.xlu0 %8959 }
 0x2ed   : > { %17935 = vst [vmem:[#allocation79_spill] sm:$0xff] %v13888_v60  ;;  %v13894_v34 = vrot.slane %v17937_v18, 2  ;;  %v3834_v10 = vsel %vm3713_vm6, %v3831_v55, %v17938_v30  ;;  %v8877_v60 = vunpack.i.h.bf16 %v13495_v28  ;;  %v17940_v18 = vrot.slane %v17931_v52, 4 }
 0x2ee   : > { %17930 = vst [vmem:[#allocation73_spill] sm:$0xff] %v13873_v16  ;;  %v13903_v17 = vsel %vm1818_vm4, %v1942_v48, %v17939_v6  ;;  %v4509_v33 = vpack.c.bf16 %v3834_v10, %v3832_v24  ;;  %v7998_v2 = vpop.f32.mrf.mxu0  ;;  %v13918_v48 = vsel %vm3949_vm8, %v17880_v61, %v8852_v53  ;;  %v13922_v28 = vsel %vm3949_vm8, %v17878_v57, %v8851_v50  ;;  %v13937_v50 = vpop.f32.mrf.mxu1 }
 0x2ef   : > { %v9133_v4 = vpack.i.bf16 %v13903_v17, %v1943_v8  ;;  %v13912_v1 = vsel %vm882_vm0, %v2810_v13, %v17940_v18  ;;  %v5615_v55 = vsel %vm1818_vm4, %v5612_v63, %v13894_v34  ;;  %v17941_v8 = vmax.f32 %v13668_v20, 0.0  ;;  %v13947_v63 = vpop.permute.xlu1 %8939 }
 0x2f0   : > { %v9168_v6 = vpack.i.bf16 %v13912_v1, %v2811_v41  ;;  %8073 = vmatmul.mubr.msk.bf16.gmra.mxu0 %vm3949_vm8, %v4509_v33  ;;  %v4302_v61 = vsel %vm4028_vm9, %v13664_v54, %v8871_v11  ;;  %v13935_v13 = vpop.f32.mrf.mxu0  ;;  %v4303_v20 = vsel %vm4028_vm9, %v13704_v14, %v8872_v56  ;;  %v1554_v53 = vrot.slane %v17889_v38, 1  ;;  %v17944_v54 = vld [vmem:[#allocation27_spill] sm:$0xff]  ;;  %v4855_v18 = vpop.f32.mrf.mxu1 }
 0x2f1   : > { %v13927_v24 = vmax.f32 %v17941_v8, %v5615_v55  ;;  %9134 = vrot.lane.b32.xlu1 %v9133_v4, %s9738_s10  ;;  %17943 = vst [vmem:[#allocation15_spill] sm:$0xff] %v13935_v13  ;;  %v4380_v4 = vsel %vm4107_vm10, %v4302_v61, %v8876_v21  ;;  %8076 = vmatprep.mubr.msk.bf16.mxu0 %vm9733_vm1, %v17342_v45  ;;  %v2537_v41 = vrot.slane %v17944_v54, 3  ;;  %v8892_v33 = vunpack.i.h.bf16 %v13541_v51  ;;  %v13958_v8 = vpop.permute.xlu0 %8964  ;;  %v17963_v13 = vld [vmem:[#allocation37_spill] sm:$0xff] }
 0x2f2   : > { %9169 = vrot.lane.b32.xlu0 %v9168_v6, %s9736_s22  ;;  %v4381_v11 = vsel %vm4107_vm10, %v4303_v20, %v8877_v60  ;;  %v17142_v30 = vrot.slane %v17895_v31, 1  ;;  %v7999_v10 = vpop.f32.mrf.mxu0  ;;  %v8891_v14 = vunpack.i.l.bf16 %v13541_v51  ;;  %v17945_v56 = vrot.slane %v17876_v32, 1  ;;  %v17946_v20 = vld [vmem:[#allocation38_spill] sm:$0xff] }
 0x2f3   : > { %17942 = vst [vmem:[#allocation94_spill] sm:$0xff] %v13927_v24  ;;  %v4478_v21 = vpack.c.bf16 %v4381_v11, %v4380_v4  ;;  %v3439_v6 = vrot.slane %v17921_v37, 5  ;;  %v17145_v60 = vrot.slane %v17931_v52, 5  ;;  %v4827_v10 = vadd.f32 %v13539_v29, %v17946_v20  ;;  %v13999_v16 = vpop.permute.xlu1 %8944 }
 0x2f4   : > { %v1555_v55 = vsel %vm1428_vm5, %v17945_v56, %v1554_v53  ;;  %v1557_v61 = vsel %vm1428_vm5, %v1554_v53, %v17142_v30  ;;  %v17947_v51 = vunpack.i.l.bf16 %v13300_v27  ;;  %v13970_v11 = vpop.f32.mrf.mxu0  ;;  %v17949_v56 = vrot.slane %v17895_v31, 5 }
 0x2f5   : > { %17948 = vst [vmem:[#allocation14_spill] sm:$0xff] %v13970_v11  ;;  %4952 = vmatprep.mubr.bf16.mxu1 %v4478_v21  ;;  %v9148_v18 = vpack.i.bf16 %v1557_v61, %v1555_v55  ;;  %v17950_v53 = vunpack.i.h.bf16 %v13300_v27  ;;  %v17951_v20 = vunpack.i.l.bf16 %v17924_v35  ;;  %v17952_v30 = vrot.slane %v17901_v9, 3  ;;  %v17953_v55 = vld [vmem:[#allocation82_spill] sm:$0xff] }
 0x2f6   : > { %v4067_v4 = vsel %vm4028_vm9, %v13599_v23, %v17947_v51  ;;  %v3440_v57 = vsel %vm3321_vm7, %v17949_v56, %v3439_v6  ;;  %v3442_v21 = vsel %vm3321_vm7, %v3439_v6, %v17145_v60  ;;  %v13989_v61 = vadd.f32 %v17953_v55, %v4827_v10  ;;  %v17955_v56 = vld [vmem:[#allocation30_spill] sm:$0xff]  ;;  %v14001_v6 = vpop.permute.xlu0 %8979  ;;  %v17956_v55 = vld [vmem:[#allocation87_spill] sm:$0xff] }
 0x2f7   : > { %v4068_v47 = vsel %vm4028_vm9, %v13579_v59, %v17950_v53  ;;  %v4146_v2 = vsel %vm4107_vm10, %v4067_v4, %v17951_v20  ;;  %v2538_v23 = vsel %vm883_vm2, %v17952_v30, %v2537_v41  ;;  %v17954_v27 = vunpack.i.h.bf16 %v17924_v35  ;;  %v8002_v59 = vpop.f32.mrf.mxu0  ;;  %9149 = vrot.lane.b32.xlu1 %v9148_v18, %s9737_s23 }
 0x2f8   : > { %v13996_v4 = vsel %vm3949_vm8, %v2538_v23, %v8891_v14  ;;  %v9173_v30 = vpack.i.bf16 %v3442_v21, %v3440_v57  ;;  %v17149_v35 = vmax.f32 %v13989_v61, 0.0  ;;  %v14009_v14 = vpop.f32.mrf.mxu1  ;;  %v2814_v57 = vrot.slane %v17956_v55, 4 }
 0x2f9   : > { %v4147_v51 = vsel %vm4107_vm10, %v4068_v47, %v17954_v27  ;;  %v3835_v47 = vrot.slane %v17956_v55, 6  ;;  %v17957_v27 = vld [vmem:[#allocation26_spill] sm:$0xff]  ;;  %v14007_v60 = vpop.f32.mrf.mxu0  ;;  %17959 = vst [vmem:[#allocation24_spill] sm:$0xff] %v14009_v14  ;;  %v4830_v18 = vadd.f32 %v13539_v29, %v13595_v39  ;;  %v8882_v23 = vunpack.i.h.bf16 %v13637_v7 }
 0x2fa   : > { %v4477_v20 = vpack.c.bf16 %v4147_v51, %v4146_v2  ;;  %v17152_v59 = vrot.slane %v17957_v27, 6  ;;  %17958 = vst [vmem:[#allocation21_spill] sm:$0xff] %v14007_v60  ;;  %9174 = vrot.lane.b32.xlu0 %v9173_v30, %s9738_s10  ;;  %v1946_v2 = vrot.slane %v17895_v31, 2  ;;  %v5616_v21 = vrot.slane %v17149_v35, 2  ;;  %v4860_v24 = vpop.f32.mrf.mxu1 }
 0x2fb   : > { %v17960_v51 = vrot.slane %v17931_v52, 6  ;;  %v8003_v53 = vpop.f32.mrf.mxu0  ;;  %v17961_v39 = vrot.slane %v17889_v38, 2  ;;  %v17962_v32 = vrot.slane %v17931_v52, 4  ;;  %v14033_v14 = vadd.f32 %v17963_v13, %v4830_v18 }
 0x2fc   : > { %4953 = vmatmul.mubr.bf16.gmra.mxu1 %v4477_v20  ;;  %v3838_v30 = vsel %vm3713_vm6, %v3835_v47, %v17152_v59  ;;  %v8881_v20 = vunpack.i.l.bf16 %v13637_v7  ;;  %v5617_v7 = vsel %vm1818_vm4, %v13894_v34, %v5616_v21  ;;  %v17967_v13 = vmax.f32 %v13697_v43, 0.0 }
 0x2fd   : > { %v3836_v10 = vsel %vm3713_vm6, %v17960_v51, %v3835_v47  ;;  %v1947_v11 = vsel %vm1818_vm4, %v17961_v39, %v1946_v2  ;;  %v2815_v35 = vsel %vm882_vm0, %v17962_v32, %v2814_v57  ;;  %v17964_v51 = vrot.slane %v17955_v56, 3 }
 0x2fe   : > { %v4512_v60 = vpack.c.bf16 %v3838_v30, %v3836_v10  ;;  %v9153_v24 = vpack.i.bf16 %v1947_v11, %v13903_v17  ;;  %v9188_v53 = vpack.i.bf16 %v2815_v35, %v13912_v1  ;;  %v14042_v10 = vpop.permute.xlu1 %8954  ;;  %v14044_v30 = vpop.f32.mrf.mxu0  ;;  %v14051_v18 = vmax.f32 %v17967_v13, %v5617_v7 }
 0x2ff   : > { %v2540_v47 = vsel %vm883_vm2, %v2537_v41, %v17964_v51  ;;  %17965 = vst [vmem:[#allocation25_spill] sm:$0xff] %v14042_v10  ;;  %17966 = vst [vmem:[#allocation33_spill] sm:$0xff] %v14044_v30  ;;  %v17150_v34 = vmax.f32 %v14033_v14, 0.0  ;;  %v14056_v17 = vpop.f32.mrf.mxu1  ;;  %v8902_v39 = vunpack.i.h.bf16 %v13606_v3  ;;  %v17151_v43 = vrot.slane %v17921_v37, 2  ;;  %v14064_v51 = vpop.permute.xlu0 %8989 }
 0x300   : > { %v14047_v32 = vsel %vm3949_vm8, %v2540_v47, %v8892_v33  ;;  %17968 = vst [vmem:[#allocation34_spill] sm:$0xff] %v14051_v18  ;;  %8077 = vmatmul.mubr.msk.bf16.gmra.mxu0 %vm3949_vm8, %v4512_v60  ;;  %17969 = vst [vmem:[#allocation68_spill] sm:$0xff] %v14056_v17  ;;  %9154 = vrot.lane.b32.xlu1 %v9153_v24, %s9736_s22  ;;  %v17153_v33 = vrot.slane %v17957_v27, 4  ;;  %v8006_v47 = vpop.f32.mrf.mxu0  ;;  %v8901_v60 = vunpack.i.l.bf16 %v13606_v3  ;;  %v17161_v18 = vrot.slane %v17957_v27, 5 }
 0x301   : > { %9189 = vrot.lane.b32.xlu0 %v9188_v53, %s9737_s23  ;;  %v14069_v7 = vrot.slane %v17150_v34, 2  ;;  %v14073_v13 = vsel %vm3949_vm8, %v17901_v9, %v8882_v23  ;;  %v14077_v24 = vsel %vm3949_vm8, %v17899_v15, %v8881_v20  ;;  %8080 = vmatprep.mubr.msk.bf16.mxu0 %vm9733_vm1, %v17342_v45  ;;  %v4863_v53 = vpop.f32.mrf.mxu1  ;;  %v8906_v47 = vunpack.i.l.bf16 %v13652_v26  ;;  %v17970_v23 = vld [vmem:[#allocation36_spill] sm:$0xff] }
 0x302   : > { %v14085_v3 = vsel %vm1818_vm4, %v1946_v2, %v17151_v43  ;;  %v14090_v9 = vsel %vm882_vm0, %v2814_v57, %v17153_v33  ;;  %v2541_v34 = vrot.slane %v17970_v23, 3  ;;  %v14093_v15 = vpop.f32.mrf.mxu0  ;;  %v8907_v53 = vunpack.i.h.bf16 %v13652_v26  ;;  %v17974_v33 = vld [vmem:[#allocation97_spill] sm:$0xff] }
 0x303   : > { %17971 = vst [vmem:[#allocation81_spill] sm:$0xff] %v14093_v15  ;;  %v5619_v20 = vsel %vm1818_vm4, %v5616_v21, %v14069_v7  ;;  %v9163_v41 = vpack.i.bf16 %v14085_v3, %v1947_v11  ;;  %v9198_v1 = vpack.i.bf16 %v14090_v9, %v2815_v35  ;;  %v17972_v43 = vmax.f32 %v13749_v36, 0.0  ;;  %v14107_v15 = vpop.permute.xlu1 %8969  ;;  %v17976_v11 = vld [vmem:[#allocation95_spill] sm:$0xff]  ;;  %v14127_v35 = vpop.permute.xlu0 %8994 }
 0x304   : > { %v3839_v30 = vrot.slane %v17974_v33, 6  ;;  %17975 = vst [vmem:[#allocation69_spill] sm:$0xff] %v14107_v15  ;;  %v8007_v38 = vpop.f32.mrf.mxu0  ;;  %v8921_v26 = vunpack.i.l.bf16 %v13688_v12  ;;  %v4304_v36 = vsel %vm4028_vm9, %v13832_v19, %v8901_v60  ;;  %v1558_v21 = vrot.slane %v17921_v37, 1  ;;  %17980 = vst [vmem:[#allocation76_spill] sm:$0xff] %v14127_v35  ;;  %v17982_v60 = vld [vmem:[#allocation74_spill] sm:$0xff] }
 0x305   : > { %v14103_v59 = vmax.f32 %v17972_v43, %v5619_v20  ;;  %9164 = vrot.lane.b32.xlu1 %v9163_v41, %s9738_s10  ;;  %9199 = vrot.lane.b32.xlu0 %v9198_v1, %s9736_s22  ;;  %v14116_v43 = vpop.f32.mrf.mxu1  ;;  %v17978_v20 = vrot.slane %v17955_v56, 3  ;;  %v17979_v38 = vrot.slane %v17957_v27, 6  ;;  %v4305_v1 = vsel %vm4028_vm9, %v13842_v25, %v8902_v39 }
 0x306   : > { %17977 = vst [vmem:[#allocation83_spill] sm:$0xff] %v14116_v43  ;;  %v4382_v57 = vsel %vm4107_vm10, %v4304_v36, %v8906_v47  ;;  %v14129_v19 = vpop.f32.mrf.mxu0  ;;  %v17983_v43 = vrot.slane %v17976_v11, 6  ;;  %v17984_v15 = vrot.slane %v17895_v31, 1  ;;  %v17162_v47 = vrot.slane %v17931_v52, 1 }
 0x307   : > { %17973 = vst [vmem:[#allocation84_spill] sm:$0xff] %v14103_v59  ;;  %v2542_v2 = vsel %vm883_vm2, %v17978_v20, %v2541_v34  ;;  %v3840_v41 = vsel %vm3713_vm6, %v17979_v38, %v3839_v30  ;;  %17981 = vst [vmem:[#allocation57_spill] sm:$0xff] %v14129_v19  ;;  %v4383_v20 = vsel %vm4107_vm10, %v4305_v1, %v8907_v53  ;;  %v4868_v10 = vpop.f32.mrf.mxu1  ;;  %v3443_v36 = vrot.slane %v17956_v55, 5 }
 0x308   : > { %v3842_v17 = vsel %vm3713_vm6, %v3839_v30, %v17983_v43  ;;  %v1559_v38 = vsel %vm1428_vm5, %v17984_v15, %v1558_v21  ;;  %v4481_v39 = vpack.c.bf16 %v4383_v20, %v4382_v57  ;;  %v8010_v19 = vpop.f32.mrf.mxu0  ;;  %v4835_v35 = vadd.f32 %v13539_v29, %v13661_v22 }
 0x309   : > { %v4515_v25 = vpack.c.bf16 %v3842_v17, %v3840_v41  ;;  %v17985_v30 = vunpack.i.l.bf16 %v13408_v62  ;;  %v17986_v15 = vunpack.i.h.bf16 %v13408_v62  ;;  %v14152_v17 = vpop.f32.mrf.mxu1  ;;  %v8922_v57 = vunpack.i.h.bf16 %v13688_v12  ;;  %v17990_v19 = vld [vmem:[#allocation88_spill] sm:$0xff] }
 0x30a   : > { %17987 = vst [vmem:[#allocation27_spill] sm:$0xff] %v14152_v17  ;;  %4960 = vmatprep.mubr.bf16.mxu1 %v4481_v39  ;;  %v1561_v22 = vsel %vm1428_vm5, %v1558_v21, %v17162_v47  ;;  %v17988_v43 = vrot.slane %v17931_v52, 5  ;;  %v17989_v62 = vunpack.i.l.bf16 %v13573_v5  ;;  %v3446_v12 = vsel %vm3321_vm7, %v3443_v36, %v17161_v18  ;;  %v14178_v39 = vpop.f32.mrf.mxu0  ;;  %v18002_v18 = vld [vmem:[#allocation59_spill] sm:$0xff]  ;;  %v18007_v47 = vld [vmem:[#allocation65_spill] sm:$0xff] }
 0x30b   : > { %v4069_v53 = vsel %vm4028_vm9, %v13729_v46, %v17985_v30  ;;  %v4070_v10 = vsel %vm4028_vm9, %v13719_v0, %v17986_v15  ;;  %8081 = vmatmul.mubr.msk.bf16.gmra.mxu0 %vm3949_vm8, %v4515_v25  ;;  %v14165_v0 = vpop.permute.xlu1 %8974  ;;  %v9178_v1 = vpack.i.bf16 %v1561_v22, %v1559_v38  ;;  %v14171_v20 = vadd.f32 %v17990_v19, %v4835_v35  ;;  %v4871_v30 = vpop.f32.mrf.mxu1 }
 0x30c   : > { %v3444_v46 = vsel %vm3321_vm7, %v17988_v43, %v3443_v36  ;;  %v4148_v41 = vsel %vm4107_vm10, %v4069_v53, %v17989_v62  ;;  %v17991_v21 = vunpack.i.h.bf16 %v13573_v5  ;;  %8084 = vmatprep.mubr.msk.bf16.mxu0 %vm9733_vm1, %v17342_v45  ;;  %17992 = vst [vmem:[#allocation38_spill] sm:$0xff] %v14178_v39  ;;  %v14182_v38 = vsel %vm3949_vm8, %v2542_v2, %v8921_v26  ;;  %v14184_v22 = vpop.permute.xlu0 %9009  ;;  %v8011_v19 = vpop.f32.mrf.mxu0 }
 0x30d   : > { %v9203_v15 = vpack.i.bf16 %v3446_v12, %v3444_v46  ;;  %v17993_v35 = vrot.slane %v17982_v60, 3  ;;  %9179 = vrot.lane.b32.xlu1 %v9178_v1, %s9737_s23  ;;  %v1950_v43 = vrot.slane %v17931_v52, 2  ;;  %v2818_v62 = vrot.slane %v17974_v33, 4  ;;  %v17995_v12 = vld [vmem:[#allocation98_spill] sm:$0xff]  ;;  %v17999_v19 = vld [vmem:[#allocation85_spill] sm:$0xff] }
 0x30e   : > { %v4149_v25 = vsel %vm4107_vm10, %v4070_v10, %v17991_v21  ;;  %v17160_v10 = vmax.f32 %v14171_v20, 0.0  ;;  %v8932_v21 = vunpack.i.h.bf16 %v17995_v12  ;;  %v8912_v2 = vunpack.i.h.bf16 %v13776_v44  ;;  %v18001_v46 = vld [vmem:[#allocation62_spill] sm:$0xff] }
 0x30f   : > { %v4480_v36 = vpack.c.bf16 %v4149_v25, %v4148_v41  ;;  %v2544_v5 = vsel %vm883_vm2, %v2541_v34, %v17993_v35  ;;  %9204 = vrot.lane.b32.xlu0 %v9203_v15, %s9738_s10  ;;  %v17994_v34 = vld [vmem:[#allocation43_spill] sm:$0xff]  ;;  %v17996_v25 = vrot.slane %v17921_v37, 2  ;;  %v14210_v15 = vpop.f32.mrf.mxu0  ;;  %v8911_v53 = vunpack.i.l.bf16 %v13776_v44 }
 0x310   : > { %v14195_v26 = vsel %vm3949_vm8, %v2544_v5, %v8922_v57  ;;  %v4838_v41 = vadd.f32 %v13539_v29, %v17994_v34  ;;  %v5620_v1 = vrot.slane %v17160_v10, 2  ;;  %v17997_v57 = vrot.slane %v17957_v27, 4  ;;  %17998 = vst [vmem:[#allocation82_spill] sm:$0xff] %v14210_v15  ;;  %v14218_v10 = vpop.permute.xlu1 %8984  ;;  %v14236_v39 = vpop.permute.xlu0 %9019 }
 0x311   : > { %4961 = vmatmul.mubr.bf16.gmra.mxu1 %v4480_v36  ;;  %v1951_v30 = vsel %vm1818_vm4, %v17996_v25, %v1950_v43  ;;  %18000 = vst [vmem:[#allocation30_spill] sm:$0xff] %v14218_v10  ;;  %v8014_v59 = vpop.f32.mrf.mxu0  ;;  %v8937_v37 = vunpack.i.h.bf16 %v18007_v47  ;;  %v8936_v31 = vunpack.i.l.bf16 %v18007_v47 }
 0x312   : > { %v2819_v35 = vsel %vm882_vm0, %v17997_v57, %v2818_v62  ;;  %v9183_v36 = vpack.i.bf16 %v1951_v30, %v14085_v3  ;;  %v14215_v34 = vadd.f32 %v17999_v19, %v4838_v41  ;;  %v5621_v25 = vsel %vm1818_vm4, %v14069_v7, %v5620_v1  ;;  %v14225_v3 = vpop.f32.mrf.mxu1 }
 0x313   : > { %v9218_v5 = vpack.i.bf16 %v2819_v35, %v14090_v9  ;;  %v3843_v57 = vrot.slane %v18001_v46, 6  ;;  %18003 = vst [vmem:[#allocation37_spill] sm:$0xff] %v14225_v3  ;;  %v18004_v9 = vld [vmem:[#allocation51_spill] sm:$0xff]  ;;  %v8931_v59 = vunpack.i.l.bf16 %v17995_v12  ;;  %v18012_v3 = vrot.slane %v17956_v55, 2 }
 0x314   : > { %v18005_v15 = vmax.f32 %v18004_v9, 0.0  ;;  %9184 = vrot.lane.b32.xlu1 %v9183_v36, %s9736_s22  ;;  %v18008_v9 = vrot.slane %v17976_v11, 6  ;;  %v18009_v36 = vrot.slane %v18002_v18, 6  ;;  %v4876_v19 = vpop.f32.mrf.mxu1  ;;  %v18011_v7 = vmax.f32 %v14215_v34, 0.0 }
 0x315   : > { %9219 = vrot.lane.b32.xlu0 %v9218_v5, %s9737_s23  ;;  %v14256_v17 = vsel %vm1818_vm4, %v1950_v43, %v18012_v3  ;;  %v14275_v3 = vsel %vm3949_vm8, %v17944_v54, %v8911_v53  ;;  %v4306_v54 = vsel %vm4028_vm9, %v13996_v4, %v8931_v59  ;;  %v4307_v53 = vsel %vm4028_vm9, %v14047_v32, %v8932_v21  ;;  %v14304_v21 = vpop.permute.xlu0 %9024 }
 0x316   : > { %v14229_v41 = vmax.f32 %v18005_v15, %v5621_v25  ;;  %v3844_v15 = vsel %vm3713_vm6, %v18008_v9, %v3843_v57  ;;  %v3846_v5 = vsel %vm3713_vm6, %v3843_v57, %v18009_v36  ;;  %v14246_v25 = vpop.f32.mrf.mxu0  ;;  %v14250_v44 = vrot.slane %v18011_v7, 2  ;;  %18023 = vst [vmem:[#allocation85_spill] sm:$0xff] %v14304_v21 }
 0x317   : > { %18010 = vst [vmem:[#allocation74_spill] sm:$0xff] %v14246_v25  ;;  %v4518_v12 = vpack.c.bf16 %v3846_v5, %v3844_v15  ;;  %v8896_v9 = vunpack.i.l.bf16 %v13724_v58  ;;  %v14261_v57 = vsel %vm3949_vm8, %v17955_v56, %v8912_v2  ;;  %v9193_v19 = vpack.i.bf16 %v14256_v17, %v1951_v30  ;;  %v14269_v15 = vpop.f32.mrf.mxu1  ;;  %v18015_v2 = vld [vmem:[#allocation61_spill] sm:$0xff]  ;;  %v14280_v5 = vpop.permute.xlu1 %8999 }
 0x318   : > { %18006 = vst [vmem:[#allocation36_spill] sm:$0xff] %v14229_v41  ;;  %v18013_v36 = vrot.slane %v17976_v11, 4  ;;  %v8015_v47 = vpop.f32.mrf.mxu0  ;;  %18014 = vst [vmem:[#allocation88_spill] sm:$0xff] %v14269_v15  ;;  %v5623_v43 = vsel %vm1818_vm4, %v5620_v1, %v14250_v44  ;;  %v18021_v1 = vld [vmem:[#allocation23_spill] sm:$0xff]  ;;  %v1562_v32 = vrot.slane %v17956_v55, 1  ;;  %v3447_v30 = vrot.slane %v17974_v33, 5 }
 0x319   : > { %8085 = vmatmul.mubr.msk.bf16.gmra.mxu0 %vm3949_vm8, %v4518_v12  ;;  %9194 = vrot.lane.b32.xlu1 %v9193_v19, %s9738_s10  ;;  %v4385_v19 = vsel %vm4107_vm10, %v4307_v53, %v8937_v37  ;;  %v8952_v25 = vunpack.i.h.bf16 %v18021_v1  ;;  %v18022_v15 = vld [vmem:[#allocation39_spill] sm:$0xff]  ;;  %v18024_v37 = vld [vmem:[#allocation44_spill] sm:$0xff]  ;;  %v8951_v53 = vunpack.i.l.bf16 %v18021_v1  ;;  %v18026_v4 = vunpack.i.l.bf16 %v13523_v42 }
 0x31a   : > { %v14267_v7 = vsel %vm882_vm0, %v2818_v62, %v18013_v36  ;;  %v18016_v62 = vld [vmem:[#allocation71_spill] sm:$0xff]  ;;  %v14292_v12 = vpop.f32.mrf.mxu0  ;;  %8088 = vmatprep.mubr.msk.bf16.mxu0 %vm9733_vm1, %v17342_v45 }
 0x31b   : > { %v9228_v56 = vpack.i.bf16 %v14267_v7, %v2819_v35  ;;  %v18017_v36 = vmax.f32 %v18016_v62, 0.0  ;;  %18019 = vst [vmem:[#allocation98_spill] sm:$0xff] %v14292_v12  ;;  %v4879_v35 = vpop.f32.mrf.mxu1  ;;  %v18020_v62 = vld [vmem:[#allocation17_spill] sm:$0xff]  ;;  %v18031_v12 = vrot.slane %v17976_v11, 5 }
 0x31c   : > { %v8018_v35 = vpop.f32.mrf.mxu0 }
 0x31d   : > { %v14284_v47 = vmax.f32 %v18017_v36, %v5623_v43  ;;  %9229 = vrot.lane.b32.xlu0 %v9228_v56, %s9736_s22  ;;  %v2545_v43 = vrot.slane %v18020_v62, 3  ;;  %v4384_v36 = vsel %vm4107_vm10, %v4306_v54, %v8936_v31  ;;  %v4843_v54 = vadd.f32 %v13539_v29, %v18024_v37 }
 0x31e   : > { %v4484_v59 = vpack.c.bf16 %v4385_v19, %v4384_v36  ;;  %v18025_v36 = vrot.slane %v17931_v52, 1  ;;  %v4071_v35 = vsel %vm4028_vm9, %v13922_v28, %v18026_v4  ;;  %v18027_v56 = vunpack.i.h.bf16 %v13523_v42  ;;  %v14323_v41 = vpop.f32.mrf.mxu0  ;;  %v18032_v28 = vld [vmem:[#allocation60_spill] sm:$0xff] }
 0x31f   : > { %18018 = vst [vmem:[#allocation43_spill] sm:$0xff] %v14284_v47  ;;  %18028 = vst [vmem:[#allocation51_spill] sm:$0xff] %v14323_v41  ;;  %v18029_v37 = vrot.slane %v17957_v27, 1  ;;  %v3450_v52 = vsel %vm3321_vm7, %v3447_v30, %v18031_v12  ;;  %v14335_v4 = vadd.f32 %v18032_v28, %v4843_v54  ;;  %v18039_v28 = vld [vmem:[#allocation48_spill] sm:$0xff] }
 0x320   : > { %4968 = vmatprep.mubr.bf16.mxu1 %v4484_v59  ;;  %v1563_v19 = vsel %vm1428_vm5, %v18025_v36, %v1562_v32  ;;  %v4072_v31 = vsel %vm4028_vm9, %v13918_v48, %v18027_v56  ;;  %v18030_v59 = vrot.slane %v17957_v27, 5  ;;  %v4150_v48 = vsel %vm4107_vm10, %v4071_v35, %v8896_v9  ;;  %v8019_v9 = vpop.f32.mrf.mxu0  ;;  %v18038_v35 = vld [vmem:[#allocation58_spill] sm:$0xff] }
 0x321   : > { %v1565_v1 = vsel %vm1428_vm5, %v1562_v32, %v18029_v37  ;;  %v18033_v56 = vunpack.i.h.bf16 %v13724_v58  ;;  %v14341_v32 = vpop.permute.xlu1 %9004  ;;  %v14343_v37 = vpop.permute.xlu0 %9039 }
 0x322   : > { %v3448_v36 = vsel %vm3321_vm7, %v18030_v59, %v3447_v30  ;;  %v9208_v42 = vpack.i.bf16 %v1565_v1, %v1563_v19  ;;  %18034 = vst [vmem:[#allocation65_spill] sm:$0xff] %v14343_v37  ;;  %v18035_v59 = vrot.slane %v17982_v60, 3  ;;  %v18036_v30 = vrot.slane %v18022_v15, 3  ;;  %v14384_v37 = vpop.f32.mrf.mxu1 }
 0x323   : > { %v9233_v21 = vpack.i.bf16 %v3450_v52, %v3448_v36  ;;  %v4151_v41 = vsel %vm4107_vm10, %v4072_v31, %v18033_v56  ;;  %v17172_v52 = vmax.f32 %v14335_v4, 0.0  ;;  %v18037_v31 = vld [vmem:[#allocation56_spill] sm:$0xff]  ;;  %v17174_v1 = vrot.slane %v18038_v35, 6  ;;  %18044 = vst [vmem:[#allocation71_spill] sm:$0xff] %v14384_v37 }
 0x324   : > { %v2546_v10 = vsel %vm883_vm2, %v18035_v59, %v2545_v43  ;;  %v2548_v12 = vsel %vm883_vm2, %v2545_v43, %v18036_v30  ;;  %v4483_v54 = vpack.c.bf16 %v4151_v41, %v4150_v48  ;;  %9209 = vrot.lane.b32.xlu1 %v9208_v42, %s9737_s23  ;;  %v3847_v19 = vrot.slane %v18037_v31, 6  ;;  %v14366_v42 = vpop.f32.mrf.mxu0 }
 0x325   : > { %v14353_v58 = vsel %vm3949_vm8, %v2546_v10, %v8951_v53  ;;  %9234 = vrot.lane.b32.xlu0 %v9233_v21, %s9738_s10  ;;  %v1954_v36 = vrot.slane %v17957_v27, 2  ;;  %v5624_v43 = vrot.slane %v17172_v52, 2  ;;  %v2822_v41 = vrot.slane %v18001_v46, 4  ;;  %18040 = vst [vmem:[#allocation61_spill] sm:$0xff] %v14366_v42 }
 0x326   : > { %4969 = vmatmul.mubr.bf16.gmra.mxu1 %v4483_v54  ;;  %v4846_v10 = vadd.f32 %v13539_v29, %v18039_v28  ;;  %v8942_v53 = vunpack.i.h.bf16 %v13947_v63  ;;  %v18041_v21 = vrot.slane %v18002_v18, 6  ;;  %v3850_v56 = vsel %vm3713_vm6, %v3847_v19, %v17174_v1  ;;  %v8022_v42 = vpop.f32.mrf.mxu0 }
 0x327   : > { %v18042_v59 = vrot.slane %v17956_v55, 2  ;;  %v8941_v54 = vunpack.i.l.bf16 %v13947_v63  ;;  %v5625_v29 = vsel %vm1818_vm4, %v14250_v44, %v5624_v43  ;;  %v18043_v52 = vrot.slane %v17976_v11, 4  ;;  %v18047_v55 = vld [vmem:[#allocation41_spill] sm:$0xff] }
 0x328   : > { %v3848_v48 = vsel %vm3713_vm6, %v18041_v21, %v3847_v19  ;;  %v18045_v1 = vmax.f32 %v13989_v61, 0.0  ;;  %v14393_v44 = vadd.f32 %v18047_v55, %v4846_v10  ;;  %v18049_v42 = vld [vmem:[#allocation77_spill] sm:$0xff]  ;;  %v17176_v61 = vrot.slane %v17974_v33, 2  ;;  %v4884_v55 = vpop.f32.mrf.mxu1 }
 0x329   : > { %v1955_v30 = vsel %vm1818_vm4, %v18042_v59, %v1954_v36  ;;  %v4521_v9 = vpack.c.bf16 %v3850_v56, %v3848_v48  ;;  %v2823_v21 = vsel %vm882_vm0, %v18043_v52, %v2822_v41  ;;  %v14395_v48 = vpop.permute.xlu1 %9014  ;;  %v14400_v52 = vsel %vm3949_vm8, %v2548_v12, %v8952_v25 }
 0x32a   : > { %v9213_v28 = vpack.i.bf16 %v1955_v30, %v14256_v17  ;;  %v14389_v59 = vmax.f32 %v18045_v1, %v5625_v29  ;;  %v9243_v63 = vpack.i.bf16 %v2823_v21, %v14267_v7  ;;  %18048 = vst [vmem:[#allocation23_spill] sm:$0xff] %v14395_v48  ;;  %v14397_v17 = vpop.permute.xlu0 %9049  ;;  %v14407_v7 = vpop.f32.mrf.mxu0  ;;  %v8962_v1 = vunpack.i.h.bf16 %v13905_v40 }
 0x32b   : > { %8089 = vmatmul.mubr.msk.bf16.gmra.mxu0 %vm3949_vm8, %v4521_v9  ;;  %18050 = vst [vmem:[#allocation39_spill] sm:$0xff] %v14407_v7  ;;  %v8961_v10 = vunpack.i.l.bf16 %v13905_v40  ;;  %v17177_v25 = vmax.f32 %v14393_v44, 0.0  ;;  %v17180_v12 = vrot.slane %v18002_v18, 4  ;;  %v3999_v29 = vsel %vm3949_vm8, %v17982_v60, %v8942_v53  ;;  %v14426_v55 = vpop.f32.mrf.mxu1  ;;  %v18053_v7 = vld [vmem:[#allocation90_spill] sm:$0xff] }
 0x32c   : > { %18046 = vst [vmem:[#allocation17_spill] sm:$0xff] %v14389_v59  ;;  %9214 = vrot.lane.b32.xlu1 %v9213_v28, %s9736_s22  ;;  %9244 = vrot.lane.b32.xlu0 %v9243_v63, %s9737_s23  ;;  %v3998_v9 = vsel %vm3949_vm8, %v17970_v23, %v8941_v54  ;;  %v14423_v28 = vsel %vm1818_vm4, %v1954_v36, %v17176_v61  ;;  %v8947_v40 = vunpack.i.h.bf16 %v13999_v16  ;;  %v8023_v63 = vpop.f32.mrf.mxu0  ;;  %18051 = vst [vmem:[#allocation44_spill] sm:$0xff] %v14426_v55 }
 0x32d   : > { %8092 = vmatprep.mubr.msk.bf16.mxu0 %vm9733_vm1, %v17342_v45  ;;  %v14430_v56 = vrot.slane %v17177_v25, 2  ;;  %v8966_v19 = vunpack.i.l.bf16 %v13958_v8  ;;  %v9223_v60 = vpack.i.bf16 %v14423_v28, %v1955_v30  ;;  %v14437_v23 = vsel %vm882_vm0, %v2822_v41, %v17180_v12  ;;  %v4887_v61 = vpop.f32.mrf.mxu1  ;;  %v18052_v30 = vld [vmem:[#allocation40_spill] sm:$0xff]  ;;  %v18054_v41 = vld [vmem:[#allocation18_spill] sm:$0xff]  ;;  %v14449_v37 = vpop.permute.xlu1 %9029 }
 0x32e   : > { %v8967_v53 = vunpack.i.h.bf16 %v13958_v8  ;;  %v9258_v54 = vpack.i.bf16 %v14437_v23, %v2823_v21  ;;  %v8946_v63 = vunpack.i.l.bf16 %v13999_v16  ;;  %v2549_v47 = vrot.slane %v18052_v30, 3  ;;  %18055 = vst [vmem:[#allocation60_spill] sm:$0xff] %v14449_v37  ;;  %v14451_v36 = vpop.f32.mrf.mxu0 }
 0x32f   : > { %v5627_v25 = vsel %vm1818_vm4, %v5624_v43, %v14430_v56  ;;  %v3851_v55 = vrot.slane %v18053_v7, 6  ;;  %18056 = vst [vmem:[#allocation58_spill] sm:$0xff] %v14451_v36  ;;  %v18057_v8 = vmax.f32 %v14033_v14, 0.0  ;;  %v14459_v16 = vsel %vm4028_vm9, %v3999_v29, %v8947_v40  ;;  %v18062_v36 = vld [vmem:[#allocation50_spill] sm:$0xff] }
 0x330   : > { %9224 = vrot.lane.b32.xlu1 %v9223_v60, %s9738_s10  ;;  %9259 = vrot.lane.b32.xlu0 %v9258_v54, %s9736_s22  ;;  %v8982_v43 = vunpack.i.h.bf16 %v14001_v6  ;;  %v4308_v61 = vsel %vm4028_vm9, %v14182_v38, %v8961_v10  ;;  %v14464_v60 = vpop.permute.xlu0 %9054  ;;  %v18060_v12 = vrot.slane %v18038_v35, 6  ;;  %v18061_v14 = vrot.slane %v18054_v41, 6  ;;  %v8026_v40 = vpop.f32.mrf.mxu0 }
 0x331   : > { %v14455_v21 = vmax.f32 %v18057_v8, %v5627_v25  ;;  %18059 = vst [vmem:[#allocation41_spill] sm:$0xff] %v14464_v60  ;;  %v4309_v54 = vsel %vm4028_vm9, %v14195_v26, %v8962_v1  ;;  %v4386_v29 = vsel %vm4107_vm10, %v4308_v61, %v8966_v19  ;;  %v8981_v8 = vunpack.i.l.bf16 %v14001_v6  ;;  %v14485_v19 = vld [vmem:[#allocation6] ss:$0 sm:$0xff] }
 0x332   : > { %v3852_v59 = vsel %vm3713_vm6, %v18060_v12, %v3851_v55  ;;  %v3854_v25 = vsel %vm3713_vm6, %v3851_v55, %v18061_v14  ;;  %v17188_v38 = vrot.slane %v18062_v36, 3  ;;  %v4387_v60 = vsel %vm4107_vm10, %v4309_v54, %v8967_v53  ;;  %v14481_v14 = vpop.f32.mrf.mxu0  ;;  %v18064_v6 = vld [vmem:[#allocation91_spill] sm:$0xff] }
 0x333   : > { %18058 = vst [vmem:[#allocation48_spill] sm:$0xff] %v14455_v21  ;;  %v4524_v10 = vpack.c.bf16 %v3854_v25, %v3852_v59  ;;  %v4487_v48 = vpack.c.bf16 %v4387_v60, %v4386_v29  ;;  %v1566_v12 = vrot.slane %v17974_v33, 1  ;;  %v17186_v37 = vrot.slane %v17976_v11, 1  ;;  %18063 = vst [vmem:[#allocation77_spill] sm:$0xff] %v14481_v14 }
 0x334   : > { %v3451_v55 = vrot.slane %v18001_v46, 5  ;;  %v17189_v26 = vrot.slane %v18002_v18, 5  ;;  %v4851_v59 = vadd.f32 %v14485_v19, %v18064_v6  ;;  %v18065_v1 = vunpack.i.l.bf16 %v13686_v49  ;;  %v14509_v6 = vpop.permute.xlu1 %9034 }
 0x335   : > { %8093 = vmatmul.mubr.msk.bf16.gmra.mxu0 %vm3949_vm8, %v4524_v10  ;;  %v18066_v61 = vunpack.i.h.bf16 %v13686_v49  ;;  %4976 = vmatprep.mubr.bf16.mxu1 %v4487_v48  ;;  %v18067_v25 = vrot.slane %v17957_v27, 1  ;;  %v1569_v29 = vsel %vm1428_vm5, %v1566_v12, %v17186_v37  ;;  %v18068_v40 = vrot.slane %v17976_v11, 5 }
 0x336   : > { %v4073_v53 = vsel %vm4028_vm9, %v14077_v24, %v18065_v1  ;;  %v18069_v24 = vunpack.i.l.bf16 %v18049_v42  ;;  %v3454_v1 = vsel %vm3321_vm7, %v3451_v55, %v17189_v26  ;;  %8096 = vmatprep.mubr.msk.bf16.mxu0 %vm9733_vm1, %v17342_v45 }
 0x337   : > { %v4074_v60 = vsel %vm4028_vm9, %v14073_v13, %v18066_v61  ;;  %v1567_v54 = vsel %vm1428_vm5, %v18067_v25, %v1566_v12  ;;  %v3452_v10 = vsel %vm3321_vm7, %v18068_v40, %v3451_v55  ;;  %v14511_v13 = vpop.permute.xlu0 %9069  ;;  %v18070_v61 = vld [vmem:[#allocation31_spill] sm:$0xff]  ;;  %v18071_v12 = vunpack.i.h.bf16 %v18049_v42 }
 0x338   : > { %v4152_v49 = vsel %vm4107_vm10, %v4073_v53, %v18069_v24  ;;  %v9238_v48 = vpack.i.bf16 %v1569_v29, %v1567_v54  ;;  %v14517_v25 = vadd.f32 %v18070_v61, %v4851_v59  ;;  %v8027_v53 = vpop.f32.mrf.mxu0  ;;  %v14525_v24 = vsel %vm4028_vm9, %v3998_v9, %v8946_v63 }
 0x339   : > { %v4153_v40 = vsel %vm4107_vm10, %v4074_v60, %v18071_v12  ;;  %v18072_v54 = vrot.slane %v18022_v15, 3  ;;  %v9263_v37 = vpack.i.bf16 %v3454_v1, %v3452_v10  ;;  %v2552_v59 = vsel %vm883_vm2, %v2549_v47, %v17188_v38  ;;  %v14558_v53 = vpop.f32.mrf.mxu1 }
 0x33a   : > { %v4486_v55 = vpack.c.bf16 %v4153_v40, %v4152_v49  ;;  %9239 = vrot.lane.b32.xlu1 %v9238_v48, %s9737_s23  ;;  %v17187_v60 = vmax.f32 %v14517_v25, 0.0  ;;  %v1958_v9 = vrot.slane %v17976_v11, 2  ;;  %v17190_v10 = vrot.slane %v18001_v46, 2  ;;  %18075 = vst [vmem:[#allocation90_spill] sm:$0xff] %v14558_v53  ;;  %v14577_v26 = vpop.f32.mrf.mxu0 }
 0x33b   : > { %v2550_v29 = vsel %vm883_vm2, %v18072_v54, %v2549_v47  ;;  %9264 = vrot.lane.b32.xlu0 %v9263_v37, %s9738_s10  ;;  %v2826_v49 = vrot.slane %v18037_v31, 4  ;;  %v4854_v47 = vadd.f32 %v14485_v19, %v13937_v50  ;;  %v14548_v48 = vsel %vm3949_vm8, %v2552_v59, %v8982_v43  ;;  %v14556_v40 = vpop.permute.xlu0 %9079  ;;  %v18076_v54 = vld [vmem:[#allocation25_spill] sm:$0xff]  ;;  %v18078_v59 = vld [vmem:[#allocation75_spill] sm:$0xff]  ;;  %18079 = vst [vmem:[#allocation50_spill] sm:$0xff] %v14577_v26  ;;  %v18085_v26 = vld [vmem:[#allocation76_spill] sm:$0xff] }
 0x33c   : > { %v14534_v42 = vsel %vm3949_vm8, %v2550_v29, %v8981_v8  ;;  %4977 = vmatmul.mubr.bf16.gmra.mxu1 %v4486_v55  ;;  %v14545_v8 = vpop.permute.xlu1 %9044  ;;  %v5628_v1 = vrot.slane %v17187_v60, 2  ;;  %v8992_v61 = vunpack.i.h.bf16 %v14064_v51  ;;  %v18073_v37 = vrot.slane %v17974_v33, 2  ;;  %18074 = vst [vmem:[#allocation40_spill] sm:$0xff] %v14556_v40 }
 0x33d   : > { %v14564_v43 = vsel %vm1818_vm4, %v1958_v9, %v17190_v10  ;;  %v18077_v29 = vrot.slane %v18002_v18, 4  ;;  %v14570_v63 = vadd.f32 %v18078_v59, %v4854_v47  ;;  %v18080_v10 = vmax.f32 %v14171_v20, 0.0  ;;  %v18082_v59 = vld [vmem:[#allocation69_spill] sm:$0xff] }
 0x33e   : > { %v1959_v12 = vsel %vm1818_vm4, %v18073_v37, %v1958_v9  ;;  %v5629_v37 = vsel %vm1818_vm4, %v14430_v56, %v5628_v1  ;;  %v4892_v9 = vpop.f32.mrf.mxu1  ;;  %v8972_v14 = vunpack.i.h.bf16 %v18082_v59  ;;  %v4311_v56 = vsel %vm4028_vm9, %v14400_v52, %v8992_v61  ;;  %v18088_v20 = vld [vmem:[#allocation93_spill] sm:$0xff] }
 0x33f   : > { %v2827_v55 = vsel %vm882_vm0, %v18077_v29, %v2826_v49  ;;  %v9248_v38 = vpack.i.bf16 %v14564_v43, %v1959_v12  ;;  %v14581_v21 = vmax.f32 %v18080_v10, %v5629_v37  ;;  %v8991_v29 = vunpack.i.l.bf16 %v14064_v51  ;;  %v18083_v9 = vld [vmem:[#allocation55_spill] sm:$0xff]  ;;  %v8030_v10 = vpop.f32.mrf.mxu0 }
 0x340   : > { %v9268_v50 = vpack.i.bf16 %v2827_v55, %v14437_v23  ;;  %v17195_v47 = vmax.f32 %v14570_v63, 0.0  ;;  %v8971_v23 = vunpack.i.l.bf16 %v18082_v59  ;;  %v3855_v60 = vrot.slane %v18083_v9, 6  ;;  %v14593_v37 = vpop.f32.mrf.mxu1  ;;  %v14602_v61 = vpop.permute.xlu1 %9059 }
 0x341   : > { %18081 = vst [vmem:[#allocation91_spill] sm:$0xff] %v14581_v21  ;;  %9249 = vrot.lane.b32.xlu1 %v9248_v38, %s9738_s10  ;;  %18084 = vst [vmem:[#allocation31_spill] sm:$0xff] %v14593_v37  ;;  %v8997_v33 = vunpack.i.h.bf16 %v18085_v26  ;;  %v8996_v52 = vunpack.i.l.bf16 %v18085_v26  ;;  %v9253_v38 = vpack.i.bf16 %v1959_v12, %v14423_v28  ;;  %v18089_v10 = vrot.slane %v18088_v20, 6  ;;  %v14616_v26 = vpop.permute.xlu0 %9084  ;;  %v14618_v28 = vpop.f32.mrf.mxu0 }
 0x342   : > { %9269 = vrot.lane.b32.xlu0 %v9268_v50, %s9737_s23  ;;  %v14597_v51 = vrot.slane %v17195_v47, 2  ;;  %18086 = vst [vmem:[#allocation25_spill] sm:$0xff] %v14602_v61  ;;  %v18087_v50 = vrot.slane %v18054_v41, 6  ;;  %v18090_v37 = vrot.slane %v18038_v35, 4  ;;  %v8976_v53 = vunpack.i.l.bf16 %v14165_v0  ;;  %18091 = vst [vmem:[#allocation75_spill] sm:$0xff] %v14616_v26 }
 0x343   : > { %v3858_v27 = vsel %vm3713_vm6, %v3855_v60, %v18089_v10  ;;  %18092 = vst [vmem:[#allocation69_spill] sm:$0xff] %v14618_v28  ;;  %v8977_v40 = vunpack.i.h.bf16 %v14165_v0  ;;  %v4310_v10 = vsel %vm4028_vm9, %v14353_v58, %v8991_v29  ;;  %v4001_v26 = vsel %vm3949_vm8, %v18022_v15, %v8972_v14  ;;  %v18095_v0 = vld [vmem:[#allocation49_spill] sm:$0xff] }
 0x344   : > { %v3856_v59 = vsel %vm3713_vm6, %v18087_v50, %v3855_v60  ;;  %v14613_v47 = vsel %vm882_vm0, %v2826_v49, %v18090_v37  ;;  %v5631_v12 = vsel %vm1818_vm4, %v5628_v1, %v14597_v51  ;;  %v4895_v60 = vpop.f32.mrf.mxu1  ;;  %v18093_v49 = vmax.f32 %v14215_v34, 0.0  ;;  %v18102_v1 = vld [vmem:[#allocation35_spill] sm:$0xff] }
 0x345   : > { %v4527_v61 = vpack.c.bf16 %v3858_v27, %v3856_v59  ;;  %v9278_v50 = vpack.i.bf16 %v14613_v47, %v2827_v55  ;;  %v4000_v28 = vsel %vm3949_vm8, %v18020_v62, %v8971_v23  ;;  %9254 = vrot.lane.b32.xlu1 %v9253_v38, %s9736_s22  ;;  %v8031_v27 = vpop.f32.mrf.mxu0  ;;  %v2553_v58 = vrot.slane %v18095_v0, 3  ;;  %v14648_v23 = vpop.permute.xlu1 %9064  ;;  %v18097_v59 = vld [vmem:[#allocation22_spill] sm:$0xff] }
 0x346   : > { %v14628_v37 = vmax.f32 %v18093_v49, %v5631_v12  ;;  %v4388_v34 = vsel %vm4107_vm10, %v4310_v10, %v8996_v52  ;;  %v4389_v55 = vsel %vm4107_vm10, %v4311_v56, %v8997_v33  ;;  %v14642_v15 = vsel %vm4028_vm9, %v4000_v28, %v8976_v53  ;;  %v14650_v38 = vpop.permute.xlu0 %9099 }
 0x347   : > { %8097 = vmatmul.mubr.msk.bf16.gmra.mxu0 %vm3949_vm8, %v4527_v61  ;;  %9279 = vrot.lane.b32.xlu0 %v9278_v50, %s9736_s22  ;;  %v4490_v14 = vpack.c.bf16 %v4389_v55, %v4388_v34  ;;  %v1962_v62 = vrot.slane %v18002_v18, 2  ;;  %v17199_v29 = vrot.slane %v18037_v31, 2  ;;  %v14653_v61 = vsel %vm4028_vm9, %v4001_v26, %v8977_v40  ;;  %v14658_v52 = vpop.f32.mrf.mxu0  ;;  %v18099_v26 = vld [vmem:[#allocation24_spill] sm:$0xff] }
 0x348   : > { %18094 = vst [vmem:[#allocation76_spill] sm:$0xff] %v14628_v37  ;;  %8100 = vmatprep.mubr.msk.bf16.mxu0 %vm9733_vm1, %v17342_v45  ;;  %v9011_v33 = vunpack.i.l.bf16 %v14184_v22  ;;  %v3455_v53 = vrot.slane %v18037_v31, 5  ;;  %v17202_v56 = vrot.slane %v18038_v35, 5  ;;  %18096 = vst [vmem:[#allocation49_spill] sm:$0xff] %v14658_v52  ;;  %v18098_v12 = vrot.slane %v18001_v46, 2 }
 0x349   : > { %4984 = vmatprep.mubr.bf16.mxu1 %v4490_v14  ;;  %v14669_v40 = vsel %vm1818_vm4, %v1962_v62, %v17199_v29  ;;  %v4859_v60 = vadd.f32 %v14485_v19, %v18099_v26  ;;  %v18100_v49 = vrot.slane %v18002_v18, 5  ;;  %v18101_v55 = vunpack.i.l.bf16 %v18015_v2 }
 0x34a   : > { %v14664_v50 = vsel %vm1818_vm4, %v18098_v12, %v1962_v62  ;;  %v3458_v34 = vsel %vm3321_vm7, %v3455_v53, %v17202_v56  ;;  %v8034_v62 = vpop.f32.mrf.mxu0  ;;  %v18103_v29 = vunpack.i.h.bf16 %v18015_v2  ;;  %v18105_v56 = vrot.slane %v18062_v36, 3 }
 0x34b   : > { %v9273_v10 = vpack.i.bf16 %v14669_v40, %v14664_v50  ;;  %v3456_v27 = vsel %vm3321_vm7, %v18100_v49, %v3455_v53  ;;  %v4075_v14 = vsel %vm4028_vm9, %v14275_v3, %v18101_v55  ;;  %v14686_v26 = vadd.f32 %v18102_v1, %v4859_v60  ;;  %v14704_v60 = vpop.f32.mrf.mxu1  ;;  %v14720_v62 = vpop.permute.xlu0 %9109 }
 0x34c   : > { %v9283_v12 = vpack.i.bf16 %v3458_v34, %v3456_v27  ;;  %v4076_v28 = vsel %vm4028_vm9, %v14261_v57, %v18103_v29  ;;  %v18104_v49 = vunpack.i.l.bf16 %v18076_v54  ;;  %v2554_v3 = vsel %vm883_vm2, %v18105_v56, %v2553_v58  ;;  %18107 = vst [vmem:[#allocation22_spill] sm:$0xff] %v14704_v60  ;;  %v14706_v57 = vpop.f32.mrf.mxu0 }
 0x34d   : > { %v9012_v27 = vunpack.i.h.bf16 %v14184_v22  ;;  %9274 = vrot.lane.b32.xlu1 %v9273_v10, %s9738_s10  ;;  %v18106_v1 = vunpack.i.h.bf16 %v18076_v54  ;;  %18108 = vst [vmem:[#allocation24_spill] sm:$0xff] %v14706_v57  ;;  %v18109_v29 = vrot.slane %v18097_v59, 3  ;;  %v18110_v22 = vld [vmem:[#allocation72_spill] sm:$0xff]  ;;  %v18112_v10 = vrot.slane %v18088_v20, 6  ;;  %v4900_v53 = vpop.f32.mrf.mxu1 }
 0x34e   : > { %v4154_v21 = vsel %vm4107_vm10, %v4075_v14, %v18104_v49  ;;  %9284 = vrot.lane.b32.xlu0 %v9283_v12, %s9738_s10  ;;  %v18111_v14 = vrot.slane %v18110_v22, 6  ;;  %v14723_v49 = vsel %vm3949_vm8, %v2554_v3, %v9011_v33  ;;  %v8035_v56 = vpop.f32.mrf.mxu0  ;;  %v9022_v37 = vunpack.i.h.bf16 %v14236_v39 }
 0x34f   : > { %v4155_v2 = vsel %vm4107_vm10, %v4076_v28, %v18106_v1  ;;  %v2556_v34 = vsel %vm883_vm2, %v2553_v58, %v18109_v29  ;;  %v14718_v28 = vpop.permute.xlu1 %9074  ;;  %v18114_v1 = vld [vmem:[#allocation70_spill] sm:$0xff]  ;;  %v2830_v3 = vrot.slane %v18053_v7, 4  ;;  %v18118_v57 = vrot.slane %v17976_v11, 1  ;;  %v18119_v56 = vld [vmem:[#allocation68_spill] sm:$0xff] }
 0x350   : > { %v4489_v55 = vpack.c.bf16 %v4155_v2, %v4154_v21  ;;  %v3860_v54 = vsel %vm3713_vm6, %v18112_v10, %v18111_v14  ;;  %18113 = vst [vmem:[#allocation35_spill] sm:$0xff] %v14718_v28  ;;  %v18115_v58 = vrot.slane %v18114_v1, 6  ;;  %v18116_v12 = vmov %v18111_v14  ;;  %v18135_v28 = vld [vmem:[#allocation19_spill] sm:$0xff] }
 0x351   : > { %v1570_v21 = vrot.slane %v18001_v46, 1  ;;  %v17206_v2 = vrot.slane %v18002_v18, 1  ;;  %v18117_v14 = vmax.f32 %v14686_v26, 0.0  ;;  %v17208_v53 = vrot.slane %v18054_v41, 4 }
 0x352   : > { %v3862_v29 = vsel %vm3713_vm6, %v18116_v12, %v18115_v58  ;;  %4985 = vmatmul.mubr.bf16.gmra.mxu1 %v4489_v55  ;;  %v4862_v12 = vadd.f32 %v14485_v19, %v18119_v56 }
 0x353   : > { %v5632_v10 = vrot.slane %v18117_v14, 2  ;;  %v4530_v33 = vpack.c.bf16 %v3862_v29, %v3860_v54  ;;  %v1571_v52 = vsel %vm1428_vm5, %v18118_v57, %v1570_v21  ;;  %v1573_v58 = vsel %vm1428_vm5, %v1570_v21, %v17206_v2  ;;  %v14745_v14 = vpop.f32.mrf.mxu1 }
 0x354   : > { %18120 = vst [vmem:[#allocation70_spill] sm:$0xff] %v14745_v14  ;;  %v9021_v54 = vunpack.i.l.bf16 %v14236_v39  ;;  %v9303_v29 = vpack.i.bf16 %v1573_v58, %v1571_v52  ;;  %v18121_v57 = vrot.slane %v18038_v35, 4  ;;  %v18122_v21 = vmax.f32 %v14335_v4, 0.0  ;;  %v18125_v4 = vld [vmem:[#allocation30_spill] sm:$0xff] }
 0x355   : > { %v5633_v55 = vsel %vm1818_vm4, %v14597_v51, %v5632_v10  ;;  %8101 = vmatmul.mubr.msk.bf16.gmra.mxu0 %vm3949_vm8, %v4530_v33  ;;  %v14763_v56 = vsel %vm882_vm0, %v2830_v3, %v17208_v53  ;;  %v18124_v51 = vld [vmem:[#allocation45_spill] sm:$0xff]  ;;  %v9002_v39 = vunpack.i.h.bf16 %v14280_v5  ;;  %v4903_v52 = vpop.f32.mrf.mxu1  ;;  %v14772_v33 = vsel %vm3949_vm8, %v2556_v34, %v9012_v27  ;;  %v14788_v53 = vpop.f32.mrf.mxu0 }
 0x356   : > { %v14754_v46 = vsel %vm882_vm0, %v18121_v57, %v2830_v3  ;;  %v14758_v2 = vmax.f32 %v18122_v21, %v5633_v55  ;;  %v14766_v11 = vadd.f32 %v18124_v51, %v4862_v12  ;;  %8104 = vmatprep.mubr.msk.bf16.mxu0 %vm9733_vm1, %v17342_v45  ;;  %v8987_v58 = vunpack.i.h.bf16 %v18125_v4  ;;  %9304 = vrot.lane.b32.xlu1 %v9303_v29, %s9737_s23  ;;  %v14779_v12 = vpop.permute.xlu1 %9089  ;;  %v14781_v57 = vpop.permute.xlu0 %9114  ;;  %v18128_v34 = vld [vmem:[#allocation85_spill] sm:$0xff] }
 0x357   : > { %v9288_v3 = vpack.i.bf16 %v14763_v56, %v14754_v46  ;;  %v9001_v55 = vunpack.i.l.bf16 %v14280_v5  ;;  %18126 = vst [vmem:[#allocation45_spill] sm:$0xff] %v14779_v12  ;;  %18127 = vst [vmem:[#allocation30_spill] sm:$0xff] %v14781_v57  ;;  %v8986_v21 = vunpack.i.l.bf16 %v18125_v4  ;;  %v4313_v51 = vsel %vm4028_vm9, %v14548_v48, %v9022_v37 }
 0x358   : > { %18123 = vst [vmem:[#allocation68_spill] sm:$0xff] %v14758_v2  ;;  %v17209_v27 = vmax.f32 %v14766_v11, 0.0  ;;  %v9027_v52 = vunpack.i.h.bf16 %v18128_v34  ;;  %18129 = vst [vmem:[#allocation85_spill] sm:$0xff] %v14788_v53  ;;  %v9026_v29 = vunpack.i.l.bf16 %v18128_v34  ;;  %v9308_v5 = vpack.i.bf16 %v14664_v50, %v14564_v43  ;;  %v8038_v34 = vpop.f32.mrf.mxu0  ;;  %v18134_v53 = vld [vmem:[#allocation13_spill] sm:$0xff] }
 0x359   : > { %9289 = vrot.lane.b32.xlu0 %v9288_v3, %s9736_s22  ;;  %v3459_v14 = vrot.slane %v18053_v7, 5  ;;  %v17214_v4 = vrot.slane %v18054_v41, 5  ;;  %v4312_v48 = vsel %vm4028_vm9, %v14534_v42, %v9021_v54  ;;  %v4003_v3 = vsel %vm3949_vm8, %v18062_v36, %v9002_v39  ;;  %v18131_v34 = vld [vmem:[#allocation20_spill] sm:$0xff] }
 0x35a   : > { %v14801_v37 = vrot.slane %v17209_v27, 2  ;;  %v4002_v43 = vsel %vm3949_vm8, %v18052_v30, %v9001_v55  ;;  %9309 = vrot.lane.b32.xlu1 %v9308_v5, %s9736_s22  ;;  %v18130_v50 = vrot.slane %v18038_v35, 5  ;;  %v9006_v54 = vunpack.i.l.bf16 %v14341_v32  ;;  %v14819_v55 = vpop.f32.mrf.mxu0  ;;  %v18133_v5 = vld [vmem:[#allocation65_spill] sm:$0xff] }
 0x35b   : > { %v3462_v42 = vsel %vm3321_vm7, %v3459_v14, %v17214_v4  ;;  %v9007_v39 = vunpack.i.h.bf16 %v14341_v32  ;;  %v2557_v30 = vrot.slane %v18131_v34, 3  ;;  %18132 = vst [vmem:[#allocation20_spill] sm:$0xff] %v14819_v55  ;;  %v9042_v2 = vunpack.i.h.bf16 %v18133_v5  ;;  %v14831_v32 = vpop.permute.xlu0 %9129 }
 0x35c   : > { %v3460_v60 = vsel %vm3321_vm7, %v18130_v50, %v3459_v14  ;;  %v5635_v27 = vsel %vm1818_vm4, %v5632_v10, %v14801_v37  ;;  %v9041_v50 = vunpack.i.l.bf16 %v18133_v5  ;;  %v18136_v57 = vpack.c.bf16 %v18134_v53, %v18135_v28  ;;  %v8039_v28 = vpop.f32.mrf.mxu0 }
 0x35d   : > { %v9293_v36 = vpack.i.bf16 %v3462_v42, %v3460_v60  ;;  %v4390_v14 = vsel %vm4107_vm10, %v4312_v48, %v9026_v29  ;;  %v4391_v10 = vsel %vm4107_vm10, %v4313_v51, %v9027_v52  ;;  %v14829_v60 = vpop.permute.xlu1 %9094  ;;  %v18137_v42 = vld [vmem:[#allocation80_spill] sm:$0xff]  ;;  %v1966_v5 = vrot.slane %v18038_v35, 2  ;;  %v18140_v29 = vld [vmem:[#allocation83_spill] sm:$0xff] }
 0x35e   : > { %8105 = vmatmul.mubr.msk.bf16.gmra.mxu0 %vm3949_vm8, %v18136_v57  ;;  %v17217_v4 = vrot.slane %v18137_v42, 3  ;;  %v4493_v55 = vpack.c.bf16 %v4391_v10, %v4390_v14  ;;  %v17216_v12 = vrot.slane %v18053_v7, 2  ;;  %v18138_v53 = vmax.f32 %v14393_v44, 0.0  ;;  %v18143_v10 = vld [vmem:[#allocation42_spill] sm:$0xff] }
 0x35f   : > { %9294 = vrot.lane.b32.xlu0 %v9293_v36, %s9738_s10  ;;  %8108 = vmatprep.mubr.msk.bf16.mxu0 %vm9733_vm1, %v17342_v45  ;;  %v14844_v51 = vsel %vm4028_vm9, %v4002_v43, %v9006_v54  ;;  %v9298_v52 = vpack.i.bf16 %v14754_v46, %v14613_v47  ;;  %v4867_v48 = vadd.f32 %v14485_v19, %v18140_v29  ;;  %v18141_v36 = vrot.slane %v18037_v31, 2  ;;  %v14864_v47 = vpop.f32.mrf.mxu1 }
 0x360   : > { %v14841_v57 = vmax.f32 %v18138_v53, %v5635_v27  ;;  %4992 = vmatprep.mubr.bf16.mxu1 %v4493_v55  ;;  %v14858_v44 = vsel %vm1818_vm4, %v1966_v5, %v17216_v12  ;;  %v4156_v27 = vsel %vm4107_vm10, %v14525_v24, %v8986_v21  ;;  %v4157_v46 = vsel %vm4107_vm10, %v14459_v16, %v8987_v58 }
 0x361   : > { %v14853_v14 = vsel %vm1818_vm4, %v18141_v36, %v1966_v5  ;;  %v18142_v43 = vrot.slane %v18097_v59, 3  ;;  %v14872_v28 = vadd.f32 %v18143_v10, %v4867_v48  ;;  %v4492_v5 = vpack.c.bf16 %v4157_v46, %v4156_v27  ;;  %v4908_v21 = vpop.f32.mrf.mxu1  ;;  %v18144_v48 = vld [vmem:[#allocation27_spill] sm:$0xff]  ;;  %v14891_v36 = vpop.permute.xlu1 %9104 }
 0x362   : > { %18139 = vst [vmem:[#allocation65_spill] sm:$0xff] %v14841_v57  ;;  %v9313_v55 = vpack.i.bf16 %v14858_v44, %v14853_v14  ;;  %v14875_v53 = vsel %vm4028_vm9, %v4003_v3, %v9007_v39  ;;  %v2560_v16 = vsel %vm883_vm2, %v2557_v30, %v17217_v4  ;;  %v1574_v58 = vrot.slane %v18037_v31, 1  ;;  %v18151_v4 = vld [vmem:[#allocation78_spill] sm:$0xff]  ;;  %v18154_v31 = vld [vmem:[#allocation60_spill] sm:$0xff] }
 0x363   : > { %v2558_v54 = vsel %vm883_vm2, %v18142_v43, %v2557_v30  ;;  %9299 = vrot.lane.b32.xlu0 %v9298_v52, %s9737_s23  ;;  %v17219_v29 = vmax.f32 %v14872_v28, 0.0  ;;  %4993 = vmatmul.mubr.bf16.gmra.mxu1 %v4492_v5  ;;  %v17223_v3 = vrot.slane %v18038_v35, 1  ;;  %v2834_v39 = vrot.slane %v18083_v9, 4  ;;  %v14903_v10 = vpop.f32.mrf.mxu1 }
 0x364   : > { %v14881_v24 = vsel %vm3949_vm8, %v2558_v54, %v9041_v50  ;;  %9314 = vrot.lane.b32.xlu1 %v9313_v55, %s9738_s10  ;;  %v4870_v30 = vadd.f32 %v14485_v19, %v18144_v48  ;;  %v14893_v50 = vpop.permute.xlu0 %9139  ;;  %v9052_v27 = vunpack.i.h.bf16 %v14397_v17  ;;  %v9051_v46 = vunpack.i.l.bf16 %v14397_v17  ;;  %v14901_v55 = vpop.f32.mrf.mxu0  ;;  %18147 = vst [vmem:[#allocation19_spill] sm:$0xff] %v14903_v10  ;;  %v18149_v17 = vld [vmem:[#allocation16_spill] sm:$0xff] }
 0x365   : > { %v18145_v43 = vrot.slane %v18002_v18, 1  ;;  %18146 = vst [vmem:[#allocation13_spill] sm:$0xff] %v14901_v55  ;;  %v5636_v5 = vrot.slane %v17219_v29, 2  ;;  %v1577_v21 = vsel %vm1428_vm5, %v1574_v58, %v17223_v3  ;;  %v18148_v48 = vrot.slane %v18054_v41, 4  ;;  %v4911_v18 = vpop.f32.mrf.mxu1 }
 0x366   : > { %v14914_v12 = vadd.f32 %v18149_v17, %v4870_v30  ;;  %v14921_v55 = vsel %vm3949_vm8, %v2560_v16, %v9042_v2  ;;  %v8042_v3 = vpop.f32.mrf.mxu0  ;;  %v18155_v30 = vld [vmem:[#allocation23_spill] sm:$0xff]  ;;  %v18158_v18 = vld [vmem:[#allocation41_spill] sm:$0xff] }
 0x367   : > { %v1575_v54 = vsel %vm1428_vm5, %v18145_v43, %v1574_v58  ;;  %v2835_v52 = vsel %vm882_vm0, %v18148_v48, %v2834_v39  ;;  %v18152_v43 = vld [vmem:[#allocation64_spill] sm:$0xff]  ;;  %v9032_v58 = vunpack.i.h.bf16 %v18154_v31  ;;  %v5637_v48 = vsel %vm1818_vm4, %v14801_v37, %v5636_v5 }
 0x368   : > { %18150 = vst [vmem:[#allocation80_spill] sm:$0xff] %v14914_v12  ;;  %v18153_v45 = vpack.c.bf16 %v18151_v4, %v18152_v43  ;;  %v9318_v29 = vpack.i.bf16 %v1577_v21, %v1575_v54  ;;  %v9338_v57 = vpack.i.bf16 %v2835_v52, %v14763_v56  ;;  %v9017_v17 = vunpack.i.h.bf16 %v18155_v30  ;;  %v14939_v3 = vpop.f32.mrf.mxu0  ;;  %v14950_v21 = vpop.permute.xlu1 %9119 }
 0x369   : > { %v17225_v10 = vmax.f32 %v14914_v12, 0.0  ;;  %v9031_v4 = vunpack.i.l.bf16 %v18154_v31  ;;  %v9016_v16 = vunpack.i.l.bf16 %v18155_v30  ;;  %v9056_v56 = vunpack.i.l.bf16 %v18158_v18  ;;  %18159 = vst [vmem:[#allocation42_spill] sm:$0xff] %v14939_v3 }
 0x36a   : > { %8109 = vmatmul.mubr.msk.bf16.gmra.mxu0 %vm3949_vm8, %v18153_v45  ;;  %v18156_v45 = vmax.f32 %v14517_v25, 0.0  ;;  %9319 = vrot.lane.b32.xlu1 %v9318_v29, %s9737_s23  ;;  %v17226_v37 = vrot.slane %v18088_v20, 4  ;;  %v4315_v54 = vsel %vm4028_vm9, %v14772_v33, %v9052_v27  ;;  %v4314_v31 = vsel %vm4028_vm9, %v14723_v49, %v9051_v46  ;;  %v14962_v27 = vpop.permute.xlu0 %9144  ;;  %v8043_v46 = vpop.f32.mrf.mxu0 }
 0x36b   : > { %9339 = vrot.lane.b32.xlu0 %v9338_v57, %s9737_s23  ;;  %v14947_v25 = vrot.slane %v17225_v10, 2  ;;  %v9057_v29 = vunpack.i.h.bf16 %v18158_v18  ;;  %v4005_v57 = vsel %vm3949_vm8, %v18097_v59, %v9032_v58  ;;  %v9323_v43 = vpack.i.bf16 %v14853_v14, %v14669_v40 }
 0x36c   : > { %v14932_v2 = vmax.f32 %v18156_v45, %v5637_v48  ;;  %v14959_v33 = vsel %vm882_vm0, %v2834_v39, %v17226_v37  ;;  %v9036_v49 = vunpack.i.l.bf16 %v14509_v6  ;;  %v4004_v30 = vsel %vm3949_vm8, %v18095_v0, %v9031_v4  ;;  %v18160_v39 = vld [vmem:[#allocation46_spill] sm:$0xff] }
 0x36d   : > { %v5639_v48 = vsel %vm1818_vm4, %v5636_v5, %v14947_v25  ;;  %v9353_v59 = vpack.i.bf16 %v14959_v33, %v2835_v52  ;;  %v9037_v40 = vunpack.i.h.bf16 %v14509_v6  ;;  %v2561_v58 = vrot.slane %v18160_v39, 3 }
 0x36e   : > { %18157 = vst [vmem:[#allocation83_spill] sm:$0xff] %v14932_v2  ;;  %9324 = vrot.lane.b32.xlu1 %v9323_v43, %s9736_s22  ;;  %v9072_v45 = vunpack.i.h.bf16 %v14511_v13  ;;  %v4392_v18 = vsel %vm4107_vm10, %v4314_v31, %v9056_v56  ;;  %v9071_v5 = vunpack.i.l.bf16 %v14511_v13  ;;  %v4393_v0 = vsel %vm4107_vm10, %v4315_v54, %v9057_v29  ;;  %v18163_v31 = vld [vmem:[#allocation47_spill] sm:$0xff]  ;;  %v15007_v37 = vpop.permute.xlu0 %9159 }
 0x36f   : > { %9354 = vrot.lane.b32.xlu0 %v9353_v59, %s9736_s22  ;;  %v1578_v52 = vrot.slane %v18053_v7, 1  ;;  %v17227_v6 = vrot.slane %v18054_v41, 1  ;;  %v18161_v4 = vmax.f32 %v14570_v63, 0.0  ;;  %v14985_v43 = vsel %vm4028_vm9, %v4004_v30, %v9036_v49 }
 0x370   : > { %v4496_v10 = vpack.c.bf16 %v4393_v0, %v4392_v18  ;;  %v3463_v56 = vrot.slane %v18083_v9, 5  ;;  %v17229_v59 = vrot.slane %v18163_v31, 3  ;;  %v18164_v13 = vrot.slane %v18038_v35, 1  ;;  %v18167_v0 = vld [vmem:[#allocation37_spill] sm:$0xff] }
 0x371   : > { %v14982_v46 = vmax.f32 %v18161_v4, %v5639_v48  ;;  %v1581_v29 = vsel %vm1428_vm5, %v1578_v52, %v17227_v6  ;;  %v17228_v63 = vrot.slane %v18088_v20, 5  ;;  %v14996_v48 = vpop.permute.xlu1 %9124  ;;  %v14998_v4 = vpop.f32.mrf.mxu0  ;;  %v18166_v30 = vrot.slane %v18054_v41, 5 }
 0x372   : > { %v1579_v54 = vsel %vm1428_vm5, %v18164_v13, %v1578_v52  ;;  %18165 = vst [vmem:[#allocation16_spill] sm:$0xff] %v14998_v4  ;;  %5000 = vmatprep.mubr.bf16.mxu1 %v4496_v10  ;;  %v4875_v14 = vadd.f32 %v14485_v19, %v18167_v0  ;;  %v4158_v13 = vsel %vm4107_vm10, %v14642_v15, %v9016_v16  ;;  %v18168_v6 = vrot.slane %v18137_v42, 3  ;;  %v18169_v16 = vld [vmem:[#allocation67_spill] sm:$0xff] }
 0x373   : > { %18162 = vst [vmem:[#allocation27_spill] sm:$0xff] %v14982_v46  ;;  %v9328_v49 = vpack.i.bf16 %v1581_v29, %v1579_v54  ;;  %v3464_v18 = vsel %vm3321_vm7, %v18166_v30, %v3463_v56  ;;  %v15010_v52 = vsel %vm4028_vm9, %v4005_v57, %v9037_v40  ;;  %v3466_v54 = vsel %vm3321_vm7, %v3463_v56, %v17228_v63  ;;  %v8046_v30 = vpop.f32.mrf.mxu0 }
 0x374   : > { %v2562_v10 = vsel %vm883_vm2, %v18168_v6, %v2561_v58  ;;  %v4159_v29 = vsel %vm4107_vm10, %v14653_v61, %v9017_v17  ;;  %v9358_v15 = vpack.i.bf16 %v3466_v54, %v3464_v18  ;;  %v15025_v57 = vadd.f32 %v18169_v16, %v4875_v14  ;;  %v18171_v61 = vld [vmem:[#allocation88_spill] sm:$0xff] }
 0x375   : > { %v15021_v0 = vsel %vm3949_vm8, %v2562_v10, %v9071_v5  ;;  %9329 = vrot.lane.b32.xlu1 %v9328_v49, %s9737_s23  ;;  %v4495_v40 = vpack.c.bf16 %v4159_v29, %v4158_v13  ;;  %v2564_v6 = vsel %vm883_vm2, %v2561_v58, %v17229_v59  ;;  %v1970_v56 = vrot.slane %v18054_v41, 2  ;;  %v15034_v5 = vpop.f32.mrf.mxu0  ;;  %v15043_v13 = vpop.f32.mrf.mxu1  ;;  %v18173_v10 = vld [vmem:[#allocation40_spill] sm:$0xff] }
 0x376   : > { %18170 = vst [vmem:[#allocation78_spill] sm:$0xff] %v15025_v57  ;;  %v2838_v63 = vrot.slane %v18110_v22, 4  ;;  %v4878_v17 = vadd.f32 %v14485_v19, %v18171_v61  ;;  %18172 = vst [vmem:[#allocation64_spill] sm:$0xff] %v15034_v5  ;;  %v15038_v18 = vsel %vm3949_vm8, %v2564_v6, %v9072_v45  ;;  %9359 = vrot.lane.b32.xlu0 %v9358_v15, %s9738_s10  ;;  %v17231_v14 = vmax.f32 %v15025_v57, 0.0  ;;  %v18176_v6 = vld [vmem:[#allocation52_spill] sm:$0xff]  ;;  %v15055_v15 = vpop.permute.xlu1 %9134 }
 0x377   : > { %5001 = vmatmul.mubr.bf16.gmra.mxu1 %v4495_v40  ;;  %v9082_v54 = vunpack.i.h.bf16 %v18173_v10  ;;  %v18174_v29 = vrot.slane %v18053_v7, 2  ;;  %v18175_v16 = vrot.slane %v18088_v20, 4  ;;  %v8047_v40 = vpop.f32.mrf.mxu0  ;;  %v9081_v59 = vunpack.i.l.bf16 %v18173_v10  ;;  %v4916_v4 = vpop.f32.mrf.mxu1 }
 0x378   : > { %v15053_v61 = vadd.f32 %v18176_v6, %v4878_v17  ;;  %v5640_v49 = vrot.slane %v17231_v14, 2  ;;  %v18178_v6 = vld [vmem:[#allocation25_spill] sm:$0xff]  ;;  %v9067_v4 = vunpack.i.h.bf16 %v14648_v23  ;;  %v18181_v3 = vmax.f32 %v14686_v26, 0.0 }
 0x379   : > { %v1971_v30 = vsel %vm1818_vm4, %v18174_v29, %v1970_v56  ;;  %v2839_v45 = vsel %vm882_vm0, %v18175_v16, %v2838_v63  ;;  %v15062_v29 = vpop.permute.xlu0 %9169  ;;  %v9046_v16 = vunpack.i.l.bf16 %v14545_v8  ;;  %v9062_v12 = vunpack.i.h.bf16 %v18178_v6  ;;  %v15077_v10 = vpop.f32.mrf.mxu1 }
 0x37a   : > { %18177 = vst [vmem:[#allocation60_spill] sm:$0xff] %v15053_v61  ;;  %v9333_v58 = vpack.i.bf16 %v1971_v30, %v14858_v44  ;;  %v9363_v5 = vpack.i.bf16 %v2839_v45, %v14959_v33  ;;  %v9061_v40 = vunpack.i.l.bf16 %v18178_v6  ;;  %v5641_v14 = vsel %vm1818_vm4, %v14947_v25, %v5640_v49  ;;  %v18180_v25 = vld [vmem:[#allocation75_spill] sm:$0xff] }
 0x37b   : > { %v15073_v44 = vrot.slane %v18083_v9, 2  ;;  %v4317_v17 = vsel %vm4028_vm9, %v14921_v55, %v9082_v54  ;;  %v18179_v6 = vmax.f32 %v15053_v61, 0.0  ;;  %v15089_v2 = vmax.f32 %v18181_v3, %v5641_v14 }
 0x37c   : > { %9334 = vrot.lane.b32.xlu1 %v9333_v58, %s9736_s22  ;;  %9364 = vrot.lane.b32.xlu0 %v9363_v5, %s9737_s23  ;;  %v9087_v58 = vunpack.i.h.bf16 %v18180_v25  ;;  %v9086_v5 = vunpack.i.l.bf16 %v18180_v25  ;;  %v4316_v33 = vsel %vm4028_vm9, %v14881_v24, %v9081_v59  ;;  %v18183_v55 = vrot.slane %v18114_v1, 4  ;;  %v15108_v59 = vpop.permute.xlu1 %9149 }
 0x37d   : > { %v15083_v57 = vrot.slane %v18179_v6, 2  ;;  %18182 = vst [vmem:[#allocation23_spill] sm:$0xff] %v15089_v2  ;;  %v15095_v46 = vsel %vm1818_vm4, %v1970_v56, %v15073_v44  ;;  %v4919_v6 = vpop.f32.mrf.mxu1  ;;  %v4007_v26 = vsel %vm3949_vm8, %v18137_v42, %v9062_v12  ;;  %v4006_v56 = vsel %vm3949_vm8, %v18131_v34, %v9061_v40 }
 0x37e   : > { %v15100_v54 = vsel %vm882_vm0, %v2838_v63, %v18183_v55  ;;  %v9343_v3 = vpack.i.bf16 %v15095_v46, %v1971_v30  ;;  %v9066_v14 = vunpack.i.l.bf16 %v14648_v23  ;;  %v15114_v63 = vsel %vm4028_vm9, %v4007_v26, %v9067_v4  ;;  %v18184_v55 = vld [vmem:[#allocation92_spill] sm:$0xff]  ;;  %v15125_v23 = vpop.f32.mrf.mxu0 }
 0x37f   : > { %v5643_v25 = vsel %vm1818_vm4, %v5640_v49, %v15083_v57  ;;  %v9378_v24 = vpack.i.bf16 %v15100_v54, %v2839_v45  ;;  %v2565_v6 = vrot.slane %v18184_v55, 3  ;;  %v15117_v49 = vpop.permute.xlu0 %9174  ;;  %v9102_v12 = vunpack.i.h.bf16 %v14650_v38  ;;  %18185 = vst [vmem:[#allocation41_spill] sm:$0xff] %v15125_v23  ;;  %v18190_v23 = vld [vmem:[#allocation54_spill] sm:$0xff] }
 0x380   : > { %9344 = vrot.lane.b32.xlu1 %v9343_v3, %s9738_s10  ;;  %v4394_v42 = vsel %vm4107_vm10, %v4316_v33, %v9086_v5  ;;  %v4395_v30 = vsel %vm4107_vm10, %v4317_v17, %v9087_v58  ;;  %v1582_v34 = vrot.slane %v18083_v9, 1  ;;  %v18186_v40 = vmax.f32 %v14766_v11, 0.0  ;;  %v18189_v58 = vld [vmem:[#allocation71_spill] sm:$0xff] }
 0x381   : > { %9379 = vrot.lane.b32.xlu0 %v9378_v24, %s9736_s22  ;;  %v4499_v26 = vpack.c.bf16 %v4395_v30, %v4394_v42  ;;  %v3467_v3 = vrot.slane %v18110_v22, 5  ;;  %v9101_v24 = vunpack.i.l.bf16 %v14650_v38  ;;  %v18188_v61 = vrot.slane %v18054_v41, 1  ;;  %v8050_v30 = vpop.f32.mrf.mxu0 }
 0x382   : > { %v15130_v4 = vmax.f32 %v18186_v40, %v5643_v25  ;;  %v17241_v17 = vrot.slane %v18114_v1, 5  ;;  %v4883_v5 = vadd.f32 %v14485_v19, %v18189_v58  ;;  %v17240_v45 = vrot.slane %v18190_v23, 3  ;;  %v18192_v58 = vld [vmem:[#allocation79_spill] sm:$0xff] }
 0x383   : > { %v1583_v33 = vsel %vm1428_vm5, %v18188_v61, %v1582_v34  ;;  %5008 = vmatprep.mubr.bf16.mxu1 %v4499_v26  ;;  %v18191_v25 = vrot.slane %v18088_v20, 5  ;;  %v4160_v38 = vsel %vm4107_vm10, %v14844_v51, %v9046_v16  ;;  %v15147_v40 = vsel %vm4028_vm9, %v4006_v56, %v9066_v14 }
 0x384   : > { %18187 = vst [vmem:[#allocation46_spill] sm:$0xff] %v15130_v4  ;;  %v9348_v11 = vpack.i.bf16 %v1582_v34, %v1583_v33  ;;  %v3470_v61 = vsel %vm3321_vm7, %v3467_v3, %v17241_v17  ;;  %v15153_v2 = vadd.f32 %v18192_v58, %v4883_v5  ;;  %v18194_v34 = vunpack.i.h.bf16 %v14545_v8  ;;  %v15159_v33 = vpop.permute.xlu1 %9154  ;;  %v15168_v5 = vpop.f32.mrf.mxu0 }
 0x385   : > { %v3468_v42 = vsel %vm3321_vm7, %v18191_v25, %v3467_v3  ;;  %v18195_v16 = vrot.slane %v18163_v31, 3  ;;  %v15166_v25 = vpop.permute.xlu0 %9189  ;;  %18196 = vst [vmem:[#allocation37_spill] sm:$0xff] %v15168_v5  ;;  %v2211_v30 = vrot.slane %v18088_v20, 2  ;;  %v2213_v58 = vrot.slane %v18110_v22, 2  ;;  %v18202_v5 = vld [vmem:[#allocation15_spill] sm:$0xff]  ;;  %v15201_v4 = vpop.f32.mrf.mxu1 }
 0x386   : > { %18193 = vst [vmem:[#allocation47_spill] sm:$0xff] %v15153_v2  ;;  %v4161_v26 = vsel %vm4107_vm10, %v14875_v53, %v18194_v34  ;;  %9349 = vrot.lane.b32.xlu1 %v9348_v11, %s9737_s23  ;;  %v9383_v14 = vpack.i.bf16 %v3470_v61, %v3468_v42  ;;  %v17244_v53 = vmax.f32 %v15153_v2, 0.0  ;;  %v2568_v34 = vsel %vm883_vm2, %v2565_v6, %v17240_v45  ;;  %v18197_v42 = vld [vmem:[#allocation32_spill] sm:$0xff]  ;;  %v8051_v51 = vpop.f32.mrf.mxu0 }
 0x387   : > { %v2566_v56 = vsel %vm883_vm2, %v18195_v16, %v2565_v6  ;;  %v4498_v3 = vpack.c.bf16 %v4161_v26, %v4160_v38  ;;  %v9112_v11 = vunpack.i.h.bf16 %v14720_v62  ;;  %v18198_v38 = vrot.slane %v18197_v42, 4  ;;  %v18200_v26 = vld [vmem:[#allocation44_spill] sm:$0xff]  ;;  %v18205_v51 = vld [vmem:[#allocation30_spill] sm:$0xff]  ;;  %v4924_v22 = vpop.f32.mrf.mxu1 }
 0x388   : > { %v15171_v8 = vsel %vm3949_vm8, %v2566_v56, %v9101_v24  ;;  %9384 = vrot.lane.b32.xlu0 %v9383_v14, %s9738_s10  ;;  %v18199_v24 = vrot.slane %v18114_v1, 4  ;;  %v4886_v16 = vadd.f32 %v14485_v19, %v18200_v26  ;;  %v15190_v56 = vrot.slane %v17244_v53, 2  ;;  %v15231_v20 = vpop.f32.mrf.mxu0 }
 0x389   : > { %5009 = vmatmul.mubr.bf16.gmra.mxu1 %v4498_v3  ;;  %v9111_v6 = vunpack.i.l.bf16 %v14720_v62  ;;  %v2212_v14 = vsel %vm1818_vm4, %v15073_v44, %v2211_v30  ;;  %v2214_v3 = vsel %vm1818_vm4, %v2211_v30, %v2213_v58  ;;  %v15204_v53 = vsel %vm3949_vm8, %v2568_v34, %v9102_v12  ;;  %v15226_v2 = vpop.permute.xlu0 %9199  ;;  %18211 = vst [vmem:[#allocation40_spill] sm:$0xff] %v15231_v20 }
 0x38a   : > { %v2843_v61 = vsel %vm882_vm0, %v18199_v24, %v18198_v38  ;;  %18201 = vst [vmem:[#allocation67_spill] sm:$0xff] %v15190_v56  ;;  %v9368_v45 = vpack.i.bf16 %v2214_v3, %v2212_v14  ;;  %v15198_v38 = vadd.f32 %v18202_v5, %v4886_v16  ;;  %v18204_v24 = vld [vmem:[#allocation45_spill] sm:$0xff]  ;;  %v5645_v62 = vsel %vm1818_vm4, %v15083_v57, %v15190_v56  ;;  %v15211_v3 = vpop.permute.xlu1 %9164 }
 0x38b   : > { %v9388_v17 = vpack.i.bf16 %v2843_v61, %v15100_v54  ;;  %v9092_v26 = vunpack.i.h.bf16 %v18204_v24  ;;  %v9091_v30 = vunpack.i.l.bf16 %v18204_v24  ;;  %v9117_v14 = vunpack.i.h.bf16 %v18205_v51  ;;  %v18207_v16 = vld [vmem:[#allocation29_spill] sm:$0xff] }
 0x38c   : > { %18203 = vst [vmem:[#allocation88_spill] sm:$0xff] %v15198_v38  ;;  %v18206_v54 = vmax.f32 %v14872_v28, 0.0  ;;  %9369 = vrot.lane.b32.xlu1 %v9368_v45, %s9738_s10  ;;  %v9116_v34 = vunpack.i.l.bf16 %v18205_v51  ;;  %v18208_v57 = vrot.slane %v18207_v16, 4  ;;  %v18209_v24 = vrot.slane %v18197_v42, 4  ;;  %v18210_v28 = vld [vmem:[#allocation35_spill] sm:$0xff] }
 0x38d   : > { %9389 = vrot.lane.b32.xlu0 %v9388_v17, %s9737_s23  ;;  %v9096_v17 = vunpack.i.l.bf16 %v14829_v60  ;;  %v4319_v51 = vsel %vm4028_vm9, %v15038_v18, %v9112_v11  ;;  %v4318_v12 = vsel %vm4028_vm9, %v15021_v0, %v9111_v6  ;;  %v9373_v22 = vpack.i.bf16 %v15073_v44, %v15095_v46  ;;  %v8054_v0 = vpop.f32.mrf.mxu0  ;;  %v15279_v20 = vpop.permute.xlu0 %9204 }
 0x38e   : > { %v15215_v5 = vmax.f32 %v18206_v54, %v5645_v62  ;;  %v3082_v56 = vsel %vm882_vm0, %v18209_v24, %v18208_v57  ;;  %v9077_v62 = vunpack.i.h.bf16 %v18210_v28  ;;  %v9076_v54 = vunpack.i.l.bf16 %v18210_v28  ;;  %v15241_v24 = vpop.f32.mrf.mxu1  ;;  %v15266_v0 = vpop.permute.xlu1 %9179 }
 0x38f   : > { %v9393_v45 = vpack.i.bf16 %v3082_v56, %v2843_v61  ;;  %v4009_v57 = vsel %vm3949_vm8, %v18163_v31, %v9092_v26  ;;  %v18212_v56 = vmax.f32 %v15198_v38, 0.0  ;;  %v4008_v18 = vsel %vm3949_vm8, %v18160_v39, %v9091_v30  ;;  %v18214_v31 = vld [vmem:[#allocation53_spill] sm:$0xff] }
 0x390   : > { %v9097_v11 = vunpack.i.h.bf16 %v14829_v60  ;;  %9374 = vrot.lane.b32.xlu1 %v9373_v22, %s9736_s22  ;;  %v2569_v46 = vrot.slane %v18214_v31, 3  ;;  %v4396_v44 = vsel %vm4107_vm10, %v4318_v12, %v9116_v34  ;;  %v4397_v6 = vsel %vm4107_vm10, %v4319_v51, %v9117_v14  ;;  %v15268_v12 = vpop.f32.mrf.mxu0  ;;  %v18218_v14 = vld [vmem:[#allocation86_spill] sm:$0xff] }
 0x391   : > { %v15246_v28 = vrot.slane %v18212_v56, 2  ;;  %9394 = vrot.lane.b32.xlu0 %v9393_v45, %s9736_s22  ;;  %v2215_v26 = vrot.slane %v18114_v1, 2  ;;  %v4927_v56 = vpop.f32.mrf.mxu1  ;;  %v15258_v61 = vsel %vm4028_vm9, %v4008_v18, %v9096_v17  ;;  %v9132_v39 = vunpack.i.h.bf16 %v14831_v32  ;;  %18217 = vst [vmem:[#allocation25_spill] sm:$0xff] %v15268_v12 }
 0x392   : > { %v4502_v60 = vpack.c.bf16 %v4397_v6, %v4396_v44  ;;  %v18215_v30 = vrot.slane %v18197_v42, 5  ;;  %v18216_v22 = vrot.slane %v18114_v1, 5  ;;  %v18219_v17 = vrot.slane %v18207_v16, 5  ;;  %v18221_v6 = vld [vmem:[#allocation90_spill] sm:$0xff]  ;;  %v8055_v34 = vpop.f32.mrf.mxu0 }
 0x393   : > { %18213 = vst [vmem:[#allocation52_spill] sm:$0xff] %v15246_v28  ;;  %v2216_v51 = vsel %vm1818_vm4, %v2213_v58, %v2215_v26  ;;  %v4891_v56 = vadd.f32 %v14485_v19, %v18221_v6  ;;  %v4162_v12 = vsel %vm4107_vm10, %v14985_v43, %v9076_v54  ;;  %v4163_v58 = vsel %vm4107_vm10, %v15010_v52, %v9077_v62  ;;  %v18222_v28 = vld [vmem:[#allocation14_spill] sm:$0xff]  ;;  %v18224_v43 = vld [vmem:[#allocation63_spill] sm:$0xff] }
 0x394   : > { %v3472_v45 = vsel %vm3321_vm7, %v18216_v22, %v18215_v30  ;;  %v18220_v18 = vmov %v18215_v30  ;;  %5016 = vmatprep.mubr.bf16.mxu1 %v4502_v60  ;;  %v9413_v30 = vpack.i.bf16 %v2215_v26, %v2216_v51  ;;  %v4501_v42 = vpack.c.bf16 %v4163_v58, %v4162_v12  ;;  %v18233_v58 = vld [vmem:[#allocation31_spill] sm:$0xff] }
 0x395   : > { %v3474_v44 = vsel %vm3321_vm7, %v18220_v18, %v18219_v17  ;;  %v15286_v38 = vadd.f32 %v18222_v28, %v4891_v56  ;;  %v9107_v17 = vunpack.i.h.bf16 %v14891_v36  ;;  %v9106_v18 = vunpack.i.l.bf16 %v14891_v36  ;;  %v18227_v28 = vld [vmem:[#allocation66_spill] sm:$0xff] }
 0x396   : > { %v9398_v22 = vpack.i.bf16 %v3474_v44, %v3472_v45  ;;  %v15291_v6 = vsel %vm4028_vm9, %v4009_v57, %v9097_v11  ;;  %v9131_v26 = vunpack.i.l.bf16 %v14831_v32  ;;  %9414 = vrot.lane.b32.xlu1 %v9413_v30, %s9738_s10  ;;  %v18225_v52 = vrot.slane %v18224_v43, 4  ;;  %5017 = vmatmul.mubr.bf16.gmra.mxu1 %v4501_v42  ;;  %v15313_v44 = vpop.f32.mrf.mxu0 }
 0x397   : > { %18223 = vst [vmem:[#allocation75_spill] sm:$0xff] %v15286_v38  ;;  %v18226_v62 = vrot.slane %v18207_v16, 4  ;;  %v18228_v60 = vrot.slane %v18227_v28, 4  ;;  %v18230_v57 = vrot.slane %v18190_v23, 3  ;;  %v18231_v11 = vrot.slane %v18218_v14, 3  ;;  %18232 = vst [vmem:[#allocation92_spill] sm:$0xff] %v15313_v44 }
 0x398   : > { %9399 = vrot.lane.b32.xlu0 %v9398_v22, %s9738_s10  ;;  %v18229_v45 = vmov %v18225_v52  ;;  %v9142_v34 = vunpack.i.h.bf16 %v14893_v50  ;;  %v17253_v56 = vmax.f32 %v15286_v38, 0.0  ;;  %v4165_v30 = vsel %vm4107_vm10, %v15114_v63, %v9107_v17 }
 0x399   : > { %v3084_v54 = vsel %vm882_vm0, %v18226_v62, %v18225_v52  ;;  %v3086_v36 = vsel %vm882_vm0, %v18229_v45, %v18228_v60  ;;  %v2570_v32 = vsel %vm883_vm2, %v18230_v57, %v2569_v46  ;;  %v2572_v12 = vsel %vm883_vm2, %v2569_v46, %v18231_v11  ;;  %v15321_v62 = vpop.permute.xlu1 %9184  ;;  %v15328_v45 = vpop.permute.xlu0 %9219 }
 0x39a   : > { %v9403_v51 = vpack.i.bf16 %v3086_v36, %v3084_v54  ;;  %v9141_v22 = vunpack.i.l.bf16 %v14893_v50  ;;  %v4894_v52 = vadd.f32 %v14485_v19, %v18233_v58  ;;  %v4164_v42 = vsel %vm4107_vm10, %v15147_v40, %v9106_v18  ;;  %v8058_v36 = vpop.f32.mrf.mxu0  ;;  %v18234_v50 = vld [vmem:[#allocation21_spill] sm:$0xff]  ;;  %v15345_v58 = vpop.f32.mrf.mxu1 }
 0x39b   : > { %v9122_v46 = vunpack.i.h.bf16 %v14950_v21  ;;  %v9121_v54 = vunpack.i.l.bf16 %v14950_v21  ;;  %v9147_v60 = vunpack.i.h.bf16 %v14962_v27  ;;  %v9146_v19 = vunpack.i.l.bf16 %v14962_v27 }
 0x39c   : > { %9404 = vrot.lane.b32.xlu0 %v9403_v51, %s9736_s22  ;;  %v15332_v63 = vadd.f32 %v18234_v50, %v4894_v52  ;;  %v18236_v17 = vrot.slane %v18224_v43, 5  ;;  %v18237_v40 = vrot.slane %v18207_v16, 5  ;;  %v18238_v21 = vrot.slane %v18227_v28, 5  ;;  %v15350_v50 = vpop.f32.mrf.mxu0 }
 0x39d   : > { %v4244_v51 = vsel %vm3949_vm8, %v2570_v32, %v9131_v26  ;;  %v4245_v52 = vsel %vm3949_vm8, %v2572_v12, %v9132_v39  ;;  %v9127_v27 = vunpack.i.h.bf16 %v14996_v48  ;;  %18240 = vst [vmem:[#allocation54_spill] sm:$0xff] %v15350_v50  ;;  %v4504_v16 = vpack.c.bf16 %v4165_v30, %v4164_v42 }
 0x39e   : > { %18235 = vst [vmem:[#allocation71_spill] sm:$0xff] %v15332_v63  ;;  %v3476_v18 = vsel %vm3321_vm7, %v18237_v40, %v18236_v17  ;;  %v18239_v57 = vmov %v18236_v17  ;;  %v4321_v17 = vsel %vm4028_vm9, %v15204_v53, %v9142_v34  ;;  %v4320_v43 = vsel %vm4028_vm9, %v15171_v8, %v9141_v22  ;;  %v4932_v40 = vpop.f32.mrf.mxu1  ;;  %v8059_v30 = vpop.f32.mrf.mxu0  ;;  %v18242_v8 = vld [vmem:[#allocation96_spill] sm:$0xff] }
 0x39f   : > { %v3478_v11 = vsel %vm3321_vm7, %v18239_v57, %v18238_v21  ;;  %v17252_v28 = vmax.f32 %v15332_v63, 0.0  ;;  %v15359_v26 = vrot.slane %v17253_v56, 2  ;;  %v4011_v39 = vsel %vm3949_vm8, %v18190_v23, %v9122_v46  ;;  %v15383_v57 = vpop.permute.xlu0 %9229  ;;  %v18283_v63 = vld [vmem:[#allocation58_spill] sm:$0xff] }
 0x3a0   : > { %v9408_v36 = vpack.i.bf16 %v3478_v11, %v3476_v18  ;;  %v9126_v32 = vunpack.i.l.bf16 %v14996_v48  ;;  %v4398_v12 = vsel %vm4107_vm10, %v4320_v43, %v9146_v19  ;;  %v4010_v53 = vsel %vm3949_vm8, %v18184_v55, %v9121_v54  ;;  %v15371_v18 = vpop.permute.xlu1 %9194  ;;  %v15373_v21 = vpop.f32.mrf.mxu1  ;;  %v15379_v19 = vld [vmem:[#allocation6] ss:$0 sm:$0xff]  ;;  %v18243_v55 = vld [vmem:[#allocation22_spill] sm:$0xff] }
 0x3a1   : > { %18241 = vst [vmem:[#allocation79_spill] sm:$0xff] %v15359_v26  ;;  %v2573_v34 = vrot.slane %v18242_v8, 3  ;;  %v9162_v22 = vunpack.i.h.bf16 %v15007_v37  ;;  %v4399_v42 = vsel %vm4107_vm10, %v4321_v17, %v9147_v60  ;;  %v15376_v48 = vsel %vm4028_vm9, %v4011_v39, %v9127_v27  ;;  %v15385_v11 = vpop.f32.mrf.mxu0  ;;  %v18247_v39 = vld [vmem:[#allocation33_spill] sm:$0xff] }
 0x3a2   : > { %9409 = vrot.lane.b32.xlu0 %v9408_v36, %s9738_s10  ;;  %v9161_v23 = vunpack.i.l.bf16 %v15007_v37  ;;  %v4505_v46 = vpack.c.bf16 %v4399_v42, %v4398_v12  ;;  %v4899_v54 = vadd.f32 %v15379_v19, %v18243_v55  ;;  %18244 = vst [vmem:[#allocation44_spill] sm:$0xff] %v15385_v11  ;;  %v15389_v60 = vrot.slane %v17252_v28, 2  ;;  %v18246_v36 = vld [vmem:[#allocation28_spill] sm:$0xff]  ;;  %v4935_v43 = vpop.f32.mrf.mxu1  ;;  %v18248_v42 = vld [vmem:[#allocation70_spill] sm:$0xff] }
 0x3a3   : > { %v2575_v17 = vrot.slane %v18246_v36, 3  ;;  %v9137_v27 = vunpack.i.h.bf16 %v15055_v15  ;;  %v9136_v37 = vunpack.i.l.bf16 %v15055_v15  ;;  %v4089_v40 = vsel %vm4028_vm9, %v4010_v53, %v9126_v32  ;;  %v8062_v28 = vpop.f32.mrf.mxu0 }
 0x3a4   : > { %18245 = vst [vmem:[#allocation15_spill] sm:$0xff] %v15389_v60  ;;  %5024 = vmatprep.mubr.bf16.mxu1 %v4505_v46  ;;  %v15396_v12 = vadd.f32 %v18247_v39, %v4899_v54  ;;  %v9172_v30 = vunpack.i.h.bf16 %v15062_v29  ;;  %v4902_v55 = vadd.f32 %v15379_v19, %v18248_v42  ;;  %v9171_v43 = vunpack.i.l.bf16 %v15062_v29  ;;  %v18250_v39 = vld [vmem:[#allocation81_spill] sm:$0xff] }
 0x3a5   : > { %5025 = vmatmul.mubr.bf16.gmra.mxu1 %v4504_v16  ;;  %v4167_v56 = vsel %vm4107_vm10, %v15291_v6, %v9137_v27  ;;  %v4166_v15 = vsel %vm4107_vm10, %v15258_v61, %v9136_v37  ;;  %v9152_v32 = vunpack.i.h.bf16 %v15108_v59  ;;  %v18249_v53 = vrot.slane %v18218_v14, 3  ;;  %v15419_v27 = vpop.permute.xlu1 %9209  ;;  %v15421_v37 = vpop.f32.mrf.mxu0 }
 0x3a6   : > { %v15412_v42 = vadd.f32 %v18250_v39, %v4902_v55  ;;  %v9151_v16 = vunpack.i.l.bf16 %v15108_v59  ;;  %v2576_v6 = vsel %vm883_vm2, %v2573_v34, %v2575_v17  ;;  %v9177_v61 = vunpack.i.h.bf16 %v15117_v49  ;;  %18251 = vst [vmem:[#allocation45_spill] sm:$0xff] %v15421_v37  ;;  %v15426_v59 = vpop.permute.xlu0 %9234 }
 0x3a7   : > { %v2574_v46 = vsel %vm883_vm2, %v18249_v53, %v2573_v34  ;;  %v9176_v29 = vunpack.i.l.bf16 %v15117_v49  ;;  %v4247_v53 = vsel %vm3949_vm8, %v2576_v6, %v9162_v22  ;;  %v4507_v54 = vpack.c.bf16 %v4167_v56, %v4166_v15  ;;  %v8063_v11 = vpop.f32.mrf.mxu0 }
 0x3a8   : > { %v4246_v28 = vsel %vm3949_vm8, %v2574_v46, %v9161_v23  ;;  %v4323_v55 = vsel %vm4028_vm9, %v4245_v52, %v9172_v30  ;;  %v17254_v39 = vmax.f32 %v15412_v42, 0.0  ;;  %v4322_v34 = vsel %vm4028_vm9, %v4244_v51, %v9171_v43  ;;  %v18254_v52 = vld [vmem:[#allocation89_spill] sm:$0xff]  ;;  %v15446_v11 = vpop.f32.mrf.mxu1 }
 0x3a9   : > { %v4013_v23 = vsel %vm3949_vm8, %v18218_v14, %v9152_v32  ;;  %v9157_v49 = vunpack.i.h.bf16 %v15159_v33  ;;  %v9156_v46 = vunpack.i.l.bf16 %v15159_v33  ;;  %v18252_v37 = vmax.f32 %v15396_v12, 0.0 }
 0x3aa   : > { %v4012_v56 = vsel %vm3949_vm8, %v18214_v31, %v9151_v16  ;;  %v2577_v30 = vrot.slane %v18254_v52, 3  ;;  %v4400_v15 = vsel %vm4107_vm10, %v4322_v34, %v9176_v29  ;;  %v9192_v51 = vunpack.i.h.bf16 %v15166_v25  ;;  %v18255_v31 = vld [vmem:[#allocation87_spill] sm:$0xff]  ;;  %v18256_v34 = vld [vmem:[#allocation57_spill] sm:$0xff]  ;;  %v4940_v50 = vpop.f32.mrf.mxu1 }
 0x3ab   : > { %v15435_v22 = vrot.slane %v18252_v37, 2  ;;  %v9191_v14 = vunpack.i.l.bf16 %v15166_v25  ;;  %v4401_v43 = vsel %vm4107_vm10, %v4323_v55, %v9177_v61  ;;  %v4907_v33 = vadd.f32 %v15379_v19, %v14864_v47  ;;  %v15460_v55 = vpop.permute.xlu1 %9214 }
 0x3ac   : > { %v15450_v32 = vrot.slane %v17254_v39, 2  ;;  %v4508_v6 = vpack.c.bf16 %v4401_v43, %v4400_v15  ;;  %v9167_v29 = vunpack.i.h.bf16 %v15211_v3  ;;  %v4091_v37 = vsel %vm4028_vm9, %v4012_v56, %v9156_v46  ;;  %v18257_v43 = vld [vmem:[#allocation19_spill] sm:$0xff]  ;;  %v15467_v56 = vpop.permute.xlu0 %9244 }
 0x3ad   : > { %18253 = vst [vmem:[#allocation30_spill] sm:$0xff] %v15435_v22  ;;  %v4092_v25 = vsel %vm4028_vm9, %v4013_v23, %v9157_v49  ;;  %v15457_v61 = vadd.f32 %v18256_v34, %v4907_v33  ;;  %v9166_v47 = vunpack.i.l.bf16 %v15211_v3  ;;  %v2578_v39 = vsel %vm883_vm2, %v2575_v17, %v2577_v30  ;;  %v15474_v49 = vpop.f32.mrf.mxu1 }
 0x3ae   : > { %5032 = vmatprep.mubr.bf16.mxu1 %v4508_v6  ;;  %v9202_v16 = vunpack.i.h.bf16 %v15226_v2  ;;  %v9201_v15 = vunpack.i.l.bf16 %v15226_v2  ;;  %v4910_v46 = vadd.f32 %v15379_v19, %v18257_v43  ;;  %v4169_v23 = vsel %vm4107_vm10, %v15376_v48, %v9167_v29  ;;  %v15484_v48 = vpop.f32.mrf.mxu0 }
 0x3af   : > { %5033 = vmatmul.mubr.bf16.gmra.mxu1 %v4507_v54  ;;  %v4168_v3 = vsel %vm4107_vm10, %v4089_v40, %v9166_v47  ;;  %v9182_v50 = vunpack.i.h.bf16 %v15266_v0  ;;  %v9181_v17 = vunpack.i.l.bf16 %v15266_v0  ;;  %v18258_v33 = vrot.slane %v18255_v31, 3  ;;  %v18259_v54 = vld [vmem:[#allocation38_spill] sm:$0xff]  ;;  %18260 = vst [vmem:[#allocation29_spill] sm:$0xff] %v15484_v48  ;;  %v4943_v44 = vpop.f32.mrf.mxu1 }
 0x3b0   : > { %v4248_v6 = vsel %vm3949_vm8, %v2578_v39, %v9191_v14  ;;  %v17257_v34 = vmax.f32 %v15457_v61, 0.0  ;;  %v15482_v43 = vadd.f32 %v18259_v54, %v4910_v46  ;;  %v9207_v29 = vunpack.i.h.bf16 %v15279_v20  ;;  %v8066_v46 = vpop.f32.mrf.mxu0  ;;  %v15499_v54 = vpop.permute.xlu1 %9224 }
 0x3b1   : > { %v2580_v2 = vsel %vm883_vm2, %v2577_v30, %v18258_v33  ;;  %v9206_v0 = vunpack.i.l.bf16 %v15279_v20  ;;  %v9187_v47 = vunpack.i.h.bf16 %v15321_v62  ;;  %v4510_v26 = vpack.c.bf16 %v4169_v23, %v4168_v3 }
 0x3b2   : > { %v4249_v40 = vsel %vm3949_vm8, %v2580_v2, %v9192_v51  ;;  %v4325_v30 = vsel %vm4028_vm9, %v4247_v53, %v9202_v16  ;;  %v4324_v39 = vsel %vm4028_vm9, %v4246_v28, %v9201_v15  ;;  %v17256_v14 = vmax.f32 %v15482_v43, 0.0  ;;  %v18261_v28 = vld [vmem:[#allocation26_spill] sm:$0xff]  ;;  %v15510_v23 = vpop.f32.mrf.mxu0 }
 0x3b3   : > { %v4015_v33 = vsel %vm3949_vm8, %v18246_v36, %v9182_v50  ;;  %v4014_v51 = vsel %vm3949_vm8, %v18242_v8, %v9181_v17  ;;  %v9186_v2 = vunpack.i.l.bf16 %v15321_v62  ;;  %v4402_v20 = vsel %vm4107_vm10, %v4324_v39, %v9206_v0  ;;  %v15508_v36 = vpop.permute.xlu0 %9259  ;;  %18262 = vst [vmem:[#allocation35_spill] sm:$0xff] %v15510_v23  ;;  %v18263_v0 = vld [vmem:[#allocation97_spill] sm:$0xff] }
 0x3b4   : > { %v15503_v44 = vrot.slane %v17257_v34, 2  ;;  %v2581_v53 = vrot.slane %v18261_v28, 3  ;;  %v9222_v16 = vunpack.i.h.bf16 %v15328_v45  ;;  %v4403_v15 = vsel %vm4107_vm10, %v4325_v30, %v9207_v29  ;;  %v8067_v46 = vpop.f32.mrf.mxu0 }
 0x3b5   : > { %v15513_v62 = vsel %vm4028_vm9, %v4015_v33, %v9187_v47  ;;  %v9221_v8 = vunpack.i.l.bf16 %v15328_v45  ;;  %v4511_v3 = vpack.c.bf16 %v4403_v15, %v4402_v20  ;;  %v4915_v50 = vadd.f32 %v15379_v19, %v15043_v13  ;;  %v18264_v33 = vld [vmem:[#allocation82_spill] sm:$0xff] }
 0x3b6   : > { %v15520_v17 = vrot.slane %v17256_v14, 2  ;;  %v2583_v39 = vrot.slane %v18263_v0, 3  ;;  %v9197_v29 = vunpack.i.h.bf16 %v15371_v18  ;;  %v9196_v30 = vunpack.i.l.bf16 %v15371_v18 }
 0x3b7   : > { %v4093_v47 = vsel %vm4028_vm9, %v4014_v51, %v9186_v2  ;;  %5040 = vmatprep.mubr.bf16.mxu1 %v4511_v3  ;;  %v15527_v45 = vadd.f32 %v18264_v33, %v4915_v50  ;;  %v9232_v20 = vunpack.i.h.bf16 %v15383_v57  ;;  %v4918_v13 = vadd.f32 %v15379_v19, %v15077_v10  ;;  %v18266_v50 = vld [vmem:[#allocation74_spill] sm:$0xff]  ;;  %v15552_v33 = vpop.permute.xlu0 %9264 }
 0x3b8   : > { %5041 = vmatmul.mubr.bf16.gmra.mxu1 %v4510_v26  ;;  %v4171_v15 = vsel %vm4107_vm10, %v4092_v25, %v9197_v29  ;;  %v4170_v14 = vsel %vm4107_vm10, %v4091_v37, %v9196_v30  ;;  %v9231_v34 = vunpack.i.l.bf16 %v15383_v57  ;;  %v9212_v18 = vunpack.i.h.bf16 %v15419_v27  ;;  %v15544_v26 = vpop.permute.xlu1 %9239  ;;  %v15546_v25 = vpop.f32.mrf.mxu0 }
 0x3b9   : > { %v18265_v51 = vrot.slane %v18255_v31, 3  ;;  %v15541_v46 = vadd.f32 %v18266_v50, %v4918_v13  ;;  %v9211_v10 = vunpack.i.l.bf16 %v15419_v27  ;;  %18267 = vst [vmem:[#allocation53_spill] sm:$0xff] %v15546_v25  ;;  %v2584_v37 = vsel %vm883_vm2, %v2581_v53, %v2583_v39 }
 0x3ba   : > { %v9237_v29 = vunpack.i.h.bf16 %v15426_v59  ;;  %v9236_v30 = vunpack.i.l.bf16 %v15426_v59  ;;  %v4513_v13 = vpack.c.bf16 %v4171_v15, %v4170_v14  ;;  %v4327_v50 = vsel %vm4028_vm9, %v4249_v40, %v9232_v20  ;;  %v8070_v3 = vpop.f32.mrf.mxu0 }
 0x3bb   : > { %v2582_v2 = vsel %vm883_vm2, %v18265_v51, %v2581_v53  ;;  %v4251_v51 = vsel %vm3949_vm8, %v2584_v37, %v9222_v16  ;;  %v17258_v27 = vmax.f32 %v15541_v46, 0.0  ;;  %v4326_v25 = vsel %vm4028_vm9, %v4248_v6, %v9231_v34 }
 0x3bc   : > { %v4250_v57 = vsel %vm3949_vm8, %v2582_v2, %v9221_v8  ;;  %v4017_v53 = vsel %vm3949_vm8, %v18255_v31, %v9212_v18  ;;  %v9216_v8 = vunpack.i.l.bf16 %v15460_v55  ;;  %v18268_v2 = vld [vmem:[#allocation95_spill] sm:$0xff]  ;;  %v18269_v59 = vmax.f32 %v15527_v45, 0.0  ;;  %v15570_v20 = vpop.f32.mrf.mxu0  ;;  %v15577_v18 = vpop.f32.mrf.mxu1 }
 0x3bd   : > { %v2585_v23 = vrot.slane %v18268_v2, 3  ;;  %v4016_v14 = vsel %vm3949_vm8, %v18254_v52, %v9211_v10  ;;  %v9217_v40 = vunpack.i.h.bf16 %v15460_v55  ;;  %v4404_v16 = vsel %vm4107_vm10, %v4326_v25, %v9236_v30  ;;  %18270 = vst [vmem:[#allocation86_spill] sm:$0xff] %v15570_v20  ;;  %v18271_v55 = vld [vmem:[#allocation62_spill] sm:$0xff]  ;;  %v9250_v37 = vpop.permute.xlu1 %9249  ;;  %v15585_v30 = vpop.permute.xlu0 %9269 }
 0x3be   : > { %v15564_v48 = vrot.slane %v18269_v59, 2  ;;  %v9247_v6 = vunpack.i.h.bf16 %v15467_v56  ;;  %v9246_v31 = vunpack.i.l.bf16 %v15467_v56  ;;  %v4405_v34 = vsel %vm4107_vm10, %v4327_v50, %v9237_v29  ;;  %v18272_v50 = vld [vmem:[#allocation98_spill] sm:$0xff]  ;;  %v4948_v20 = vpop.f32.mrf.mxu1 }
 0x3bf   : > { %v4923_v15 = vadd.f32 %v15379_v19, %v15201_v4  ;;  %v15581_v52 = vrot.slane %v17258_v27, 2  ;;  %v4514_v10 = vpack.c.bf16 %v4405_v34, %v4404_v16  ;;  %v9227_v25 = vunpack.i.h.bf16 %v15499_v54  ;;  %v8071_v27 = vpop.f32.mrf.mxu0 }
 0x3c0   : > { %v4095_v56 = vsel %vm4028_vm9, %v4016_v14, %v9216_v8  ;;  %v2586_v29 = vsel %vm883_vm2, %v2583_v39, %v2585_v23  ;;  %v9226_v59 = vunpack.i.l.bf16 %v15499_v54  ;;  %v9262_v34 = vunpack.i.h.bf16 %v15508_v36  ;;  %v15603_v20 = vpop.f32.mrf.mxu1 }
 0x3c1   : > { %v15590_v4 = vadd.f32 %v18272_v50, %v4923_v15  ;;  %5048 = vmatprep.mubr.bf16.mxu1 %v4514_v10  ;;  %v4173_v16 = vsel %vm4107_vm10, %v15513_v62, %v9227_v25  ;;  %v9261_v3 = vunpack.i.l.bf16 %v15508_v36  ;;  %v4926_v8 = vadd.f32 %v15379_v19, %v15241_v24  ;;  %v18274_v24 = vld [vmem:[#allocation51_spill] sm:$0xff] }
 0x3c2   : > { %5049 = vmatmul.mubr.bf16.gmra.mxu1 %v4513_v13  ;;  %v4172_v14 = vsel %vm4107_vm10, %v4093_v47, %v9226_v59  ;;  %v9242_v54 = vunpack.i.h.bf16 %v15544_v26  ;;  %v9241_v27 = vunpack.i.l.bf16 %v15544_v26  ;;  %v4096_v62 = vsel %vm4028_vm9, %v4017_v53, %v9217_v40  ;;  %v9255_v59 = vpop.permute.xlu1 %9254  ;;  %v4951_v39 = vpop.f32.mrf.mxu1 }
 0x3c3   : > { %v18273_v15 = vrot.slane %v18271_v55, 3  ;;  %v4252_v10 = vsel %vm3949_vm8, %v2586_v29, %v9246_v31  ;;  %v15611_v25 = vadd.f32 %v18274_v24, %v4926_v8  ;;  %v9267_v47 = vunpack.i.h.bf16 %v15552_v33  ;;  %v18276_v39 = vld [vmem:[#allocation59_spill] sm:$0xff] }
 0x3c4   : > { %v9266_v50 = vunpack.i.l.bf16 %v15552_v33  ;;  %v9252_v26 = vunpack.i.h.bf16 %v9250_v37  ;;  %v4516_v60 = vpack.c.bf16 %v4173_v16, %v4172_v14  ;;  %v4329_v53 = vsel %vm4028_vm9, %v4251_v51, %v9262_v34 }
 0x3c5   : > { %v2588_v36 = vsel %vm883_vm2, %v2585_v23, %v18273_v15  ;;  %v4328_v40 = vsel %vm4028_vm9, %v4250_v57, %v9261_v3  ;;  %v9251_v23 = vunpack.i.l.bf16 %v9250_v37  ;;  %v9280_v15 = vpop.permute.xlu0 %9279  ;;  %v18275_v31 = vmax.f32 %v15590_v4, 0.0  ;;  %v15631_v37 = vpop.f32.mrf.mxu0 }
 0x3c6   : > { %v4253_v13 = vsel %vm3949_vm8, %v2588_v36, %v9247_v6  ;;  %v4019_v6 = vsel %vm3949_vm8, %v18263_v0, %v9242_v54  ;;  %v4018_v33 = vsel %vm3949_vm8, %v18261_v28, %v9241_v27  ;;  %v4406_v8 = vsel %vm4107_vm10, %v4328_v40, %v9266_v50  ;;  %18277 = vst [vmem:[#allocation90_spill] sm:$0xff] %v15631_v37  ;;  %v18278_v0 = vld [vmem:[#allocation56_spill] sm:$0xff] }
 0x3c7   : > { %v15620_v29 = vrot.slane %v18275_v31, 2  ;;  %v17260_v16 = vmax.f32 %v15611_v25, 0.0  ;;  %v2589_v51 = vrot.slane %v18276_v39, 3  ;;  %v9272_v57 = vunpack.i.h.bf16 %v15585_v30  ;;  %v8074_v40 = vpop.f32.mrf.mxu0 }
 0x3c8   : > { %v4407_v3 = vsel %vm4107_vm10, %v4329_v53, %v9267_v47  ;;  %v4175_v34 = vsel %vm4107_vm10, %v4096_v62, %v9252_v26  ;;  %v9271_v14 = vunpack.i.l.bf16 %v15585_v30  ;;  %v4174_v28 = vsel %vm4107_vm10, %v4095_v56, %v9251_v23  ;;  %v9275_v62 = vpop.permute.xlu1 %9274 }
 0x3c9   : > { %v4517_v36 = vpack.c.bf16 %v4407_v3, %v4406_v8  ;;  %v4931_v27 = vadd.f32 %v15379_v19, %v15345_v58  ;;  %v9257_v24 = vunpack.i.h.bf16 %v9255_v59  ;;  %v9256_v50 = vunpack.i.l.bf16 %v9255_v59  ;;  %v18280_v59 = vld [vmem:[#allocation61_spill] sm:$0xff]  ;;  %v9285_v8 = vpop.permute.xlu0 %9284  ;;  %v15653_v3 = vpop.f32.mrf.mxu0 }
 0x3ca   : > { %v9282_v31 = vunpack.i.h.bf16 %v9280_v15  ;;  %v9281_v47 = vunpack.i.l.bf16 %v9280_v15  ;;  %v4934_v53 = vadd.f32 %v15379_v19, %v15373_v21  ;;  %v4939_v30 = vadd.f32 %v15379_v19, %v15446_v11  ;;  %18281 = vst [vmem:[#allocation14_spill] sm:$0xff] %v15653_v3  ;;  %v18282_v11 = vld [vmem:[#allocation39_spill] sm:$0xff] }
 0x3cb   : > { %5056 = vmatprep.mubr.bf16.mxu1 %v4517_v36  ;;  %v15645_v26 = vrot.slane %v17260_v16, 2  ;;  %v18279_v56 = vrot.slane %v18271_v55, 3  ;;  %v15651_v23 = vadd.f32 %v18280_v59, %v4931_v27  ;;  %v9277_v15 = vunpack.i.h.bf16 %v9275_v62  ;;  %v8075_v27 = vpop.f32.mrf.mxu0 }
 0x3cc   : > { %5057 = vmatmul.mubr.bf16.gmra.mxu1 %v4516_v60  ;;  %v4519_v21 = vpack.c.bf16 %v4175_v34, %v4174_v28  ;;  %v4098_v36 = vsel %vm4028_vm9, %v4019_v6, %v9257_v24  ;;  %v15657_v40 = vadd.f32 %v18282_v11, %v4934_v53  ;;  %v9276_v16 = vunpack.i.l.bf16 %v9275_v62 }
 0x3cd   : > { %v2590_v58 = vsel %vm883_vm2, %v18279_v56, %v2589_v51  ;;  %v4097_v54 = vsel %vm4028_vm9, %v4018_v33, %v9256_v50  ;;  %v4331_v37 = vsel %vm4028_vm9, %v4253_v13, %v9282_v31  ;;  %v9287_v56 = vunpack.i.h.bf16 %v9285_v8 }
 0x3ce   : > { %v9286_v22 = vunpack.i.l.bf16 %v9285_v8  ;;  %v17265_v60 = vmax.f32 %v15651_v23, 0.0  ;;  %v4330_v59 = vsel %vm4028_vm9, %v4252_v10, %v9281_v47  ;;  %v15664_v3 = vadd.f32 %v18283_v63, %v4939_v30  ;;  %v18284_v63 = vld [vmem:[#allocation77_spill] sm:$0xff]  ;;  %v4954_v47 = vpop.f32.mrf.mxu1  ;;  %v9305_v30 = vpop.permute.xlu1 %9304 }
 0x3cf   : > { %v4942_v6 = vadd.f32 %v15379_v19, %v15474_v49  ;;  %v17264_v34 = vmax.f32 %v15657_v40, 0.0  ;;  %v15670_v28 = vsel %vm4107_vm10, %v4098_v36, %v9277_v15  ;;  %v4409_v33 = vsel %vm4107_vm10, %v4331_v37, %v9287_v56 }
 0x3d0   : > { %v4408_v13 = vsel %vm4107_vm10, %v4330_v59, %v9286_v22  ;;  %v15675_v24 = vsel %vm4107_vm10, %v4097_v54, %v9276_v16  ;;  %v17263_v10 = vmax.f32 %v15664_v3, 0.0  ;;  %v18285_v49 = vrot.slane %v18278_v0, 3  ;;  %v4956_v36 = vpop.f32.mrf.mxu1 }
 0x3d1   : > { %v4520_v50 = vpack.c.bf16 %v4409_v33, %v4408_v13  ;;  %v15679_v31 = vadd.f32 %v18284_v63, %v4942_v6  ;;  %v4254_v62 = vsel %vm3949_vm8, %v2590_v58, %v9271_v14  ;;  %v2593_v22 = vrot.slane %v18038_v35, 3  ;;  %v9290_v58 = vpop.permute.xlu0 %9289  ;;  %v15703_v13 = vpop.f32.mrf.mxu0 }
 0x3d2   : > { %v2592_v53 = vsel %vm883_vm2, %v2589_v51, %v18285_v49  ;;  %v2595_v37 = vrot.slane %v18053_v7, 3  ;;  %v9307_v16 = vunpack.i.h.bf16 %v9305_v30  ;;  %v9306_v54 = vunpack.i.l.bf16 %v9305_v30  ;;  %18286 = vst [vmem:[#allocation63_spill] sm:$0xff] %v15703_v13  ;;  %v4957_v33 = vpop.f32.mrf.mxu1 }
 0x3d3   : > { %5064 = vmatprep.mubr.bf16.mxu1 %v4520_v50  ;;  %v2597_v15 = vrot.slane %v18054_v41, 3  ;;  %v2599_v8 = vrot.slane %v18083_v9, 3  ;;  %v4255_v11 = vsel %vm3949_vm8, %v2592_v53, %v9272_v57  ;;  %v15692_v51 = vrot.slane %v17265_v60, 2 }
 0x3d4   : > { %v4522_v14 = vpack.c.bf16 %v15670_v28, %v15675_v24  ;;  %5065 = vmatmul.mubr.bf16.gmra.mxu1 %v4519_v21  ;;  %v17266_v56 = vmax.f32 %v15679_v31, 0.0  ;;  %v15699_v27 = vrot.slane %v17264_v34, 2  ;;  %v9292_v59 = vunpack.i.h.bf16 %v9290_v58  ;;  %v18289_v34 = vld [vmem:[#allocation69_spill] sm:$0xff] }
 0x3d5   : > { %v9291_v6 = vunpack.i.l.bf16 %v9290_v58  ;;  %v5672_v57 = vrot.slane %v17263_v10, 2  ;;  %v18287_v50 = vmov %v18285_v49  ;;  %v15711_v21 = vsel %vm883_vm2, %v2593_v22, %v2595_v37  ;;  %v4959_v58 = vpop.f32.mrf.mxu1  ;;  %v18288_v10 = vld [vmem:[#allocation50_spill] sm:$0xff] }
 0x3d6   : > { %v15708_v28 = vsel %vm883_vm2, %v18287_v50, %v2593_v22  ;;  %v4947_v24 = vadd.f32 %v15379_v19, %v15577_v18  ;;  %v4950_v63 = vadd.f32 %v15379_v19, %v15603_v20  ;;  %v4021_v49 = vsel %vm3949_vm8, %v18271_v55, %v9307_v16  ;;  %v8078_v22 = vpop.f32.mrf.mxu0  ;;  %v9310_v50 = vpop.permute.xlu1 %9309  ;;  %v18290_v16 = vld [vmem:[#allocation93_spill] sm:$0xff] }
 0x3d7   : > { %v4020_v53 = vsel %vm3949_vm8, %v18268_v2, %v9306_v54  ;;  %v15722_v30 = vsel %vm883_vm2, %v2595_v37, %v2597_v15  ;;  %v15725_v36 = vsel %vm883_vm2, %v2597_v15, %v2599_v8  ;;  %v5674_v18 = vrot.slane %v17266_v56, 2  ;;  %v9295_v15 = vpop.permute.xlu0 %9294 }
 0x3d8   : > { %v15730_v20 = vadd.f32 %v18288_v10, %v4947_v24  ;;  %v15733_v55 = vadd.f32 %v18289_v34, %v4950_v63  ;;  %v2601_v2 = vrot.slane %v18290_v16, 3  ;;  %v4333_v37 = vsel %vm4028_vm9, %v4255_v11, %v9292_v59  ;;  %v15740_v60 = vpop.f32.mrf.mxu0  ;;  %v18292_v16 = vld [vmem:[#allocation49_spill] sm:$0xff]  ;;  %v18293_v11 = vld [vmem:[#allocation24_spill] sm:$0xff] }
 0x3d9   : > { %v4332_v54 = vsel %vm4028_vm9, %v4254_v62, %v9291_v6  ;;  %v4955_v22 = vadd.f32 %v15379_v19, %v4954_v47  ;;  %v4958_v58 = vadd.f32 %v15379_v19, %v4957_v33  ;;  %18291 = vst [vmem:[#allocation66_spill] sm:$0xff] %v15740_v60  ;;  %v9297_v56 = vunpack.i.h.bf16 %v9295_v15 }
 0x3da   : > { %v9296_v13 = vunpack.i.l.bf16 %v9295_v15  ;;  %v17270_v10 = vmax.f32 %v15730_v20, 0.0  ;;  %v17269_v34 = vmax.f32 %v15733_v55, 0.0  ;;  %v9312_v24 = vunpack.i.h.bf16 %v9310_v50  ;;  %v8079_v59 = vpop.f32.mrf.mxu0 }
 0x3db   : > { %v9311_v63 = vunpack.i.l.bf16 %v9310_v50  ;;  %v15745_v41 = vadd.f32 %v18292_v16, %v4955_v22  ;;  %v15748_v62 = vadd.f32 %v18293_v11, %v4958_v58  ;;  %v4411_v6 = vsel %vm4107_vm10, %v4333_v37, %v9297_v56  ;;  %v9300_v60 = vpop.permute.xlu0 %9299  ;;  %v9315_v16 = vpop.permute.xlu1 %9314  ;;  %v18297_v58 = vld [vmem:[#allocation72_spill] sm:$0xff] }
 0x3dc   : > { %v4410_v47 = vsel %vm4107_vm10, %v4332_v54, %v9296_v13  ;;  %v5676_v33 = vrot.slane %v17270_v10, 2  ;;  %v5678_v15 = vrot.slane %v17269_v34, 2  ;;  %v15757_v50 = vsel %vm883_vm2, %v2599_v8, %v2601_v2 }
 0x3dd   : > { %v4523_v9 = vpack.c.bf16 %v4411_v6, %v4410_v47  ;;  %v17272_v22 = vmax.f32 %v15745_v41, 0.0  ;;  %v5673_v37 = vsel %vm1818_vm4, %v15699_v27, %v5672_v57  ;;  %v5675_v54 = vsel %vm1818_vm4, %v5672_v57, %v5674_v18 }
 0x3de   : > { %v5677_v13 = vsel %vm1818_vm4, %v5674_v18, %v5676_v33  ;;  %v5679_v56 = vsel %vm1818_vm4, %v5676_v33, %v5678_v15  ;;  %v9317_v11 = vunpack.i.h.bf16 %v9315_v16  ;;  %v9316_v59 = vunpack.i.l.bf16 %v9315_v16 }
 0x3df   : > { %5072 = vmatprep.mubr.bf16.mxu1 %v4523_v9  ;;  %v18294_v8 = vmax.f32 %v15651_v23, 0.0  ;;  %v18296_v6 = vmax.f32 %v15657_v40, 0.0  ;;  %v9302_v10 = vunpack.i.h.bf16 %v9300_v60  ;;  %v5680_v38 = vrot.slane %v17272_v22, 2  ;;  %v15781_v9 = vpop.f32.mrf.mxu0 }
 0x3e0   : > { %5073 = vmatmul.mubr.bf16.gmra.mxu1 %v4522_v14  ;;  %v18298_v57 = vmax.f32 %v15748_v62, 0.0  ;;  %18299 = vst [vmem:[#allocation21_spill] sm:$0xff] %v15781_v9  ;;  %v4099_v23 = vsel %vm4028_vm9, %v4020_v53, %v9311_v63  ;;  %v4100_v16 = vsel %vm4028_vm9, %v4021_v49, %v9312_v24  ;;  %v9301_v40 = vunpack.i.l.bf16 %v9300_v60  ;;  %v9320_v60 = vpop.permute.xlu1 %9319  ;;  %v9340_v49 = vpop.permute.xlu0 %9339 }
 0x3e1   : > { %v15768_v47 = vmax.f32 %v18294_v8, %v5677_v13  ;;  %v15772_v34 = vmax.f32 %v18296_v6, %v5679_v56  ;;  %v18300_v13 = vmax.f32 %v15590_v4, 0.0  ;;  %v15790_v14 = vsel %vm4107_vm10, %v4100_v16, %v9317_v11  ;;  %v8082_v33 = vpop.f32.mrf.mxu0 }
 0x3e2   : > { %v15779_v18 = vrot.slane %v18298_v57, 2  ;;  %v5681_v8 = vsel %vm1818_vm4, %v5678_v15, %v5680_v38  ;;  %v18301_v57 = vmax.f32 %v15611_v25, 0.0  ;;  %v15798_v53 = vsel %vm4107_vm10, %v4099_v23, %v9316_v59  ;;  %v4962_v33 = vpop.f32.mrf.mxu1 }
 0x3e3   : > { %18295 = vst [vmem:[#allocation31_spill] sm:$0xff] %v15768_v47  ;;  %v15787_v56 = vmax.f32 %v18300_v13, %v5673_v37  ;;  %v18302_v4 = vmax.f32 %v15664_v3, 0.0  ;;  %v18304_v63 = vmax.f32 %v15679_v31, 0.0  ;;  %v9322_v25 = vunpack.i.h.bf16 %v9320_v60  ;;  %v15816_v3 = vpop.f32.mrf.mxu0 }
 0x3e4   : > { %v5683_v6 = vsel %vm1818_vm4, %v5680_v38, %v15779_v18  ;;  %v5866_v22 = vmax.f32 %v18301_v57, %v5675_v54  ;;  %v4257_v38 = vsel %vm3949_vm8, %v15711_v21, %v9302_v10  ;;  %v9321_v54 = vunpack.i.l.bf16 %v9320_v60  ;;  %18307 = vst [vmem:[#allocation28_spill] sm:$0xff] %v15816_v3  ;;  %v18310_v57 = vld [vmem:[#allocation23_spill] sm:$0xff] }
 0x3e5   : > { %v15802_v24 = vmax.f32 %v18302_v4, %v5681_v8  ;;  %v15806_v37 = vmax.f32 %v18304_v63, %v5683_v6  ;;  %v18306_v11 = vrot.slane %v18297_v58, 3  ;;  %v4256_v31 = vsel %vm3949_vm8, %v15708_v28, %v9301_v40  ;;  %v18308_v6 = vld [vmem:[#allocation46_spill] sm:$0xff]  ;;  %v4964_v63 = vpop.f32.mrf.mxu1  ;;  %v9325_v40 = vpop.permute.xlu1 %9324 }
 0x3e6   : > { %v9341_v23 = vunpack.i.l.bf16 %v9340_v49  ;;  %v6044_v16 = vrot.slane %v15787_v56, 1  ;;  %v6046_v13 = vrot.slane %v5866_v22, 1  ;;  %v4023_v10 = vsel %vm3949_vm8, %v18278_v0, %v9322_v25 }
 0x3e7   : > { %18303 = vst [vmem:[#allocation96_spill] sm:$0xff] %v15802_v24  ;;  %18305 = vst [vmem:[#allocation22_spill] sm:$0xff] %v15806_v37  ;;  %v15814_v59 = vsel %vm883_vm2, %v2601_v2, %v18306_v11  ;;  %v9342_v8 = vunpack.i.h.bf16 %v9340_v49  ;;  %v18309_v2 = vrot.slane %v18308_v6, 1  ;;  %v18311_v60 = vrot.slane %v18310_v57, 1  ;;  %v8083_v11 = vpop.f32.mrf.mxu0 }
 0x3e8   : > { %v4022_v28 = vsel %vm3949_vm8, %v18276_v39, %v9321_v54  ;;  %v6047_v15 = vsel %vm1428_vm5, %v6044_v16, %v6046_v13  ;;  %v18312_v21 = vrot.slane %v15768_v47, 1  ;;  %v18313_v0 = vrot.slane %v15215_v5, 1  ;;  %v15842_v39 = vpop.f32.mrf.mxu1 }
 0x3e9   : > { %v6015_v4 = vsel %vm1428_vm5, %v18311_v60, %v18309_v2  ;;  %v18314_v49 = vmov %v18309_v2  ;;  %v9327_v9 = vunpack.i.h.bf16 %v9325_v40  ;;  %v9326_v2 = vunpack.i.l.bf16 %v9325_v40  ;;  %v9355_v60 = vpop.permute.xlu0 %9354 }
 0x3ea   : > { %v6049_v3 = vsel %vm1428_vm5, %v6046_v13, %v18312_v21  ;;  %v6017_v25 = vsel %vm1428_vm5, %v18314_v49, %v18313_v0  ;;  %v6239_v63 = vmax.f32 %v15787_v56, %v6047_v15  ;;  %v15846_v54 = vsel %vm3949_vm8, %v15722_v30, %v9341_v23  ;;  %v4967_v56 = vpop.f32.mrf.mxu1  ;;  %v9330_v0 = vpop.permute.xlu1 %9329  ;;  %v18319_v49 = vld [vmem:[#allocation83_spill] sm:$0xff] }
 0x3eb   : > { %v6240_v11 = vmax.f32 %v5866_v22, %v6049_v3  ;;  %v9357_v47 = vunpack.i.h.bf16 %v9355_v60  ;;  %v6223_v13 = vmax.f32 %v18310_v57, %v6015_v4  ;;  %v6224_v21 = vmax.f32 %v18308_v6, %v6017_v25 }
 0x3ec   : > { %v9356_v24 = vunpack.i.l.bf16 %v9355_v60  ;;  %v2605_v40 = vrot.slane %v18114_v1, 3  ;;  %v5669_v22 = vsel %vm1818_vm4, %v15645_v26, %v15692_v51  ;;  %v15858_v15 = vsel %vm3949_vm8, %v15725_v36, %v9342_v8 }
 0x3ed   : > { %v15850_v37 = vpack.c.bf16 %v6240_v11, %v6239_v63  ;;  %v15861_v30 = vsel %vm4028_vm9, %v4022_v28, %v9326_v2  ;;  %v15864_v3 = vsel %vm4028_vm9, %v4023_v10, %v9327_v9  ;;  %v15866_v23 = vpack.c.bf16 %v6224_v21, %v6223_v13  ;;  %v15876_v28 = vpop.f32.mrf.mxu0  ;;  %v18324_v13 = vld [vmem:[#allocation85_spill] sm:$0xff] }
 0x3ee   : > { %v4335_v6 = vsel %vm4028_vm9, %v4257_v38, %v9357_v47  ;;  %v5671_v1 = vsel %vm1818_vm4, %v15692_v51, %v15699_v27  ;;  %v18315_v4 = vmax.f32 %v15527_v45, 0.0  ;;  %v4963_v8 = vadd.f32 %v15379_v19, %v4962_v33  ;;  %v18317_v47 = vld [vmem:[#allocation27_spill] sm:$0xff] }
 0x3ef   : > { %7572 = vmatprep.subr.bf16.mxu1 %v15850_v37  ;;  %v18316_v9 = vmax.f32 %v15541_v46, 0.0  ;;  %v18318_v38 = vrot.slane %v18317_v47, 1  ;;  %v18320_v25 = vrot.slane %v18319_v49, 1  ;;  %v18321_v51 = vrot.slane %v18310_v57, 1  ;;  %v8086_v57 = vpop.f32.mrf.mxu0 }
 0x3f0   : > { %v5863_v36 = vmax.f32 %v18315_v4, %v5669_v22  ;;  %7573 = vmatpush3.bf16.msra.mxu1 %v15866_v23  ;;  %v5665_v33 = vsel %vm1818_vm4, %v15581_v52, %v15620_v29  ;;  %v4334_v60 = vsel %vm4028_vm9, %v4256_v31, %v9356_v24  ;;  %v18323_v46 = vrot.slane %v18297_v58, 3  ;;  %v9360_v22 = vpop.permute.xlu0 %9359 }
 0x3f1   : > { %v5864_v10 = vmax.f32 %v18316_v9, %v5671_v1  ;;  %v6011_v2 = vsel %vm1428_vm5, %v18320_v25, %v18318_v38  ;;  %v18322_v45 = vmov %v18318_v38  ;;  %v15901_v21 = vadd.f32 %v18324_v13, %v4963_v8  ;;  %v15908_v25 = vpop.f32.mrf.mxu0 }
 0x3f2   : > { %v6013_v27 = vsel %vm1428_vm5, %v18322_v45, %v18321_v51  ;;  %v15898_v63 = vsel %vm883_vm2, %v18323_v46, %v2605_v40  ;;  %v6040_v11 = vrot.slane %v5863_v36, 1  ;;  %v6221_v1 = vmax.f32 %v18319_v49, %v6011_v2 }
 0x3f3   : > { %v6042_v56 = vrot.slane %v5864_v10, 1  ;;  %v6222_v4 = vmax.f32 %v18317_v47, %v6013_v27  ;;  %v5667_v24 = vsel %vm1818_vm4, %v15620_v29, %v15645_v26  ;;  %v9332_v31 = vunpack.i.h.bf16 %v9330_v0  ;;  %v8087_v26 = vpop.f32.mrf.mxu0 }
 0x3f4   : > { %v9331_v58 = vunpack.i.l.bf16 %v9330_v0  ;;  %v9362_v9 = vunpack.i.h.bf16 %v9360_v22  ;;  %v9361_v38 = vunpack.i.l.bf16 %v9360_v22  ;;  %v5498_v45 = vmax.f32 %v15901_v21, 0.0  ;;  %v9335_v0 = vpop.permute.xlu1 %9334  ;;  %v9365_v13 = vpop.permute.xlu0 %9364 }
 0x3f5   : > { %v6043_v8 = vsel %vm1428_vm5, %v6040_v11, %v6042_v56  ;;  %v6045_v51 = vsel %vm1428_vm5, %v6042_v56, %v6044_v16  ;;  %v15913_v46 = vpack.c.bf16 %v6222_v4, %v6221_v1  ;;  %v18325_v16 = vmax.f32 %v15457_v61, 0.0 }
 0x3f6   : > { %v4412_v47 = vsel %vm4107_vm10, %v4334_v60, %v9361_v38  ;;  %v4413_v2 = vsel %vm4107_vm10, %v4335_v6, %v9362_v9  ;;  %v6237_v27 = vmax.f32 %v5863_v36, %v6043_v8  ;;  %v6238_v29 = vmax.f32 %v5864_v10, %v6045_v51  ;;  %v18327_v60 = vld [vmem:[#allocation32_spill] sm:$0xff] }
 0x3f7   : > { %v4526_v57 = vpack.c.bf16 %v4413_v2, %v4412_v47  ;;  %v15919_v22 = vrot.slane %v5498_v45, 2  ;;  %v15923_v56 = vmax.f32 %v18325_v16, %v5665_v33  ;;  %v18326_v1 = vmax.f32 %v15482_v43, 0.0  ;;  %v15948_v47 = vpop.f32.mrf.mxu1 }
 0x3f8   : > { %v4024_v6 = vsel %vm3949_vm8, %v18038_v35, %v9331_v58  ;;  %v9337_v36 = vunpack.i.h.bf16 %v9335_v0  ;;  %v9336_v10 = vunpack.i.l.bf16 %v9335_v0  ;;  %v18328_v9 = vrot.slane %v18327_v60, 3  ;;  %v18331_v0 = vld [vmem:[#allocation65_spill] sm:$0xff] }
 0x3f9   : > { %v5862_v4 = vmax.f32 %v18326_v1, %v5667_v24  ;;  %5080 = vmatprep.mubr.bf16.mxu1 %v4526_v57  ;;  %v15934_v8 = vpack.c.bf16 %v6238_v29, %v6237_v27  ;;  %v5685_v61 = vsel %vm1818_vm4, %v15779_v18, %v15919_v22  ;;  %v6036_v43 = vrot.slane %v15923_v56, 1  ;;  %v9345_v29 = vpop.permute.xlu1 %9344 }
 0x3fa   : > { %v15932_v38 = vsel %vm883_vm2, %v2605_v40, %v18328_v9  ;;  %v4025_v35 = vsel %vm3949_vm8, %v18053_v7, %v9332_v31  ;;  %v15943_v24 = vsel %vm4028_vm9, %v4024_v6, %v9336_v10  ;;  %v9367_v58 = vunpack.i.h.bf16 %v9365_v13  ;;  %v4972_v9 = vpop.f32.mrf.mxu1 }
 0x3fb   : > { %v6038_v33 = vrot.slane %v5862_v4, 1  ;;  %v9366_v51 = vunpack.i.l.bf16 %v9365_v13  ;;  %v18329_v40 = vpack.c.bf16 %v15790_v14, %v15798_v53  ;;  %7574 = vmatprep.subr.bf16.mxu1 %v15934_v8  ;;  %v18330_v18 = vmax.f32 %v15730_v20, 0.0  ;;  %v9380_v14 = vpop.permute.xlu0 %9379  ;;  %v18333_v13 = vld [vmem:[#allocation68_spill] sm:$0xff] }
 0x3fc   : > { %v4966_v27 = vadd.f32 %v15379_v19, %v15842_v39  ;;  %7575 = vmatpush3.bf16.msra.mxu1 %v15913_v46  ;;  %v18332_v20 = vrot.slane %v18331_v0, 1  ;;  %v18334_v57 = vrot.slane %v18333_v13, 1  ;;  %v18335_v1 = vrot.slane %v18319_v49, 1  ;;  %v15982_v49 = vpop.f32.mrf.mxu0 }
 0x3fd   : > { %5081 = vmatmul.mubr.bf16.gmra.mxu1 %v18329_v40  ;;  %v15953_v2 = vmax.f32 %v18330_v18, %v5685_v61  ;;  %v6039_v7 = vsel %vm1428_vm5, %v6036_v43, %v6038_v33  ;;  %v6041_v31 = vsel %vm1428_vm5, %v6038_v33, %v6040_v11  ;;  %v15974_v19 = vsel %vm4028_vm9, %v4025_v35, %v9337_v36  ;;  %v18337_v33 = vld [vmem:[#allocation20_spill] sm:$0xff] }
 0x3fe   : > { %v6235_v53 = vmax.f32 %v15923_v56, %v6039_v7  ;;  %v6236_v26 = vmax.f32 %v5862_v4, %v6041_v31  ;;  %v6007_v16 = vsel %vm1428_vm5, %v18334_v57, %v18332_v20  ;;  %v18336_v11 = vmov %v18332_v20  ;;  %v18341_v20 = vld [vmem:[#allocation91_spill] sm:$0xff] }
 0x3ff   : > { %v6009_v6 = vsel %vm1428_vm5, %v18336_v11, %v18335_v1  ;;  %v9347_v39 = vunpack.i.h.bf16 %v9345_v29  ;;  %v9346_v10 = vunpack.i.l.bf16 %v9345_v29  ;;  %v9382_v60 = vunpack.i.h.bf16 %v9380_v14  ;;  %v9385_v9 = vpop.permute.xlu0 %9384  ;;  %v18350_v56 = vld [vmem:[#allocation71_spill] sm:$0xff] }
 0x400   : > { %v9381_v4 = vunpack.i.l.bf16 %v9380_v14  ;;  %v15976_v61 = vpack.c.bf16 %v6236_v26, %v6235_v53  ;;  %v15979_v40 = vadd.f32 %v18337_v33, %v4966_v27  ;;  %v6219_v18 = vmax.f32 %v18333_v13, %v6007_v16  ;;  %v15996_v27 = vpop.f32.mrf.mxu1 }
 0x401   : > { %v15986_v7 = vsel %vm3949_vm8, %v15757_v50, %v9366_v51  ;;  %v15990_v36 = vsel %vm3949_vm8, %v15814_v59, %v9367_v58  ;;  %v4181_v35 = vsel %vm4107_vm10, %v15864_v3, %v9347_v39  ;;  %v4180_v31 = vsel %vm4107_vm10, %v15861_v30, %v9346_v10  ;;  %v8090_v58 = vpop.f32.mrf.mxu0  ;;  %v9350_v3 = vpop.permute.xlu1 %9349 }
 0x402   : > { %v4337_v29 = vsel %vm4028_vm9, %v15858_v15, %v9382_v60  ;;  %7576 = vmatprep.subr.bf16.mxu1 %v15976_v61  ;;  %v5499_v50 = vmax.f32 %v15979_v40, 0.0  ;;  %v6220_v51 = vmax.f32 %v18331_v0, %v6009_v6  ;;  %v5661_v59 = vsel %vm1818_vm4, %v15520_v17, %v15564_v48  ;;  %v18339_v15 = vld [vmem:[#allocation76_spill] sm:$0xff]  ;;  %v4975_v6 = vpop.f32.mrf.mxu1 }
 0x403   : > { %v5663_v30 = vsel %vm1818_vm4, %v15564_v48, %v15581_v52  ;;  %v18338_v14 = vmax.f32 %v15396_v12, 0.0  ;;  %v18340_v26 = vrot.slane %v18339_v15, 1  ;;  %v18342_v57 = vrot.slane %v18341_v20, 1  ;;  %v16031_v10 = vpop.f32.mrf.mxu0 }
 0x404   : > { %v18343_v16 = vrot.slane %v18333_v13, 1  ;;  %v4528_v39 = vpack.c.bf16 %v4181_v35, %v4180_v31  ;;  %v4336_v48 = vsel %vm4028_vm9, %v15846_v54, %v9381_v4  ;;  %v16027_v12 = vrot.slane %v5499_v50, 2 }
 0x405   : > { %v16011_v53 = vmax.f32 %v18338_v14, %v5661_v59  ;;  %v6003_v0 = vsel %vm1428_vm5, %v18342_v57, %v18340_v26  ;;  %v18344_v1 = vmov %v18340_v26  ;;  %v16029_v52 = vpack.c.bf16 %v6220_v51, %v6219_v18  ;;  %v8091_v18 = vpop.f32.mrf.mxu0 }
 0x406   : > { %v6005_v11 = vsel %vm1428_vm5, %v18344_v1, %v18343_v16  ;;  %v9352_v60 = vunpack.i.h.bf16 %v9350_v3  ;;  %v18345_v13 = vmax.f32 %v15412_v42, 0.0  ;;  %v6217_v59 = vmax.f32 %v18341_v20, %v6003_v0  ;;  %v9390_v16 = vpop.permute.xlu0 %9389 }
 0x407   : > { %v6218_v35 = vmax.f32 %v18339_v15, %v6005_v11  ;;  %v9351_v31 = vunpack.i.l.bf16 %v9350_v3  ;;  %v9387_v58 = vunpack.i.h.bf16 %v9385_v9  ;;  %v9386_v54 = vunpack.i.l.bf16 %v9385_v9  ;;  %7577 = vmatpush3.bf16.msra.mxu1 %v16029_v52 }
 0x408   : > { %v5860_v33 = vmax.f32 %v18345_v13, %v5663_v30  ;;  %v6032_v4 = vrot.slane %v16011_v53, 1  ;;  %v5687_v51 = vsel %vm1818_vm4, %v15919_v22, %v16027_v12  ;;  %v5657_v42 = vsel %vm1818_vm4, %v15450_v32, %v15503_v44  ;;  %v9370_v22 = vpop.permute.xlu1 %9369 }
 0x409   : > { %v16042_v26 = vpack.c.bf16 %v6218_v35, %v6217_v59  ;;  %v4414_v3 = vsel %vm4107_vm10, %v4336_v48, %v9386_v54  ;;  %v4415_v30 = vsel %vm4107_vm10, %v4337_v29, %v9387_v58  ;;  %v18346_v15 = vmax.f32 %v15733_v55, 0.0  ;;  %v18347_v48 = vld [vmem:[#allocation75_spill] sm:$0xff]  ;;  %v16064_v58 = vpop.f32.mrf.mxu0 }
 0x40a   : > { %v6034_v14 = vrot.slane %v5860_v33, 1  ;;  %v5659_v0 = vsel %vm1818_vm4, %v15503_v44, %v15520_v17  ;;  %v4529_v1 = vpack.c.bf16 %v4415_v30, %v4414_v3  ;;  %v18348_v9 = vmax.f32 %v18347_v48, 0.0  ;;  %v18349_v44 = vld [vmem:[#allocation55_spill] sm:$0xff] }
 0x40b   : > { %v16051_v57 = vmax.f32 %v18346_v15, %v5687_v51  ;;  %v9372_v55 = vunpack.i.h.bf16 %v9370_v22  ;;  %v9371_v13 = vunpack.i.l.bf16 %v9370_v22  ;;  %v9392_v59 = vunpack.i.h.bf16 %v9390_v16 }
 0x40c   : > { %v6035_v11 = vsel %vm1428_vm5, %v6032_v4, %v6034_v14  ;;  %v6037_v6 = vsel %vm1428_vm5, %v6034_v14, %v6036_v43  ;;  %v16062_v29 = vmax.f32 %v18348_v9, %v5657_v42  ;;  %v9391_v35 = vunpack.i.l.bf16 %v9390_v16  ;;  %5088 = vmatprep.mubr.bf16.mxu1 %v4529_v1  ;;  %v18352_v14 = vld [vmem:[#allocation18_spill] sm:$0xff]  ;;  %v9375_v15 = vpop.permute.xlu1 %9374  ;;  %v18353_v9 = vld [vmem:[#allocation48_spill] sm:$0xff] }
 0x40d   : > { %v4027_v17 = vsel %vm3949_vm8, %v18349_v44, %v9352_v60  ;;  %v6233_v54 = vmax.f32 %v16011_v53, %v6035_v11  ;;  %v6234_v18 = vmax.f32 %v5860_v33, %v6037_v6  ;;  %v18351_v51 = vmax.f32 %v18350_v56, 0.0  ;;  %5089 = vmatmul.mubr.bf16.gmra.mxu1 %v4528_v39  ;;  %v8094_v53 = vpop.f32.mrf.mxu0  ;;  %v16101_v6 = vld [vmem:[#allocation6] ss:$0 sm:$0xff]  ;;  %v16110_v44 = vpop.f32.mrf.mxu1 }
 0x40e   : > { %v4026_v42 = vsel %vm3949_vm8, %v18352_v14, %v9351_v31  ;;  %v16075_v3 = vsel %vm4107_vm10, %v15974_v19, %v9372_v55  ;;  %v16079_v30 = vsel %vm4107_vm10, %v15943_v24, %v9371_v13  ;;  %v16083_v60 = vsel %vm3949_vm8, %v15898_v63, %v9391_v35  ;;  %v9395_v31 = vpop.permute.xlu0 %9394  ;;  %v18355_v13 = vld [vmem:[#allocation17_spill] sm:$0xff] }
 0x40f   : > { %v5858_v43 = vmax.f32 %v18351_v51, %v5659_v0  ;;  %v16087_v33 = vsel %vm3949_vm8, %v15932_v38, %v9392_v59  ;;  %v16089_v0 = vpack.c.bf16 %v6234_v18, %v6233_v54  ;;  %v6028_v19 = vrot.slane %v16062_v29, 1  ;;  %v16094_v11 = vpop.f32.mrf.mxu0 }
 0x410   : > { %v4531_v24 = vpack.c.bf16 %v16075_v3, %v16079_v30  ;;  %v9377_v16 = vunpack.i.h.bf16 %v9375_v15  ;;  %v9397_v1 = vunpack.i.h.bf16 %v9395_v31  ;;  %v9396_v63 = vunpack.i.l.bf16 %v9395_v31  ;;  %v18357_v3 = vld [vmem:[#allocation13_spill] sm:$0xff]  ;;  %v4980_v31 = vpop.f32.mrf.mxu1 }
 0x411   : > { %v6030_v22 = vrot.slane %v5858_v43, 1  ;;  %7578 = vmatprep.subr.bf16.mxu1 %v16089_v0  ;;  %v4971_v48 = vadd.f32 %v16101_v6, %v15948_v47  ;;  %v18354_v55 = vrot.slane %v18353_v9, 1  ;;  %v18356_v59 = vrot.slane %v18355_v13, 1  ;;  %v8095_v47 = vpop.f32.mrf.mxu0 }
 0x412   : > { %v4106_v54 = vsel %vm4028_vm9, %v4027_v17, %v9377_v16  ;;  %v9376_v18 = vunpack.i.l.bf16 %v9375_v15  ;;  %v4339_v56 = vsel %vm4028_vm9, %v15990_v36, %v9397_v1  ;;  %7579 = vmatpush3.bf16.msra.mxu1 %v16042_v26  ;;  %v18358_v53 = vrot.slane %v18341_v20, 1  ;;  %v9415_v36 = vpop.permute.xlu1 %9414  ;;  %v18360_v1 = vld [vmem:[#allocation30_spill] sm:$0xff] }
 0x413   : > { %v6031_v38 = vsel %vm1428_vm5, %v6028_v19, %v6030_v22  ;;  %v6033_v39 = vsel %vm1428_vm5, %v6030_v22, %v6032_v4  ;;  %v5999_v35 = vsel %vm1428_vm5, %v18356_v59, %v18354_v55  ;;  %v4338_v4 = vsel %vm4028_vm9, %v15986_v7, %v9396_v63  ;;  %v9400_v22 = vpop.permute.xlu0 %9399  ;;  %v18361_v63 = vld [vmem:[#allocation15_spill] sm:$0xff]  ;;  %v16135_v59 = vpop.f32.mrf.mxu1 }
 0x414   : > { %v6231_v51 = vmax.f32 %v16062_v29, %v6031_v38  ;;  %v6232_v14 = vmax.f32 %v5858_v43, %v6033_v39  ;;  %v16120_v30 = vadd.f32 %v18357_v3, %v4971_v48  ;;  %v18359_v17 = vmov %v18354_v55  ;;  %v18377_v29 = vld [vmem:[#allocation79_spill] sm:$0xff] }
 0x415   : > { %v6001_v15 = vsel %vm1428_vm5, %v18359_v17, %v18358_v53  ;;  %v6215_v7 = vmax.f32 %v18355_v13, %v5999_v35  ;;  %v5653_v43 = vsel %vm1818_vm4, %v18361_v63, %v18360_v1  ;;  %v5655_v38 = vsel %vm1818_vm4, %v18360_v1, %v15450_v32  ;;  %v18366_v1 = vld [vmem:[#allocation88_spill] sm:$0xff] }
 0x416   : > { %v6216_v16 = vmax.f32 %v18353_v9, %v6001_v15  ;;  %v9417_v20 = vunpack.i.h.bf16 %v9415_v36  ;;  %v9416_v39 = vunpack.i.l.bf16 %v9415_v36  ;;  %v9402_v48 = vunpack.i.h.bf16 %v9400_v22  ;;  %v18364_v9 = vld [vmem:[#allocation47_spill] sm:$0xff] }
 0x417   : > { %v9401_v55 = vunpack.i.l.bf16 %v9400_v22  ;;  %v16137_v47 = vpack.c.bf16 %v6232_v14, %v6231_v51  ;;  %v5500_v35 = vmax.f32 %v16120_v30, 0.0  ;;  %v18365_v53 = vmax.f32 %v18364_v9, 0.0  ;;  %v4983_v22 = vpop.f32.mrf.mxu1  ;;  %v9405_v14 = vpop.permute.xlu0 %9404  ;;  %v18370_v9 = vld [vmem:[#allocation36_spill] sm:$0xff] }
 0x418   : > { %v16140_v3 = vpack.c.bf16 %v6216_v16, %v6215_v7  ;;  %v4105_v15 = vsel %vm4028_vm9, %v4026_v42, %v9376_v18  ;;  %v16148_v32 = vsel %vm4107_vm10, %v4106_v54, %v9417_v20  ;;  %v4417_v36 = vsel %vm4107_vm10, %v4339_v56, %v9402_v48  ;;  %v18368_v48 = vld [vmem:[#allocation43_spill] sm:$0xff] }
 0x419   : > { %18362 = vst [vmem:[#allocation33_spill] sm:$0xff] %v16137_v47  ;;  %v16144_v17 = vmax.f32 %v18365_v53, %v5653_v43  ;;  %v4416_v31 = vsel %vm4107_vm10, %v4338_v4, %v9401_v55  ;;  %v16153_v51 = vsel %vm4107_vm10, %v4105_v15, %v9416_v39  ;;  %7580 = vmatprep.subr.bf16.mxu1 %v16137_v47  ;;  %v5688_v16 = vrot.slane %v5500_v35, 2 }
 0x41a   : > { %18363 = vst [vmem:[#allocation70_spill] sm:$0xff] %v16140_v3  ;;  %v4532_v7 = vpack.c.bf16 %v4417_v36, %v4416_v31  ;;  %v18367_v42 = vmax.f32 %v18366_v1, 0.0  ;;  %v9407_v54 = vunpack.i.h.bf16 %v9405_v14  ;;  %v9406_v43 = vunpack.i.l.bf16 %v9405_v14  ;;  %7581 = vmatpush3.bf16.msra.mxu1 %v16140_v3 }
 0x41b   : > { %v6024_v56 = vrot.slane %v16144_v17, 1  ;;  %v4974_v4 = vadd.f32 %v16101_v6, %v15996_v27  ;;  %v5689_v20 = vsel %vm1818_vm4, %v16027_v12, %v5688_v16  ;;  %v18369_v55 = vrot.slane %v18368_v48, 1 }
 0x41c   : > { %v5856_v18 = vmax.f32 %v18367_v42, %v5655_v38  ;;  %5096 = vmatprep.mubr.bf16.mxu1 %v4532_v7  ;;  %v18371_v53 = vrot.slane %v18370_v9, 1  ;;  %v18372_v15 = vrot.slane %v18355_v13, 1  ;;  %v4534_v27 = vpack.c.bf16 %v16148_v32, %v16153_v51  ;;  %v18375_v7 = vld [vmem:[#allocation42_spill] sm:$0xff]  ;;  %v16187_v42 = vpop.f32.mrf.mxu0  ;;  %v9410_v13 = vpop.permute.xlu0 %9409 }
 0x41d   : > { %v18373_v31 = vmov %v18369_v55  ;;  %v4341_v22 = vsel %vm4028_vm9, %v16087_v33, %v9407_v54  ;;  %v18374_v12 = vmax.f32 %v15745_v41, 0.0  ;;  %5097 = vmatmul.mubr.bf16.gmra.mxu1 %v4531_v24  ;;  %v16185_v1 = vadd.f32 %v18375_v7, %v4974_v4 }
 0x41e   : > { %v6026_v39 = vrot.slane %v5856_v18, 1  ;;  %v5995_v38 = vsel %vm1428_vm5, %v18371_v53, %v18369_v55  ;;  %v5997_v36 = vsel %vm1428_vm5, %v18373_v31, %v18372_v15  ;;  %v4340_v41 = vsel %vm4028_vm9, %v16083_v60, %v9406_v43 }
 0x41f   : > { %v16182_v14 = vmax.f32 %v18374_v12, %v5689_v20  ;;  %v6213_v51 = vmax.f32 %v18370_v9, %v5995_v38  ;;  %v6214_v33 = vmax.f32 %v18368_v48, %v5997_v36  ;;  %v9412_v24 = vunpack.i.h.bf16 %v9410_v13  ;;  %v8098_v20 = vpop.f32.mrf.mxu0  ;;  %v18378_v12 = vld [vmem:[#allocation52_spill] sm:$0xff]  ;;  %v18379_v48 = vld [vmem:[#allocation78_spill] sm:$0xff] }
 0x420   : > { %v6027_v55 = vsel %vm1428_vm5, %v6024_v56, %v6026_v39  ;;  %v6029_v32 = vsel %vm1428_vm5, %v6026_v39, %v6028_v19  ;;  %v9411_v54 = vunpack.i.l.bf16 %v9410_v13  ;;  %v17277_v15 = vmax.f32 %v16185_v1, 0.0  ;;  %v18382_v13 = vld [vmem:[#allocation60_spill] sm:$0xff] }
 0x421   : > { %v6229_v4 = vmax.f32 %v16144_v17, %v6027_v55  ;;  %v6230_v53 = vmax.f32 %v5856_v18, %v6029_v32  ;;  %v16199_v31 = vpack.c.bf16 %v6214_v33, %v6213_v51  ;;  %v5649_v19 = vsel %vm1818_vm4, %v18378_v12, %v18377_v29  ;;  %v16211_v18 = vpop.f32.mrf.mxu0 }
 0x422   : > { %v5651_v39 = vsel %vm1818_vm4, %v18377_v29, %v18361_v63  ;;  %v18380_v60 = vmax.f32 %v18379_v48, 0.0  ;;  %v4418_v38 = vsel %vm4107_vm10, %v4340_v41, %v9411_v54  ;;  %v4419_v17 = vsel %vm4107_vm10, %v4341_v22, %v9412_v24  ;;  %v18384_v63 = vld [vmem:[#allocation84_spill] sm:$0xff]  ;;  %v18386_v29 = vld [vmem:[#allocation34_spill] sm:$0xff] }
 0x423   : > { %18376 = vst [vmem:[#allocation81_spill] sm:$0xff] %v16199_v31  ;;  %v16213_v36 = vpack.c.bf16 %v6230_v53, %v6229_v4  ;;  %v5690_v7 = vrot.slane %v17277_v15, 2  ;;  %v18383_v55 = vmax.f32 %v18382_v13, 0.0  ;;  %v4535_v51 = vpack.c.bf16 %v4419_v17, %v4418_v38  ;;  %v18390_v4 = vld [vmem:[#allocation67_spill] sm:$0xff]  ;;  %v8099_v48 = vpop.f32.mrf.mxu0 }
 0x424   : > { %v5853_v43 = vmax.f32 %v18380_v60, %v5649_v19  ;;  %v18385_v20 = vrot.slane %v18384_v63, 1  ;;  %v18387_v19 = vrot.slane %v18386_v29, 1  ;;  %v18388_v22 = vrot.slane %v18370_v9, 1 }
 0x425   : > { %18381 = vst [vmem:[#allocation89_spill] sm:$0xff] %v16213_v36  ;;  %v5854_v32 = vmax.f32 %v18383_v55, %v5651_v39  ;;  %v5647_v53 = vsel %vm1818_vm4, %v18390_v4, %v18378_v12  ;;  %7582 = vmatprep.subr.bf16.mxu1 %v16213_v36  ;;  %v5691_v39 = vsel %vm1818_vm4, %v5688_v16, %v5690_v7  ;;  %v18391_v9 = vmax.f32 %v15748_v62, 0.0  ;;  %v18392_v55 = vld [vmem:[#allocation80_spill] sm:$0xff] }
 0x426   : > { %v6020_v33 = vrot.slane %v5853_v43, 1  ;;  %v5991_v41 = vsel %vm1428_vm5, %v18387_v19, %v18385_v20  ;;  %v18389_v24 = vmov %v18385_v20  ;;  %5104 = vmatprep.mubr.bf16.mxu1 %v4535_v51  ;;  %7583 = vmatpush3.bf16.msra.mxu1 %v16199_v31  ;;  %v18393_v20 = vmax.f32 %v18392_v55, 0.0 }
 0x427   : > { %v5993_v54 = vsel %vm1428_vm5, %v18389_v24, %v18388_v22  ;;  %v6022_v60 = vrot.slane %v5854_v32, 1  ;;  %v6211_v38 = vmax.f32 %v18386_v29, %v5991_v41  ;;  %v16238_v13 = vmax.f32 %v18391_v9, %v5691_v39  ;;  %v18394_v22 = vld [vmem:[#allocation94_spill] sm:$0xff]  ;;  %v18396_v24 = vld [vmem:[#allocation73_spill] sm:$0xff]  ;;  %5105 = vmatmul.mubr.bf16.gmra.mxu1 %v4534_v27 }
 0x428   : > { %v6212_v17 = vmax.f32 %v18384_v63, %v5993_v54  ;;  %v5852_v12 = vmax.f32 %v18393_v20, %v5647_v53  ;;  %v4979_v19 = vadd.f32 %v16101_v6, %v16110_v44  ;;  %v18395_v16 = vrot.slane %v18394_v22, 1  ;;  %v4986_v44 = vpop.f32.mrf.mxu1  ;;  %v18401_v20 = vld [vmem:[#allocation16_spill] sm:$0xff] }
 0x429   : > { %v18397_v51 = vrot.slane %v18396_v24, 1  ;;  %v6023_v63 = vsel %vm1428_vm5, %v6020_v33, %v6022_v60  ;;  %v6025_v62 = vsel %vm1428_vm5, %v6022_v60, %v6024_v56  ;;  %v18399_v4 = vrot.slane %v18386_v29, 1  ;;  %v16266_v60 = vpop.f32.mrf.mxu0 }
 0x42a   : > { %v16252_v54 = vpack.c.bf16 %v6212_v17, %v6211_v38  ;;  %v18400_v53 = vmov %v18395_v16  ;;  %v6227_v39 = vmax.f32 %v5853_v43, %v6023_v63  ;;  %v6228_v9 = vmax.f32 %v5854_v32, %v6025_v62  ;;  %v4988_v29 = vpop.f32.mrf.mxu1  ;;  %v18405_v62 = vld [vmem:[#allocation64_spill] sm:$0xff] }
 0x42b   : > { %v5987_v41 = vsel %vm1428_vm5, %v18397_v51, %v18395_v16  ;;  %v5989_v48 = vsel %vm1428_vm5, %v18400_v53, %v18399_v4  ;;  %v6018_v55 = vrot.slane %v5852_v12, 1  ;;  %v16260_v15 = vadd.f32 %v18401_v20, %v4979_v19  ;;  %v18406_v53 = vld [vmem:[#allocation41_spill] sm:$0xff] }
 0x42c   : > { %18398 = vst [vmem:[#allocation87_spill] sm:$0xff] %v16252_v54  ;;  %v6209_v16 = vmax.f32 %v18396_v24, %v5987_v41  ;;  %v6210_v56 = vmax.f32 %v18394_v22, %v5989_v48  ;;  %v4982_v27 = vadd.f32 %v16101_v6, %v16135_v59  ;;  %v16268_v38 = vpack.c.bf16 %v6228_v9, %v6227_v39  ;;  %v8102_v59 = vpop.f32.mrf.mxu0  ;;  %v4989_v63 = vpop.f32.mrf.mxu1 }
 0x42d   : > { %v18403_v17 = vrot.slane %v15215_v5, 1  ;;  %v6021_v32 = vsel %vm1428_vm5, %v6018_v55, %v6020_v33  ;;  %v4987_v19 = vadd.f32 %v16101_v6, %v4986_v44  ;;  %v5502_v22 = vmax.f32 %v16260_v15, 0.0 }
 0x42e   : > { %18402 = vst [vmem:[#allocation57_spill] sm:$0xff] %v16268_v38  ;;  %v6226_v51 = vmax.f32 %v5852_v12, %v6021_v32  ;;  %v16277_v41 = vpack.c.bf16 %v6210_v56, %v6209_v16  ;;  %7584 = vmatprep.subr.bf16.mxu1 %v16268_v38  ;;  %v5327_v4 = vadd.f32 %v18405_v62, %v4982_v27  ;;  %v16288_v12 = vpop.f32.mrf.mxu0  ;;  %v4991_v15 = vpop.f32.mrf.mxu1 }
 0x42f   : > { %v6019_v43 = vsel %vm1428_vm5, %v18403_v17, %v6018_v55  ;;  %v16282_v48 = vadd.f32 %v18406_v53, %v4987_v19  ;;  %v4990_v33 = vadd.f32 %v16101_v6, %v4989_v63  ;;  %7585 = vmatpush3.bf16.msra.mxu1 %v16252_v54  ;;  %v18408_v55 = vld [vmem:[#allocation37_spill] sm:$0xff]  ;;  %v18409_v63 = vmax.f32 %v16185_v1, 0.0  ;;  %v18410_v15 = vld [vmem:[#allocation40_spill] sm:$0xff] }
 0x430   : > { %v6225_v24 = vmax.f32 %v15215_v5, %v6019_v43  ;;  %18404 = vst [vmem:[#allocation19_spill] sm:$0xff] %v16277_v41  ;;  %v5692_v5 = vrot.slane %v5502_v22, 2  ;;  %v5503_v39 = vmax.f32 %v5327_v4, 0.0  ;;  %v8103_v56 = vpop.f32.mrf.mxu0  ;;  %v4994_v53 = vpop.f32.mrf.mxu1 }
 0x431   : > { %v5504_v9 = vmax.f32 %v16282_v48, 0.0  ;;  %v16292_v20 = vadd.f32 %v18408_v55, %v4990_v33 }
 0x432   : > { %v16286_v44 = vpack.c.bf16 %v6226_v51, %v6225_v24  ;;  %v5693_v16 = vsel %vm1818_vm4, %v5690_v7, %v5692_v5  ;;  %v5694_v29 = vrot.slane %v5503_v39, 2  ;;  %v16304_v32 = vpop.f32.mrf.mxu0  ;;  %v4996_v40 = vpop.f32.mrf.mxu1 }
 0x433   : > { %v16298_v27 = vmax.f32 %v5498_v45, %v5693_v16  ;;  %v5696_v17 = vrot.slane %v5504_v9, 2  ;;  %v5505_v43 = vmax.f32 %v16292_v20, 0.0  ;;  %v9500_v20 = vld [vmem:[#allocation7] ss:$20 sps:$4 sm:$0xff]   ;;  %v9502_v16 = vld [vmem:[#allocation7 + $0x4] ss:$20 sps:$4 sm:$0xff]  }
 0x434   : > { %18407 = vst [vmem:[#allocation38_spill] sm:$0xff] %v16286_v44  ;;  %7586 = vmatprep.subr.bf16.mxu1 %v16286_v44  ;;  %v5695_v19 = vsel %vm1818_vm4, %v5692_v5, %v5694_v29  ;;  %v8106_v51 = vpop.f32.mrf.mxu0  ;;  %v4995_v5 = vadd.f32 %v16101_v6, %v4994_v53  ;;  %6493 = vmatprep.mubr.bf16.mxu1 %v9502_v16 }
 0x435   : > { %7587 = vmatpush3.bf16.msra.mxu1 %v16277_v41  ;;  %v5697_v24 = vsel %vm1818_vm4, %v5694_v29, %v5696_v17  ;;  %v5698_v7 = vrot.slane %v5505_v43, 2  ;;  %v16310_v21 = vmax.f32 %v5499_v50, %v5695_v19 }
 0x436   : > { %v16314_v45 = vmax.f32 %v5500_v35, %v5697_v24  ;;  %v16321_v4 = vpop.f32.mrf.mxu0  ;;  %v16327_v30 = vadd.f32 %v18410_v15, %v4995_v5  ;;  %v4997_v35 = vpop.f32.mrf.mxu1  ;;  %v18411_v24 = vld [vmem:[#allocation25_spill] sm:$0xff] }
 0x437   : > { %v5699_v59 = vsel %vm1818_vm4, %v5696_v17, %v5698_v7  ;;  %v4998_v56 = vadd.f32 %v16101_v6, %v4997_v35 }
 0x438   : > { %v16319_v62 = vmax.f32 %v18409_v63, %v5699_v59  ;;  %v8107_v33 = vpop.f32.mrf.mxu0  ;;  %v17279_v1 = vmax.f32 %v16327_v30, 0.0  ;;  %v4999_v29 = vpop.f32.mrf.mxu1  ;;  %6494 = vmatmul.mubr.bf16.vlgmr.msra.gmra.mxu1 %v9500_v20 }
 0x439   : > { %v16336_v51 = vadd.f32 %v18411_v24, %v4998_v56  ;;  %v18412_v29 = vld [vmem:[#allocation92_spill] sm:$0xff] }
 0x43a   : > { %v16324_v50 = vpop.f32.mrf.mxu0  ;;  %v5700_v19 = vrot.slane %v17279_v1, 2  ;;  %v5002_v35 = vpop.f32.mrf.mxu1  ;;  %v6070_v48 = vrot.slane %v16319_v62, 1 }
 0x43b   : > { %v17278_v53 = vmax.f32 %v16336_v51, 0.0 }
 0x43c   : > { %v8110_v55 = vpop.f32.mrf.mxu0  ;;  %v5701_v63 = vsel %vm1818_vm4, %v5698_v7, %v5700_v19  ;;  %v5004_v16 = vpop.f32.mrf.mxu1 }
 0x43d   : > { %v5879_v33 = vmax.f32 %v5502_v22, %v5701_v63  ;;  %v5702_v5 = vrot.slane %v17278_v53, 2  ;;  %v5003_v55 = vadd.f32 %v16101_v6, %v5002_v35  ;;  %v9505_v16 = vld [vmem:[#allocation7 + $0x2c] ss:$20 sps:$4 sm:$0xff]  }
 0x43e   : > { %v16331_v17 = vpop.f32.mrf.mxu0  ;;  %v5005_v20 = vpop.f32.mrf.mxu1  ;;  %6501 = vmatprep.mubr.bf16.mxu1 %v9505_v16 }
 0x43f   : > { %v5703_v40 = vsel %vm1818_vm4, %v5700_v19, %v5702_v5  ;;  %v16345_v56 = vadd.f32 %v18412_v29, %v5003_v55  ;;  %v6072_v63 = vrot.slane %v5879_v33, 1  ;;  %v18413_v19 = vld [vmem:[#allocation54_spill] sm:$0xff]  ;;  %v9503_v55 = vld [vmem:[#allocation7 + $0x28] ss:$20 sps:$4 sm:$0xff]  }
 0x440   : > { %v8111_v59 = vpop.f32.mrf.mxu0  ;;  %v5880_v15 = vmax.f32 %v5503_v39, %v5703_v40  ;;  %v5007_v22 = vpop.f32.mrf.mxu1  ;;  %6502 = vmatmul.mubr.bf16.gmra.mxu1 %v9503_v55  ;;  %v18414_v55 = vld [vmem:[#allocation44_spill] sm:$0xff] }
 0x441   : > { %v17280_v7 = vmax.f32 %v16345_v56, 0.0  ;;  %v5006_v59 = vadd.f32 %v16101_v6, %v5005_v20 }
 0x442   : > { %v6074_v24 = vrot.slane %v5880_v15, 1 }
 0x443   : > { %v5704_v53 = vrot.slane %v17280_v7, 2  ;;  %v16352_v39 = vadd.f32 %v18413_v19, %v5006_v59 }
 0x444   : > { %v6075_v29 = vsel %vm1428_vm5, %v6072_v63, %v6074_v24 }
 0x445   : > { %v5705_v40 = vsel %vm1818_vm4, %v5702_v5, %v5704_v53  ;;  %v17284_v35 = vmax.f32 %v16352_v39, 0.0  ;;  %v6253_v20 = vmax.f32 %v5879_v33, %v6075_v29  ;;  %v6068_v29 = vrot.slane %v16314_v45, 1 }
 0x446   : > { %v16359_v1 = vmax.f32 %v5504_v9, %v5705_v40 }
 0x447   : > { %v5706_v22 = vrot.slane %v17284_v35, 2 }
 0x448   : > { %v6076_v59 = vrot.slane %v16359_v1, 1 }
 0x449   : > { %v5707_v5 = vsel %vm1818_vm4, %v5704_v53, %v5706_v22  ;;  %v5010_v54 = vpop.f32.mrf.mxu1  ;;  %v6066_v53 = vrot.slane %v16310_v21, 1 }
 0x44a   : > { %v5882_v19 = vmax.f32 %v5505_v43, %v5707_v5  ;;  %v6077_v7 = vsel %vm1428_vm5, %v6074_v24, %v6076_v59  ;;  %v5011_v9 = vadd.f32 %v16101_v6, %v5010_v54  ;;  %v6071_v54 = vsel %vm1428_vm5, %v6068_v29, %v6070_v48 }
 0x44b   : > { %v6254_v41 = vmax.f32 %v5880_v15, %v6077_v7  ;;  %v5012_v40 = vpop.f32.mrf.mxu1  ;;  %v6062_v5 = vrot.slane %v16238_v13, 1 }
 0x44c   : > { %v6078_v44 = vrot.slane %v5882_v19, 1  ;;  %v16373_v35 = vadd.f32 %v18414_v55, %v5011_v9  ;;  %v6251_v9 = vmax.f32 %v16314_v45, %v6071_v54  ;;  %v9511_v54 = vld [vmem:[#allocation7 + $0x7c] ss:$20 sps:$4 sm:$0xff]  }
 0x44d   : > { %v16368_v33 = vpack.c.bf16 %v6254_v41, %v6253_v20  ;;  %v5013_v15 = vpop.f32.mrf.mxu1  ;;  %v6073_v41 = vsel %vm1428_vm5, %v6070_v48, %v6072_v63  ;;  %v9506_v20 = vld [vmem:[#allocation7 + $0x50] ss:$20 sps:$4 sm:$0xff]   ;;  %v18415_v48 = vld [vmem:[#allocation45_spill] sm:$0xff] }
 0x44e   : > { %v6079_v16 = vsel %vm1428_vm5, %v6076_v59, %v6078_v44  ;;  %v17288_v24 = vmax.f32 %v16373_v35, 0.0  ;;  %v5014_v7 = vadd.f32 %v16101_v6, %v5013_v15  ;;  %v9508_v59 = vld [vmem:[#allocation7 + $0x54] ss:$20 sps:$4 sm:$0xff]   ;;  %v6060_v15 = vrot.slane %v16182_v14, 1 }
 0x44f   : > { %v6255_v43 = vmax.f32 %v16359_v1, %v6079_v16  ;;  %v5015_v40 = vpop.f32.mrf.mxu1  ;;  %v6252_v1 = vmax.f32 %v16319_v62, %v6073_v41  ;;  %v6064_v16 = vrot.slane %v16298_v27, 1  ;;  %6509 = vmatprep.mubr.bf16.mxu1 %v9508_v59  ;;  %v6069_v62 = vsel %vm1428_vm5, %v6066_v53, %v6068_v29 }
 0x450   : > { %v5708_v55 = vrot.slane %v17288_v24, 2  ;;  %6510 = vmatmul.mubr.bf16.gmra.mxu1 %v9506_v20  ;;  %v16392_v31 = vadd.f32 %v18415_v48, %v5014_v7  ;;  %v18416_v41 = vmax.f32 %v16327_v30, 0.0  ;;  %v6063_v20 = vsel %vm1428_vm5, %v6060_v15, %v6062_v5  ;;  %v9509_v30 = vld [vmem:[#allocation7 + $0x78] ss:$20 sps:$4 sm:$0xff]  }
 0x451   : > { %v16388_v38 = vpack.c.bf16 %v6252_v1, %v6251_v9  ;;  %v6067_v45 = vsel %vm1428_vm5, %v6064_v16, %v6066_v53  ;;  %v6250_v9 = vmax.f32 %v16310_v21, %v6069_v62  ;;  %v6247_v7 = vmax.f32 %v16182_v14, %v6063_v20  ;;  %6517 = vmatprep.mubr.bf16.mxu1 %v9511_v54 }
 0x452   : > { %v5709_v63 = vsel %vm1818_vm4, %v5706_v22, %v5708_v55  ;;  %v6249_v59 = vmax.f32 %v16298_v27, %v6067_v45  ;;  %v6065_v22 = vsel %vm1428_vm5, %v6062_v5, %v6064_v16  ;;  %v6058_v53 = vrot.slane %v16051_v57, 1 }
 0x453   : > { %v16398_v40 = vmax.f32 %v18416_v41, %v5709_v63  ;;  %v6248_v29 = vmax.f32 %v16238_v13, %v6065_v22  ;;  %v17287_v27 = vmax.f32 %v16392_v31, 0.0  ;;  %v6056_v16 = vrot.slane %v15953_v2, 1  ;;  %v18417_v13 = vld [vmem:[#allocation29_spill] sm:$0xff] }
 0x454   : > { %v16406_v48 = vpack.c.bf16 %v6250_v9, %v6249_v59  ;;  %v6050_v54 = vrot.slane %v15772_v34, 1  ;;  %v18418_v9 = vld [vmem:[#allocation22_spill] sm:$0xff] }
 0x455   : > { %v6080_v1 = vrot.slane %v16398_v40, 1  ;;  %v16412_v45 = vpack.c.bf16 %v6248_v29, %v6247_v7  ;;  %v6054_v20 = vrot.slane %v18418_v9, 1  ;;  %v6059_v7 = vsel %vm1428_vm5, %v6056_v16, %v6058_v53 }
 0x456   : > { %v5018_v63 = vpop.f32.mrf.mxu1 }
 0x457   : > { %v6081_v21 = vsel %vm1428_vm5, %v6078_v44, %v6080_v1  ;;  %v5019_v5 = vadd.f32 %v16101_v6, %v5018_v63  ;;  %v5710_v44 = vrot.slane %v17287_v27, 2  ;;  %v6245_v63 = vmax.f32 %v15953_v2, %v6059_v7  ;;  %v18421_v7 = vld [vmem:[#allocation31_spill] sm:$0xff] }
 0x458   : > { %v6256_v14 = vmax.f32 %v5882_v19, %v6081_v21  ;;  %v5020_v62 = vpop.f32.mrf.mxu1  ;;  %6518 = vmatmul.mubr.bf16.gmra.mxu1 %v9509_v30  ;;  %v6061_v19 = vsel %vm1428_vm5, %v6058_v53, %v6060_v15  ;;  %v6057_v53 = vsel %vm1428_vm5, %v6054_v20, %v6056_v16 }
 0x459   : > { %v16418_v41 = vadd.f32 %v18417_v13, %v5019_v5  ;;  %v6246_v21 = vmax.f32 %v16051_v57, %v6061_v19  ;;  %v18420_v13 = vld [vmem:[#allocation35_spill] sm:$0xff]  ;;  %v5711_v2 = vsel %vm1818_vm4, %v5708_v55, %v5710_v44  ;;  %v18422_v57 = vrot.slane %v18421_v7, 1 }
 0x45a   : > { %v16420_v59 = vpack.c.bf16 %v6256_v14, %v6255_v43  ;;  %v5021_v22 = vpop.f32.mrf.mxu1  ;;  %v18419_v43 = vld [vmem:[#allocation96_spill] sm:$0xff] }
 0x45b   : > { %v17289_v29 = vmax.f32 %v16418_v41, 0.0  ;;  %v5022_v30 = vadd.f32 %v16101_v6, %v5021_v22  ;;  %v6052_v5 = vrot.slane %v18419_v43, 1  ;;  %v16437_v24 = vpack.c.bf16 %v6246_v21, %v6245_v63  ;;  %v413_v22 = vld [vmem:[#allocation7 + $0xa0] sm:$0xff] }
 0x45c   : > { %v5023_v14 = vpop.f32.mrf.mxu1  ;;  %v6051_v19 = vsel %vm1428_vm5, %v18422_v57, %v6050_v54  ;;  %v6244_v63 = vmax.f32 %v18418_v9, %v6057_v53  ;;  %v18423_v21 = vmax.f32 %v16345_v56, 0.0  ;;  %v7404_v36 = vcombine.low %v413_v22, %v413_v22 }
 0x45d   : > { %v5712_v62 = vrot.slane %v17289_v29, 2  ;;  %v16435_v27 = vadd.f32 %v18420_v13, %v5022_v30  ;;  %v6055_v15 = vsel %vm1428_vm5, %v6052_v5, %v6054_v20  ;;  %v7405_v16 = vcombine.high %v413_v22, %v413_v22  ;;  %v18425_v22 = vld [vmem:[#allocation53_spill] sm:$0xff] }
 0x45e   : > { %v6243_v30 = vmax.f32 %v18419_v43, %v6055_v15  ;;  %v18424_v20 = vmax.f32 %v16336_v51, 0.0  ;;  %v6241_v51 = vmax.f32 %v18421_v7, %v6051_v19 }
 0x45f   : > { %v5513_v14 = vmax.f32 %v16435_v27, 0.0  ;;  %v5713_v29 = vsel %vm1818_vm4, %v5710_v44, %v5712_v62  ;;  %v6053_v44 = vsel %vm1428_vm5, %v6050_v54, %v6052_v5  ;;  %6525 = vmatprep.mubr.bf16.mxu1 %v7405_v16 }
 0x460   : > { %v5885_v13 = vmax.f32 %v18423_v21, %v5713_v29  ;;  %v5884_v55 = vmax.f32 %v18424_v20, %v5711_v2  ;;  %v16455_v47 = vpack.c.bf16 %v6244_v63, %v6243_v30  ;;  %v6242_v56 = vmax.f32 %v15772_v34, %v6053_v44  ;;  %6526 = vmatmul.mubr.bf16.gmra.mxu1 %v7404_v36  ;;  %v18427_v44 = vld [vmem:[#allocation86_spill] sm:$0xff] }
 0x461   : > { %v5714_v3 = vrot.slane %v5513_v14, 2  ;;  %v18426_v30 = vmax.f32 %v16352_v39, 0.0 }
 0x462   : > { %v6084_v15 = vrot.slane %v5885_v13, 1  ;;  %v6082_v9 = vrot.slane %v5884_v55, 1  ;;  %v16470_v20 = vpack.c.bf16 %v6242_v56, %v6241_v51  ;;  %v9516_v56 = vld [vmem:[#allocation7 + $0xc] ss:$20 sps:$4 sm:$0xff]  }
 0x463   : > { %v5715_v53 = vsel %vm1818_vm4, %v5712_v62, %v5714_v3  ;;  %6565 = vmatprep.mubr.bf16.mxu1 %v9516_v56 }
 0x464   : > { %v5886_v63 = vmax.f32 %v18426_v30, %v5715_v53  ;;  %v6083_v54 = vsel %vm1428_vm5, %v6080_v1, %v6082_v9  ;;  %v6085_v5 = vsel %vm1428_vm5, %v6082_v9, %v6084_v15  ;;  %v18428_v53 = vmax.f32 %v16373_v35, 0.0 }
 0x465   : > { %v5026_v57 = vpop.f32.mrf.mxu1  ;;  %v6257_v16 = vmax.f32 %v16398_v40, %v6083_v54  ;;  %v6258_v34 = vmax.f32 %v5884_v55, %v6085_v5  ;;  %v18429_v5 = vld [vmem:[#allocation90_spill] sm:$0xff] }
 0x466   : > { %v5027_v43 = vadd.f32 %v16101_v6, %v5026_v57  ;;  %v6086_v7 = vrot.slane %v5886_v63, 1 }
 0x467   : > { %v5028_v29 = vpop.f32.mrf.mxu1  ;;  %v16474_v57 = vpack.c.bf16 %v6258_v34, %v6257_v16  ;;  %v18430_v16 = vmax.f32 %v16392_v31, 0.0 }
 0x468   : > { %v16463_v2 = vadd.f32 %v18425_v22, %v5027_v43  ;;  %v6087_v1 = vsel %vm1428_vm5, %v6084_v15, %v6086_v7 }
 0x469   : > { %v5029_v21 = vpop.f32.mrf.mxu1  ;;  %v6259_v9 = vmax.f32 %v5885_v13, %v6087_v1 }
 0x46a   : > { %v5514_v36 = vmax.f32 %v16463_v2, 0.0  ;;  %v5030_v62 = vadd.f32 %v16101_v6, %v5029_v21 }
 0x46b   : > { %v5031_v19 = vpop.f32.mrf.mxu1 }
 0x46c   : > { %v5716_v39 = vrot.slane %v5514_v36, 2  ;;  %v16477_v43 = vadd.f32 %v18427_v44, %v5030_v62 }
 0x46e   : > { %v5515_v40 = vmax.f32 %v16477_v43, 0.0  ;;  %v5717_v55 = vsel %vm1818_vm4, %v5714_v3, %v5716_v39 }
 0x46f   : > { %v5034_v29 = vpop.f32.mrf.mxu1  ;;  %v5887_v51 = vmax.f32 %v18428_v53, %v5717_v55  ;;  %v18431_v55 = vld [vmem:[#allocation14_spill] sm:$0xff] }
 0x470   : > { %v5718_v22 = vrot.slane %v5515_v40, 2  ;;  %v5035_v2 = vadd.f32 %v16101_v6, %v5034_v29 }
 0x471   : > { %v5036_v30 = vpop.f32.mrf.mxu1  ;;  %v6088_v54 = vrot.slane %v5887_v51, 1 }
 0x472   : > { %v5380_v21 = vadd.f32 %v18429_v5, %v5035_v2  ;;  %v5719_v15 = vsel %vm1818_vm4, %v5716_v39, %v5718_v22 }
 0x473   : > { %v5037_v13 = vpop.f32.mrf.mxu1  ;;  %v5888_v34 = vmax.f32 %v18430_v16, %v5719_v15  ;;  %v6089_v3 = vsel %vm1428_vm5, %v6086_v7, %v6088_v54 }
 0x474   : > { %v5516_v62 = vmax.f32 %v5380_v21, 0.0  ;;  %v5038_v35 = vadd.f32 %v16101_v6, %v5037_v13  ;;  %v6260_v19 = vmax.f32 %v5886_v63, %v6089_v3  ;;  %v18432_v63 = vmax.f32 %v16418_v41, 0.0  ;;  %v18433_v13 = vld [vmem:[#allocation63_spill] sm:$0xff] }
 0x475   : > { %v5039_v44 = vpop.f32.mrf.mxu1  ;;  %v6090_v43 = vrot.slane %v5888_v34, 1 }
 0x476   : > { %v5720_v1 = vrot.slane %v5516_v62, 2  ;;  %v16492_v56 = vadd.f32 %v18431_v55, %v5038_v35  ;;  %v16494_v29 = vpack.c.bf16 %v6260_v19, %v6259_v9 }
 0x477   : > { %v6091_v39 = vsel %vm1428_vm5, %v6088_v54, %v6090_v43 }
 0x478   : > { %v17293_v53 = vmax.f32 %v16492_v56, 0.0  ;;  %v5042_v31 = vpop.f32.mrf.mxu1  ;;  %v5721_v2 = vsel %vm1818_vm4, %v5718_v22, %v5720_v1  ;;  %v6261_v7 = vmax.f32 %v5887_v51, %v6091_v39  ;;  %v18434_v39 = vld [vmem:[#allocation66_spill] sm:$0xff] }
 0x479   : > { %v5043_v30 = vadd.f32 %v16101_v6, %v5042_v31  ;;  %v5889_v5 = vmax.f32 %v18432_v63, %v5721_v2 }
 0x47a   : > { %v5722_v21 = vrot.slane %v17293_v53, 2  ;;  %v5044_v15 = vpop.f32.mrf.mxu1 }
 0x47b   : > { %v16505_v9 = vadd.f32 %v18433_v13, %v5043_v30  ;;  %v6092_v16 = vrot.slane %v5889_v5, 1 }
 0x47c   : > { %v5045_v54 = vpop.f32.mrf.mxu1  ;;  %v5723_v3 = vsel %vm1818_vm4, %v5720_v1, %v5722_v21 }
 0x47d   : > { %v17294_v35 = vmax.f32 %v16505_v9, 0.0  ;;  %v5046_v51 = vadd.f32 %v16101_v6, %v5045_v54  ;;  %v5890_v22 = vmax.f32 %v5513_v14, %v5723_v3  ;;  %v6093_v41 = vsel %vm1428_vm5, %v6090_v43, %v6092_v16 }
 0x47e   : > { %v5047_v19 = vpop.f32.mrf.mxu1  ;;  %v6262_v44 = vmax.f32 %v5888_v34, %v6093_v41 }
 0x47f   : > { %v5724_v55 = vrot.slane %v17294_v35, 2  ;;  %v16516_v31 = vadd.f32 %v18434_v39, %v5046_v51  ;;  %v6094_v2 = vrot.slane %v5890_v22, 1  ;;  %v18435_v51 = vld [vmem:[#allocation21_spill] sm:$0xff] }
 0x480   : > { %v16518_v30 = vpack.c.bf16 %v6262_v44, %v6261_v7 }
 0x481   : > { %v5519_v1 = vmax.f32 %v16516_v31, 0.0  ;;  %v5725_v63 = vsel %vm1818_vm4, %v5722_v21, %v5724_v55  ;;  %v6095_v27 = vsel %vm1428_vm5, %v6092_v16, %v6094_v2 }
 0x482   : > { %v5050_v14 = vpop.f32.mrf.mxu1  ;;  %v5891_v15 = vmax.f32 %v5514_v36, %v5725_v63  ;;  %v6263_v43 = vmax.f32 %v5889_v5, %v6095_v27 }
 0x483   : > { %v5726_v34 = vrot.slane %v5519_v1, 2  ;;  %v5051_v13 = vadd.f32 %v16101_v6, %v5050_v14 }
 0x484   : > { %v5052_v54 = vpop.f32.mrf.mxu1  ;;  %v6096_v3 = vrot.slane %v5891_v15, 1 }
 0x485   : > { %v5396_v41 = vadd.f32 %v18435_v51, %v5051_v13  ;;  %v5727_v7 = vsel %vm1818_vm4, %v5724_v55, %v5726_v34 }
 0x486   : > { %v5053_v19 = vpop.f32.mrf.mxu1  ;;  %v5892_v44 = vmax.f32 %v5515_v40, %v5727_v7  ;;  %v6097_v21 = vsel %vm1428_vm5, %v6094_v2, %v6096_v3 }
 0x487   : > { %v5520_v39 = vmax.f32 %v5396_v41, 0.0  ;;  %v6264_v16 = vmax.f32 %v5890_v22, %v6097_v21  ;;  %v5054_v7 = vadd.f32 %v16101_v6, %v5053_v19 }
 0x488   : > { %v5055_v53 = vpop.f32.mrf.mxu1  ;;  %v6098_v36 = vrot.slane %v5892_v44, 1 }
 0x489   : > { %v5728_v5 = vrot.slane %v5520_v39, 2  ;;  %v16529_v63 = vpack.c.bf16 %v6264_v16, %v6263_v43 }
 0x48a   : > { %v6099_v27 = vsel %vm1428_vm5, %v6096_v3, %v6098_v36 }
 0x48b   : > { %v5729_v54 = vsel %vm1818_vm4, %v5726_v34, %v5728_v5  ;;  %v6265_v35 = vmax.f32 %v5891_v15, %v6099_v27 }
 0x48c   : > { %v5058_v14 = vpop.f32.mrf.mxu1  ;;  %v16533_v13 = vmax.f32 %v5516_v62, %v5729_v54 }
 0x48d   : > { %v5059_v34 = vadd.f32 %v16101_v6, %v5058_v14 }
 0x48e   : > { %v5060_v55 = vpop.f32.mrf.mxu1  ;;  %v6100_v40 = vrot.slane %v16533_v13, 1 }
 0x48f   : > { %v18436_v55 = vld [vmem:[#allocation28_spill] sm:$0xff] }
 0x490   : > { %v5061_v51 = vpop.f32.mrf.mxu1  ;;  %v6101_v53 = vsel %vm1428_vm5, %v6098_v36, %v6100_v40  ;;  %v5399_v14 = vadd.f32 %v18436_v55, %v5054_v7 }
 0x491   : > { %v6266_v2 = vmax.f32 %v5892_v44, %v6101_v53  ;;  %v5062_v43 = vadd.f32 %v16101_v6, %v5061_v51  ;;  %v5404_v44 = vadd.f32 %v15876_v28, %v5059_v34 }
 0x492   : > { %v5063_v22 = vpop.f32.mrf.mxu1 }
 0x493   : > { %v16540_v3 = vpack.c.bf16 %v6266_v2, %v6265_v35  ;;  %v5407_v21 = vadd.f32 %v15908_v25, %v5062_v43  ;;  %v5522_v19 = vmax.f32 %v5404_v44, 0.0  ;;  %v5521_v22 = vmax.f32 %v5399_v14, 0.0 }
 0x494   : > { %v5066_v41 = vpop.f32.mrf.mxu1 }
 0x495   : > { %v5067_v62 = vadd.f32 %v16101_v6, %v5066_v41  ;;  %v5523_v51 = vmax.f32 %v5407_v21, 0.0  ;;  %v5732_v41 = vrot.slane %v5522_v19, 2  ;;  %v5730_v7 = vrot.slane %v5521_v22, 2 }
 0x496   : > { %v5068_v15 = vpop.f32.mrf.mxu1 }
 0x497   : > { %v16547_v16 = vadd.f32 %v15982_v49, %v5067_v62  ;;  %v5734_v2 = vrot.slane %v5523_v51, 2 }
 0x498   : > { %v5069_v36 = vpop.f32.mrf.mxu1 }
 0x499   : > { %v17298_v27 = vmax.f32 %v16547_v16, 0.0  ;;  %v5070_v35 = vadd.f32 %v16101_v6, %v5069_v36  ;;  %v5735_v36 = vsel %vm1818_vm4, %v5732_v41, %v5734_v2 }
 0x49a   : > { %v5071_v54 = vpop.f32.mrf.mxu1 }
 0x49b   : > { %v16554_v53 = vadd.f32 %v16031_v10, %v5070_v35  ;;  %v5736_v25 = vrot.slane %v17298_v27, 2 }
 0x49d   : > { %v17295_v49 = vmax.f32 %v16554_v53, 0.0  ;;  %v5737_v62 = vsel %vm1818_vm4, %v5734_v2, %v5736_v25  ;;  %v5731_v2 = vsel %vm1818_vm4, %v5728_v5, %v5730_v7 }
 0x49e   : > { %v5897_v35 = vmax.f32 %v5520_v39, %v5737_v62 }
 0x49f   : > { %v5738_v28 = vrot.slane %v17295_v49, 2 }
 0x4a0   : > { %v5074_v43 = vpop.f32.mrf.mxu1  ;;  %v6108_v39 = vrot.slane %v5897_v35, 1 }
 0x4a1   : > { %v5075_v34 = vadd.f32 %v16101_v6, %v5074_v43  ;;  %v5739_v10 = vsel %vm1818_vm4, %v5736_v25, %v5738_v28  ;;  %v5733_v43 = vsel %vm1818_vm4, %v5730_v7, %v5732_v41  ;;  %v5896_v25 = vmax.f32 %v5519_v1, %v5735_v36 }
 0x4a2   : > { %v5076_v15 = vpop.f32.mrf.mxu1  ;;  %v5898_v54 = vmax.f32 %v5521_v22, %v5739_v10  ;;  %v18438_v1 = vmax.f32 %v16492_v56, 0.0 }
 0x4a3   : > { %v16565_v21 = vadd.f32 %v16064_v58, %v5075_v34  ;;  %v18437_v34 = vmax.f32 %v16505_v9, 0.0  ;;  %v6106_v31 = vrot.slane %v5896_v25, 1 }
 0x4a4   : > { %v5077_v44 = vpop.f32.mrf.mxu1  ;;  %v6110_v22 = vrot.slane %v5898_v54, 1  ;;  %v5894_v36 = vmax.f32 %v18438_v1, %v5731_v2 }
 0x4a5   : > { %v17297_v55 = vmax.f32 %v16565_v21, 0.0  ;;  %v5078_v14 = vadd.f32 %v16101_v6, %v5077_v44  ;;  %v5895_v62 = vmax.f32 %v18437_v34, %v5733_v43 }
 0x4a6   : > { %v5079_v49 = vpop.f32.mrf.mxu1  ;;  %v6111_v44 = vsel %vm1428_vm5, %v6108_v39, %v6110_v22  ;;  %v6102_v34 = vrot.slane %v5894_v36, 1 }
 0x4a7   : > { %v5740_v15 = vrot.slane %v17297_v55, 2  ;;  %v16576_v58 = vadd.f32 %v16094_v11, %v5078_v14  ;;  %v6104_v7 = vrot.slane %v5895_v62, 1  ;;  %v6109_v14 = vsel %vm1428_vm5, %v6106_v31, %v6108_v39 }
 0x4a8   : > { %v6270_v2 = vmax.f32 %v5896_v25, %v6109_v14  ;;  %v6103_v39 = vsel %vm1428_vm5, %v6100_v40, %v6102_v34  ;;  %v18439_v14 = vmax.f32 %v16547_v16, 0.0 }
 0x4a9   : > { %v5741_v10 = vsel %vm1818_vm4, %v5738_v28, %v5740_v15  ;;  %v17296_v49 = vmax.f32 %v16576_v58, 0.0 }
 0x4aa   : > { %v5899_v41 = vmax.f32 %v5522_v19, %v5741_v10  ;;  %v6107_v19 = vsel %vm1428_vm5, %v6104_v7, %v6106_v31  ;;  %v6271_v10 = vmax.f32 %v5897_v35, %v6111_v44 }
 0x4ab   : > { %v5742_v11 = vrot.slane %v17296_v49, 2  ;;  %v6105_v49 = vsel %vm1428_vm5, %v6102_v34, %v6104_v7  ;;  %v6269_v27 = vmax.f32 %v5895_v62, %v6107_v19  ;;  %v18440_v34 = vmax.f32 %v16554_v53, 0.0 }
 0x4ac   : > { %v6112_v5 = vrot.slane %v5899_v41, 1 }
 0x4ad   : > { %v5743_v9 = vsel %vm1818_vm4, %v5740_v15, %v5742_v11  ;;  %v16600_v15 = vpack.c.bf16 %v6270_v2, %v6269_v27 }
 0x4ae   : > { %v5900_v43 = vmax.f32 %v5523_v51, %v5743_v9  ;;  %v6113_v28 = vsel %vm1428_vm5, %v6110_v22, %v6112_v5  ;;  %v6268_v22 = vmax.f32 %v5894_v36, %v6105_v49 }
 0x4af   : > { %v6272_v56 = vmax.f32 %v5898_v54, %v6113_v28  ;;  %v6267_v54 = vmax.f32 %v16533_v13, %v6103_v39 }
 0x4b0   : > { %v6114_v1 = vrot.slane %v5900_v43, 1 }
 0x4b1   : > { %v16593_v55 = vpack.c.bf16 %v6272_v56, %v6271_v10  ;;  %v16606_v31 = vpack.c.bf16 %v6268_v22, %v6267_v54 }
 0x4b2   : > { %v6115_v51 = vsel %vm1428_vm5, %v6112_v5, %v6114_v1 }
 0x4b3   : > { %7618 = vmatprep.subr.bf16.mxu1 %v16593_v55  ;;  %v6273_v35 = vmax.f32 %v5899_v41, %v6115_v51 }
 0x4b4   : > { %7619 = vmatpush3.bf16.msra.mxu1 %v16420_v59 }
 0x4b5   : > { %7620 = vmatprep.subr.bf16.mxu1 %v16600_v15 }
 0x4b8   : > { %7621 = vmatpush3.bf16.msra.mxu1 %v16368_v33 }
 0x4b9   : > { %7622 = vmatprep.subr.bf16.mxu1 %v16606_v31 }
 0x4bc   : > { %7623 = vmatpush3.bf16.msra.mxu1 %v16388_v38 }
 0x4bd   : > { %v5082_v25 = vpop.f32.mrf.mxu1  ;;  %7624 = vmatprep.subr.bf16.mxu1 %v16540_v3 }
 0x4be   : > { %v5083_v62 = vadd.f32 %v16101_v6, %v5082_v25 }
 0x4bf   : > { %v5084_v40 = vpop.f32.mrf.mxu1 }
 0x4c0   : > { %v16610_v44 = vadd.f32 %v16187_v42, %v5083_v62  ;;  %7625 = vmatpush3.bf16.msra.mxu1 %v16406_v48 }
 0x4c1   : > { %v5085_v27 = vpop.f32.mrf.mxu1  ;;  %7626 = vmatprep.subr.bf16.mxu1 %v16529_v63 }
 0x4c2   : > { %v5528_v49 = vmax.f32 %v16610_v44, 0.0  ;;  %v5086_v41 = vadd.f32 %v16101_v6, %v5085_v27 }
 0x4c3   : > { %v5087_v36 = vpop.f32.mrf.mxu1 }
 0x4c4   : > { %v5744_v13 = vrot.slane %v5528_v49, 2  ;;  %v16619_v5 = vadd.f32 %v16211_v18, %v5086_v41  ;;  %7627 = vmatpush3.bf16.msra.mxu1 %v16412_v45  ;;  %v9514_v36 = vld [vmem:[#allocation7 + $0x8] ss:$20 sps:$4 sm:$0xff]  }
 0x4c5   : > { %7628 = vmatprep.subr.bf16.mxu1 %v16518_v30 }
 0x4c6   : > { %v5745_v42 = vsel %vm1818_vm4, %v5742_v11, %v5744_v13  ;;  %v5529_v7 = vmax.f32 %v16619_v5, 0.0 }
 0x4c7   : > { %v5901_v9 = vmax.f32 %v18439_v14, %v5745_v42 }
 0x4c8   : > { %v5746_v28 = vrot.slane %v5529_v7, 2  ;;  %7629 = vmatpush3.bf16.msra.mxu1 %v16437_v24 }
 0x4c9   : > { %v6116_v19 = vrot.slane %v5901_v9, 1  ;;  %7630 = vmatprep.subr.bf16.mxu1 %v16494_v29 }
 0x4ca   : > { %v5747_v18 = vsel %vm1818_vm4, %v5744_v13, %v5746_v28  ;;  %v18441_v13 = vmax.f32 %v16565_v21, 0.0 }
 0x4cb   : > { %v5902_v10 = vmax.f32 %v18440_v34, %v5747_v18  ;;  %v6117_v11 = vsel %vm1428_vm5, %v6114_v1, %v6116_v19 }
 0x4cc   : > { %v6274_v16 = vmax.f32 %v5900_v43, %v6117_v11  ;;  %7631 = vmatpush3.bf16.msra.mxu1 %v16455_v47  ;;  %v9572_v11 = vld [vmem:[#allocation6] ss:$0 sm:$0xff] }
 0x4cd   : > { %v6118_v56 = vrot.slane %v5902_v10, 1  ;;  %v5090_v2 = vpop.f32.mrf.mxu1  ;;  %7632 = vmatprep.subr.bf16.mxu1 %v16474_v57 }
 0x4ce   : > { %v5091_v39 = vadd.f32 %v16101_v6, %v5090_v2  ;;  %v16637_v51 = vpack.c.bf16 %v6274_v16, %v6273_v35 }
 0x4cf   : > { %v5092_v22 = vpop.f32.mrf.mxu1  ;;  %v6119_v54 = vsel %vm1428_vm5, %v6116_v19, %v6118_v56 }
 0x4d0   : > { %v16642_v53 = vadd.f32 %v16266_v60, %v5091_v39  ;;  %v6275_v1 = vmax.f32 %v5901_v9, %v6119_v54  ;;  %7633 = vmatpush3.bf16.msra.mxu1 %v16470_v20  ;;  %v18442_v9 = vmov 0.0  }
 0x4d1   : > { %v5093_v25 = vpop.f32.mrf.mxu1  ;;  %8112 = vmatprep.subr.bf16.mxu1 %v18442_v9 }
 0x4d2   : > { %v5530_v43 = vmax.f32 %v16642_v53, 0.0  ;;  %v5094_v62 = vadd.f32 %v16101_v6, %v5093_v25  ;;  %v9519_v6 = vld [vmem:[#allocation7 + $0x34] ss:$20 sps:$4 sm:$0xff]  }
 0x4d3   : > { %v5095_v40 = vpop.f32.mrf.mxu1  ;;  %6566 = vmatmul.mubr.bf16.vlgmr.msra.gmra.mxu1 %v9514_v36  ;;  %v9522_v36 = vld [vmem:[#allocation7 + $0x5c] ss:$20 sps:$4 sm:$0xff]  }
 0x4d4   : > { %v5748_v35 = vrot.slane %v5530_v43, 2  ;;  %v16651_v27 = vadd.f32 %v16288_v12, %v5094_v62  ;;  %6573 = vmatprep.mubr.bf16.mxu1 %v9519_v6  ;;  %v9517_v62 = vld [vmem:[#allocation7 + $0x30] ss:$20 sps:$4 sm:$0xff]  }
 0x4d6   : > { %v5749_v60 = vsel %vm1818_vm4, %v5746_v28, %v5748_v35  ;;  %v5531_v41 = vmax.f32 %v16651_v27, 0.0  ;;  %v18443_v28 = vmax.f32 %v16576_v58, 0.0 }
 0x4d7   : > { %v5903_v42 = vmax.f32 %v18441_v13, %v5749_v60 }
 0x4d8   : > { %v5750_v14 = vrot.slane %v5531_v41, 2 }
 0x4d9   : > { %v6120_v12 = vrot.slane %v5903_v42, 1 }
 0x4da   : > { %v5751_v19 = vsel %vm1818_vm4, %v5748_v35, %v5750_v14 }
 0x4db   : > { %v5904_v34 = vmax.f32 %v18443_v28, %v5751_v19  ;;  %v6121_v21 = vsel %vm1428_vm5, %v6118_v56, %v6120_v12  ;;  %6574 = vmatmul.mubr.bf16.gmra.mxu1 %v9517_v62 }
 0x4dc   : > { %v6276_v39 = vmax.f32 %v5902_v10, %v6121_v21  ;;  %6581 = vmatprep.mubr.bf16.mxu1 %v9522_v36 }
 0x4dd   : > { %v5098_v18 = vpop.f32.mrf.mxu1  ;;  %v6122_v22 = vrot.slane %v5904_v34, 1 }
 0x4de   : > { %v5099_v16 = vadd.f32 %v9572_v11, %v5098_v18  ;;  %v16667_v40 = vpack.c.bf16 %v6276_v39, %v6275_v1 }
 0x4df   : > { %v5100_v2 = vpop.f32.mrf.mxu1  ;;  %v6123_v58 = vsel %vm1428_vm5, %v6120_v12, %v6122_v22  ;;  %v9520_v12 = vld [vmem:[#allocation7 + $0x58] ss:$20 sps:$4 sm:$0xff]  }
 0x4e0   : > { %v5444_v54 = vadd.f32 %v16304_v32, %v5099_v16  ;;  %v6277_v19 = vmax.f32 %v5903_v42, %v6123_v58  ;;  %v9525_v42 = vld [vmem:[#allocation7 + $0x84] ss:$20 sps:$4 sm:$0xff]  }
 0x4e1   : > { %v5101_v25 = vpop.f32.mrf.mxu1 }
 0x4e2   : > { %v5532_v35 = vmax.f32 %v5444_v54, 0.0  ;;  %v5102_v60 = vadd.f32 %v9572_v11, %v5101_v25 }
 0x4e3   : > { %v5103_v13 = vpop.f32.mrf.mxu1  ;;  %6582 = vmatmul.mubr.bf16.gmra.mxu1 %v9520_v12 }
 0x4e4   : > { %v5752_v18 = vrot.slane %v5532_v35, 2  ;;  %v5447_v6 = vadd.f32 %v16321_v4, %v5102_v60  ;;  %6589 = vmatprep.mubr.bf16.mxu1 %v9525_v42  ;;  %v414_v13 = vld [vmem:[#allocation7 + $0xa8] sm:$0xff] }
 0x4e6   : > { %v5753_v10 = vsel %vm1818_vm4, %v5750_v14, %v5752_v18  ;;  %v5533_v21 = vmax.f32 %v5447_v6, 0.0 }
 0x4e7   : > { %v5106_v56 = vpop.f32.mrf.mxu1  ;;  %v5905_v32 = vmax.f32 %v5528_v49, %v5753_v10  ;;  %v9523_v10 = vld [vmem:[#allocation7 + $0x80] ss:$20 sps:$4 sm:$0xff]  }
 0x4e8   : > { %v5107_v1 = vadd.f32 %v9572_v11, %v5106_v56  ;;  %v5754_v60 = vrot.slane %v5533_v21, 2 }
 0x4e9   : > { %v5108_v28 = vpop.f32.mrf.mxu1  ;;  %v6124_v16 = vrot.slane %v5905_v32, 1 }
 0x4ea   : > { %v5452_v2 = vadd.f32 %v16324_v50, %v5107_v1  ;;  %v18444_v1 = vmov 65535  }
 0x4eb   : > { %v5109_v39 = vpop.f32.mrf.mxu1  ;;  %v6125_v4 = vsel %vm1428_vm5, %v6122_v22, %v6124_v16  ;;  %v7407_v22 = vcombine.high %v414_v13, %v414_v13  ;;  %v6456_v28 = vsel %vm6455_vm11, 4294967295, %v18444_v1  ;;  %6590 = vmatmul.mubr.bf16.gmra.mxu1 %v9523_v10  ;;  %v18447_v1 = vld [vmem:[#allocation89_spill] sm:$0xff] }
 0x4ec   : > { %v5534_v54 = vmax.f32 %v5452_v2, 0.0  ;;  %v5110_v25 = vadd.f32 %v9572_v11, %v5109_v39  ;;  %v6278_v14 = vmax.f32 %v5904_v34, %v6125_v4  ;;  %v5755_v34 = vsel %vm1818_vm4, %v5752_v18, %v5754_v60 }
 0x4ed   : > { %v5111_v62 = vpop.f32.mrf.mxu1  ;;  %v5906_v2 = vmax.f32 %v5529_v7, %v5755_v34  ;;  %6597 = vmatprep.mubr.bf16.mxu1 %v7407_v22  ;;  %v9529_v34 = vld [vmem:[#allocation7 + $0x38] ss:$20 sps:$4 sm:$0xff]  }
 0x4ee   : > { %v5756_v36 = vrot.slane %v5534_v54, 2  ;;  %v5455_v44 = vadd.f32 %v16331_v17, %v5110_v25  ;;  %v16677_v49 = vpack.c.bf16 %v6278_v14, %v6277_v19 }
 0x4ef   : > { %v6126_v27 = vrot.slane %v5906_v2, 1 }
 0x4f0   : > { %v5757_v58 = vsel %vm1818_vm4, %v5754_v60, %v5756_v36  ;;  %v5535_v50 = vmax.f32 %v5455_v44, 0.0 }
 0x4f1   : > { %v5907_v11 = vmax.f32 %v5530_v43, %v5757_v58  ;;  %v6457_v43 = vsel %vm3713_vm6, %v6456_v28, 0  ;;  %v6127_v7 = vsel %vm1428_vm5, %v6124_v16, %v6126_v27 }
 0x4f2   : > { %v5758_v6 = vrot.slane %v5535_v50, 2 }
 0x4f3   : > { %v6128_v12 = vrot.slane %v5907_v11, 1 }
 0x4f4   : > { %v5759_v56 = vsel %vm1818_vm4, %v5756_v36, %v5758_v6  ;;  %v5909_v17 = vmax.f32 %v5532_v35, %v5758_v6  ;;  %v6279_v36 = vmax.f32 %v5905_v32, %v6127_v7 }
 0x4f5   : > { %v5908_v19 = vmax.f32 %v5531_v41, %v5759_v56  ;;  %v7406_v41 = vcombine.low %v414_v13, %v414_v13  ;;  %v6129_v5 = vsel %vm1428_vm5, %v6126_v27, %v6128_v12  ;;  %v9528_v13 = vld [vmem:[#allocation7 + $0x10] ss:$20 sps:$4 sm:$0xff]  }
 0x4f6   : > { %v6132_v21 = vrot.slane %v5909_v17, 1  ;;  %v6280_v14 = vmax.f32 %v5906_v2, %v6129_v5  ;;  %v9532_v27 = vld [vmem:[#allocation7 + $0xb0] ss:$0 sps:$4 sm:$0xff]  }
 0x4f7   : > { %v6130_v39 = vrot.slane %v5908_v19, 1  ;;  %6598 = vmatmul.mubr.bf16.gmra.mxu1 %v7406_v41  ;;  %v18452_v41 = vld [vmem:[#allocation19_spill] sm:$0xff] }
 0x4f8   : > { %v6283_v53 = vmax.f32 %v5909_v17, %v6132_v21  ;;  %8124 = vmatprep.mubr.msk.bf16.mxu1 %vm9733_vm1, %v18442_v9  ;;  %v7588_v60 = vpop.f32.mrf.mxu1  ;;  %v16704_v44 = vpack.c.bf16 %v6280_v14, %v6279_v36  ;;  %v18445_v17 = vld [vmem:[#allocation33_spill] sm:$0xff] }
 0x4f9   : > { %v6131_v18 = vsel %vm1428_vm5, %v6128_v12, %v6130_v39  ;;  %v6133_v35 = vsel %vm1428_vm5, %v6130_v39, %v6132_v21  ;;  %v18448_v21 = vld [vmem:[#allocation81_spill] sm:$0xff] }
 0x4fa   : > { %v6321_v42 = vpack.c.bf16 %v6283_v53, %v6283_v53  ;;  %v6281_v25 = vmax.f32 %v5907_v11, %v6131_v18  ;;  %v6282_v4 = vmax.f32 %v5908_v19, %v6133_v35  ;;  %v7589_v58 = vpop.f32.mrf.mxu1  ;;  %v18446_v19 = vld [vmem:[#allocation70_spill] sm:$0xff]  ;;  %v18449_v12 = vld [vmem:[#allocation57_spill] sm:$0xff] }
 0x4fb   : > { %v16707_v50 = vadd.f32 %v7589_v58, %v7588_v60  ;;  %v18451_v35 = vld [vmem:[#allocation38_spill] sm:$0xff] }
 0x4fc   : > { %v16692_v54 = vand.u32 %v6457_v43, %v6321_v42  ;;  %v16698_v62 = vpack.c.bf16 %v6282_v4, %v6281_v25  ;;  %v16712_v16 = vpop.f32.mrf.mxu1  ;;  %v18450_v43 = vld [vmem:[#allocation87_spill] sm:$0xff]  ;;  %v9533_v60 = vld [vmem:[#allocation9] ss:$20 sps:$4 sm:$0xff]  }
 0x4fd   : > { %v9535_v25 = vld [vmem:[#allocation9 + $0x4] ss:$20 sps:$4 sm:$0xff]   ;;  %v9538_v58 = vld [vmem:[#allocation9 + $0x2c] ss:$20 sps:$4 sm:$0xff]  }
 0x4fe   : > { %8113 = vmatpush3.bf16.msra.mxu1 %v16692_v54  ;;  %v16716_v32 = vpop.f32.mrf.mxu1 }
 0x4ff   : > { %8114 = vmatprep.subr.bf16.mxu1 %v18442_v9 }
 0x500   : > { %v7594_v6 = vpop.f32.mrf.mxu1 }
 0x502   : > { %8115 = vmatpush3.bf16.msra.mxu1 %v16698_v62  ;;  %v7595_v10 = vpop.f32.mrf.mxu1 }
 0x503   : > { %8116 = vmatprep.subr.bf16.mxu1 %v18442_v9  ;;  %v16725_v11 = vadd.f32 %v7595_v10, %v7594_v6  ;;  %v9539_v6 = vld [vmem:[#allocation9 + $0x50] ss:$20 sps:$4 sm:$0xff]  }
 0x504   : > { %v16727_v22 = vpop.f32.mrf.mxu1  ;;  %v9544_v10 = vld [vmem:[#allocation9 + $0x7c] ss:$20 sps:$4 sm:$0xff]  }
 0x506   : > { %8117 = vmatpush3.bf16.msra.mxu1 %v16704_v44 }
 0x507   : > { %8118 = vmatprep.subr.bf16.mxu1 %v18442_v9 }
 0x50a   : > { %8119 = vmatpush3.bf16.msra.mxu1 %v16677_v49 }
 0x50b   : > { %8120 = vmatprep.subr.bf16.mxu1 %v18442_v9 }
 0x50e   : > { %8121 = vmatpush3.bf16.msra.mxu1 %v16667_v40 }
 0x50f   : > { %8122 = vmatprep.subr.bf16.mxu1 %v18442_v9 }
 0x512   : > { %8123 = vmatpush3.bf16.msra.mxu1 %v16637_v51 }
 0x513   : > { %7675 = vmatprep.subr.bf16.mxu1 %v15850_v37  ;;  %v16731_v37 = vpop.f32.mrf.mxu1 }
 0x515   : > { %8125 = vmatmul.mubr.msk.bf16.vlgmr.msra.gmra.mxu1 %vm6439_vm12, %v9528_v13  ;;  %v9536_v13 = vld [vmem:[#allocation9 + $0x28] ss:$20 sps:$4 sm:$0xff]  }
 0x516   : > { %7676 = vmatpush3.bf16.msra.mxu1 %v15866_v23  ;;  %8128 = vmatprep.mubr.msk.bf16.mxu1 %vm9733_vm1, %v18442_v9  ;;  %v7600_v23 = vpop.f32.mrf.mxu1 }
 0x517   : > { %7677 = vmatprep.subr.bf16.mxu1 %v15934_v8  ;;  %v9530_v8 = vld [vmem:[#allocation7 + $0x60] ss:$20 sps:$4 sm:$0xff]  }
 0x518   : > { %v7601_v56 = vpop.f32.mrf.mxu1 }
 0x51a   : > { %7678 = vmatpush3.bf16.msra.mxu1 %v15913_v46  ;;  %v16740_v46 = vadd.f32 %v7601_v56, %v7600_v23 }
 0x51b   : > { %7679 = vmatprep.subr.bf16.mxu1 %v15976_v61  ;;  %v7603_v61 = vpop.f32.mrf.mxu1 }
 0x51d   : > { %8129 = vmatmul.mubr.msk.bf16.gmra.mxu1 %vm6439_vm12, %v9529_v34 }
 0x51e   : > { %7680 = vmatpush3.bf16.msra.mxu1 %v16029_v52  ;;  %8132 = vmatprep.mubr.msk.bf16.mxu1 %vm9733_vm1, %v18442_v9  ;;  %v7604_v52 = vpop.f32.mrf.mxu1 }
 0x51f   : > { %7681 = vmatprep.subr.bf16.mxu1 %v16089_v0  ;;  %v16747_v0 = vadd.f32 %v7604_v52, %v7603_v61 }
 0x520   : > { %v7606_v28 = vpop.f32.mrf.mxu1 }
 0x522   : > { %7682 = vmatpush3.bf16.msra.mxu1 %v16042_v26  ;;  %v9531_v26 = vld [vmem:[#allocation7 + $0x88] ss:$20 sps:$4 sm:$0xff]   ;;  %v7607_v2 = vpop.f32.mrf.mxu1 }
 0x523   : > { %7683 = vmatprep.subr.bf16.mxu1 %v18445_v17  ;;  %v16751_v39 = vadd.f32 %v7607_v2, %v7606_v28  ;;  %v7593_v17 = vadd.f32 %v16716_v32, %v16712_v16  ;;  %v9565_v28 = vld [vmem:[#allocation9 + $0xb0] ss:$0 sps:$4 sm:$0xff]  }
 0x524   : > { %v7609_v53 = vpop.f32.mrf.mxu1 }
 0x525   : > { %8133 = vmatmul.mubr.msk.bf16.gmra.mxu1 %vm6439_vm12, %v9530_v8 }
 0x526   : > { %7684 = vmatpush3.bf16.msra.mxu1 %v18446_v19  ;;  %8136 = vmatprep.mubr.msk.bf16.mxu1 %vm9733_vm1, %v18442_v9  ;;  %v7610_v18 = vpop.f32.mrf.mxu1 }
 0x527   : > { %7685 = vmatprep.subr.bf16.mxu1 %v18447_v1  ;;  %v16758_v42 = vadd.f32 %v7610_v18, %v7609_v53 }
 0x528   : > { %v7612_v4 = vpop.f32.mrf.mxu1 }
 0x52a   : > { %7686 = vmatpush3.bf16.msra.mxu1 %v18448_v21  ;;  %v7613_v5 = vpop.f32.mrf.mxu1 }
 0x52b   : > { %7687 = vmatprep.subr.bf16.mxu1 %v18449_v12  ;;  %v16763_v7 = vadd.f32 %v7613_v5, %v7612_v4 }
 0x52c   : > { %v7615_v14 = vpop.f32.mrf.mxu1 }
 0x52d   : > { %8137 = vmatmul.mubr.msk.bf16.gmra.mxu1 %vm6439_vm12, %v9531_v26 }
 0x52e   : > { %7688 = vmatpush3.bf16.msra.mxu1 %v18450_v43  ;;  %8140 = vmatprep.mubr.msk.bf16.mxu1 %vm9733_vm1, %v18442_v9  ;;  %v7616_v36 = vpop.f32.mrf.mxu1 }
 0x52f   : > { %7689 = vmatprep.subr.bf16.mxu1 %v18451_v35 }
 0x532   : > { %7690 = vmatpush3.bf16.msra.mxu1 %v18452_v41 }
 0x533   : > { %7721 = vmatprep.subr.bf16.mxu1 %v16593_v55  ;;  %v9541_v55 = vld [vmem:[#allocation9 + $0x54] ss:$20 sps:$4 sm:$0xff]  }
 0x535   : > { %8141 = vmatmul.mubr.msk.bf16.gmra.mxu1 %vm6439_vm12, %v9532_v27 }
 0x536   : > { %6841 = vmatprep.mubr.bf16.mxu1 %v9535_v25 }
 0x53d   : > { %6842 = vmatmul.mubr.bf16.vlgmr.msra.gmra.mxu1 %v9533_v60 }
 0x53e   : > { %7722 = vmatpush3.bf16.msra.mxu1 %v16420_v59  ;;  %6849 = vmatprep.mubr.bf16.mxu1 %v9538_v58  ;;  %v9542_v59 = vld [vmem:[#allocation9 + $0x78] ss:$20 sps:$4 sm:$0xff]  }
 0x53f   : > { %7723 = vmatprep.subr.bf16.mxu1 %v16600_v15 }
 0x542   : > { %7724 = vmatpush3.bf16.msra.mxu1 %v16368_v33  ;;  %v440_v33 = vld [vmem:[#allocation9 + $0xa0] sm:$0xff] }
 0x543   : > { %7725 = vmatprep.subr.bf16.mxu1 %v16606_v31 }
 0x545   : > { %6850 = vmatmul.mubr.bf16.gmra.mxu1 %v9536_v13 }
 0x546   : > { %7726 = vmatpush3.bf16.msra.mxu1 %v16388_v38  ;;  %6857 = vmatprep.mubr.bf16.mxu1 %v9541_v55  ;;  %v7435_v38 = vcombine.high %v440_v33, %v440_v33 }
 0x547   : > { %7727 = vmatprep.subr.bf16.mxu1 %v16540_v3  ;;  %v9556_v3 = vld [vmem:[#allocation9 + $0x80] ss:$20 sps:$4 sm:$0xff]  }
 0x54a   : > { %7728 = vmatpush3.bf16.msra.mxu1 %v16406_v48  ;;  %v7434_v48 = vcombine.low %v440_v33, %v440_v33 }
 0x54b   : > { %7729 = vmatprep.subr.bf16.mxu1 %v16529_v63  ;;  %v9552_v63 = vld [vmem:[#allocation9 + $0x34] ss:$20 sps:$4 sm:$0xff]  }
 0x54d   : > { %6858 = vmatmul.mubr.bf16.gmra.mxu1 %v9539_v6 }
 0x54e   : > { %7730 = vmatpush3.bf16.msra.mxu1 %v16412_v45  ;;  %6865 = vmatprep.mubr.bf16.mxu1 %v9544_v10  ;;  %v9549_v45 = vld [vmem:[#allocation9 + $0xc] ss:$20 sps:$4 sm:$0xff]  }
 0x54f   : > { %7731 = vmatprep.subr.bf16.mxu1 %v16518_v30  ;;  %v9547_v30 = vld [vmem:[#allocation9 + $0x8] ss:$20 sps:$4 sm:$0xff]  }
 0x552   : > { %7732 = vmatpush3.bf16.msra.mxu1 %v16437_v24  ;;  %v9555_v24 = vld [vmem:[#allocation9 + $0x5c] ss:$20 sps:$4 sm:$0xff]  }
 0x553   : > { %7733 = vmatprep.subr.bf16.mxu1 %v16494_v29  ;;  %v441_v29 = vld [vmem:[#allocation9 + $0xa8] sm:$0xff] }
 0x554   : > { %v7437_v15 = vcombine.high %v441_v29, %v441_v29  ;;  %v7436_v31 = vcombine.low %v441_v29, %v441_v29 }
 0x555   : > { %6866 = vmatmul.mubr.bf16.gmra.mxu1 %v9542_v59 }
 0x556   : > { %7734 = vmatpush3.bf16.msra.mxu1 %v16455_v47  ;;  %6873 = vmatprep.mubr.bf16.mxu1 %v7435_v38  ;;  %v9550_v47 = vld [vmem:[#allocation9 + $0x30] ss:$20 sps:$4 sm:$0xff]  }
 0x557   : > { %7735 = vmatprep.subr.bf16.mxu1 %v16474_v57  ;;  %v9558_v57 = vld [vmem:[#allocation9 + $0x84] ss:$20 sps:$4 sm:$0xff]  }
 0x55a   : > { %7736 = vmatpush3.bf16.msra.mxu1 %v16470_v20  ;;  %v9553_v20 = vld [vmem:[#allocation9 + $0x58] ss:$20 sps:$4 sm:$0xff]  }
 0x55b   : > { %8144 = vmatprep.subr.bf16.mxu1 %v18442_v9 }
 0x55d   : > { %6874 = vmatmul.mubr.bf16.gmra.mxu1 %v7434_v48 }
 0x55e   : > { %6913 = vmatprep.mubr.bf16.mxu1 %v9549_v45 }
 0x565   : > { %6914 = vmatmul.mubr.bf16.vlgmr.msra.gmra.mxu1 %v9547_v30 }
 0x566   : > { %8145 = vmatpush3.bf16.msra.mxu1 %v16692_v54  ;;  %6921 = vmatprep.mubr.bf16.mxu1 %v9552_v63 }
 0x567   : > { %8146 = vmatprep.subr.bf16.mxu1 %v18442_v9 }
 0x56a   : > { %8147 = vmatpush3.bf16.msra.mxu1 %v16698_v62 }
 0x56b   : > { %8148 = vmatprep.subr.bf16.mxu1 %v18442_v9 }
 0x56d   : > { %6922 = vmatmul.mubr.bf16.gmra.mxu1 %v9550_v47 }
 0x56e   : > { %8149 = vmatpush3.bf16.msra.mxu1 %v16704_v44  ;;  %6929 = vmatprep.mubr.bf16.mxu1 %v9555_v24  ;;  %v9564_v44 = vld [vmem:[#allocation9 + $0x88] ss:$20 sps:$4 sm:$0xff]  }
 0x56f   : > { %8150 = vmatprep.subr.bf16.mxu1 %v18442_v9 }
 0x572   : > { %8151 = vmatpush3.bf16.msra.mxu1 %v16677_v49  ;;  %v9561_v49 = vld [vmem:[#allocation9 + $0x10] ss:$20 sps:$4 sm:$0xff]  }
 0x573   : > { %8152 = vmatprep.subr.bf16.mxu1 %v18442_v9 }
 0x575   : > { %6930 = vmatmul.mubr.bf16.gmra.mxu1 %v9553_v20 }
 0x576   : > { %8153 = vmatpush3.bf16.msra.mxu1 %v16667_v40  ;;  %6937 = vmatprep.mubr.bf16.mxu1 %v9558_v57  ;;  %v9562_v40 = vld [vmem:[#allocation9 + $0x38] ss:$20 sps:$4 sm:$0xff]  }
 0x577   : > { %8154 = vmatprep.subr.bf16.mxu1 %v18442_v9 }
 0x57a   : > { %8155 = vmatpush3.bf16.msra.mxu1 %v16637_v51  ;;  %v9563_v51 = vld [vmem:[#allocation9 + $0x60] ss:$20 sps:$4 sm:$0xff]  }
 0x57d   : > { %6938 = vmatmul.mubr.bf16.gmra.mxu1 %v9556_v3 }
 0x57e   : > { %6945 = vmatprep.mubr.bf16.mxu1 %v7437_v15 }
 0x585   : > { %6946 = vmatmul.mubr.bf16.gmra.mxu1 %v7436_v31 }
 0x586   : > { %8156 = vmatprep.mubr.msk.bf16.mxu1 %vm9733_vm1, %v18442_v9 }
 0x58d   : > { %8157 = vmatmul.mubr.msk.bf16.vlgmr.msra.gmra.mxu1 %vm6439_vm12, %v9561_v49 }
 0x58e   : > { %8160 = vmatprep.mubr.msk.bf16.mxu1 %vm9733_vm1, %v18442_v9 }
 0x593   : > { %v7634_v54 = vpop.f32.mrf.mxu1 }
 0x595   : > { %8161 = vmatmul.mubr.msk.bf16.gmra.mxu1 %vm6439_vm12, %v9562_v40  ;;  %v7635_v62 = vpop.f32.mrf.mxu1 }
 0x596   : > { %8164 = vmatprep.mubr.msk.bf16.mxu1 %vm9733_vm1, %v18442_v9  ;;  %v7636_v34 = vadd.f32 %v7635_v62, %v7634_v54 }
 0x597   : > { %v7637_v23 = vpop.f32.mrf.mxu1 }
 0x598   : > { %v6568_v8 = vadd.f32 %v7636_v34, %v16707_v50  ;;  %v7599_v50 = vadd.f32 %v16731_v37, %v16727_v22 }
 0x599   : > { %v7638_v56 = vpop.f32.mrf.mxu1 }
 0x59a   : > { %v7639_v61 = vadd.f32 %v7638_v56, %v7637_v23 }
 0x59b   : > { %v7640_v19 = vpop.f32.mrf.mxu1 }
 0x59c   : > { %v6571_v52 = vadd.f32 %v7639_v61, %v7593_v17 }
 0x59d   : > { %8165 = vmatmul.mubr.msk.bf16.gmra.mxu1 %vm6439_vm12, %v9563_v51  ;;  %v7641_v1 = vpop.f32.mrf.mxu1 }
 0x59e   : > { %8168 = vmatprep.mubr.msk.bf16.mxu1 %vm9733_vm1, %v18442_v9  ;;  %v7642_v26 = vadd.f32 %v7641_v1, %v7640_v19 }
 0x59f   : > { %v7643_v21 = vpop.f32.mrf.mxu1 }
 0x5a0   : > { %v6576_v2 = vadd.f32 %v7642_v26, %v16725_v11 }
 0x5a1   : > { %v7644_v12 = vpop.f32.mrf.mxu1 }
 0x5a2   : > { %v7645_v16 = vadd.f32 %v7644_v12, %v7643_v21 }
 0x5a3   : > { %v7646_v32 = vpop.f32.mrf.mxu1 }
 0x5a4   : > { %v6579_v53 = vadd.f32 %v7645_v16, %v7599_v50 }
 0x5a5   : > { %8169 = vmatmul.mubr.msk.bf16.gmra.mxu1 %vm6439_vm12, %v9564_v44  ;;  %v7647_v43 = vpop.f32.mrf.mxu1 }
 0x5a6   : > { %8172 = vmatprep.mubr.msk.bf16.mxu1 %vm9733_vm1, %v18442_v9  ;;  %v7648_v18 = vadd.f32 %v7647_v43, %v7646_v32 }
 0x5a7   : > { %v7649_v9 = vpop.f32.mrf.mxu1 }
 0x5a8   : > { %v6584_v35 = vadd.f32 %v7648_v18, %v16740_v46 }
 0x5a9   : > { %v7650_v27 = vpop.f32.mrf.mxu1 }
 0x5aa   : > { %v7651_v41 = vadd.f32 %v7650_v27, %v7649_v9 }
 0x5ab   : > { %v7652_v25 = vpop.f32.mrf.mxu1 }
 0x5ac   : > { %v6587_v4 = vadd.f32 %v7651_v41, %v16747_v0 }
 0x5ad   : > { %8173 = vmatmul.mubr.msk.bf16.gmra.mxu1 %vm6439_vm12, %v9565_v28  ;;  %v7653_v11 = vpop.f32.mrf.mxu1 }
 0x5ae   : > { %v7654_v5 = vadd.f32 %v7653_v11, %v7652_v25 }
 0x5af   : > { %v7655_v14 = vpop.f32.mrf.mxu1 }
 0x5b0   : > { %v6592_v22 = vadd.f32 %v7654_v5, %v16751_v39 }
 0x5b1   : > { %v7656_v37 = vpop.f32.mrf.mxu1 }
 0x5b2   : > { %v7657_v60 = vadd.f32 %v7656_v37, %v7655_v14 }
 0x5b4   : > { %v6595_v58 = vadd.f32 %v7657_v60, %v16758_v42 }
 0x5b7   : > { %v7658_v36 = vpop.f32.mrf.mxu1 }
 0x5b9   : > { %v7659_v13 = vpop.f32.mrf.mxu1 }
 0x5ba   : > { %v7660_v55 = vadd.f32 %v7659_v13, %v7658_v36 }
 0x5bb   : > { %v7661_v6 = vpop.f32.mrf.mxu1 }
 0x5bc   : > { %v6600_v46 = vadd.f32 %v7660_v55, %v16763_v7 }
 0x5bd   : > { %v7662_v10 = vpop.f32.mrf.mxu1 }
 0x5d5   : > { %v6639_v33 = vpop.f32.mrf.mxu1 }
 0x5d6   : > { %v16818_v59 = vadd.f32 %v6639_v33, %v6568_v8 }
 0x5d7   : > { %v8126_v0 = vpop.f32.mrf.mxu1 }
 0x5d9   : > { %v6642_v38 = vpop.f32.mrf.mxu1 }
 0x5da   : > { %v16820_v48 = vadd.f32 %v6642_v38, %v6571_v52 }
 0x5db   : > { %v8127_v45 = vpop.f32.mrf.mxu1 }
 0x5dd   : > { %v6647_v39 = vpop.f32.mrf.mxu1 }
 0x5de   : > { %v16822_v30 = vadd.f32 %v6647_v39, %v6576_v2 }
 0x5df   : > { %v8130_v63 = vpop.f32.mrf.mxu1 }
 0x5e1   : > { %v6650_v47 = vpop.f32.mrf.mxu1 }
 0x5e2   : > { %v16824_v42 = vadd.f32 %v6650_v47, %v6579_v53 }
 0x5e3   : > { %v8131_v24 = vpop.f32.mrf.mxu1 }
 0x5e5   : > { %v6655_v20 = vpop.f32.mrf.mxu1 }
 0x5e6   : > { %v16826_v57 = vadd.f32 %v6655_v20, %v6584_v35 }
 0x5e7   : > { %v8134_v7 = vpop.f32.mrf.mxu1 }
 0x5e9   : > { %v6658_v29 = vpop.f32.mrf.mxu1 }
 0x5ea   : > { %v16828_v3 = vadd.f32 %v6658_v29, %v6587_v4 }
 0x5eb   : > { %v8135_v15 = vpop.f32.mrf.mxu1 }
 0x5ed   : > { %v6663_v31 = vpop.f32.mrf.mxu1 }
 0x5ee   : > { %v16830_v49 = vadd.f32 %v6663_v31, %v6592_v22 }
 0x5ef   : > { %v8138_v40 = vpop.f32.mrf.mxu1 }
 0x5f1   : > { %v6666_v51 = vpop.f32.mrf.mxu1 }
 0x5f2   : > { %v16832_v54 = vadd.f32 %v6666_v51, %v6595_v58 }
 0x5f3   : > { %v8139_v62 = vpop.f32.mrf.mxu1 }
 0x5f5   : > { %v6671_v44 = vpop.f32.mrf.mxu1 }
 0x5f6   : > { %v16834_v34 = vadd.f32 %v6671_v44, %v6600_v46 }
 0x5f7   : > { %v8142_v23 = vpop.f32.mrf.mxu1 }
 0x5f9   : > { %v6674_v8 = vpop.f32.mrf.mxu1 }
 0x5fb   : > { %v8143_v56 = vpop.f32.mrf.mxu1 }
 0x5fd   : > { %v7691_v17 = vpop.f32.mrf.mxu1 }
 0x5ff   : > { %v7692_v61 = vpop.f32.mrf.mxu1 }
 0x600   : > { %v7693_v19 = vadd.f32 %v7692_v61, %v7691_v17 }
 0x601   : > { %v7694_v52 = vpop.f32.mrf.mxu1 }
 0x603   : > { %v7695_v1 = vpop.f32.mrf.mxu1 }
 0x604   : > { %v7696_v28 = vadd.f32 %v7695_v1, %v7694_v52 }
 0x605   : > { %v7697_v26 = vpop.f32.mrf.mxu1 }
 0x607   : > { %v7698_v21 = vpop.f32.mrf.mxu1 }
 0x608   : > { %v7699_v2 = vadd.f32 %v7698_v21, %v7697_v26 }
 0x609   : > { %v7700_v12 = vpop.f32.mrf.mxu1 }
 0x60b   : > { %v7701_v50 = vpop.f32.mrf.mxu1 }
 0x60c   : > { %v7702_v16 = vadd.f32 %v7701_v50, %v7700_v12 }
 0x60d   : > { %v7703_v32 = vpop.f32.mrf.mxu1 }
 0x60f   : > { %v7704_v53 = vpop.f32.mrf.mxu1 }
 0x610   : > { %v16836_v43 = vadd.f32 %v7704_v53, %v7703_v32 }
 0x611   : > { %v7706_v18 = vpop.f32.mrf.mxu1 }
 0x613   : > { %v7707_v9 = vpop.f32.mrf.mxu1 }
 0x614   : > { %v7708_v35 = vadd.f32 %v7707_v9, %v7706_v18 }
 0x615   : > { %v7709_v27 = vpop.f32.mrf.mxu1 }
 0x617   : > { %v7710_v41 = vpop.f32.mrf.mxu1 }
 0x618   : > { %v16838_v25 = vadd.f32 %v7710_v41, %v7709_v27 }
 0x619   : > { %v7712_v4 = vpop.f32.mrf.mxu1 }
 0x61b   : > { %v7713_v11 = vpop.f32.mrf.mxu1 }
 0x61c   : > { %v16840_v5 = vadd.f32 %v7713_v11, %v7712_v4 }
 0x61d   : > { %v7715_v14 = vpop.f32.mrf.mxu1 }
 0x61f   : > { %v7716_v22 = vpop.f32.mrf.mxu1 }
 0x620   : > { %v16842_v37 = vadd.f32 %v7716_v22, %v7715_v14 }
 0x621   : > { %v7718_v60 = vpop.f32.mrf.mxu1 }
 0x623   : > { %v7719_v36 = vpop.f32.mrf.mxu1 }
 0x625   : > { %v7737_v58 = vpop.f32.mrf.mxu1 }
 0x627   : > { %v7738_v13 = vpop.f32.mrf.mxu1 }
 0x628   : > { %v7739_v51 = vadd.f32 %v7738_v13, %v7737_v58 }
 0x629   : > { %v7740_v55 = vpop.f32.mrf.mxu1 }
 0x62a   : > { %v6916_v8 = vadd.f32 %v7739_v51, %v7693_v19 }
 0x62b   : > { %v7741_v6 = vpop.f32.mrf.mxu1 }
 0x62c   : > { %v7742_v62 = vadd.f32 %v7741_v6, %v7740_v55 }
 0x62d   : > { %v7743_v46 = vpop.f32.mrf.mxu1 }
 0x62e   : > { %v6919_v56 = vadd.f32 %v7742_v62, %v7696_v28 }
 0x62f   : > { %v7744_v10 = vpop.f32.mrf.mxu1 }
 0x630   : > { %v7745_v26 = vadd.f32 %v7744_v10, %v7743_v46 }
 0x631   : > { %v7746_v33 = vpop.f32.mrf.mxu1 }
 0x632   : > { %v6924_v53 = vadd.f32 %v7745_v26, %v7699_v2 }
 0x633   : > { %v7747_v0 = vpop.f32.mrf.mxu1 }
 0x634   : > { %v7748_v21 = vadd.f32 %v7747_v0, %v7746_v33 }
 0x635   : > { %v7749_v38 = vpop.f32.mrf.mxu1 }
 0x636   : > { %v6927_v18 = vadd.f32 %v7748_v21, %v7702_v16 }
 0x637   : > { %v7750_v45 = vpop.f32.mrf.mxu1 }
 0x638   : > { %v7751_v11 = vadd.f32 %v7750_v45, %v7749_v38 }
 0x639   : > { %v7752_v39 = vpop.f32.mrf.mxu1 }
 0x63a   : > { %v6932_v60 = vadd.f32 %v7751_v11, %v16836_v43 }
 0x63b   : > { %v7753_v63 = vpop.f32.mrf.mxu1 }
 0x63c   : > { %v7754_v19 = vadd.f32 %v7753_v63, %v7752_v39 }
 0x63d   : > { %v7755_v47 = vpop.f32.mrf.mxu1 }
 0x63e   : > { %v6935_v36 = vadd.f32 %v7754_v19, %v7708_v35 }
 0x63f   : > { %v7756_v24 = vpop.f32.mrf.mxu1 }
 0x640   : > { %v7757_v2 = vadd.f32 %v7756_v24, %v7755_v47 }
 0x641   : > { %v7758_v20 = vpop.f32.mrf.mxu1 }
 0x642   : > { %v6940_v38 = vadd.f32 %v7757_v2, %v16838_v25 }
 0x643   : > { %v7759_v7 = vpop.f32.mrf.mxu1 }
 0x644   : > { %v7760_v16 = vadd.f32 %v7759_v7, %v7758_v20 }
 0x645   : > { %v7761_v29 = vpop.f32.mrf.mxu1 }
 0x646   : > { %v6943_v45 = vadd.f32 %v7760_v16, %v16840_v5 }
 0x647   : > { %v7762_v15 = vpop.f32.mrf.mxu1 }
 0x648   : > { %v7763_v0 = vadd.f32 %v7762_v15, %v7761_v29 }
 0x649   : > { %v7764_v31 = vpop.f32.mrf.mxu1 }
 0x64b   : > { %v7765_v40 = vpop.f32.mrf.mxu1 }
 0x64c   : > { %v6948_v40 = vadd.f32 %v7763_v0, %v16842_v37 }
 0x64d   : > { %v6987_v44 = vpop.f32.mrf.mxu1 }
 0x64e   : > { %v6988_v61 = vadd.f32 %v6987_v44, %v6916_v8 }
 0x64f   : > { %v8158_v23 = vpop.f32.mrf.mxu1 }
 0x651   : > { %v6990_v17 = vpop.f32.mrf.mxu1 }
 0x652   : > { %v6991_v52 = vadd.f32 %v6990_v17, %v6919_v56 }
 0x653   : > { %v8159_v1 = vpop.f32.mrf.mxu1 }
 0x654   : > { %v9418_v12 = vpack.i.bf16 %v6991_v52, %v6988_v61 }
 0x655   : > { %v6995_v50 = vpop.f32.mrf.mxu1 }
 0x656   : > { %9419 = vrot.lane.b32.xlu0 %v9418_v12, %s9736_s22  ;;  %v6996_v27 = vadd.f32 %v6995_v50, %v6924_v53 }
 0x657   : > { %v8162_v32 = vpop.f32.mrf.mxu1 }
 0x659   : > { %v6998_v9 = vpop.f32.mrf.mxu1 }
 0x65a   : > { %v6999_v41 = vadd.f32 %v6998_v9, %v6927_v18 }
 0x65b   : > { %v8163_v4 = vpop.f32.mrf.mxu1 }
 0x65c   : > { %v9423_v28 = vpack.i.bf16 %v6999_v41, %v6996_v27 }
 0x65d   : > { %v7003_v14 = vpop.f32.mrf.mxu1 }
 0x65e   : > { %9424 = vrot.lane.b32.xlu1 %v9423_v28, %s9736_s22  ;;  %v7004_v13 = vadd.f32 %v7003_v14, %v6932_v60 }
 0x65f   : > { %v8166_v22 = vpop.f32.mrf.mxu1 }
 0x661   : > { %v7006_v58 = vpop.f32.mrf.mxu1 }
 0x662   : > { %v7007_v55 = vadd.f32 %v7006_v58, %v6935_v36 }
 0x663   : > { %v8167_v6 = vpop.f32.mrf.mxu1 }
 0x664   : > { %v9428_v46 = vpack.i.bf16 %v7007_v55, %v7004_v13 }
 0x665   : > { %v7011_v10 = vpop.f32.mrf.mxu1 }
 0x666   : > { %9429 = vrot.lane.b32.xlu0 %v9428_v46, %s9736_s22  ;;  %v7012_v43 = vadd.f32 %v7011_v10, %v6940_v38 }
 0x667   : > { %v8170_v33 = vpop.f32.mrf.mxu1 }
 0x669   : > { %v7014_v39 = vpop.f32.mrf.mxu1 }
 0x66a   : > { %v7015_v35 = vadd.f32 %v7014_v39, %v6943_v45 }
 0x66b   : > { %v8171_v63 = vpop.f32.mrf.mxu1 }
 0x66c   : > { %v9433_v31 = vpack.i.bf16 %v7015_v35, %v7012_v43 }
 0x66d   : > { %v7019_v47 = vpop.f32.mrf.mxu1 }
 0x66e   : > { %v7020_v24 = vadd.f32 %v7019_v47, %v6948_v40  ;;  %9434 = vrot.lane.b32.xlu1 %v9433_v31, %s9736_s22 }
 0x66f   : > { %v8174_v20 = vpop.f32.mrf.mxu1 }
 0x670   : > { %7050 = vrot.lane.b32.xlu0 %v7020_v24, %s9736_s22 }
 0x671   : > { %v7022_v7 = vpop.f32.mrf.mxu1 }
 0x673   : > { %v8175_v29 = vpop.f32.mrf.mxu1 }
 0x6c8   : > { %v9420_v25 = vpop.permute.xlu0 %9419 }
 0x6c9   : > { %v9422_v15 = vunpack.i.h.bf16 %v9420_v25  ;;  %v9421_v5 = vunpack.i.l.bf16 %v9420_v25 }
 0x6cb   : > { %v7062_v37 = vsel %vm4028_vm9, %v16820_v48, %v9422_v15  ;;  %v7061_v51 = vsel %vm4028_vm9, %v16818_v59, %v9421_v5 }
 0x6cc   : > { %v7467_v62 = vpack.c.bf16 %v7062_v37, %v7061_v51 }
 0x6ce   : > { %7468 = vst [vmem:[%s347_s21] sm:$0xff] %v7467_v62  }
 0x6d0   : > { %v9425_v44 = vpop.permute.xlu1 %9424 }
 0x6d1   : > { %v9427_v23 = vunpack.i.h.bf16 %v9425_v44  ;;  %v9426_v8 = vunpack.i.l.bf16 %v9425_v44 }
 0x6d3   : > { %v7064_v56 = vsel %vm4028_vm9, %v16824_v42, %v9427_v23  ;;  %v7063_v17 = vsel %vm4028_vm9, %v16822_v30, %v9426_v8 }
 0x6d4   : > { %v7472_v61 = vpack.c.bf16 %v7064_v56, %v7063_v17 }
 0x6d6   : > { %7484 = vst [vmem:[%s347_s21 + $0x8] sm:$0xff] %v7472_v61  }
 0x6d8   : > { %v9430_v52 = vpop.permute.xlu0 %9429 }
 0x6d9   : > { %v9432_v1 = vunpack.i.h.bf16 %v9430_v52  ;;  %v9431_v26 = vunpack.i.l.bf16 %v9430_v52 }
 0x6db   : > { %v7066_v48 = vsel %vm4028_vm9, %v16828_v3, %v9432_v1  ;;  %v7065_v59 = vsel %vm4028_vm9, %v16826_v57, %v9431_v26 }
 0x6dc   : > { %v7477_v21 = vpack.c.bf16 %v7066_v48, %v7065_v59 }
 0x6de   : > { %7485 = vst [vmem:[%s347_s21 + $0x10] sm:$0xff] %v7477_v21  }
 0x6e0   : > { %v9435_v12 = vpop.permute.xlu1 %9434 }
 0x6e1   : > { %v9437_v50 = vunpack.i.h.bf16 %v9435_v12  ;;  %v9436_v32 = vunpack.i.l.bf16 %v9435_v12 }
 0x6e2   : > { %v7051_v42 = vpop.permute.xlu0 %7050 }
 0x6e3   : > { %v7068_v30 = vsel %vm4028_vm9, %v16832_v54, %v9437_v50  ;;  %v7067_v53 = vsel %vm4028_vm9, %v16830_v49, %v9436_v32  ;;  %v7069_v18 = vsel %vm4028_vm9, %v16834_v34, %v7051_v42 }
 0x6e4   : > { %v7482_v9 = vpack.c.bf16 %v7068_v30, %v7067_v53  ;;  %v7463_v3 = vpack.c.bf16 %v7069_v18, %v7069_v18 }
 0x6e6   : > { %7486 = vst [vmem:[%s347_s21 + $0x18] sm:$0xff] %v7482_v9   ;;  %7115 = vst [vmem:[%s347_s21 + $0x20] sm:$0xf] %v7463_v3 }
 0x6e7 PF: > { %s20_s24 = sadd.s32 1, %s9721_s24  }
 0x6e8   : > { %p17_p0 = scmp.ge.s32.totalorder %s20_s24, 4  }
 0x6ea   :  { %19 = sbr.rel (!%p17_p0) target bundleno = 3 (0x3), region = 99 }
 0x6ef   :  { %7137 = vsyncpa [#allocation3], 1 }
 0x6f0   :  { %7139 = vsyncpa [#allocation3 + $0x1], 1 }
 0x6f1   :  { %7140 = vsyncpa [#allocation5], 1 }
 0x6f2   :  { %7141 = vsyncpa [#allocation8], 1 }

// kernel: pt_net_forward.3
= control target key start
LH: loop header
LB: loop body
LE: loop exit
PB: predicated region body
PF: predicated region fallthrough
CT: control target
= control target key end

     0   :  { %10 = vsyncpa [#allocation3], 0  ;;  %s8973_s0 = inlined_call_operand.vmem [shape: bf16[8,9216], index: 0, kind: input, shape index: {}]   ;;  %s8974_s1 = inlined_call_operand.hbm [shape: bf16[9216,128], index: 1, kind: input, shape index: {}]   ;;  %s8975_s2 = inlined_call_operand.hbm [shape: f32[1,128], index: 2, kind: input, shape index: {}]   ;;  %s8976_s3 = inlined_call_operand.vmem [shape: f32[128,10], index: 3, kind: input, shape index: {}]   ;;  %s8977_s4 = inlined_call_operand.hbm [shape: f32[1,10], index: 4, kind: input, shape index: {}]   ;;  %s8978_s5 = inlined_call_operand.vmem [shape: f32[8,10], index: 5, kind: output, shape index: {}]  }
   0x1   :  { %11 = vsyncpa [#allocation5], 0  ;;  %s8732_s18 = smov [#allocation4]   ;;  %s8733_s20 = smov [#allocation2]  }
   0x2   :  { %s32_s19 = sshll.u32 %s8732_s18, 4  ;;  %s19_s21 = sshll.u32 %s8733_s20, 4  ;;  %s33_s19 = int_to_ptr.vmem [resolvable:$true] %s32_s19  ;;  %s20_s21 = int_to_ptr.vmem [resolvable:$true] %s19_s21 }
   0x3   :  { %s8676_s22 = scalar_lea.vmem %s33_s19, 16  ;;  %s8680_s23 = scalar_lea.vmem %s33_s19, 32 }
   0x4   :  { %p8677_p0 = scmp.ne.s32.totalorder %s33_s19, %s8676_s22  ;;  %p8681_p1 = scmp.lt.s32.totalorder %s33_s19, %s33_s19 }
   0x5   :  { %p8682_p2 = scmp.lt.s32.totalorder %s8680_s23, %s8676_s22 }
   0x7   :  { %p8683_p3 = por %p8682_p2, %p8681_p1 }
   0x9   :  { %p8684_p4 = pnand %p8683_p3, %p8677_p0 }
   0xb   :  { %8687 = shalt.err (!%p8684_p4)
}
   0xc   :  { %35 = dma.hbm_to_vmem [thread:$0]  %s8975_s2, 16, %s33_s19, [#allocation5]  }
   0xd   :  { %s8696_s26 = scalar_lea.vmem %s20_s21, 73728  ;;  %p8701_p6 = scmp.lt.s32.totalorder %s20_s21, %s20_s21 }
   0xe   :  { %p8697_p5 = scmp.ne.s32.totalorder %s20_s21, %s8696_s26  ;;  %p8702_p7 = scmp.lt.s32.totalorder %s8696_s26, %s8696_s26 }
  0x10   :  { %p8703_p8 = por %p8702_p7, %p8701_p6 }
  0x12   :  { %p8704_p9 = pnand %p8703_p8, %p8697_p5 }
  0x14   :  { %8707 = shalt.err (!%p8704_p9)
}
  0x15   :  { %s8734_s27 = smov 64   ;;  %s8735_s28 = smov 4  }
  0x16   :  { %25 = dma.hbm_to_vmem [thread:$0]  %s8974_s1, 73728, %s20_s21, [#allocation3], %s8734_s27, %s8734_s27, %s8735_s28  }
  0x17   :  { %s8736_s6 = smov [#allocation6]  }
  0x18   :  { %s44_s7 = sshll.u32 %s8736_s6, 4  ;;  %s45_s7 = int_to_ptr.vmem [resolvable:$true] %s44_s7 }
  0x19   :  { %s8716_s8 = scalar_lea.vmem %s45_s7, 16  ;;  %s8720_s9 = scalar_lea.vmem %s45_s7, 32 }
  0x1a   :  { %p8717_p10 = scmp.ne.s32.totalorder %s45_s7, %s8716_s8  ;;  %p8721_p11 = scmp.lt.s32.totalorder %s45_s7, %s45_s7 }
  0x1b   :  { %p8722_p12 = scmp.lt.s32.totalorder %s8720_s9, %s8716_s8 }
  0x1d   :  { %p8723_p13 = por %p8722_p12, %p8721_p11 }
  0x1f   :  { %p8724_p0 = pnand %p8723_p13, %p8717_p10 }
  0x21   :  { %8727 = shalt.err (!%p8724_p0)
}
  0x22   :  { %47 = dma.hbm_to_vmem [thread:$0]  %s8977_s4, 16, %s45_s7, [#allocation5]  }
  0x23   :  { %8728 = dma.done.wait [#allocation3], 73728  }
  0x24   :  { %8729 = vsyncadd [#allocation3], 4294893568 }
  0x25   :  { %8730 = dma.done.wait [#allocation5], 32  }
  0x26   :  { %8731 = vsyncadd [#allocation5], 4294967264  ;;  %v8016_v0 = vld [vmem:[#allocation2 + $0x78] sm:$0xff]   ;;  %v8020_v4 = vld [vmem:[#allocation2 + $0x70] sm:$0xff]   ;;  %vm8738_vm0 = vmmov 0   ;;  %vm6495_vm1 = vcmask 80896  }
  0x27   :  { %v8017_v1 = vld [vmem:[#allocation2 + $0xf8] sm:$0xff]   ;;  %7165 = vmatprep.subr.bf16.mxu0 %v8016_v0  ;;  %v8021_v5 = vld [vmem:[#allocation2 + $0xf0] sm:$0xff]   ;;  %v8024_v8 = vld [vmem:[#allocation2 + $0x68] sm:$0xff]  }
  0x28   :  { %v8018_v2 = vld [vmem:[#allocation2 + $0x38] sm:$0xff]   ;;  %7187 = vmatprep.subr.bf16.mxu1 %v8017_v1  ;;  %v8022_v6 = vld [vmem:[#allocation2 + $0x30] sm:$0xff]   ;;  %v8025_v9 = vld [vmem:[#allocation2 + $0xe8] sm:$0xff]  }
  0x29   :  { %v8019_v3 = vld [vmem:[#allocation2 + $0xb8] sm:$0xff]   ;;  %7166 = vmatpush3.bf16.msra.mxu0 %v8018_v2  ;;  %v8023_v7 = vld [vmem:[#allocation2 + $0xb0] sm:$0xff]   ;;  %v8026_v10 = vld [vmem:[#allocation2 + $0x28] sm:$0xff]  }
  0x2a   :  { %7188 = vmatpush3.bf16.msra.mxu1 %v8019_v3  ;;  %7167 = vmatprep.subr.bf16.mxu0 %v8020_v4  ;;  %v8027_v11 = vld [vmem:[#allocation2 + $0xa8] sm:$0xff]   ;;  %v8028_v12 = vld [vmem:[#allocation2 + $0x60] sm:$0xff]   ;;  %v8032_v16 = vld [vmem:[#allocation2 + $0x58] sm:$0xff]  }
  0x2b   :  { %7189 = vmatprep.subr.bf16.mxu1 %v8021_v5  ;;  %v8029_v13 = vld [vmem:[#allocation2 + $0xe0] sm:$0xff]   ;;  %v8033_v17 = vld [vmem:[#allocation2 + $0xd8] sm:$0xff]   ;;  %v8036_v20 = vld [vmem:[#allocation2 + $0x50] sm:$0xff]  }
  0x2c   :  { %v8030_v14 = vld [vmem:[#allocation2 + $0x20] sm:$0xff]   ;;  %v8034_v18 = vld [vmem:[#allocation2 + $0x18] sm:$0xff]   ;;  %v8037_v21 = vld [vmem:[#allocation2 + $0xd0] sm:$0xff]  }
  0x2d   :  { %7168 = vmatpush3.bf16.msra.mxu0 %v8022_v6  ;;  %v8031_v15 = vld [vmem:[#allocation2 + $0xa0] sm:$0xff]   ;;  %v8035_v19 = vld [vmem:[#allocation2 + $0x98] sm:$0xff]   ;;  %v8038_v22 = vld [vmem:[#allocation2 + $0x10] sm:$0xff]  }
  0x2e   :  { %7190 = vmatpush3.bf16.msra.mxu1 %v8023_v7  ;;  %7169 = vmatprep.subr.bf16.mxu0 %v8024_v8  ;;  %v8039_v23 = vld [vmem:[#allocation2 + $0x90] sm:$0xff]   ;;  %v8040_v24 = vld [vmem:[#allocation2 + $0x48] sm:$0xff]   ;;  %v8044_v28 = vld [vmem:[#allocation2 + $0x40] sm:$0xff]  }
  0x2f   :  { %7191 = vmatprep.subr.bf16.mxu1 %v8025_v9  ;;  %v8041_v25 = vld [vmem:[#allocation2 + $0xc8] sm:$0xff]   ;;  %v8045_v29 = vld [vmem:[#allocation2 + $0xc0] sm:$0xff]   ;;  %v8052_v38 = vld [vmem:[#allocation2 + $0x178] sm:$0xff]  }
  0x30   :  { %v8042_v26 = vld [vmem:[#allocation2 + $0x8] sm:$0xff]   ;;  %v8046_v30 = vld [vmem:[#allocation2] sm:$0xff]   ;;  %v8053_v39 = vld [vmem:[#allocation2 + $0x1f8] sm:$0xff]  }
  0x31   :  { %7170 = vmatpush3.bf16.msra.mxu0 %v8026_v10  ;;  %v8043_v27 = vld [vmem:[#allocation2 + $0x88] sm:$0xff]   ;;  %v8047_v31 = vld [vmem:[#allocation2 + $0x80] sm:$0xff]   ;;  %v8054_v40 = vld [vmem:[#allocation2 + $0x138] sm:$0xff]  }
  0x32   :  { %7192 = vmatpush3.bf16.msra.mxu1 %v8027_v11  ;;  %7171 = vmatprep.subr.bf16.mxu0 %v8028_v12  ;;  %v58_v32 = vld [vmem:[%s8973_s0] sm:$0xff]  ;;  %v59_v33 = vld [vmem:[%s8973_s0 + $0x8] sm:$0xff]  ;;  %v8055_v41 = vld [vmem:[#allocation2 + $0x1b8] sm:$0xff]  }
  0x33   :  { %7193 = vmatprep.subr.bf16.mxu1 %v8029_v13  ;;  %v6516_v34 = vcombine.low %v58_v32, %v58_v32  ;;  %v6517_v35 = vcombine.high %v58_v32, %v58_v32  ;;  %v6518_v36 = vcombine.low %v59_v33, %v59_v33  ;;  %v6519_v37 = vcombine.high %v59_v33, %v59_v33  ;;  %v8056_v42 = vld [vmem:[#allocation2 + $0x170] sm:$0xff]   ;;  %v8060_v46 = vld [vmem:[#allocation2 + $0x168] sm:$0xff]   ;;  %v8064_v50 = vld [vmem:[#allocation2 + $0x160] sm:$0xff]  }
  0x34   :  { %v8057_v43 = vld [vmem:[#allocation2 + $0x1f0] sm:$0xff]   ;;  %v8061_v47 = vld [vmem:[#allocation2 + $0x1e8] sm:$0xff]   ;;  %v8065_v51 = vld [vmem:[#allocation2 + $0x1e0] sm:$0xff]  }
  0x35   :  { %7172 = vmatpush3.bf16.msra.mxu0 %v8030_v14  ;;  %4993 = vmatprep.mubr.bf16.mxu0 %v6517_v35  ;;  %v8058_v44 = vld [vmem:[#allocation2 + $0x130] sm:$0xff]   ;;  %v8062_v48 = vld [vmem:[#allocation2 + $0x128] sm:$0xff]   ;;  %v8066_v52 = vld [vmem:[#allocation2 + $0x120] sm:$0xff]  }
  0x36   :  { %7194 = vmatpush3.bf16.msra.mxu1 %v8031_v15  ;;  %7173 = vmatprep.subr.bf16.mxu0 %v8032_v16  ;;  %v8059_v45 = vld [vmem:[#allocation2 + $0x1b0] sm:$0xff]   ;;  %v8063_v49 = vld [vmem:[#allocation2 + $0x1a8] sm:$0xff]   ;;  %v8067_v53 = vld [vmem:[#allocation2 + $0x1a0] sm:$0xff]  }
  0x37   :  { %7195 = vmatprep.subr.bf16.mxu1 %v8033_v17  ;;  %5033 = vmatprep.mubr.bf16.mxu1 %v6519_v37  ;;  %v8068_v54 = vld [vmem:[#allocation2 + $0x158] sm:$0xff]   ;;  %v8072_v58 = vld [vmem:[#allocation2 + $0x150] sm:$0xff]   ;;  %v8076_v62 = vld [vmem:[#allocation2 + $0x148] sm:$0xff]  }
  0x38   :  { %v8069_v55 = vld [vmem:[#allocation2 + $0x1d8] sm:$0xff]   ;;  %v8073_v59 = vld [vmem:[#allocation2 + $0x1d0] sm:$0xff]   ;;  %v8077_v63 = vld [vmem:[#allocation2 + $0x1c8] sm:$0xff]  }
  0x39   :  { %7174 = vmatpush3.bf16.msra.mxu0 %v8034_v18  ;;  %v8070_v56 = vld [vmem:[#allocation2 + $0x118] sm:$0xff]   ;;  %v8074_v60 = vld [vmem:[#allocation2 + $0x110] sm:$0xff]   ;;  %v8078_v0 = vld [vmem:[#allocation2 + $0x108] sm:$0xff]  }
  0x3a   :  { %7196 = vmatpush3.bf16.msra.mxu1 %v8035_v19  ;;  %7175 = vmatprep.subr.bf16.mxu0 %v8036_v20  ;;  %v8071_v57 = vld [vmem:[#allocation2 + $0x198] sm:$0xff]   ;;  %v8075_v61 = vld [vmem:[#allocation2 + $0x190] sm:$0xff]   ;;  %v8079_v1 = vld [vmem:[#allocation2 + $0x188] sm:$0xff]  }
  0x3b   :  { %7197 = vmatprep.subr.bf16.mxu1 %v8037_v21  ;;  %v8080_v2 = vld [vmem:[#allocation2 + $0x140] sm:$0xff]   ;;  %v60_v6 = vld [vmem:[%s8973_s0 + $0x10] sm:$0xff]  ;;  %v61_v9 = vld [vmem:[%s8973_s0 + $0x18] sm:$0xff] }
  0x3c   :  { %v8081_v3 = vld [vmem:[#allocation2 + $0x1c0] sm:$0xff]   ;;  %v6520_v7 = vcombine.low %v60_v6, %v60_v6  ;;  %v6521_v8 = vcombine.high %v60_v6, %v60_v6  ;;  %v6522_v10 = vcombine.low %v61_v9, %v61_v9  ;;  %v6523_v11 = vcombine.high %v61_v9, %v61_v9  ;;  %v8088_v12 = vld [vmem:[#allocation2 + $0x278] sm:$0xff]   ;;  %v8092_v16 = vld [vmem:[#allocation2 + $0x270] sm:$0xff]  }
  0x3d   :  { %7176 = vmatpush3.bf16.msra.mxu0 %v8038_v22  ;;  %v8082_v4 = vld [vmem:[#allocation2 + $0x100] sm:$0xff]   ;;  %v8089_v13 = vld [vmem:[#allocation2 + $0x2f8] sm:$0xff]   ;;  %v8093_v17 = vld [vmem:[#allocation2 + $0x2f0] sm:$0xff]  }
  0x3e   :  { %7198 = vmatpush3.bf16.msra.mxu1 %v8039_v23  ;;  %7177 = vmatprep.subr.bf16.mxu0 %v8040_v24  ;;  %v8083_v5 = vld [vmem:[#allocation2 + $0x180] sm:$0xff]   ;;  %v8090_v14 = vld [vmem:[#allocation2 + $0x238] sm:$0xff]   ;;  %v8094_v18 = vld [vmem:[#allocation2 + $0x230] sm:$0xff]  }
  0x3f   :  { %7199 = vmatprep.subr.bf16.mxu1 %v8041_v25  ;;  %v8091_v15 = vld [vmem:[#allocation2 + $0x2b8] sm:$0xff]   ;;  %v8095_v19 = vld [vmem:[#allocation2 + $0x2b0] sm:$0xff]   ;;  %v8096_v20 = vld [vmem:[#allocation2 + $0x268] sm:$0xff]  }
  0x40   :  { %v8097_v21 = vld [vmem:[#allocation2 + $0x2e8] sm:$0xff]   ;;  %v8100_v24 = vld [vmem:[#allocation2 + $0x260] sm:$0xff]   ;;  %v8108_v32 = vld [vmem:[#allocation2 + $0x250] sm:$0xff]  }
  0x41   :  { %7178 = vmatpush3.bf16.msra.mxu0 %v8042_v26  ;;  %v8098_v22 = vld [vmem:[#allocation2 + $0x228] sm:$0xff]   ;;  %v8101_v25 = vld [vmem:[#allocation2 + $0x2e0] sm:$0xff]   ;;  %v8109_v33 = vld [vmem:[#allocation2 + $0x2d0] sm:$0xff]  }
  0x42   :  { %7200 = vmatpush3.bf16.msra.mxu1 %v8043_v27  ;;  %7179 = vmatprep.subr.bf16.mxu0 %v8044_v28  ;;  %v8099_v23 = vld [vmem:[#allocation2 + $0x2a8] sm:$0xff]   ;;  %v8102_v26 = vld [vmem:[#allocation2 + $0x220] sm:$0xff]   ;;  %v8104_v28 = vld [vmem:[#allocation2 + $0x258] sm:$0xff]  }
  0x43   :  { %7201 = vmatprep.subr.bf16.mxu1 %v8045_v29  ;;  %v8103_v27 = vld [vmem:[#allocation2 + $0x2a0] sm:$0xff]   ;;  %v8105_v29 = vld [vmem:[#allocation2 + $0x2d8] sm:$0xff]   ;;  %v8111_v35 = vld [vmem:[#allocation2 + $0x290] sm:$0xff]  }
  0x44   :  { %v8113_v37 = vld [vmem:[#allocation2 + $0x2c8] sm:$0xff]   ;;  %v8144_v6 = vld [vmem:[#allocation2 + $0x350] sm:$0xff]  }
  0x45   :  { %7180 = vmatpush3.bf16.msra.mxu0 %v8046_v30  ;;  %v8106_v30 = vld [vmem:[#allocation2 + $0x218] sm:$0xff]   ;;  %v8147_v9 = vld [vmem:[#allocation2 + $0x390] sm:$0xff]  }
  0x46   :  { %7202 = vmatpush3.bf16.msra.mxu1 %v8047_v31  ;;  %7209 = vmatprep.subr.bf16.mxu0 %v8052_v38  ;;  %v8107_v31 = vld [vmem:[#allocation2 + $0x298] sm:$0xff]   ;;  %v8114_v38 = vld [vmem:[#allocation2 + $0x208] sm:$0xff]  }
  0x47   :  { %7231 = vmatprep.subr.bf16.mxu1 %v8053_v39  ;;  %v8115_v39 = vld [vmem:[#allocation2 + $0x288] sm:$0xff]  }
  0x48   :  { %4994 = vmatmul.mubr.bf16.vlgmr.msra.gmra.mxu0 %v6516_v34  ;;  %v8110_v34 = vld [vmem:[#allocation2 + $0x210] sm:$0xff]  }
  0x49   :  { %5034 = vmatmul.mubr.bf16.vlgmr.msra.gmra.mxu1 %v6518_v36  ;;  %7210 = vmatpush3.bf16.msra.mxu0 %v8054_v40  ;;  %v8112_v36 = vld [vmem:[#allocation2 + $0x248] sm:$0xff]   ;;  %v8116_v40 = vld [vmem:[#allocation2 + $0x240] sm:$0xff]  }
  0x4a   :  { %7232 = vmatpush3.bf16.msra.mxu1 %v8055_v41  ;;  %7211 = vmatprep.subr.bf16.mxu0 %v8056_v42  ;;  %v8117_v41 = vld [vmem:[#allocation2 + $0x2c0] sm:$0xff]  }
  0x4b   :  { %7233 = vmatprep.subr.bf16.mxu1 %v8057_v43  ;;  %5073 = vmatprep.mubr.bf16.mxu0 %v6521_v8  ;;  %v8118_v42 = vld [vmem:[#allocation2 + $0x200] sm:$0xff]   ;;  %v8146_v8 = vld [vmem:[#allocation2 + $0x310] sm:$0xff]  }
  0x4c   :  { %5113 = vmatprep.mubr.bf16.mxu1 %v6523_v11  ;;  %v8119_v43 = vld [vmem:[#allocation2 + $0x280] sm:$0xff]   ;;  %v8149_v11 = vld [vmem:[#allocation2 + $0x3c8] sm:$0xff]  }
  0x4d   :  { %7212 = vmatpush3.bf16.msra.mxu0 %v8058_v44  ;;  %v62_v44 = vld [vmem:[%s8973_s0 + $0x20] sm:$0xff] }
  0x4e   :  { %7234 = vmatpush3.bf16.msra.mxu1 %v8059_v45  ;;  %7213 = vmatprep.subr.bf16.mxu0 %v8060_v46  ;;  %v63_v45 = vld [vmem:[%s8973_s0 + $0x28] sm:$0xff]  ;;  %v6524_v46 = vcombine.low %v62_v44, %v62_v44 }
  0x4f   :  { %7235 = vmatprep.subr.bf16.mxu1 %v8061_v47  ;;  %v6525_v47 = vcombine.high %v62_v44, %v62_v44  ;;  %v8180_v44 = vld [vmem:[#allocation2 + $0x450] sm:$0xff]  }
  0x51   :  { %7214 = vmatpush3.bf16.msra.mxu0 %v8062_v48  ;;  %v6526_v48 = vcombine.low %v63_v45, %v63_v45 }
  0x52   :  { %7236 = vmatpush3.bf16.msra.mxu1 %v8063_v49  ;;  %7215 = vmatprep.subr.bf16.mxu0 %v8064_v50  ;;  %v6527_v49 = vcombine.high %v63_v45, %v63_v45  ;;  %v8124_v50 = vld [vmem:[#allocation2 + $0x378] sm:$0xff]   ;;  %v8181_v45 = vld [vmem:[#allocation2 + $0x4d0] sm:$0xff]  }
  0x53   :  { %7237 = vmatprep.subr.bf16.mxu1 %v8065_v51  ;;  %v8125_v51 = vld [vmem:[#allocation2 + $0x3f8] sm:$0xff]  }
  0x55   :  { %7216 = vmatpush3.bf16.msra.mxu0 %v8066_v52  ;;  %v8126_v52 = vld [vmem:[#allocation2 + $0x338] sm:$0xff]  }
  0x56   :  { %7238 = vmatpush3.bf16.msra.mxu1 %v8067_v53  ;;  %7217 = vmatprep.subr.bf16.mxu0 %v8068_v54  ;;  %v8127_v53 = vld [vmem:[#allocation2 + $0x3b8] sm:$0xff]   ;;  %v8128_v54 = vld [vmem:[#allocation2 + $0x370] sm:$0xff]  }
  0x57   :  { %7239 = vmatprep.subr.bf16.mxu1 %v8069_v55  ;;  %v8129_v55 = vld [vmem:[#allocation2 + $0x3f0] sm:$0xff]  }
  0x59   :  { %7218 = vmatpush3.bf16.msra.mxu0 %v8070_v56  ;;  %v8130_v56 = vld [vmem:[#allocation2 + $0x330] sm:$0xff]  }
  0x5a   :  { %7240 = vmatpush3.bf16.msra.mxu1 %v8071_v57  ;;  %7219 = vmatprep.subr.bf16.mxu0 %v8072_v58  ;;  %v8131_v57 = vld [vmem:[#allocation2 + $0x3b0] sm:$0xff]   ;;  %v8132_v58 = vld [vmem:[#allocation2 + $0x368] sm:$0xff]  }
  0x5b   :  { %7241 = vmatprep.subr.bf16.mxu1 %v8073_v59  ;;  %v8133_v59 = vld [vmem:[#allocation2 + $0x3e8] sm:$0xff]  }
  0x5d   :  { %7220 = vmatpush3.bf16.msra.mxu0 %v8074_v60  ;;  %v8134_v60 = vld [vmem:[#allocation2 + $0x328] sm:$0xff]  }
  0x5e   :  { %7242 = vmatpush3.bf16.msra.mxu1 %v8075_v61  ;;  %7221 = vmatprep.subr.bf16.mxu0 %v8076_v62  ;;  %v8135_v61 = vld [vmem:[#allocation2 + $0x3a8] sm:$0xff]   ;;  %v8136_v62 = vld [vmem:[#allocation2 + $0x360] sm:$0xff]  }
  0x5f   :  { %7243 = vmatprep.subr.bf16.mxu1 %v8077_v63  ;;  %v8137_v63 = vld [vmem:[#allocation2 + $0x3e0] sm:$0xff]  }
  0x61   :  { %7222 = vmatpush3.bf16.msra.mxu0 %v8078_v0  ;;  %v8138_v0 = vld [vmem:[#allocation2 + $0x320] sm:$0xff]  }
  0x62   :  { %7244 = vmatpush3.bf16.msra.mxu1 %v8079_v1  ;;  %7223 = vmatprep.subr.bf16.mxu0 %v8080_v2  ;;  %v8139_v1 = vld [vmem:[#allocation2 + $0x3a0] sm:$0xff]   ;;  %v8140_v2 = vld [vmem:[#allocation2 + $0x358] sm:$0xff]  }
  0x63   :  { %7245 = vmatprep.subr.bf16.mxu1 %v8081_v3  ;;  %v8141_v3 = vld [vmem:[#allocation2 + $0x3d8] sm:$0xff]  }
  0x65   :  { %7224 = vmatpush3.bf16.msra.mxu0 %v8082_v4  ;;  %v8142_v4 = vld [vmem:[#allocation2 + $0x318] sm:$0xff]  }
  0x66   :  { %7246 = vmatpush3.bf16.msra.mxu1 %v8083_v5  ;;  %7253 = vmatprep.subr.bf16.mxu0 %v8088_v12  ;;  %v8143_v5 = vld [vmem:[#allocation2 + $0x398] sm:$0xff]   ;;  %v8150_v12 = vld [vmem:[#allocation2 + $0x308] sm:$0xff]  }
  0x67   :  { %7275 = vmatprep.subr.bf16.mxu1 %v8089_v13  ;;  %v8151_v13 = vld [vmem:[#allocation2 + $0x388] sm:$0xff]  }
  0x68   :  { %5074 = vmatmul.mubr.bf16.vlgmr.msra.gmra.mxu0 %v6520_v7  ;;  %v8145_v7 = vld [vmem:[#allocation2 + $0x3d0] sm:$0xff]  }
  0x69   :  { %5114 = vmatmul.mubr.bf16.vlgmr.msra.gmra.mxu1 %v6522_v10  ;;  %7254 = vmatpush3.bf16.msra.mxu0 %v8090_v14  ;;  %v8148_v10 = vld [vmem:[#allocation2 + $0x348] sm:$0xff]   ;;  %v8152_v14 = vld [vmem:[#allocation2 + $0x340] sm:$0xff]  }
  0x6a   :  { %7276 = vmatpush3.bf16.msra.mxu1 %v8091_v15  ;;  %7255 = vmatprep.subr.bf16.mxu0 %v8092_v16  ;;  %v8153_v15 = vld [vmem:[#allocation2 + $0x3c0] sm:$0xff]  }
  0x6b   :  { %7277 = vmatprep.subr.bf16.mxu1 %v8093_v17  ;;  %5153 = vmatprep.mubr.bf16.mxu0 %v6525_v47  ;;  %v8154_v16 = vld [vmem:[#allocation2 + $0x300] sm:$0xff]   ;;  %v8183_v47 = vld [vmem:[#allocation2 + $0x490] sm:$0xff]  }
  0x6c   :  { %5193 = vmatprep.mubr.bf16.mxu1 %v6527_v49  ;;  %v8155_v17 = vld [vmem:[#allocation2 + $0x380] sm:$0xff]   ;;  %v8185_v49 = vld [vmem:[#allocation2 + $0x4c8] sm:$0xff]  }
  0x6d   :  { %7256 = vmatpush3.bf16.msra.mxu0 %v8094_v18  ;;  %v64_v18 = vld [vmem:[%s8973_s0 + $0x30] sm:$0xff] }
  0x6e   :  { %7278 = vmatpush3.bf16.msra.mxu1 %v8095_v19  ;;  %7257 = vmatprep.subr.bf16.mxu0 %v8096_v20  ;;  %v65_v19 = vld [vmem:[%s8973_s0 + $0x38] sm:$0xff]  ;;  %v6528_v20 = vcombine.low %v64_v18, %v64_v18 }
  0x6f   :  { %7279 = vmatprep.subr.bf16.mxu1 %v8097_v21  ;;  %v6529_v21 = vcombine.high %v64_v18, %v64_v18  ;;  %v8216_v18 = vld [vmem:[#allocation2 + $0x550] sm:$0xff]  }
  0x71   :  { %7258 = vmatpush3.bf16.msra.mxu0 %v8098_v22  ;;  %v6530_v22 = vcombine.low %v65_v19, %v65_v19 }
  0x72   :  { %7280 = vmatpush3.bf16.msra.mxu1 %v8099_v23  ;;  %7259 = vmatprep.subr.bf16.mxu0 %v8100_v24  ;;  %v8160_v23 = vld [vmem:[#allocation2 + $0x478] sm:$0xff]   ;;  %v6531_v24 = vcombine.high %v65_v19, %v65_v19  ;;  %v8217_v19 = vld [vmem:[#allocation2 + $0x5d0] sm:$0xff]  }
  0x73   :  { %7281 = vmatprep.subr.bf16.mxu1 %v8101_v25  ;;  %v8161_v25 = vld [vmem:[#allocation2 + $0x4f8] sm:$0xff]  }
  0x75   :  { %7260 = vmatpush3.bf16.msra.mxu0 %v8102_v26  ;;  %v8162_v26 = vld [vmem:[#allocation2 + $0x438] sm:$0xff]  }
  0x76   :  { %7282 = vmatpush3.bf16.msra.mxu1 %v8103_v27  ;;  %7261 = vmatprep.subr.bf16.mxu0 %v8104_v28  ;;  %v8163_v27 = vld [vmem:[#allocation2 + $0x4b8] sm:$0xff]   ;;  %v8164_v28 = vld [vmem:[#allocation2 + $0x470] sm:$0xff]  }
  0x77   :  { %7283 = vmatprep.subr.bf16.mxu1 %v8105_v29  ;;  %v8165_v29 = vld [vmem:[#allocation2 + $0x4f0] sm:$0xff]  }
  0x79   :  { %7262 = vmatpush3.bf16.msra.mxu0 %v8106_v30  ;;  %v8166_v30 = vld [vmem:[#allocation2 + $0x430] sm:$0xff]  }
  0x7a   :  { %7284 = vmatpush3.bf16.msra.mxu1 %v8107_v31  ;;  %7263 = vmatprep.subr.bf16.mxu0 %v8108_v32  ;;  %v8167_v31 = vld [vmem:[#allocation2 + $0x4b0] sm:$0xff]   ;;  %v8168_v32 = vld [vmem:[#allocation2 + $0x468] sm:$0xff]  }
  0x7b   :  { %7285 = vmatprep.subr.bf16.mxu1 %v8109_v33  ;;  %v8169_v33 = vld [vmem:[#allocation2 + $0x4e8] sm:$0xff]  }
  0x7d   :  { %7264 = vmatpush3.bf16.msra.mxu0 %v8110_v34  ;;  %v8170_v34 = vld [vmem:[#allocation2 + $0x428] sm:$0xff]  }
  0x7e   :  { %7286 = vmatpush3.bf16.msra.mxu1 %v8111_v35  ;;  %7265 = vmatprep.subr.bf16.mxu0 %v8112_v36  ;;  %v8171_v35 = vld [vmem:[#allocation2 + $0x4a8] sm:$0xff]   ;;  %v8172_v36 = vld [vmem:[#allocation2 + $0x460] sm:$0xff]  }
  0x7f   :  { %7287 = vmatprep.subr.bf16.mxu1 %v8113_v37  ;;  %v8173_v37 = vld [vmem:[#allocation2 + $0x4e0] sm:$0xff]  }
  0x81   :  { %7266 = vmatpush3.bf16.msra.mxu0 %v8114_v38  ;;  %v8174_v38 = vld [vmem:[#allocation2 + $0x420] sm:$0xff]  }
  0x82   :  { %7288 = vmatpush3.bf16.msra.mxu1 %v8115_v39  ;;  %7267 = vmatprep.subr.bf16.mxu0 %v8116_v40  ;;  %v8175_v39 = vld [vmem:[#allocation2 + $0x4a0] sm:$0xff]   ;;  %v8176_v40 = vld [vmem:[#allocation2 + $0x458] sm:$0xff]  }
  0x83   :  { %7289 = vmatprep.subr.bf16.mxu1 %v8117_v41  ;;  %v8177_v41 = vld [vmem:[#allocation2 + $0x4d8] sm:$0xff]  }
  0x85   :  { %7268 = vmatpush3.bf16.msra.mxu0 %v8118_v42  ;;  %v8178_v42 = vld [vmem:[#allocation2 + $0x418] sm:$0xff]  }
  0x86   :  { %7290 = vmatpush3.bf16.msra.mxu1 %v8119_v43  ;;  %7297 = vmatprep.subr.bf16.mxu0 %v8124_v50  ;;  %v8179_v43 = vld [vmem:[#allocation2 + $0x498] sm:$0xff]   ;;  %v8186_v50 = vld [vmem:[#allocation2 + $0x408] sm:$0xff]  }
  0x87   :  { %7319 = vmatprep.subr.bf16.mxu1 %v8125_v51  ;;  %v8187_v51 = vld [vmem:[#allocation2 + $0x488] sm:$0xff]  }
  0x88   :  { %5154 = vmatmul.mubr.bf16.vlgmr.msra.gmra.mxu0 %v6524_v46  ;;  %v8182_v46 = vld [vmem:[#allocation2 + $0x410] sm:$0xff]  }
  0x89   :  { %5194 = vmatmul.mubr.bf16.vlgmr.msra.gmra.mxu1 %v6526_v48  ;;  %7298 = vmatpush3.bf16.msra.mxu0 %v8126_v52  ;;  %v8184_v48 = vld [vmem:[#allocation2 + $0x448] sm:$0xff]   ;;  %v8188_v52 = vld [vmem:[#allocation2 + $0x440] sm:$0xff]  }
  0x8a   :  { %7320 = vmatpush3.bf16.msra.mxu1 %v8127_v53  ;;  %7299 = vmatprep.subr.bf16.mxu0 %v8128_v54  ;;  %v8189_v53 = vld [vmem:[#allocation2 + $0x4c0] sm:$0xff]  }
  0x8b   :  { %7321 = vmatprep.subr.bf16.mxu1 %v8129_v55  ;;  %5233 = vmatprep.mubr.bf16.mxu0 %v6529_v21  ;;  %v8190_v54 = vld [vmem:[#allocation2 + $0x400] sm:$0xff]   ;;  %v8219_v21 = vld [vmem:[#allocation2 + $0x590] sm:$0xff]  }
  0x8c   :  { %5273 = vmatprep.mubr.bf16.mxu1 %v6531_v24  ;;  %v8191_v55 = vld [vmem:[#allocation2 + $0x480] sm:$0xff]   ;;  %v8222_v24 = vld [vmem:[#allocation2 + $0x508] sm:$0xff]  }
  0x8d   :  { %7300 = vmatpush3.bf16.msra.mxu0 %v8130_v56  ;;  %v66_v56 = vld [vmem:[%s8973_s0 + $0x40] sm:$0xff] }
  0x8e   :  { %7322 = vmatpush3.bf16.msra.mxu1 %v8131_v57  ;;  %7301 = vmatprep.subr.bf16.mxu0 %v8132_v58  ;;  %v6532_v57 = vcombine.low %v66_v56, %v66_v56  ;;  %v6533_v58 = vcombine.high %v66_v56, %v66_v56  ;;  %v8252_v56 = vld [vmem:[#allocation2 + $0x650] sm:$0xff]  }
  0x8f   :  { %7323 = vmatprep.subr.bf16.mxu1 %v8133_v59  ;;  %v67_v59 = vld [vmem:[%s8973_s0 + $0x48] sm:$0xff] }
  0x91   :  { %7302 = vmatpush3.bf16.msra.mxu0 %v8134_v60  ;;  %v6534_v60 = vcombine.low %v67_v59, %v67_v59 }
  0x92   :  { %7324 = vmatpush3.bf16.msra.mxu1 %v8135_v61  ;;  %7303 = vmatprep.subr.bf16.mxu0 %v8136_v62  ;;  %v6535_v61 = vcombine.high %v67_v59, %v67_v59  ;;  %v8196_v62 = vld [vmem:[#allocation2 + $0x578] sm:$0xff]   ;;  %v8255_v59 = vld [vmem:[#allocation2 + $0x690] sm:$0xff]  }
  0x93   :  { %7325 = vmatprep.subr.bf16.mxu1 %v8137_v63  ;;  %v8197_v63 = vld [vmem:[#allocation2 + $0x5f8] sm:$0xff]  }
  0x95   :  { %7304 = vmatpush3.bf16.msra.mxu0 %v8138_v0  ;;  %v8198_v0 = vld [vmem:[#allocation2 + $0x538] sm:$0xff]  }
  0x96   :  { %7326 = vmatpush3.bf16.msra.mxu1 %v8139_v1  ;;  %7305 = vmatprep.subr.bf16.mxu0 %v8140_v2  ;;  %v8199_v1 = vld [vmem:[#allocation2 + $0x5b8] sm:$0xff]   ;;  %v8200_v2 = vld [vmem:[#allocation2 + $0x570] sm:$0xff]  }
  0x97   :  { %7327 = vmatprep.subr.bf16.mxu1 %v8141_v3  ;;  %v8201_v3 = vld [vmem:[#allocation2 + $0x5f0] sm:$0xff]  }
  0x99   :  { %7306 = vmatpush3.bf16.msra.mxu0 %v8142_v4  ;;  %v8202_v4 = vld [vmem:[#allocation2 + $0x530] sm:$0xff]  }
  0x9a   :  { %7328 = vmatpush3.bf16.msra.mxu1 %v8143_v5  ;;  %7307 = vmatprep.subr.bf16.mxu0 %v8144_v6  ;;  %v8203_v5 = vld [vmem:[#allocation2 + $0x5b0] sm:$0xff]   ;;  %v8204_v6 = vld [vmem:[#allocation2 + $0x568] sm:$0xff]  }
  0x9b   :  { %7329 = vmatprep.subr.bf16.mxu1 %v8145_v7  ;;  %v8205_v7 = vld [vmem:[#allocation2 + $0x5e8] sm:$0xff]  }
  0x9d   :  { %7308 = vmatpush3.bf16.msra.mxu0 %v8146_v8  ;;  %v8206_v8 = vld [vmem:[#allocation2 + $0x528] sm:$0xff]  }
  0x9e   :  { %7330 = vmatpush3.bf16.msra.mxu1 %v8147_v9  ;;  %7309 = vmatprep.subr.bf16.mxu0 %v8148_v10  ;;  %v8207_v9 = vld [vmem:[#allocation2 + $0x5a8] sm:$0xff]   ;;  %v8208_v10 = vld [vmem:[#allocation2 + $0x560] sm:$0xff]  }
  0x9f   :  { %7331 = vmatprep.subr.bf16.mxu1 %v8149_v11  ;;  %v8209_v11 = vld [vmem:[#allocation2 + $0x5e0] sm:$0xff]  }
  0xa1   :  { %7310 = vmatpush3.bf16.msra.mxu0 %v8150_v12  ;;  %v8210_v12 = vld [vmem:[#allocation2 + $0x520] sm:$0xff]  }
  0xa2   :  { %7332 = vmatpush3.bf16.msra.mxu1 %v8151_v13  ;;  %7311 = vmatprep.subr.bf16.mxu0 %v8152_v14  ;;  %v8211_v13 = vld [vmem:[#allocation2 + $0x5a0] sm:$0xff]   ;;  %v8212_v14 = vld [vmem:[#allocation2 + $0x558] sm:$0xff]  }
  0xa3   :  { %7333 = vmatprep.subr.bf16.mxu1 %v8153_v15  ;;  %v8213_v15 = vld [vmem:[#allocation2 + $0x5d8] sm:$0xff]  }
  0xa5   :  { %7312 = vmatpush3.bf16.msra.mxu0 %v8154_v16  ;;  %v8214_v16 = vld [vmem:[#allocation2 + $0x518] sm:$0xff]  }
  0xa6   :  { %7334 = vmatpush3.bf16.msra.mxu1 %v8155_v17  ;;  %7341 = vmatprep.subr.bf16.mxu0 %v8160_v23  ;;  %v8215_v17 = vld [vmem:[#allocation2 + $0x598] sm:$0xff]   ;;  %v8221_v23 = vld [vmem:[#allocation2 + $0x5c8] sm:$0xff]  }
  0xa7   :  { %7363 = vmatprep.subr.bf16.mxu1 %v8161_v25  ;;  %v8223_v25 = vld [vmem:[#allocation2 + $0x588] sm:$0xff]  }
  0xa8   :  { %5234 = vmatmul.mubr.bf16.vlgmr.msra.gmra.mxu0 %v6528_v20  ;;  %v8218_v20 = vld [vmem:[#allocation2 + $0x510] sm:$0xff]  }
  0xa9   :  { %5274 = vmatmul.mubr.bf16.vlgmr.msra.gmra.mxu1 %v6530_v22  ;;  %7342 = vmatpush3.bf16.msra.mxu0 %v8162_v26  ;;  %v8220_v22 = vld [vmem:[#allocation2 + $0x548] sm:$0xff]   ;;  %v8224_v26 = vld [vmem:[#allocation2 + $0x540] sm:$0xff]  }
  0xaa   :  { %7364 = vmatpush3.bf16.msra.mxu1 %v8163_v27  ;;  %7343 = vmatprep.subr.bf16.mxu0 %v8164_v28  ;;  %v8225_v27 = vld [vmem:[#allocation2 + $0x5c0] sm:$0xff]  }
  0xab   :  { %7365 = vmatprep.subr.bf16.mxu1 %v8165_v29  ;;  %5313 = vmatprep.mubr.bf16.mxu0 %v6533_v58  ;;  %v8226_v28 = vld [vmem:[#allocation2 + $0x500] sm:$0xff]   ;;  %v8254_v58 = vld [vmem:[#allocation2 + $0x610] sm:$0xff]  }
  0xac   :  { %5353 = vmatprep.mubr.bf16.mxu1 %v6535_v61  ;;  %v8227_v29 = vld [vmem:[#allocation2 + $0x580] sm:$0xff]   ;;  %v8257_v61 = vld [vmem:[#allocation2 + $0x6c8] sm:$0xff]  }
  0xad   :  { %7344 = vmatpush3.bf16.msra.mxu0 %v8166_v30  ;;  %v68_v30 = vld [vmem:[%s8973_s0 + $0x50] sm:$0xff] }
  0xae   :  { %7366 = vmatpush3.bf16.msra.mxu1 %v8167_v31  ;;  %7345 = vmatprep.subr.bf16.mxu0 %v8168_v32  ;;  %v69_v31 = vld [vmem:[%s8973_s0 + $0x58] sm:$0xff]  ;;  %v6536_v32 = vcombine.low %v68_v30, %v68_v30 }
  0xaf   :  { %7367 = vmatprep.subr.bf16.mxu1 %v8169_v33  ;;  %v6537_v33 = vcombine.high %v68_v30, %v68_v30  ;;  %v8275_v30 = vld [vmem:[#allocation2 + $0x7b0] sm:$0xff]  }
  0xb1   :  { %7346 = vmatpush3.bf16.msra.mxu0 %v8170_v34  ;;  %v6538_v34 = vcombine.low %v69_v31, %v69_v31 }
  0xb2   :  { %7368 = vmatpush3.bf16.msra.mxu1 %v8171_v35  ;;  %7347 = vmatprep.subr.bf16.mxu0 %v8172_v36  ;;  %v6539_v35 = vcombine.high %v69_v31, %v69_v31  ;;  %v8232_v36 = vld [vmem:[#allocation2 + $0x678] sm:$0xff]   ;;  %v8276_v31 = vld [vmem:[#allocation2 + $0x768] sm:$0xff]  }
  0xb3   :  { %7369 = vmatprep.subr.bf16.mxu1 %v8173_v37  ;;  %v8233_v37 = vld [vmem:[#allocation2 + $0x6f8] sm:$0xff]  }
  0xb5   :  { %7348 = vmatpush3.bf16.msra.mxu0 %v8174_v38  ;;  %v8234_v38 = vld [vmem:[#allocation2 + $0x638] sm:$0xff]  }
  0xb6   :  { %7370 = vmatpush3.bf16.msra.mxu1 %v8175_v39  ;;  %7349 = vmatprep.subr.bf16.mxu0 %v8176_v40  ;;  %v8235_v39 = vld [vmem:[#allocation2 + $0x6b8] sm:$0xff]   ;;  %v8236_v40 = vld [vmem:[#allocation2 + $0x670] sm:$0xff]  }
  0xb7   :  { %7371 = vmatprep.subr.bf16.mxu1 %v8177_v41  ;;  %v8237_v41 = vld [vmem:[#allocation2 + $0x6f0] sm:$0xff]  }
  0xb9   :  { %7350 = vmatpush3.bf16.msra.mxu0 %v8178_v42  ;;  %v8238_v42 = vld [vmem:[#allocation2 + $0x630] sm:$0xff]  }
  0xba   :  { %7372 = vmatpush3.bf16.msra.mxu1 %v8179_v43  ;;  %7351 = vmatprep.subr.bf16.mxu0 %v8180_v44  ;;  %v8239_v43 = vld [vmem:[#allocation2 + $0x6b0] sm:$0xff]   ;;  %v8240_v44 = vld [vmem:[#allocation2 + $0x668] sm:$0xff]  }
  0xbb   :  { %7373 = vmatprep.subr.bf16.mxu1 %v8181_v45  ;;  %v8241_v45 = vld [vmem:[#allocation2 + $0x6e8] sm:$0xff]  }
  0xbd   :  { %7352 = vmatpush3.bf16.msra.mxu0 %v8182_v46  ;;  %v8242_v46 = vld [vmem:[#allocation2 + $0x628] sm:$0xff]  }
  0xbe   :  { %7374 = vmatpush3.bf16.msra.mxu1 %v8183_v47  ;;  %7353 = vmatprep.subr.bf16.mxu0 %v8184_v48  ;;  %v8243_v47 = vld [vmem:[#allocation2 + $0x6a8] sm:$0xff]   ;;  %v8244_v48 = vld [vmem:[#allocation2 + $0x660] sm:$0xff]  }
  0xbf   :  { %7375 = vmatprep.subr.bf16.mxu1 %v8185_v49  ;;  %v8245_v49 = vld [vmem:[#allocation2 + $0x6e0] sm:$0xff]  }
  0xc1   :  { %7354 = vmatpush3.bf16.msra.mxu0 %v8186_v50  ;;  %v8246_v50 = vld [vmem:[#allocation2 + $0x620] sm:$0xff]  }
  0xc2   :  { %7376 = vmatpush3.bf16.msra.mxu1 %v8187_v51  ;;  %7355 = vmatprep.subr.bf16.mxu0 %v8188_v52  ;;  %v8247_v51 = vld [vmem:[#allocation2 + $0x6a0] sm:$0xff]   ;;  %v8248_v52 = vld [vmem:[#allocation2 + $0x658] sm:$0xff]  }
  0xc3   :  { %7377 = vmatprep.subr.bf16.mxu1 %v8189_v53  ;;  %v8249_v53 = vld [vmem:[#allocation2 + $0x6d8] sm:$0xff]  }
  0xc5   :  { %7356 = vmatpush3.bf16.msra.mxu0 %v8190_v54  ;;  %v8250_v54 = vld [vmem:[#allocation2 + $0x618] sm:$0xff]  }
  0xc6   :  { %7378 = vmatpush3.bf16.msra.mxu1 %v8191_v55  ;;  %7385 = vmatprep.subr.bf16.mxu0 %v8196_v62  ;;  %v8251_v55 = vld [vmem:[#allocation2 + $0x698] sm:$0xff]   ;;  %v8258_v62 = vld [vmem:[#allocation2 + $0x608] sm:$0xff]  }
  0xc7   :  { %7407 = vmatprep.subr.bf16.mxu1 %v8197_v63  ;;  %v8259_v63 = vld [vmem:[#allocation2 + $0x688] sm:$0xff]  }
  0xc8   :  { %5314 = vmatmul.mubr.bf16.vlgmr.msra.gmra.mxu0 %v6532_v57  ;;  %v8253_v57 = vld [vmem:[#allocation2 + $0x6d0] sm:$0xff]  }
  0xc9   :  { %5354 = vmatmul.mubr.bf16.vlgmr.msra.gmra.mxu1 %v6534_v60  ;;  %7386 = vmatpush3.bf16.msra.mxu0 %v8198_v0  ;;  %v8256_v60 = vld [vmem:[#allocation2 + $0x648] sm:$0xff]   ;;  %v8260_v0 = vld [vmem:[#allocation2 + $0x640] sm:$0xff]  }
  0xca   :  { %7408 = vmatpush3.bf16.msra.mxu1 %v8199_v1  ;;  %7387 = vmatprep.subr.bf16.mxu0 %v8200_v2  ;;  %v8261_v1 = vld [vmem:[#allocation2 + $0x6c0] sm:$0xff]  }
  0xcb   :  { %7409 = vmatprep.subr.bf16.mxu1 %v8201_v3  ;;  %5393 = vmatprep.mubr.bf16.mxu0 %v6537_v33  ;;  %v8262_v2 = vld [vmem:[#allocation2 + $0x600] sm:$0xff]   ;;  %v8278_v33 = vld [vmem:[#allocation2 + $0x728] sm:$0xff]  }
  0xcc   :  { %5433 = vmatprep.mubr.bf16.mxu1 %v6539_v35  ;;  %v8263_v3 = vld [vmem:[#allocation2 + $0x680] sm:$0xff]  }
  0xcd   :  { %7388 = vmatpush3.bf16.msra.mxu0 %v8202_v4  ;;  %v70_v4 = vld [vmem:[%s8973_s0 + $0x60] sm:$0xff] }
  0xce   :  { %7410 = vmatpush3.bf16.msra.mxu1 %v8203_v5  ;;  %7389 = vmatprep.subr.bf16.mxu0 %v8204_v6  ;;  %v71_v5 = vld [vmem:[%s8973_s0 + $0x68] sm:$0xff]  ;;  %v8280_v35 = vld [vmem:[#allocation2 + $0x760] sm:$0xff]  }
  0xcf   :  { %7411 = vmatprep.subr.bf16.mxu1 %v8205_v7 }
  0xd1   :  { %7390 = vmatpush3.bf16.msra.mxu0 %v8206_v8  ;;  %v6540_v8 = vcombine.low %v70_v4, %v70_v4 }
  0xd2   :  { %7412 = vmatpush3.bf16.msra.mxu1 %v8207_v9  ;;  %7391 = vmatprep.subr.bf16.mxu0 %v8208_v10  ;;  %v6541_v9 = vcombine.high %v70_v4, %v70_v4  ;;  %v6542_v10 = vcombine.low %v71_v5, %v71_v5 }
  0xd3   :  { %7413 = vmatprep.subr.bf16.mxu1 %v8209_v11  ;;  %v8268_v11 = vld [vmem:[#allocation2 + $0x778] sm:$0xff]  }
  0xd5   :  { %7392 = vmatpush3.bf16.msra.mxu0 %v8210_v12  ;;  %v6543_v12 = vcombine.high %v71_v5, %v71_v5 }
  0xd6   :  { %7414 = vmatpush3.bf16.msra.mxu1 %v8211_v13  ;;  %7393 = vmatprep.subr.bf16.mxu0 %v8212_v14  ;;  %v8269_v13 = vld [vmem:[#allocation2 + $0x7f8] sm:$0xff]  }
  0xd7   :  { %7415 = vmatprep.subr.bf16.mxu1 %v8213_v15 }
  0xd9   :  { %7394 = vmatpush3.bf16.msra.mxu0 %v8214_v16  ;;  %v8270_v16 = vld [vmem:[#allocation2 + $0x738] sm:$0xff]  }
  0xda   :  { %7416 = vmatpush3.bf16.msra.mxu1 %v8215_v17  ;;  %7395 = vmatprep.subr.bf16.mxu0 %v8216_v18 }
  0xdb   :  { %7417 = vmatprep.subr.bf16.mxu1 %v8217_v19  ;;  %v8271_v19 = vld [vmem:[#allocation2 + $0x7b8] sm:$0xff]  }
  0xdd   :  { %7396 = vmatpush3.bf16.msra.mxu0 %v8218_v20  ;;  %v6515_v20 = vld [vmem:[#allocation4] ss:$0 sm:$0xff] }
  0xde   :  { %7418 = vmatpush3.bf16.msra.mxu1 %v8219_v21  ;;  %7397 = vmatprep.subr.bf16.mxu0 %v8220_v22 }
  0xdf   :  { %7419 = vmatprep.subr.bf16.mxu1 %v8221_v23 }
  0xe1   :  { %7398 = vmatpush3.bf16.msra.mxu0 %v8222_v24  ;;  %v8272_v24 = vld [vmem:[#allocation2 + $0x770] sm:$0xff]  }
  0xe2   :  { %7420 = vmatpush3.bf16.msra.mxu1 %v8223_v25  ;;  %7399 = vmatprep.subr.bf16.mxu0 %v8224_v26  ;;  %v8273_v25 = vld [vmem:[#allocation2 + $0x7f0] sm:$0xff]  }
  0xe3   :  { %7421 = vmatprep.subr.bf16.mxu1 %v8225_v27 }
  0xe5   :  { %7400 = vmatpush3.bf16.msra.mxu0 %v8226_v28 }
  0xe6   :  { %7422 = vmatpush3.bf16.msra.mxu1 %v8227_v29  ;;  %7429 = vmatprep.subr.bf16.mxu0 %v8232_v36  ;;  %v8274_v29 = vld [vmem:[#allocation2 + $0x730] sm:$0xff]   ;;  %v8281_v36 = vld [vmem:[#allocation2 + $0x7e0] sm:$0xff]  }
  0xe7   :  { %7451 = vmatprep.subr.bf16.mxu1 %v8233_v37  ;;  %v8282_v37 = vld [vmem:[#allocation2 + $0x720] sm:$0xff]  }
  0xe8   :  { %5394 = vmatmul.mubr.bf16.vlgmr.msra.gmra.mxu0 %v6536_v32  ;;  %v8277_v32 = vld [vmem:[#allocation2 + $0x7e8] sm:$0xff]  }
  0xe9   :  { %5434 = vmatmul.mubr.bf16.vlgmr.msra.gmra.mxu1 %v6538_v34  ;;  %7430 = vmatpush3.bf16.msra.mxu0 %v8234_v38  ;;  %v8279_v34 = vld [vmem:[#allocation2 + $0x7a8] sm:$0xff]   ;;  %v8283_v38 = vld [vmem:[#allocation2 + $0x7a0] sm:$0xff]  }
  0xea   :  { %7452 = vmatpush3.bf16.msra.mxu1 %v8235_v39  ;;  %7431 = vmatprep.subr.bf16.mxu0 %v8236_v40  ;;  %v8284_v39 = vld [vmem:[#allocation2 + $0x758] sm:$0xff]  }
  0xeb   :  { %7453 = vmatprep.subr.bf16.mxu1 %v8237_v41  ;;  %5473 = vmatprep.mubr.bf16.mxu0 %v6541_v9  ;;  %v8285_v40 = vld [vmem:[#allocation2 + $0x7d8] sm:$0xff]  }
  0xec   :  { %5513 = vmatprep.mubr.bf16.mxu1 %v6543_v12  ;;  %v8286_v41 = vld [vmem:[#allocation2 + $0x718] sm:$0xff]  }
  0xed   :  { %7432 = vmatpush3.bf16.msra.mxu0 %v8238_v42  ;;  %v8287_v42 = vld [vmem:[#allocation2 + $0x798] sm:$0xff]  }
  0xee   :  { %7454 = vmatpush3.bf16.msra.mxu1 %v8239_v43  ;;  %7433 = vmatprep.subr.bf16.mxu0 %v8240_v44  ;;  %v8288_v43 = vld [vmem:[#allocation2 + $0x750] sm:$0xff]  }
  0xef   :  { %7455 = vmatprep.subr.bf16.mxu1 %v8241_v45  ;;  %v8289_v44 = vld [vmem:[#allocation2 + $0x7d0] sm:$0xff]  }
  0xf0   :  { %v8290_v45 = vld [vmem:[#allocation2 + $0x710] sm:$0xff]  }
  0xf1   :  { %7434 = vmatpush3.bf16.msra.mxu0 %v8242_v46  ;;  %v8291_v46 = vld [vmem:[#allocation2 + $0x790] sm:$0xff]  }
  0xf2   :  { %7456 = vmatpush3.bf16.msra.mxu1 %v8243_v47  ;;  %7435 = vmatprep.subr.bf16.mxu0 %v8244_v48  ;;  %v8292_v47 = vld [vmem:[#allocation2 + $0x748] sm:$0xff]  }
  0xf3   :  { %7457 = vmatprep.subr.bf16.mxu1 %v8245_v49  ;;  %v8293_v48 = vld [vmem:[#allocation2 + $0x7c8] sm:$0xff]  }
  0xf4   :  { %v8294_v49 = vld [vmem:[#allocation2 + $0x708] sm:$0xff]  }
  0xf5   :  { %7436 = vmatpush3.bf16.msra.mxu0 %v8246_v50  ;;  %v8295_v50 = vld [vmem:[#allocation2 + $0x788] sm:$0xff]  }
  0xf6   :  { %7458 = vmatpush3.bf16.msra.mxu1 %v8247_v51  ;;  %7437 = vmatprep.subr.bf16.mxu0 %v8248_v52  ;;  %v8296_v51 = vld [vmem:[#allocation2 + $0x740] sm:$0xff]  }
  0xf7   :  { %7459 = vmatprep.subr.bf16.mxu1 %v8249_v53  ;;  %v8297_v52 = vld [vmem:[#allocation2 + $0x7c0] sm:$0xff]  }
  0xf8   :  { %v8298_v53 = vld [vmem:[#allocation2 + $0x700] sm:$0xff]  }
  0xf9   :  { %7438 = vmatpush3.bf16.msra.mxu0 %v8250_v54  ;;  %v8299_v54 = vld [vmem:[#allocation2 + $0x780] sm:$0xff]  }
  0xfa   :  { %7460 = vmatpush3.bf16.msra.mxu1 %v8251_v55  ;;  %7439 = vmatprep.subr.bf16.mxu0 %v8252_v56  ;;  %v72_v55 = vld [vmem:[%s8973_s0 + $0x70] sm:$0xff]  ;;  %v73_v56 = vld [vmem:[%s8973_s0 + $0x78] sm:$0xff] }
  0xfb   :  { %7461 = vmatprep.subr.bf16.mxu1 %v8253_v57 }
  0xfd   :  { %7440 = vmatpush3.bf16.msra.mxu0 %v8254_v58 }
  0xfe   :  { %7462 = vmatpush3.bf16.msra.mxu1 %v8255_v59  ;;  %7441 = vmatprep.subr.bf16.mxu0 %v8256_v60  ;;  %v6544_v59 = vcombine.low %v72_v55, %v72_v55  ;;  %v6545_v60 = vcombine.high %v72_v55, %v72_v55 }
  0xff   :  { %7463 = vmatprep.subr.bf16.mxu1 %v8257_v61  ;;  %v6546_v61 = vcombine.low %v73_v56, %v73_v56 }
 0x101   :  { %7442 = vmatpush3.bf16.msra.mxu0 %v8258_v62  ;;  %v8304_v62 = vld [vmem:[#allocation2 + $0x878] sm:$0xff]  }
 0x102   :  { %7464 = vmatpush3.bf16.msra.mxu1 %v8259_v63  ;;  %7443 = vmatprep.subr.bf16.mxu0 %v8260_v0  ;;  %v6547_v63 = vcombine.high %v73_v56, %v73_v56  ;;  %v8305_v0 = vld [vmem:[#allocation2 + $0x8f8] sm:$0xff]  }
 0x103   :  { %7465 = vmatprep.subr.bf16.mxu1 %v8261_v1 }
 0x105   :  { %7444 = vmatpush3.bf16.msra.mxu0 %v8262_v2 }
 0x106   :  { %7466 = vmatpush3.bf16.msra.mxu1 %v8263_v3  ;;  %7473 = vmatprep.subr.bf16.mxu0 %v8268_v11  ;;  %v8306_v3 = vld [vmem:[#allocation2 + $0x838] sm:$0xff]   ;;  %v8309_v11 = vld [vmem:[#allocation2 + $0x8f0] sm:$0xff]  }
 0x107   :  { %7495 = vmatprep.subr.bf16.mxu1 %v8269_v13 }
 0x108   :  { %v7181_v6 = vpop.f32.mrf.mxu0  ;;  %5474 = vmatmul.mubr.bf16.vlgmr.msra.gmra.mxu0 %v6540_v8 }
 0x109   :  { %v7203_v7 = vpop.f32.mrf.mxu1  ;;  %5514 = vmatmul.mubr.bf16.vlgmr.msra.gmra.mxu1 %v6542_v10  ;;  %7474 = vmatpush3.bf16.msra.mxu0 %v8270_v16  ;;  %v8308_v10 = vld [vmem:[#allocation2 + $0x870] sm:$0xff]  }
 0x10a   :  { %v7182_v14 = vpop.f32.mrf.mxu0  ;;  %7496 = vmatpush3.bf16.msra.mxu1 %v8271_v19  ;;  %7475 = vmatprep.subr.bf16.mxu0 %v8272_v24  ;;  %v8311_v16 = vld [vmem:[#allocation2 + $0x8b0] sm:$0xff]   ;;  %v8314_v19 = vld [vmem:[#allocation2 + $0x828] sm:$0xff]   ;;  %v8319_v24 = vld [vmem:[#allocation2 + $0x8a0] sm:$0xff]  }
 0x10b   :  { %v7204_v15 = vpop.f32.mrf.mxu1  ;;  %v7183_v17 = vadd.f32 %v7182_v14, %v7181_v6  ;;  %7497 = vmatprep.subr.bf16.mxu1 %v8273_v25  ;;  %5553 = vmatprep.mubr.bf16.mxu0 %v6545_v60  ;;  %v8307_v6 = vld [vmem:[#allocation2 + $0x8b8] sm:$0xff]   ;;  %v8344_v60 = vld [vmem:[#allocation2 + $0x970] sm:$0xff]  }
 0x10c   :  { %v7205_v18 = vadd.f32 %v7204_v15, %v7203_v7  ;;  %v7184_v21 = vpop.f32.mrf.mxu0  ;;  %5593 = vmatprep.mubr.bf16.mxu1 %v6547_v63  ;;  %v8310_v15 = vld [vmem:[#allocation2 + $0x830] sm:$0xff]   ;;  %v8320_v25 = vld [vmem:[#allocation2 + $0x858] sm:$0xff]  }
 0x10d   :  { %v7206_v22 = vpop.f32.mrf.mxu1  ;;  %v4996_v23 = vadd.f32 %v7183_v17, %v6515_v20  ;;  %7476 = vmatpush3.bf16.msra.mxu0 %v8274_v29  ;;  %v8312_v17 = vld [vmem:[#allocation2 + $0x868] sm:$0xff]   ;;  %v8316_v21 = vld [vmem:[#allocation2 + $0x860] sm:$0xff]   ;;  %v8324_v29 = vld [vmem:[#allocation2 + $0x850] sm:$0xff]  }
 0x10e   :  { %v7185_v26 = vpop.f32.mrf.mxu0  ;;  %7498 = vmatpush3.bf16.msra.mxu1 %v8275_v30  ;;  %7477 = vmatprep.subr.bf16.mxu0 %v8276_v31  ;;  %v8315_v20 = vld [vmem:[#allocation2 + $0x8a8] sm:$0xff]   ;;  %v8317_v22 = vld [vmem:[#allocation2 + $0x8e0] sm:$0xff]   ;;  %v8325_v30 = vld [vmem:[#allocation2 + $0x8d0] sm:$0xff]  }
 0x10f   :  { %v7207_v27 = vpop.f32.mrf.mxu1  ;;  %v8820_v28 = vadd.f32 %v7205_v18, %v4996_v23  ;;  %7499 = vmatprep.subr.bf16.mxu1 %v8277_v32  ;;  %v8313_v18 = vld [vmem:[#allocation2 + $0x8e8] sm:$0xff]   ;;  %v8318_v23 = vld [vmem:[#allocation2 + $0x820] sm:$0xff]   ;;  %v8321_v26 = vld [vmem:[#allocation2 + $0x8d8] sm:$0xff]  }
 0x110   :  { %v8322_v27 = vld [vmem:[#allocation2 + $0x818] sm:$0xff]   ;;  %v8326_v31 = vld [vmem:[#allocation2 + $0x810] sm:$0xff]  }
 0x111   :  { %7478 = vmatpush3.bf16.msra.mxu0 %v8278_v33  ;;  %v8327_v32 = vld [vmem:[#allocation2 + $0x890] sm:$0xff]   ;;  %v8328_v33 = vld [vmem:[#allocation2 + $0x848] sm:$0xff]  }
 0x112   :  { %7500 = vmatpush3.bf16.msra.mxu1 %v8279_v34  ;;  %7479 = vmatprep.subr.bf16.mxu0 %v8280_v35  ;;  %v8329_v34 = vld [vmem:[#allocation2 + $0x8c8] sm:$0xff]   ;;  %v8345_v63 = vld [vmem:[#allocation2 + $0x9f0] sm:$0xff]  }
 0x113   :  { %7501 = vmatprep.subr.bf16.mxu1 %v8281_v36  ;;  %v8330_v35 = vld [vmem:[#allocation2 + $0x808] sm:$0xff]  }
 0x114   :  { %v8331_v36 = vld [vmem:[#allocation2 + $0x888] sm:$0xff]  }
 0x115   :  { %7480 = vmatpush3.bf16.msra.mxu0 %v8282_v37  ;;  %v8332_v37 = vld [vmem:[#allocation2 + $0x840] sm:$0xff]  }
 0x116   :  { %7502 = vmatpush3.bf16.msra.mxu1 %v8283_v38  ;;  %7481 = vmatprep.subr.bf16.mxu0 %v8284_v39  ;;  %v8333_v38 = vld [vmem:[#allocation2 + $0x8c0] sm:$0xff]  }
 0x117   :  { %7503 = vmatprep.subr.bf16.mxu1 %v8285_v40  ;;  %v8334_v39 = vld [vmem:[#allocation2 + $0x800] sm:$0xff]  }
 0x118   :  { %v8335_v40 = vld [vmem:[#allocation2 + $0x880] sm:$0xff]  }
 0x119   :  { %7482 = vmatpush3.bf16.msra.mxu0 %v8286_v41  ;;  %v74_v41 = vld [vmem:[%s8973_s0 + $0x80] sm:$0xff] }
 0x11a   :  { %7504 = vmatpush3.bf16.msra.mxu1 %v8287_v42  ;;  %7483 = vmatprep.subr.bf16.mxu0 %v8288_v43  ;;  %v6548_v43 = vcombine.low %v74_v41, %v74_v41 }
 0x11b   :  { %7505 = vmatprep.subr.bf16.mxu1 %v8289_v44  ;;  %v6549_v44 = vcombine.high %v74_v41, %v74_v41  ;;  %v8379_v41 = vld [vmem:[#allocation2 + $0xab8] sm:$0xff]  }
 0x11d   :  { %7484 = vmatpush3.bf16.msra.mxu0 %v8290_v45  ;;  %v75_v45 = vld [vmem:[%s8973_s0 + $0x88] sm:$0xff] }
 0x11e   :  { %7506 = vmatpush3.bf16.msra.mxu1 %v8291_v46  ;;  %7485 = vmatprep.subr.bf16.mxu0 %v8292_v47  ;;  %v6550_v47 = vcombine.low %v75_v45, %v75_v45 }
 0x11f   :  { %7507 = vmatprep.subr.bf16.mxu1 %v8293_v48  ;;  %v6551_v48 = vcombine.high %v75_v45, %v75_v45 }
 0x121   :  { %7486 = vmatpush3.bf16.msra.mxu0 %v8294_v49  ;;  %v8340_v49 = vld [vmem:[#allocation2 + $0x978] sm:$0xff]  }
 0x122   :  { %7508 = vmatpush3.bf16.msra.mxu1 %v8295_v50  ;;  %7487 = vmatprep.subr.bf16.mxu0 %v8296_v51  ;;  %v8341_v51 = vld [vmem:[#allocation2 + $0x9f8] sm:$0xff]  }
 0x123   :  { %7509 = vmatprep.subr.bf16.mxu1 %v8297_v52 }
 0x125   :  { %7488 = vmatpush3.bf16.msra.mxu0 %v8298_v53 }
 0x126   :  { %7510 = vmatpush3.bf16.msra.mxu1 %v8299_v54  ;;  %7517 = vmatprep.subr.bf16.mxu0 %v8304_v62  ;;  %v8342_v54 = vld [vmem:[#allocation2 + $0x938] sm:$0xff]  }
 0x127   :  { %7539 = vmatprep.subr.bf16.mxu1 %v8305_v0 }
 0x128   :  { %v7225_v57 = vpop.f32.mrf.mxu0  ;;  %5554 = vmatmul.mubr.bf16.vlgmr.msra.gmra.mxu0 %v6544_v59 }
 0x129   :  { %v7247_v58 = vpop.f32.mrf.mxu1  ;;  %5594 = vmatmul.mubr.bf16.vlgmr.msra.gmra.mxu1 %v6546_v61  ;;  %7518 = vmatpush3.bf16.msra.mxu0 %v8306_v3  ;;  %v8348_v3 = vld [vmem:[#allocation2 + $0x968] sm:$0xff]  }
 0x12a   :  { %v7226_v1 = vpop.f32.mrf.mxu0  ;;  %7540 = vmatpush3.bf16.msra.mxu1 %v8307_v6  ;;  %7519 = vmatprep.subr.bf16.mxu0 %v8308_v10  ;;  %v8351_v6 = vld [vmem:[#allocation2 + $0x9a8] sm:$0xff]   ;;  %v8355_v10 = vld [vmem:[#allocation2 + $0x9a0] sm:$0xff]  }
 0x12b   :  { %v7248_v2 = vpop.f32.mrf.mxu1  ;;  %v7227_v4 = vadd.f32 %v7226_v1, %v7225_v57  ;;  %7541 = vmatprep.subr.bf16.mxu1 %v8309_v11  ;;  %5633 = vmatprep.mubr.bf16.mxu0 %v6549_v44  ;;  %v8343_v57 = vld [vmem:[#allocation2 + $0x9b8] sm:$0xff]   ;;  %v8346_v1 = vld [vmem:[#allocation2 + $0x930] sm:$0xff]  }
 0x12c   :  { %v7249_v5 = vadd.f32 %v7248_v2, %v7247_v58  ;;  %v7228_v7 = vpop.f32.mrf.mxu0  ;;  %5673 = vmatprep.mubr.bf16.mxu1 %v6551_v48  ;;  %v8347_v2 = vld [vmem:[#allocation2 + $0x9b0] sm:$0xff]   ;;  %v8356_v11 = vld [vmem:[#allocation2 + $0x958] sm:$0xff]  }
 0x12d   :  { %v7250_v8 = vpop.f32.mrf.mxu1  ;;  %v5076_v9 = vadd.f32 %v7227_v4, %v8820_v28  ;;  %7520 = vmatpush3.bf16.msra.mxu0 %v8310_v15  ;;  %v8323_v28 = vld [vmem:[#allocation2 + $0x898] sm:$0xff]   ;;  %v8349_v4 = vld [vmem:[#allocation2 + $0x9e8] sm:$0xff]   ;;  %v8352_v7 = vld [vmem:[#allocation2 + $0x960] sm:$0xff]  }
 0x12e   :  { %v7229_v12 = vpop.f32.mrf.mxu0  ;;  %7542 = vmatpush3.bf16.msra.mxu1 %v8311_v16  ;;  %7521 = vmatprep.subr.bf16.mxu0 %v8312_v17  ;;  %v8353_v8 = vld [vmem:[#allocation2 + $0x9e0] sm:$0xff]   ;;  %v8360_v15 = vld [vmem:[#allocation2 + $0x950] sm:$0xff]  }
 0x12f   :  { %v7251_v13 = vpop.f32.mrf.mxu1  ;;  %v8829_v14 = vadd.f32 %v7249_v5, %v5076_v9  ;;  %7543 = vmatprep.subr.bf16.mxu1 %v8313_v18  ;;  %v8350_v5 = vld [vmem:[#allocation2 + $0x928] sm:$0xff]   ;;  %v8354_v9 = vld [vmem:[#allocation2 + $0x920] sm:$0xff]   ;;  %v8357_v12 = vld [vmem:[#allocation2 + $0x9d8] sm:$0xff]  }
 0x130   :  { %v8358_v13 = vld [vmem:[#allocation2 + $0x918] sm:$0xff]   ;;  %v8361_v16 = vld [vmem:[#allocation2 + $0x9d0] sm:$0xff]  }
 0x131   :  { %7522 = vmatpush3.bf16.msra.mxu0 %v8314_v19  ;;  %v8362_v17 = vld [vmem:[#allocation2 + $0x910] sm:$0xff]   ;;  %v8364_v19 = vld [vmem:[#allocation2 + $0x948] sm:$0xff]  }
 0x132   :  { %7544 = vmatpush3.bf16.msra.mxu1 %v8315_v20  ;;  %7523 = vmatprep.subr.bf16.mxu0 %v8316_v21  ;;  %v8363_v18 = vld [vmem:[#allocation2 + $0x990] sm:$0xff]   ;;  %v8365_v20 = vld [vmem:[#allocation2 + $0x9c8] sm:$0xff]  }
 0x133   :  { %7545 = vmatprep.subr.bf16.mxu1 %v8317_v22  ;;  %v8366_v21 = vld [vmem:[#allocation2 + $0x908] sm:$0xff]  }
 0x134   :  { %v8367_v22 = vld [vmem:[#allocation2 + $0x988] sm:$0xff]  }
 0x135   :  { %7524 = vmatpush3.bf16.msra.mxu0 %v8318_v23  ;;  %v8368_v23 = vld [vmem:[#allocation2 + $0x940] sm:$0xff]  }
 0x136   :  { %7546 = vmatpush3.bf16.msra.mxu1 %v8319_v24  ;;  %7525 = vmatprep.subr.bf16.mxu0 %v8320_v25  ;;  %v8369_v24 = vld [vmem:[#allocation2 + $0x9c0] sm:$0xff]  }
 0x137   :  { %7547 = vmatprep.subr.bf16.mxu1 %v8321_v26  ;;  %v8370_v25 = vld [vmem:[#allocation2 + $0x900] sm:$0xff]  }
 0x138   :  { %v8371_v26 = vld [vmem:[#allocation2 + $0x980] sm:$0xff]  }
 0x139   :  { %7526 = vmatpush3.bf16.msra.mxu0 %v8322_v27  ;;  %v76_v27 = vld [vmem:[%s8973_s0 + $0x90] sm:$0xff] }
 0x13a   :  { %7548 = vmatpush3.bf16.msra.mxu1 %v8323_v28  ;;  %7527 = vmatprep.subr.bf16.mxu0 %v8324_v29  ;;  %v77_v28 = vld [vmem:[%s8973_s0 + $0x98] sm:$0xff] }
 0x13b   :  { %7549 = vmatprep.subr.bf16.mxu1 %v8325_v30  ;;  %v6552_v30 = vcombine.low %v76_v27, %v76_v27 }
 0x13d   :  { %7528 = vmatpush3.bf16.msra.mxu0 %v8326_v31  ;;  %v6553_v31 = vcombine.high %v76_v27, %v76_v27 }
 0x13e   :  { %7550 = vmatpush3.bf16.msra.mxu1 %v8327_v32  ;;  %7529 = vmatprep.subr.bf16.mxu0 %v8328_v33  ;;  %v6554_v32 = vcombine.low %v77_v28, %v77_v28  ;;  %v6555_v33 = vcombine.high %v77_v28, %v77_v28  ;;  %v8415_v28 = vld [vmem:[#allocation2 + $0xbb8] sm:$0xff]  }
 0x13f   :  { %7551 = vmatprep.subr.bf16.mxu1 %v8329_v34 }
 0x141   :  { %7530 = vmatpush3.bf16.msra.mxu0 %v8330_v35  ;;  %v8376_v35 = vld [vmem:[#allocation2 + $0xa78] sm:$0xff]  }
 0x142   :  { %7552 = vmatpush3.bf16.msra.mxu1 %v8331_v36  ;;  %7531 = vmatprep.subr.bf16.mxu0 %v8332_v37  ;;  %v8377_v36 = vld [vmem:[#allocation2 + $0xaf8] sm:$0xff]  }
 0x143   :  { %7553 = vmatprep.subr.bf16.mxu1 %v8333_v38  ;;  %v8378_v38 = vld [vmem:[#allocation2 + $0xa38] sm:$0xff]  }
 0x145   :  { %7532 = vmatpush3.bf16.msra.mxu0 %v8334_v39 }
 0x146   :  { %7554 = vmatpush3.bf16.msra.mxu1 %v8335_v40  ;;  %7561 = vmatprep.subr.bf16.mxu0 %v8340_v49 }
 0x147   :  { %7583 = vmatprep.subr.bf16.mxu1 %v8341_v51 }
 0x148   :  { %v7269_v42 = vpop.f32.mrf.mxu0  ;;  %5634 = vmatmul.mubr.bf16.vlgmr.msra.gmra.mxu0 %v6548_v43 }
 0x149   :  { %v7291_v46 = vpop.f32.mrf.mxu1  ;;  %5674 = vmatmul.mubr.bf16.vlgmr.msra.gmra.mxu1 %v6550_v47  ;;  %7562 = vmatpush3.bf16.msra.mxu0 %v8342_v54  ;;  %v8381_v47 = vld [vmem:[#allocation2 + $0xaf0] sm:$0xff]   ;;  %v8385_v54 = vld [vmem:[#allocation2 + $0xae8] sm:$0xff]  }
 0x14a   :  { %v7270_v50 = vpop.f32.mrf.mxu0  ;;  %7584 = vmatpush3.bf16.msra.mxu1 %v8343_v57  ;;  %7563 = vmatprep.subr.bf16.mxu0 %v8344_v60  ;;  %v8388_v57 = vld [vmem:[#allocation2 + $0xa60] sm:$0xff]  }
 0x14b   :  { %v7271_v52 = vadd.f32 %v7270_v50, %v7269_v42  ;;  %v7292_v53 = vpop.f32.mrf.mxu1  ;;  %7585 = vmatprep.subr.bf16.mxu1 %v8345_v63  ;;  %5713 = vmatprep.mubr.bf16.mxu0 %v6553_v31  ;;  %v8382_v50 = vld [vmem:[#allocation2 + $0xa30] sm:$0xff]   ;;  %v8391_v60 = vld [vmem:[#allocation2 + $0xaa0] sm:$0xff]   ;;  %v8394_v63 = vld [vmem:[#allocation2 + $0xa18] sm:$0xff]  }
 0x14c   :  { %v7293_v55 = vadd.f32 %v7292_v53, %v7291_v46  ;;  %v7272_v56 = vpop.f32.mrf.mxu0  ;;  %5753 = vmatprep.mubr.bf16.mxu1 %v6555_v33  ;;  %v8380_v46 = vld [vmem:[#allocation2 + $0xa70] sm:$0xff]   ;;  %v8384_v53 = vld [vmem:[#allocation2 + $0xa68] sm:$0xff]  }
 0x14d   :  { %v5156_v58 = vadd.f32 %v7271_v52, %v8829_v14  ;;  %v7294_v59 = vpop.f32.mrf.mxu1  ;;  %7564 = vmatpush3.bf16.msra.mxu0 %v8346_v1  ;;  %v8359_v14 = vld [vmem:[#allocation2 + $0x998] sm:$0xff]   ;;  %v8383_v52 = vld [vmem:[#allocation2 + $0xab0] sm:$0xff]   ;;  %v8387_v56 = vld [vmem:[#allocation2 + $0xaa8] sm:$0xff]  }
 0x14e   :  { %v7273_v61 = vpop.f32.mrf.mxu0  ;;  %7586 = vmatpush3.bf16.msra.mxu1 %v8347_v2  ;;  %7565 = vmatprep.subr.bf16.mxu0 %v8348_v3  ;;  %v8390_v59 = vld [vmem:[#allocation2 + $0xa20] sm:$0xff]   ;;  %v8396_v1 = vld [vmem:[#allocation2 + $0xa50] sm:$0xff]  }
 0x14f   :  { %v8838_v62 = vadd.f32 %v7293_v55, %v5156_v58  ;;  %v7295_v0 = vpop.f32.mrf.mxu1  ;;  %7587 = vmatprep.subr.bf16.mxu1 %v8349_v4  ;;  %v8386_v55 = vld [vmem:[#allocation2 + $0xa28] sm:$0xff]   ;;  %v8389_v58 = vld [vmem:[#allocation2 + $0xae0] sm:$0xff]   ;;  %v8392_v61 = vld [vmem:[#allocation2 + $0xa58] sm:$0xff]  }
 0x150   :  { %v8395_v0 = vld [vmem:[#allocation2 + $0xa98] sm:$0xff]   ;;  %v8397_v2 = vld [vmem:[#allocation2 + $0xad0] sm:$0xff]  }
 0x151   :  { %7566 = vmatpush3.bf16.msra.mxu0 %v8350_v5  ;;  %v8398_v3 = vld [vmem:[#allocation2 + $0xa10] sm:$0xff]   ;;  %v8400_v5 = vld [vmem:[#allocation2 + $0xa48] sm:$0xff]  }
 0x152   :  { %7588 = vmatpush3.bf16.msra.mxu1 %v8351_v6  ;;  %7567 = vmatprep.subr.bf16.mxu0 %v8352_v7  ;;  %v8399_v4 = vld [vmem:[#allocation2 + $0xa90] sm:$0xff]   ;;  %v8401_v6 = vld [vmem:[#allocation2 + $0xac8] sm:$0xff]  }
 0x153   :  { %7589 = vmatprep.subr.bf16.mxu1 %v8353_v8  ;;  %v8402_v7 = vld [vmem:[#allocation2 + $0xa08] sm:$0xff]   ;;  %v8417_v33 = vld [vmem:[#allocation2 + $0xbf0] sm:$0xff]  }
 0x154   :  { %v8403_v8 = vld [vmem:[#allocation2 + $0xa88] sm:$0xff]  }
 0x155   :  { %7568 = vmatpush3.bf16.msra.mxu0 %v8354_v9  ;;  %v8404_v9 = vld [vmem:[#allocation2 + $0xa40] sm:$0xff]  }
 0x156   :  { %7590 = vmatpush3.bf16.msra.mxu1 %v8355_v10  ;;  %7569 = vmatprep.subr.bf16.mxu0 %v8356_v11  ;;  %v8405_v10 = vld [vmem:[#allocation2 + $0xac0] sm:$0xff]  }
 0x157   :  { %7591 = vmatprep.subr.bf16.mxu1 %v8357_v12  ;;  %v8406_v11 = vld [vmem:[#allocation2 + $0xa00] sm:$0xff]  }
 0x158   :  { %v8407_v12 = vld [vmem:[#allocation2 + $0xa80] sm:$0xff]  }
 0x159   :  { %7570 = vmatpush3.bf16.msra.mxu0 %v8358_v13  ;;  %v78_v13 = vld [vmem:[%s8973_s0 + $0xa0] sm:$0xff] }
 0x15a   :  { %7592 = vmatpush3.bf16.msra.mxu1 %v8359_v14  ;;  %7571 = vmatprep.subr.bf16.mxu0 %v8360_v15  ;;  %v79_v14 = vld [vmem:[%s8973_s0 + $0xa8] sm:$0xff] }
 0x15b   :  { %7593 = vmatprep.subr.bf16.mxu1 %v8361_v16 }
 0x15d   :  { %7572 = vmatpush3.bf16.msra.mxu0 %v8362_v17  ;;  %v6556_v17 = vcombine.low %v78_v13, %v78_v13 }
 0x15e   :  { %7594 = vmatpush3.bf16.msra.mxu1 %v8363_v18  ;;  %7573 = vmatprep.subr.bf16.mxu0 %v8364_v19  ;;  %v6557_v18 = vcombine.high %v78_v13, %v78_v13  ;;  %v6558_v19 = vcombine.low %v79_v14, %v79_v14 }
 0x15f   :  { %7595 = vmatprep.subr.bf16.mxu1 %v8365_v20  ;;  %v8412_v20 = vld [vmem:[#allocation2 + $0xb78] sm:$0xff]  }
 0x161   :  { %7574 = vmatpush3.bf16.msra.mxu0 %v8366_v21  ;;  %v6559_v21 = vcombine.high %v79_v14, %v79_v14 }
 0x162   :  { %7596 = vmatpush3.bf16.msra.mxu1 %v8367_v22  ;;  %7575 = vmatprep.subr.bf16.mxu0 %v8368_v23  ;;  %v8413_v22 = vld [vmem:[#allocation2 + $0xbf8] sm:$0xff]  }
 0x163   :  { %7597 = vmatprep.subr.bf16.mxu1 %v8369_v24 }
 0x165   :  { %7576 = vmatpush3.bf16.msra.mxu0 %v8370_v25  ;;  %v8414_v25 = vld [vmem:[#allocation2 + $0xb38] sm:$0xff]  }
 0x166   :  { %7598 = vmatpush3.bf16.msra.mxu1 %v8371_v26  ;;  %7605 = vmatprep.subr.bf16.mxu0 %v8376_v35 }
 0x167   :  { %7627 = vmatprep.subr.bf16.mxu1 %v8377_v36 }
 0x168   :  { %v7313_v29 = vpop.f32.mrf.mxu0  ;;  %5714 = vmatmul.mubr.bf16.vlgmr.msra.gmra.mxu0 %v6552_v30 }
 0x169   :  { %v7335_v34 = vpop.f32.mrf.mxu1  ;;  %5754 = vmatmul.mubr.bf16.vlgmr.msra.gmra.mxu1 %v6554_v32  ;;  %7606 = vmatpush3.bf16.msra.mxu0 %v8378_v38  ;;  %v8416_v32 = vld [vmem:[#allocation2 + $0xb70] sm:$0xff]  }
 0x16a   :  { %v7314_v37 = vpop.f32.mrf.mxu0  ;;  %7628 = vmatpush3.bf16.msra.mxu1 %v8379_v41  ;;  %7607 = vmatprep.subr.bf16.mxu0 %v8380_v46  ;;  %v8419_v38 = vld [vmem:[#allocation2 + $0xbb0] sm:$0xff]   ;;  %v8422_v41 = vld [vmem:[#allocation2 + $0xb28] sm:$0xff]   ;;  %v8427_v46 = vld [vmem:[#allocation2 + $0xba0] sm:$0xff]  }
 0x16b   :  { %v7315_v39 = vadd.f32 %v7314_v37, %v7313_v29  ;;  %v7336_v40 = vpop.f32.mrf.mxu1  ;;  %7629 = vmatprep.subr.bf16.mxu1 %v8381_v47  ;;  %5793 = vmatprep.mubr.bf16.mxu0 %v6557_v18  ;;  %v8418_v37 = vld [vmem:[#allocation2 + $0xb30] sm:$0xff]   ;;  %v8428_v47 = vld [vmem:[#allocation2 + $0xb58] sm:$0xff]  }
 0x16c   :  { %v7337_v42 = vadd.f32 %v7336_v40, %v7335_v34  ;;  %v7316_v43 = vpop.f32.mrf.mxu0  ;;  %5833 = vmatprep.mubr.bf16.mxu1 %v6559_v21  ;;  %v8421_v40 = vld [vmem:[#allocation2 + $0xbe8] sm:$0xff]   ;;  %v8452_v18 = vld [vmem:[#allocation2 + $0xc70] sm:$0xff]  }
 0x16d   :  { %v5236_v44 = vadd.f32 %v7315_v39, %v8838_v62  ;;  %v7338_v45 = vpop.f32.mrf.mxu1  ;;  %7608 = vmatpush3.bf16.msra.mxu0 %v8382_v50  ;;  %v8393_v62 = vld [vmem:[#allocation2 + $0xad8] sm:$0xff]   ;;  %v8420_v39 = vld [vmem:[#allocation2 + $0xb68] sm:$0xff]   ;;  %v8424_v43 = vld [vmem:[#allocation2 + $0xb60] sm:$0xff]  }
 0x16e   :  { %v7317_v48 = vpop.f32.mrf.mxu0  ;;  %7630 = vmatpush3.bf16.msra.mxu1 %v8383_v52  ;;  %7609 = vmatprep.subr.bf16.mxu0 %v8384_v53  ;;  %v8426_v45 = vld [vmem:[#allocation2 + $0xb20] sm:$0xff]   ;;  %v8431_v50 = vld [vmem:[#allocation2 + $0xb98] sm:$0xff]   ;;  %v8433_v52 = vld [vmem:[#allocation2 + $0xbd0] sm:$0xff]  }
 0x16f   :  { %v8847_v49 = vadd.f32 %v7337_v42, %v5236_v44  ;;  %v7339_v51 = vpop.f32.mrf.mxu1  ;;  %7631 = vmatprep.subr.bf16.mxu1 %v8385_v54  ;;  %v8423_v42 = vld [vmem:[#allocation2 + $0xba8] sm:$0xff]   ;;  %v8425_v44 = vld [vmem:[#allocation2 + $0xbe0] sm:$0xff]   ;;  %v8429_v48 = vld [vmem:[#allocation2 + $0xbd8] sm:$0xff]  }
 0x170   :  { %v8432_v51 = vld [vmem:[#allocation2 + $0xb50] sm:$0xff]  }
 0x171   :  { %7610 = vmatpush3.bf16.msra.mxu0 %v8386_v55  ;;  %v8434_v53 = vld [vmem:[#allocation2 + $0xb10] sm:$0xff]   ;;  %v8436_v55 = vld [vmem:[#allocation2 + $0xb48] sm:$0xff]  }
 0x172   :  { %7632 = vmatpush3.bf16.msra.mxu1 %v8387_v56  ;;  %7611 = vmatprep.subr.bf16.mxu0 %v8388_v57  ;;  %v8435_v54 = vld [vmem:[#allocation2 + $0xb90] sm:$0xff]   ;;  %v8437_v56 = vld [vmem:[#allocation2 + $0xbc8] sm:$0xff]  }
 0x173   :  { %7633 = vmatprep.subr.bf16.mxu1 %v8389_v58  ;;  %v8438_v57 = vld [vmem:[#allocation2 + $0xb08] sm:$0xff]   ;;  %v8453_v21 = vld [vmem:[#allocation2 + $0xcf0] sm:$0xff]  }
 0x174   :  { %v8439_v58 = vld [vmem:[#allocation2 + $0xb88] sm:$0xff]  }
 0x175   :  { %7612 = vmatpush3.bf16.msra.mxu0 %v8390_v59  ;;  %v8440_v59 = vld [vmem:[#allocation2 + $0xb40] sm:$0xff]  }
 0x176   :  { %7634 = vmatpush3.bf16.msra.mxu1 %v8391_v60  ;;  %7613 = vmatprep.subr.bf16.mxu0 %v8392_v61  ;;  %v8441_v60 = vld [vmem:[#allocation2 + $0xbc0] sm:$0xff]  }
 0x177   :  { %7635 = vmatprep.subr.bf16.mxu1 %v8393_v62  ;;  %v8442_v61 = vld [vmem:[#allocation2 + $0xb00] sm:$0xff]  }
 0x178   :  { %v8443_v62 = vld [vmem:[#allocation2 + $0xb80] sm:$0xff]  }
 0x179   :  { %7614 = vmatpush3.bf16.msra.mxu0 %v8394_v63  ;;  %v80_v63 = vld [vmem:[%s8973_s0 + $0xb0] sm:$0xff] }
 0x17a   :  { %7636 = vmatpush3.bf16.msra.mxu1 %v8395_v0  ;;  %7615 = vmatprep.subr.bf16.mxu0 %v8396_v1  ;;  %v6560_v1 = vcombine.low %v80_v63, %v80_v63 }
 0x17b   :  { %7637 = vmatprep.subr.bf16.mxu1 %v8397_v2  ;;  %v6561_v2 = vcombine.high %v80_v63, %v80_v63  ;;  %v8487_v63 = vld [vmem:[#allocation2 + $0xdb8] sm:$0xff]  }
 0x17d   :  { %7616 = vmatpush3.bf16.msra.mxu0 %v8398_v3  ;;  %v81_v3 = vld [vmem:[%s8973_s0 + $0xb8] sm:$0xff] }
 0x17e   :  { %7638 = vmatpush3.bf16.msra.mxu1 %v8399_v4  ;;  %7617 = vmatprep.subr.bf16.mxu0 %v8400_v5  ;;  %v6562_v5 = vcombine.low %v81_v3, %v81_v3 }
 0x17f   :  { %7639 = vmatprep.subr.bf16.mxu1 %v8401_v6  ;;  %v6563_v6 = vcombine.high %v81_v3, %v81_v3 }
 0x181   :  { %7618 = vmatpush3.bf16.msra.mxu0 %v8402_v7  ;;  %v8448_v7 = vld [vmem:[#allocation2 + $0xc78] sm:$0xff]  }
 0x182   :  { %7640 = vmatpush3.bf16.msra.mxu1 %v8403_v8  ;;  %7619 = vmatprep.subr.bf16.mxu0 %v8404_v9  ;;  %v8449_v9 = vld [vmem:[#allocation2 + $0xcf8] sm:$0xff]  }
 0x183   :  { %7641 = vmatprep.subr.bf16.mxu1 %v8405_v10 }
 0x185   :  { %7620 = vmatpush3.bf16.msra.mxu0 %v8406_v11 }
 0x186   :  { %7642 = vmatpush3.bf16.msra.mxu1 %v8407_v12  ;;  %7649 = vmatprep.subr.bf16.mxu0 %v8412_v20  ;;  %v8450_v12 = vld [vmem:[#allocation2 + $0xc38] sm:$0xff]  }
 0x187   :  { %7671 = vmatprep.subr.bf16.mxu1 %v8413_v22 }
 0x188   :  { %v7357_v15 = vpop.f32.mrf.mxu0  ;;  %5794 = vmatmul.mubr.bf16.vlgmr.msra.gmra.mxu0 %v6556_v17 }
 0x189   :  { %v7379_v16 = vpop.f32.mrf.mxu1  ;;  %5834 = vmatmul.mubr.bf16.vlgmr.msra.gmra.mxu1 %v6558_v19  ;;  %7650 = vmatpush3.bf16.msra.mxu0 %v8414_v25  ;;  %v8456_v25 = vld [vmem:[#allocation2 + $0xc68] sm:$0xff]  }
 0x18a   :  { %v7358_v23 = vpop.f32.mrf.mxu0  ;;  %7672 = vmatpush3.bf16.msra.mxu1 %v8415_v28  ;;  %7651 = vmatprep.subr.bf16.mxu0 %v8416_v32  ;;  %v8459_v28 = vld [vmem:[#allocation2 + $0xca8] sm:$0xff]   ;;  %v8463_v32 = vld [vmem:[#allocation2 + $0xca0] sm:$0xff]  }
 0x18b   :  { %v7380_v24 = vpop.f32.mrf.mxu1  ;;  %v7359_v26 = vadd.f32 %v7358_v23, %v7357_v15  ;;  %7673 = vmatprep.subr.bf16.mxu1 %v8417_v33  ;;  %5873 = vmatprep.mubr.bf16.mxu0 %v6561_v2  ;;  %v8451_v15 = vld [vmem:[#allocation2 + $0xcb8] sm:$0xff]   ;;  %v8454_v23 = vld [vmem:[#allocation2 + $0xc30] sm:$0xff]  }
 0x18c   :  { %v7381_v27 = vadd.f32 %v7380_v24, %v7379_v16  ;;  %v7360_v29 = vpop.f32.mrf.mxu0  ;;  %5913 = vmatprep.mubr.bf16.mxu1 %v6563_v6  ;;  %v8455_v24 = vld [vmem:[#allocation2 + $0xcb0] sm:$0xff]   ;;  %v8464_v33 = vld [vmem:[#allocation2 + $0xc58] sm:$0xff]  }
 0x18d   :  { %v7382_v30 = vpop.f32.mrf.mxu1  ;;  %v5316_v31 = vadd.f32 %v7359_v26, %v8847_v49  ;;  %7652 = vmatpush3.bf16.msra.mxu0 %v8418_v37  ;;  %v8430_v49 = vld [vmem:[#allocation2 + $0xb18] sm:$0xff]   ;;  %v8457_v26 = vld [vmem:[#allocation2 + $0xce8] sm:$0xff]   ;;  %v8460_v29 = vld [vmem:[#allocation2 + $0xc60] sm:$0xff]  }
 0x18e   :  { %v7361_v34 = vpop.f32.mrf.mxu0  ;;  %7674 = vmatpush3.bf16.msra.mxu1 %v8419_v38  ;;  %7653 = vmatprep.subr.bf16.mxu0 %v8420_v39  ;;  %v8461_v30 = vld [vmem:[#allocation2 + $0xce0] sm:$0xff]   ;;  %v8468_v37 = vld [vmem:[#allocation2 + $0xc50] sm:$0xff]  }
 0x18f   :  { %v7383_v35 = vpop.f32.mrf.mxu1  ;;  %v8856_v36 = vadd.f32 %v7381_v27, %v5316_v31  ;;  %7675 = vmatprep.subr.bf16.mxu1 %v8421_v40  ;;  %v8458_v27 = vld [vmem:[#allocation2 + $0xc28] sm:$0xff]   ;;  %v8462_v31 = vld [vmem:[#allocation2 + $0xc20] sm:$0xff]   ;;  %v8465_v34 = vld [vmem:[#allocation2 + $0xcd8] sm:$0xff]  }
 0x190   :  { %v8466_v35 = vld [vmem:[#allocation2 + $0xc18] sm:$0xff]   ;;  %v8469_v38 = vld [vmem:[#allocation2 + $0xcd0] sm:$0xff]  }
 0x191   :  { %7654 = vmatpush3.bf16.msra.mxu0 %v8422_v41  ;;  %v8470_v39 = vld [vmem:[#allocation2 + $0xc10] sm:$0xff]   ;;  %v8472_v41 = vld [vmem:[#allocation2 + $0xc48] sm:$0xff]  }
 0x192   :  { %7676 = vmatpush3.bf16.msra.mxu1 %v8423_v42  ;;  %7655 = vmatprep.subr.bf16.mxu0 %v8424_v43  ;;  %v8471_v40 = vld [vmem:[#allocation2 + $0xc90] sm:$0xff]   ;;  %v8473_v42 = vld [vmem:[#allocation2 + $0xcc8] sm:$0xff]  }
 0x193   :  { %7677 = vmatprep.subr.bf16.mxu1 %v8425_v44  ;;  %v8474_v43 = vld [vmem:[#allocation2 + $0xc08] sm:$0xff]  }
 0x194   :  { %v8475_v44 = vld [vmem:[#allocation2 + $0xc88] sm:$0xff]  }
 0x195   :  { %7656 = vmatpush3.bf16.msra.mxu0 %v8426_v45  ;;  %v8476_v45 = vld [vmem:[#allocation2 + $0xc40] sm:$0xff]  }
 0x196   :  { %7678 = vmatpush3.bf16.msra.mxu1 %v8427_v46  ;;  %7657 = vmatprep.subr.bf16.mxu0 %v8428_v47  ;;  %v8477_v46 = vld [vmem:[#allocation2 + $0xcc0] sm:$0xff]  }
 0x197   :  { %7679 = vmatprep.subr.bf16.mxu1 %v8429_v48  ;;  %v8478_v47 = vld [vmem:[#allocation2 + $0xc00] sm:$0xff]  }
 0x198   :  { %v8479_v48 = vld [vmem:[#allocation2 + $0xc80] sm:$0xff]  }
 0x199   :  { %7658 = vmatpush3.bf16.msra.mxu0 %v8430_v49  ;;  %v82_v49 = vld [vmem:[%s8973_s0 + $0xc0] sm:$0xff] }
 0x19a   :  { %7680 = vmatpush3.bf16.msra.mxu1 %v8431_v50  ;;  %7659 = vmatprep.subr.bf16.mxu0 %v8432_v51  ;;  %v83_v50 = vld [vmem:[%s8973_s0 + $0xc8] sm:$0xff] }
 0x19b   :  { %7681 = vmatprep.subr.bf16.mxu1 %v8433_v52  ;;  %v6564_v52 = vcombine.low %v82_v49, %v82_v49 }
 0x19d   :  { %7660 = vmatpush3.bf16.msra.mxu0 %v8434_v53  ;;  %v6565_v53 = vcombine.high %v82_v49, %v82_v49  ;;  %v8523_v49 = vld [vmem:[#allocation2 + $0xeb8] sm:$0xff]  }
 0x19e   :  { %7682 = vmatpush3.bf16.msra.mxu1 %v8435_v54  ;;  %7661 = vmatprep.subr.bf16.mxu0 %v8436_v55  ;;  %v6566_v54 = vcombine.low %v83_v50, %v83_v50  ;;  %v6567_v55 = vcombine.high %v83_v50, %v83_v50 }
 0x19f   :  { %7683 = vmatprep.subr.bf16.mxu1 %v8437_v56 }
 0x1a1   :  { %7662 = vmatpush3.bf16.msra.mxu0 %v8438_v57  ;;  %v8484_v57 = vld [vmem:[#allocation2 + $0xd78] sm:$0xff]  }
 0x1a2   :  { %7684 = vmatpush3.bf16.msra.mxu1 %v8439_v58  ;;  %7663 = vmatprep.subr.bf16.mxu0 %v8440_v59  ;;  %v8485_v58 = vld [vmem:[#allocation2 + $0xdf8] sm:$0xff]  }
 0x1a3   :  { %7685 = vmatprep.subr.bf16.mxu1 %v8441_v60  ;;  %v8486_v60 = vld [vmem:[#allocation2 + $0xd38] sm:$0xff]  }
 0x1a5   :  { %7664 = vmatpush3.bf16.msra.mxu0 %v8442_v61 }
 0x1a6   :  { %7686 = vmatpush3.bf16.msra.mxu1 %v8443_v62  ;;  %7693 = vmatprep.subr.bf16.mxu0 %v8448_v7 }
 0x1a7   :  { %7715 = vmatprep.subr.bf16.mxu1 %v8449_v9 }
 0x1a8   :  { %v7401_v0 = vpop.f32.mrf.mxu0  ;;  %5874 = vmatmul.mubr.bf16.vlgmr.msra.gmra.mxu0 %v6560_v1 }
 0x1a9   :  { %v7423_v4 = vpop.f32.mrf.mxu1  ;;  %5914 = vmatmul.mubr.bf16.vlgmr.msra.gmra.mxu1 %v6562_v5  ;;  %7694 = vmatpush3.bf16.msra.mxu0 %v8450_v12  ;;  %v8489_v5 = vld [vmem:[#allocation2 + $0xdf0] sm:$0xff]   ;;  %v8493_v12 = vld [vmem:[#allocation2 + $0xde8] sm:$0xff]  }
 0x1aa   :  { %v7402_v8 = vpop.f32.mrf.mxu0  ;;  %7716 = vmatpush3.bf16.msra.mxu1 %v8451_v15  ;;  %7695 = vmatprep.subr.bf16.mxu0 %v8452_v18  ;;  %v8496_v15 = vld [vmem:[#allocation2 + $0xd60] sm:$0xff]  }
 0x1ab   :  { %v7403_v10 = vadd.f32 %v7402_v8, %v7401_v0  ;;  %v7424_v11 = vpop.f32.mrf.mxu1  ;;  %7717 = vmatprep.subr.bf16.mxu1 %v8453_v21  ;;  %5953 = vmatprep.mubr.bf16.mxu0 %v6565_v53  ;;  %v8490_v8 = vld [vmem:[#allocation2 + $0xd30] sm:$0xff]   ;;  %v8499_v18 = vld [vmem:[#allocation2 + $0xda0] sm:$0xff]   ;;  %v8502_v21 = vld [vmem:[#allocation2 + $0xd18] sm:$0xff]  }
 0x1ac   :  { %v7425_v13 = vadd.f32 %v7424_v11, %v7423_v4  ;;  %v7404_v14 = vpop.f32.mrf.mxu0  ;;  %5993 = vmatprep.mubr.bf16.mxu1 %v6567_v55  ;;  %v8488_v4 = vld [vmem:[#allocation2 + $0xd70] sm:$0xff]   ;;  %v8492_v11 = vld [vmem:[#allocation2 + $0xd68] sm:$0xff]  }
 0x1ad   :  { %v5396_v16 = vadd.f32 %v7403_v10, %v8856_v36  ;;  %v7426_v17 = vpop.f32.mrf.mxu1  ;;  %7696 = vmatpush3.bf16.msra.mxu0 %v8454_v23  ;;  %v8467_v36 = vld [vmem:[#allocation2 + $0xc98] sm:$0xff]   ;;  %v8491_v10 = vld [vmem:[#allocation2 + $0xdb0] sm:$0xff]   ;;  %v8495_v14 = vld [vmem:[#allocation2 + $0xda8] sm:$0xff]  }
 0x1ae   :  { %v7405_v19 = vpop.f32.mrf.mxu0  ;;  %7718 = vmatpush3.bf16.msra.mxu1 %v8455_v24  ;;  %7697 = vmatprep.subr.bf16.mxu0 %v8456_v25  ;;  %v8498_v17 = vld [vmem:[#allocation2 + $0xd20] sm:$0xff]   ;;  %v8504_v23 = vld [vmem:[#allocation2 + $0xd50] sm:$0xff]  }
 0x1af   :  { %v8865_v20 = vadd.f32 %v7425_v13, %v5396_v16  ;;  %v7427_v22 = vpop.f32.mrf.mxu1  ;;  %7719 = vmatprep.subr.bf16.mxu1 %v8457_v26  ;;  %v8494_v13 = vld [vmem:[#allocation2 + $0xd28] sm:$0xff]   ;;  %v8497_v16 = vld [vmem:[#allocation2 + $0xde0] sm:$0xff]   ;;  %v8500_v19 = vld [vmem:[#allocation2 + $0xd58] sm:$0xff]  }
 0x1b0   :  { %v8503_v22 = vld [vmem:[#allocation2 + $0xd98] sm:$0xff]   ;;  %v8505_v24 = vld [vmem:[#allocation2 + $0xdd0] sm:$0xff]  }
 0x1b1   :  { %7698 = vmatpush3.bf16.msra.mxu0 %v8458_v27  ;;  %v8506_v25 = vld [vmem:[#allocation2 + $0xd10] sm:$0xff]   ;;  %v8508_v27 = vld [vmem:[#allocation2 + $0xd48] sm:$0xff]  }
 0x1b2   :  { %7720 = vmatpush3.bf16.msra.mxu1 %v8459_v28  ;;  %7699 = vmatprep.subr.bf16.mxu0 %v8460_v29  ;;  %v8507_v26 = vld [vmem:[#allocation2 + $0xd90] sm:$0xff]   ;;  %v8509_v28 = vld [vmem:[#allocation2 + $0xdc8] sm:$0xff]  }
 0x1b3   :  { %7721 = vmatprep.subr.bf16.mxu1 %v8461_v30  ;;  %v8510_v29 = vld [vmem:[#allocation2 + $0xd08] sm:$0xff]   ;;  %v8525_v55 = vld [vmem:[#allocation2 + $0xef0] sm:$0xff]  }
 0x1b4   :  { %v8511_v30 = vld [vmem:[#allocation2 + $0xd88] sm:$0xff]  }
 0x1b5   :  { %7700 = vmatpush3.bf16.msra.mxu0 %v8462_v31  ;;  %v8512_v31 = vld [vmem:[#allocation2 + $0xd40] sm:$0xff]  }
 0x1b6   :  { %7722 = vmatpush3.bf16.msra.mxu1 %v8463_v32  ;;  %7701 = vmatprep.subr.bf16.mxu0 %v8464_v33  ;;  %v8513_v32 = vld [vmem:[#allocation2 + $0xdc0] sm:$0xff]  }
 0x1b7   :  { %7723 = vmatprep.subr.bf16.mxu1 %v8465_v34  ;;  %v8514_v33 = vld [vmem:[#allocation2 + $0xd00] sm:$0xff]  }
 0x1b8   :  { %v8515_v34 = vld [vmem:[#allocation2 + $0xd80] sm:$0xff]  }
 0x1b9   :  { %7702 = vmatpush3.bf16.msra.mxu0 %v8466_v35  ;;  %v84_v35 = vld [vmem:[%s8973_s0 + $0xd0] sm:$0xff] }
 0x1ba   :  { %7724 = vmatpush3.bf16.msra.mxu1 %v8467_v36  ;;  %7703 = vmatprep.subr.bf16.mxu0 %v8468_v37  ;;  %v85_v36 = vld [vmem:[%s8973_s0 + $0xd8] sm:$0xff] }
 0x1bb   :  { %7725 = vmatprep.subr.bf16.mxu1 %v8469_v38  ;;  %v6568_v38 = vcombine.low %v84_v35, %v84_v35 }
 0x1bd   :  { %7704 = vmatpush3.bf16.msra.mxu0 %v8470_v39  ;;  %v6569_v39 = vcombine.high %v84_v35, %v84_v35 }
 0x1be   :  { %7726 = vmatpush3.bf16.msra.mxu1 %v8471_v40  ;;  %7705 = vmatprep.subr.bf16.mxu0 %v8472_v41  ;;  %v6570_v40 = vcombine.low %v85_v36, %v85_v36 }
 0x1bf   :  { %7727 = vmatprep.subr.bf16.mxu1 %v8473_v42  ;;  %v8520_v42 = vld [vmem:[#allocation2 + $0xe78] sm:$0xff]  }
 0x1c1   :  { %7706 = vmatpush3.bf16.msra.mxu0 %v8474_v43  ;;  %v6571_v43 = vcombine.high %v85_v36, %v85_v36  ;;  %v8559_v36 = vld [vmem:[#allocation2 + $0xfb8] sm:$0xff]  }
 0x1c2   :  { %7728 = vmatpush3.bf16.msra.mxu1 %v8475_v44  ;;  %7707 = vmatprep.subr.bf16.mxu0 %v8476_v45  ;;  %v8521_v44 = vld [vmem:[#allocation2 + $0xef8] sm:$0xff]  }
 0x1c3   :  { %7729 = vmatprep.subr.bf16.mxu1 %v8477_v46  ;;  %v8522_v46 = vld [vmem:[#allocation2 + $0xe38] sm:$0xff]  }
 0x1c5   :  { %7708 = vmatpush3.bf16.msra.mxu0 %v8478_v47 }
 0x1c6   :  { %7730 = vmatpush3.bf16.msra.mxu1 %v8479_v48  ;;  %7737 = vmatprep.subr.bf16.mxu0 %v8484_v57 }
 0x1c7   :  { %7759 = vmatprep.subr.bf16.mxu1 %v8485_v58  ;;  %v8526_v58 = vld [vmem:[#allocation2 + $0xe30] sm:$0xff]  }
 0x1c8   :  { %v7445_v51 = vpop.f32.mrf.mxu0  ;;  %5954 = vmatmul.mubr.bf16.vlgmr.msra.gmra.mxu0 %v6564_v52 }
 0x1c9   :  { %v7467_v56 = vpop.f32.mrf.mxu1  ;;  %5994 = vmatmul.mubr.bf16.vlgmr.msra.gmra.mxu1 %v6566_v54  ;;  %7738 = vmatpush3.bf16.msra.mxu0 %v8486_v60  ;;  %v8524_v54 = vld [vmem:[#allocation2 + $0xe70] sm:$0xff]  }
 0x1ca   :  { %v7446_v59 = vpop.f32.mrf.mxu0  ;;  %7760 = vmatpush3.bf16.msra.mxu1 %v8487_v63  ;;  %7739 = vmatprep.subr.bf16.mxu0 %v8488_v4  ;;  %v8527_v60 = vld [vmem:[#allocation2 + $0xeb0] sm:$0xff]   ;;  %v8530_v63 = vld [vmem:[#allocation2 + $0xe28] sm:$0xff]   ;;  %v8535_v4 = vld [vmem:[#allocation2 + $0xea0] sm:$0xff]  }
 0x1cb   :  { %v7447_v61 = vadd.f32 %v7446_v59, %v7445_v51  ;;  %v7468_v62 = vpop.f32.mrf.mxu1  ;;  %7761 = vmatprep.subr.bf16.mxu1 %v8489_v5  ;;  %6033 = vmatprep.mubr.bf16.mxu0 %v6569_v39  ;;  %v8536_v5 = vld [vmem:[#allocation2 + $0xe58] sm:$0xff]  }
 0x1cc   :  { %v7469_v0 = vadd.f32 %v7468_v62, %v7467_v56  ;;  %v7448_v1 = vpop.f32.mrf.mxu0  ;;  %6073 = vmatprep.mubr.bf16.mxu1 %v6571_v43  ;;  %v8529_v62 = vld [vmem:[#allocation2 + $0xee8] sm:$0xff]  }
 0x1cd   :  { %v5476_v2 = vadd.f32 %v7447_v61, %v8865_v20  ;;  %v7470_v3 = vpop.f32.mrf.mxu1  ;;  %7740 = vmatpush3.bf16.msra.mxu0 %v8490_v8  ;;  %v8501_v20 = vld [vmem:[#allocation2 + $0xdd8] sm:$0xff]   ;;  %v8528_v61 = vld [vmem:[#allocation2 + $0xe68] sm:$0xff]   ;;  %v8532_v1 = vld [vmem:[#allocation2 + $0xe60] sm:$0xff]  }
 0x1ce   :  { %v7449_v6 = vpop.f32.mrf.mxu0  ;;  %7762 = vmatpush3.bf16.msra.mxu1 %v8491_v10  ;;  %7741 = vmatprep.subr.bf16.mxu0 %v8492_v11  ;;  %v8534_v3 = vld [vmem:[#allocation2 + $0xe20] sm:$0xff]   ;;  %v8539_v8 = vld [vmem:[#allocation2 + $0xe98] sm:$0xff]   ;;  %v8541_v10 = vld [vmem:[#allocation2 + $0xed0] sm:$0xff]  }
 0x1cf   :  { %v8874_v7 = vadd.f32 %v7469_v0, %v5476_v2  ;;  %v7471_v9 = vpop.f32.mrf.mxu1  ;;  %7763 = vmatprep.subr.bf16.mxu1 %v8493_v12  ;;  %v8531_v0 = vld [vmem:[#allocation2 + $0xea8] sm:$0xff]   ;;  %v8533_v2 = vld [vmem:[#allocation2 + $0xee0] sm:$0xff]   ;;  %v8537_v6 = vld [vmem:[#allocation2 + $0xed8] sm:$0xff]  }
 0x1d0   :  { %v8540_v9 = vld [vmem:[#allocation2 + $0xe50] sm:$0xff]  }
 0x1d1   :  { %7742 = vmatpush3.bf16.msra.mxu0 %v8494_v13  ;;  %v8542_v11 = vld [vmem:[#allocation2 + $0xe10] sm:$0xff]   ;;  %v8544_v13 = vld [vmem:[#allocation2 + $0xe48] sm:$0xff]  }
 0x1d2   :  { %7764 = vmatpush3.bf16.msra.mxu1 %v8495_v14  ;;  %7743 = vmatprep.subr.bf16.mxu0 %v8496_v15  ;;  %v8543_v12 = vld [vmem:[#allocation2 + $0xe90] sm:$0xff]   ;;  %v8545_v14 = vld [vmem:[#allocation2 + $0xec8] sm:$0xff]  }
 0x1d3   :  { %7765 = vmatprep.subr.bf16.mxu1 %v8497_v16  ;;  %v8546_v15 = vld [vmem:[#allocation2 + $0xe08] sm:$0xff]  }
 0x1d4   :  { %v8547_v16 = vld [vmem:[#allocation2 + $0xe88] sm:$0xff]  }
 0x1d5   :  { %7744 = vmatpush3.bf16.msra.mxu0 %v8498_v17  ;;  %v8548_v17 = vld [vmem:[#allocation2 + $0xe40] sm:$0xff]  }
 0x1d6   :  { %7766 = vmatpush3.bf16.msra.mxu1 %v8499_v18  ;;  %7745 = vmatprep.subr.bf16.mxu0 %v8500_v19  ;;  %v8549_v18 = vld [vmem:[#allocation2 + $0xec0] sm:$0xff]  }
 0x1d7   :  { %7767 = vmatprep.subr.bf16.mxu1 %v8501_v20  ;;  %v8550_v19 = vld [vmem:[#allocation2 + $0xe00] sm:$0xff]  }
 0x1d8   :  { %v8551_v20 = vld [vmem:[#allocation2 + $0xe80] sm:$0xff]  }
 0x1d9   :  { %7746 = vmatpush3.bf16.msra.mxu0 %v8502_v21  ;;  %v86_v21 = vld [vmem:[%s8973_s0 + $0xe0] sm:$0xff] }
 0x1da   :  { %7768 = vmatpush3.bf16.msra.mxu1 %v8503_v22  ;;  %7747 = vmatprep.subr.bf16.mxu0 %v8504_v23  ;;  %v6572_v22 = vcombine.low %v86_v21, %v86_v21  ;;  %v6573_v23 = vcombine.high %v86_v21, %v86_v21  ;;  %v8595_v21 = vld [vmem:[#allocation2 + $0x10b8] sm:$0xff]  }
 0x1db   :  { %7769 = vmatprep.subr.bf16.mxu1 %v8505_v24  ;;  %v87_v24 = vld [vmem:[%s8973_s0 + $0xe8] sm:$0xff] }
 0x1dd   :  { %7748 = vmatpush3.bf16.msra.mxu0 %v8506_v25 }
 0x1de   :  { %7770 = vmatpush3.bf16.msra.mxu1 %v8507_v26  ;;  %7749 = vmatprep.subr.bf16.mxu0 %v8508_v27  ;;  %v6574_v27 = vcombine.low %v87_v24, %v87_v24 }
 0x1df   :  { %7771 = vmatprep.subr.bf16.mxu1 %v8509_v28  ;;  %v6575_v28 = vcombine.high %v87_v24, %v87_v24 }
 0x1e1   :  { %7750 = vmatpush3.bf16.msra.mxu0 %v8510_v29  ;;  %v8556_v29 = vld [vmem:[#allocation2 + $0xf78] sm:$0xff]  }
 0x1e2   :  { %7772 = vmatpush3.bf16.msra.mxu1 %v8511_v30  ;;  %7751 = vmatprep.subr.bf16.mxu0 %v8512_v31  ;;  %v8557_v30 = vld [vmem:[#allocation2 + $0xff8] sm:$0xff]  }
 0x1e3   :  { %7773 = vmatprep.subr.bf16.mxu1 %v8513_v32 }
 0x1e5   :  { %7752 = vmatpush3.bf16.msra.mxu0 %v8514_v33  ;;  %v8558_v33 = vld [vmem:[#allocation2 + $0xf38] sm:$0xff]  }
 0x1e6   :  { %7774 = vmatpush3.bf16.msra.mxu1 %v8515_v34  ;;  %7781 = vmatprep.subr.bf16.mxu0 %v8520_v42 }
 0x1e7   :  { %7803 = vmatprep.subr.bf16.mxu1 %v8521_v44 }
 0x1e8   :  { %v7489_v37 = vpop.f32.mrf.mxu0  ;;  %6034 = vmatmul.mubr.bf16.vlgmr.msra.gmra.mxu0 %v6568_v38 }
 0x1e9   :  { %v7511_v41 = vpop.f32.mrf.mxu1  ;;  %6074 = vmatmul.mubr.bf16.vlgmr.msra.gmra.mxu1 %v6570_v40  ;;  %7782 = vmatpush3.bf16.msra.mxu0 %v8522_v46  ;;  %v8560_v40 = vld [vmem:[#allocation2 + $0xf70] sm:$0xff]  }
 0x1ea   :  { %v7490_v45 = vpop.f32.mrf.mxu0  ;;  %7804 = vmatpush3.bf16.msra.mxu1 %v8523_v49  ;;  %7783 = vmatprep.subr.bf16.mxu0 %v8524_v54  ;;  %v8563_v46 = vld [vmem:[#allocation2 + $0xfb0] sm:$0xff]   ;;  %v8566_v49 = vld [vmem:[#allocation2 + $0xf28] sm:$0xff]   ;;  %v8571_v54 = vld [vmem:[#allocation2 + $0xfa0] sm:$0xff]  }
 0x1eb   :  { %v7491_v47 = vadd.f32 %v7490_v45, %v7489_v37  ;;  %v7512_v48 = vpop.f32.mrf.mxu1  ;;  %7805 = vmatprep.subr.bf16.mxu1 %v8525_v55  ;;  %6113 = vmatprep.mubr.bf16.mxu0 %v6573_v23  ;;  %v8562_v45 = vld [vmem:[#allocation2 + $0xf30] sm:$0xff]   ;;  %v8572_v55 = vld [vmem:[#allocation2 + $0xf58] sm:$0xff]  }
 0x1ec   :  { %v7513_v50 = vadd.f32 %v7512_v48, %v7511_v41  ;;  %v7492_v51 = vpop.f32.mrf.mxu0  ;;  %6153 = vmatprep.mubr.bf16.mxu1 %v6575_v28  ;;  %v8561_v41 = vld [vmem:[#allocation2 + $0xff0] sm:$0xff]   ;;  %v8565_v48 = vld [vmem:[#allocation2 + $0xfe8] sm:$0xff]  }
 0x1ed   :  { %v5556_v52 = vadd.f32 %v7491_v47, %v8874_v7  ;;  %v7514_v53 = vpop.f32.mrf.mxu1  ;;  %7784 = vmatpush3.bf16.msra.mxu0 %v8526_v58  ;;  %v8538_v7 = vld [vmem:[#allocation2 + $0xe18] sm:$0xff]   ;;  %v8564_v47 = vld [vmem:[#allocation2 + $0xf68] sm:$0xff]   ;;  %v8568_v51 = vld [vmem:[#allocation2 + $0xf60] sm:$0xff]  }
 0x1ee   :  { %v7493_v56 = vpop.f32.mrf.mxu0  ;;  %7806 = vmatpush3.bf16.msra.mxu1 %v8527_v60  ;;  %7785 = vmatprep.subr.bf16.mxu0 %v8528_v61  ;;  %v8570_v53 = vld [vmem:[#allocation2 + $0xf20] sm:$0xff]   ;;  %v8575_v58 = vld [vmem:[#allocation2 + $0xf98] sm:$0xff]   ;;  %v8577_v60 = vld [vmem:[#allocation2 + $0xfd0] sm:$0xff]  }
 0x1ef   :  { %v8883_v57 = vadd.f32 %v7513_v50, %v5556_v52  ;;  %v7515_v59 = vpop.f32.mrf.mxu1  ;;  %7807 = vmatprep.subr.bf16.mxu1 %v8529_v62  ;;  %v8567_v50 = vld [vmem:[#allocation2 + $0xfa8] sm:$0xff]   ;;  %v8569_v52 = vld [vmem:[#allocation2 + $0xfe0] sm:$0xff]   ;;  %v8573_v56 = vld [vmem:[#allocation2 + $0xfd8] sm:$0xff]  }
 0x1f0   :  { %v8576_v59 = vld [vmem:[#allocation2 + $0xf50] sm:$0xff]  }
 0x1f1   :  { %7786 = vmatpush3.bf16.msra.mxu0 %v8530_v63  ;;  %v8578_v61 = vld [vmem:[#allocation2 + $0xf10] sm:$0xff]   ;;  %v8580_v63 = vld [vmem:[#allocation2 + $0xf48] sm:$0xff]  }
 0x1f2   :  { %7808 = vmatpush3.bf16.msra.mxu1 %v8531_v0  ;;  %7787 = vmatprep.subr.bf16.mxu0 %v8532_v1  ;;  %v8579_v62 = vld [vmem:[#allocation2 + $0xf90] sm:$0xff]   ;;  %v8581_v0 = vld [vmem:[#allocation2 + $0xfc8] sm:$0xff]  }
 0x1f3   :  { %7809 = vmatprep.subr.bf16.mxu1 %v8533_v2  ;;  %v8582_v1 = vld [vmem:[#allocation2 + $0xf08] sm:$0xff]  }
 0x1f4   :  { %v8583_v2 = vld [vmem:[#allocation2 + $0xf88] sm:$0xff]  }
 0x1f5   :  { %7788 = vmatpush3.bf16.msra.mxu0 %v8534_v3  ;;  %v8584_v3 = vld [vmem:[#allocation2 + $0xf40] sm:$0xff]  }
 0x1f6   :  { %7810 = vmatpush3.bf16.msra.mxu1 %v8535_v4  ;;  %7789 = vmatprep.subr.bf16.mxu0 %v8536_v5  ;;  %v8585_v4 = vld [vmem:[#allocation2 + $0xfc0] sm:$0xff]  }
 0x1f7   :  { %7811 = vmatprep.subr.bf16.mxu1 %v8537_v6  ;;  %v8586_v5 = vld [vmem:[#allocation2 + $0xf00] sm:$0xff]  }
 0x1f8   :  { %v8587_v6 = vld [vmem:[#allocation2 + $0xf80] sm:$0xff]  }
 0x1f9   :  { %7790 = vmatpush3.bf16.msra.mxu0 %v8538_v7  ;;  %v88_v7 = vld [vmem:[%s8973_s0 + $0xf0] sm:$0xff] }
 0x1fa   :  { %7812 = vmatpush3.bf16.msra.mxu1 %v8539_v8  ;;  %7791 = vmatprep.subr.bf16.mxu0 %v8540_v9  ;;  %v89_v8 = vld [vmem:[%s8973_s0 + $0xf8] sm:$0xff] }
 0x1fb   :  { %7813 = vmatprep.subr.bf16.mxu1 %v8541_v10  ;;  %v6576_v10 = vcombine.low %v88_v7, %v88_v7 }
 0x1fd   :  { %7792 = vmatpush3.bf16.msra.mxu0 %v8542_v11  ;;  %v6577_v11 = vcombine.high %v88_v7, %v88_v7  ;;  %v8631_v7 = vld [vmem:[#allocation2 + $0x11b8] sm:$0xff]  }
 0x1fe   :  { %7814 = vmatpush3.bf16.msra.mxu1 %v8543_v12  ;;  %7793 = vmatprep.subr.bf16.mxu0 %v8544_v13  ;;  %v6578_v12 = vcombine.low %v89_v8, %v89_v8  ;;  %v6579_v13 = vcombine.high %v89_v8, %v89_v8 }
 0x1ff   :  { %7815 = vmatprep.subr.bf16.mxu1 %v8545_v14 }
 0x201   :  { %7794 = vmatpush3.bf16.msra.mxu0 %v8546_v15  ;;  %v8592_v15 = vld [vmem:[#allocation2 + $0x1078] sm:$0xff]  }
 0x202   :  { %7816 = vmatpush3.bf16.msra.mxu1 %v8547_v16  ;;  %7795 = vmatprep.subr.bf16.mxu0 %v8548_v17  ;;  %v8593_v16 = vld [vmem:[#allocation2 + $0x10f8] sm:$0xff]  }
 0x203   :  { %7817 = vmatprep.subr.bf16.mxu1 %v8549_v18  ;;  %v8594_v18 = vld [vmem:[#allocation2 + $0x1038] sm:$0xff]  }
 0x205   :  { %7796 = vmatpush3.bf16.msra.mxu0 %v8550_v19 }
 0x206   :  { %7818 = vmatpush3.bf16.msra.mxu1 %v8551_v20  ;;  %7825 = vmatprep.subr.bf16.mxu0 %v8556_v29 }
 0x207   :  { %7847 = vmatprep.subr.bf16.mxu1 %v8557_v30  ;;  %v8598_v30 = vld [vmem:[#allocation2 + $0x1030] sm:$0xff]  }
 0x208   :  { %v7533_v25 = vpop.f32.mrf.mxu0  ;;  %6114 = vmatmul.mubr.bf16.vlgmr.msra.gmra.mxu0 %v6572_v22 }
 0x209   :  { %v7555_v26 = vpop.f32.mrf.mxu1  ;;  %6154 = vmatmul.mubr.bf16.vlgmr.msra.gmra.mxu1 %v6574_v27  ;;  %7826 = vmatpush3.bf16.msra.mxu0 %v8558_v33  ;;  %v8597_v27 = vld [vmem:[#allocation2 + $0x10f0] sm:$0xff]   ;;  %v8600_v33 = vld [vmem:[#allocation2 + $0x1068] sm:$0xff]  }
 0x20a   :  { %v7534_v31 = vpop.f32.mrf.mxu0  ;;  %7848 = vmatpush3.bf16.msra.mxu1 %v8559_v36  ;;  %7827 = vmatprep.subr.bf16.mxu0 %v8560_v40  ;;  %v8603_v36 = vld [vmem:[#allocation2 + $0x10a8] sm:$0xff]   ;;  %v8607_v40 = vld [vmem:[#allocation2 + $0x10a0] sm:$0xff]  }
 0x20b   :  { %v7556_v32 = vpop.f32.mrf.mxu1  ;;  %v7535_v34 = vadd.f32 %v7534_v31, %v7533_v25  ;;  %7849 = vmatprep.subr.bf16.mxu1 %v8561_v41  ;;  %6193 = vmatprep.mubr.bf16.mxu0 %v6577_v11  ;;  %v8608_v41 = vld [vmem:[#allocation2 + $0x1058] sm:$0xff]  }
 0x20c   :  { %v7557_v35 = vadd.f32 %v7556_v32, %v7555_v26  ;;  %v7536_v37 = vpop.f32.mrf.mxu0  ;;  %6233 = vmatprep.mubr.bf16.mxu1 %v6579_v13  ;;  %v8596_v26 = vld [vmem:[#allocation2 + $0x1070] sm:$0xff]  }
 0x20d   :  { %v7558_v38 = vpop.f32.mrf.mxu1  ;;  %v5636_v39 = vadd.f32 %v7535_v34, %v8883_v57  ;;  %7828 = vmatpush3.bf16.msra.mxu0 %v8562_v45  ;;  %v8574_v57 = vld [vmem:[#allocation2 + $0xf18] sm:$0xff]   ;;  %v8599_v32 = vld [vmem:[#allocation2 + $0x10b0] sm:$0xff]   ;;  %v8601_v34 = vld [vmem:[#allocation2 + $0x10e8] sm:$0xff]  }
 0x20e   :  { %v7537_v42 = vpop.f32.mrf.mxu0  ;;  %7850 = vmatpush3.bf16.msra.mxu1 %v8563_v46  ;;  %7829 = vmatprep.subr.bf16.mxu0 %v8564_v47  ;;  %v8604_v37 = vld [vmem:[#allocation2 + $0x1060] sm:$0xff]   ;;  %v8612_v45 = vld [vmem:[#allocation2 + $0x1050] sm:$0xff]  }
 0x20f   :  { %v7559_v43 = vpop.f32.mrf.mxu1  ;;  %v8892_v44 = vadd.f32 %v7557_v35, %v5636_v39  ;;  %7851 = vmatprep.subr.bf16.mxu1 %v8565_v48  ;;  %v8602_v35 = vld [vmem:[#allocation2 + $0x1028] sm:$0xff]   ;;  %v8605_v38 = vld [vmem:[#allocation2 + $0x10e0] sm:$0xff]   ;;  %v8609_v42 = vld [vmem:[#allocation2 + $0x10d8] sm:$0xff]  }
 0x210   :  { %v8606_v39 = vld [vmem:[#allocation2 + $0x1020] sm:$0xff]   ;;  %v8610_v43 = vld [vmem:[#allocation2 + $0x1018] sm:$0xff]   ;;  %v8613_v46 = vld [vmem:[#allocation2 + $0x10d0] sm:$0xff]  }
 0x211   :  { %7830 = vmatpush3.bf16.msra.mxu0 %v8566_v49  ;;  %v8614_v47 = vld [vmem:[#allocation2 + $0x1010] sm:$0xff]   ;;  %v8616_v49 = vld [vmem:[#allocation2 + $0x1048] sm:$0xff]  }
 0x212   :  { %7852 = vmatpush3.bf16.msra.mxu1 %v8567_v50  ;;  %7831 = vmatprep.subr.bf16.mxu0 %v8568_v51  ;;  %v8615_v48 = vld [vmem:[#allocation2 + $0x1090] sm:$0xff]   ;;  %v8617_v50 = vld [vmem:[#allocation2 + $0x10c8] sm:$0xff]  }
 0x213   :  { %7853 = vmatprep.subr.bf16.mxu1 %v8569_v52  ;;  %v8618_v51 = vld [vmem:[#allocation2 + $0x1008] sm:$0xff]   ;;  %v8633_v13 = vld [vmem:[#allocation2 + $0x11f0] sm:$0xff]  }
 0x214   :  { %v8619_v52 = vld [vmem:[#allocation2 + $0x1088] sm:$0xff]  }
 0x215   :  { %7832 = vmatpush3.bf16.msra.mxu0 %v8570_v53  ;;  %v8620_v53 = vld [vmem:[#allocation2 + $0x1040] sm:$0xff]  }
 0x216   :  { %7854 = vmatpush3.bf16.msra.mxu1 %v8571_v54  ;;  %7833 = vmatprep.subr.bf16.mxu0 %v8572_v55  ;;  %v8621_v54 = vld [vmem:[#allocation2 + $0x10c0] sm:$0xff]  }
 0x217   :  { %7855 = vmatprep.subr.bf16.mxu1 %v8573_v56  ;;  %v8622_v55 = vld [vmem:[#allocation2 + $0x1000] sm:$0xff]  }
 0x218   :  { %v8623_v56 = vld [vmem:[#allocation2 + $0x1080] sm:$0xff]  }
 0x219   :  { %7834 = vmatpush3.bf16.msra.mxu0 %v8574_v57  ;;  %v90_v57 = vld [vmem:[%s8973_s0 + $0x100] sm:$0xff] }
 0x21a   :  { %7856 = vmatpush3.bf16.msra.mxu1 %v8575_v58  ;;  %7835 = vmatprep.subr.bf16.mxu0 %v8576_v59  ;;  %v91_v58 = vld [vmem:[%s8973_s0 + $0x108] sm:$0xff] }
 0x21b   :  { %7857 = vmatprep.subr.bf16.mxu1 %v8577_v60  ;;  %v6580_v60 = vcombine.low %v90_v57, %v90_v57 }
 0x21d   :  { %7836 = vmatpush3.bf16.msra.mxu0 %v8578_v61  ;;  %v6581_v61 = vcombine.high %v90_v57, %v90_v57 }
 0x21e   :  { %7858 = vmatpush3.bf16.msra.mxu1 %v8579_v62  ;;  %7837 = vmatprep.subr.bf16.mxu0 %v8580_v63  ;;  %v6582_v62 = vcombine.low %v91_v58, %v91_v58 }
 0x21f   :  { %7859 = vmatprep.subr.bf16.mxu1 %v8581_v0  ;;  %v8628_v0 = vld [vmem:[#allocation2 + $0x1178] sm:$0xff]  }
 0x221   :  { %7838 = vmatpush3.bf16.msra.mxu0 %v8582_v1  ;;  %v6583_v1 = vcombine.high %v91_v58, %v91_v58 }
 0x222   :  { %7860 = vmatpush3.bf16.msra.mxu1 %v8583_v2  ;;  %7839 = vmatprep.subr.bf16.mxu0 %v8584_v3  ;;  %v8629_v2 = vld [vmem:[#allocation2 + $0x11f8] sm:$0xff]  }
 0x223   :  { %7861 = vmatprep.subr.bf16.mxu1 %v8585_v4  ;;  %v8630_v4 = vld [vmem:[#allocation2 + $0x1138] sm:$0xff]  }
 0x225   :  { %7840 = vmatpush3.bf16.msra.mxu0 %v8586_v5 }
 0x226   :  { %7862 = vmatpush3.bf16.msra.mxu1 %v8587_v6  ;;  %7869 = vmatprep.subr.bf16.mxu0 %v8592_v15 }
 0x227   :  { %7891 = vmatprep.subr.bf16.mxu1 %v8593_v16  ;;  %v8634_v16 = vld [vmem:[#allocation2 + $0x1130] sm:$0xff]  }
 0x228   :  { %v7577_v9 = vpop.f32.mrf.mxu0  ;;  %6194 = vmatmul.mubr.bf16.vlgmr.msra.gmra.mxu0 %v6576_v10 }
 0x229   :  { %v7599_v14 = vpop.f32.mrf.mxu1  ;;  %6234 = vmatmul.mubr.bf16.vlgmr.msra.gmra.mxu1 %v6578_v12  ;;  %7870 = vmatpush3.bf16.msra.mxu0 %v8594_v18  ;;  %v8632_v12 = vld [vmem:[#allocation2 + $0x1170] sm:$0xff]  }
 0x22a   :  { %v7578_v17 = vpop.f32.mrf.mxu0  ;;  %7892 = vmatpush3.bf16.msra.mxu1 %v8595_v21  ;;  %7871 = vmatprep.subr.bf16.mxu0 %v8596_v26  ;;  %v8635_v18 = vld [vmem:[#allocation2 + $0x11b0] sm:$0xff]   ;;  %v8638_v21 = vld [vmem:[#allocation2 + $0x1128] sm:$0xff]   ;;  %v8643_v26 = vld [vmem:[#allocation2 + $0x11a0] sm:$0xff]  }
 0x22b   :  { %v7579_v19 = vadd.f32 %v7578_v17, %v7577_v9  ;;  %v7600_v20 = vpop.f32.mrf.mxu1  ;;  %7893 = vmatprep.subr.bf16.mxu1 %v8597_v27  ;;  %6273 = vmatprep.mubr.bf16.mxu0 %v6581_v61  ;;  %v8644_v27 = vld [vmem:[#allocation2 + $0x1158] sm:$0xff]  }
 0x22c   :  { %v7601_v22 = vadd.f32 %v7600_v20, %v7599_v14  ;;  %v7580_v23 = vpop.f32.mrf.mxu0  ;;  %6313 = vmatprep.mubr.bf16.mxu1 %v6583_v1  ;;  %v8637_v20 = vld [vmem:[#allocation2 + $0x11e8] sm:$0xff]  }
 0x22d   :  { %v5716_v24 = vadd.f32 %v7579_v19, %v8892_v44  ;;  %v7602_v25 = vpop.f32.mrf.mxu1  ;;  %7872 = vmatpush3.bf16.msra.mxu0 %v8598_v30  ;;  %v8611_v44 = vld [vmem:[#allocation2 + $0x1098] sm:$0xff]   ;;  %v8636_v19 = vld [vmem:[#allocation2 + $0x1168] sm:$0xff]   ;;  %v8640_v23 = vld [vmem:[#allocation2 + $0x1160] sm:$0xff]  }
 0x22e   :  { %v7581_v28 = vpop.f32.mrf.mxu0  ;;  %7894 = vmatpush3.bf16.msra.mxu1 %v8599_v32  ;;  %7873 = vmatprep.subr.bf16.mxu0 %v8600_v33  ;;  %v8642_v25 = vld [vmem:[#allocation2 + $0x1120] sm:$0xff]   ;;  %v8647_v30 = vld [vmem:[#allocation2 + $0x1198] sm:$0xff]   ;;  %v8649_v32 = vld [vmem:[#allocation2 + $0x11d0] sm:$0xff]  }
 0x22f   :  { %v8901_v29 = vadd.f32 %v7601_v22, %v5716_v24  ;;  %v7603_v31 = vpop.f32.mrf.mxu1  ;;  %7895 = vmatprep.subr.bf16.mxu1 %v8601_v34  ;;  %v8639_v22 = vld [vmem:[#allocation2 + $0x11a8] sm:$0xff]   ;;  %v8641_v24 = vld [vmem:[#allocation2 + $0x11e0] sm:$0xff]   ;;  %v8645_v28 = vld [vmem:[#allocation2 + $0x11d8] sm:$0xff]  }
 0x230   :  { %v8648_v31 = vld [vmem:[#allocation2 + $0x1150] sm:$0xff]  }
 0x231   :  { %7874 = vmatpush3.bf16.msra.mxu0 %v8602_v35  ;;  %v8650_v33 = vld [vmem:[#allocation2 + $0x1110] sm:$0xff]   ;;  %v8652_v35 = vld [vmem:[#allocation2 + $0x1148] sm:$0xff]  }
 0x232   :  { %7896 = vmatpush3.bf16.msra.mxu1 %v8603_v36  ;;  %7875 = vmatprep.subr.bf16.mxu0 %v8604_v37  ;;  %v8651_v34 = vld [vmem:[#allocation2 + $0x1190] sm:$0xff]   ;;  %v8653_v36 = vld [vmem:[#allocation2 + $0x11c8] sm:$0xff]  }
 0x233   :  { %7897 = vmatprep.subr.bf16.mxu1 %v8605_v38  ;;  %v8654_v37 = vld [vmem:[#allocation2 + $0x1108] sm:$0xff]  }
 0x234   :  { %v8655_v38 = vld [vmem:[#allocation2 + $0x1188] sm:$0xff]  }
 0x235   :  { %7876 = vmatpush3.bf16.msra.mxu0 %v8606_v39  ;;  %v8656_v39 = vld [vmem:[#allocation2 + $0x1140] sm:$0xff]  }
 0x236   :  { %7898 = vmatpush3.bf16.msra.mxu1 %v8607_v40  ;;  %7877 = vmatprep.subr.bf16.mxu0 %v8608_v41  ;;  %v8657_v40 = vld [vmem:[#allocation2 + $0x11c0] sm:$0xff]  }
 0x237   :  { %7899 = vmatprep.subr.bf16.mxu1 %v8609_v42  ;;  %v8658_v41 = vld [vmem:[#allocation2 + $0x1100] sm:$0xff]  }
 0x238   :  { %v8659_v42 = vld [vmem:[#allocation2 + $0x1180] sm:$0xff]  }
 0x239   :  { %7878 = vmatpush3.bf16.msra.mxu0 %v8610_v43  ;;  %v92_v43 = vld [vmem:[%s8973_s0 + $0x110] sm:$0xff] }
 0x23a   :  { %7900 = vmatpush3.bf16.msra.mxu1 %v8611_v44  ;;  %7879 = vmatprep.subr.bf16.mxu0 %v8612_v45  ;;  %v6584_v44 = vcombine.low %v92_v43, %v92_v43  ;;  %v6585_v45 = vcombine.high %v92_v43, %v92_v43 }
 0x23b   :  { %7901 = vmatprep.subr.bf16.mxu1 %v8613_v46  ;;  %v93_v46 = vld [vmem:[%s8973_s0 + $0x118] sm:$0xff] }
 0x23d   :  { %7880 = vmatpush3.bf16.msra.mxu0 %v8614_v47 }
 0x23e   :  { %7902 = vmatpush3.bf16.msra.mxu1 %v8615_v48  ;;  %7881 = vmatprep.subr.bf16.mxu0 %v8616_v49  ;;  %v6586_v49 = vcombine.low %v93_v46, %v93_v46 }
 0x23f   :  { %7903 = vmatprep.subr.bf16.mxu1 %v8617_v50  ;;  %v6587_v50 = vcombine.high %v93_v46, %v93_v46 }
 0x241   :  { %7882 = vmatpush3.bf16.msra.mxu0 %v8618_v51 }
 0x242   :  { %7904 = vmatpush3.bf16.msra.mxu1 %v8619_v52  ;;  %7883 = vmatprep.subr.bf16.mxu0 %v8620_v53 }
 0x243   :  { %7905 = vmatprep.subr.bf16.mxu1 %v8621_v54 }
 0x245   :  { %7884 = vmatpush3.bf16.msra.mxu0 %v8622_v55 }
 0x246   :  { %7906 = vmatpush3.bf16.msra.mxu1 %v8623_v56  ;;  %7913 = vmatprep.subr.bf16.mxu0 %v8628_v0 }
 0x247   :  { %7935 = vmatprep.subr.bf16.mxu1 %v8629_v2 }
 0x248   :  { %v7621_v59 = vpop.f32.mrf.mxu0  ;;  %6274 = vmatmul.mubr.bf16.vlgmr.msra.gmra.mxu0 %v6580_v60 }
 0x249   :  { %v7643_v63 = vpop.f32.mrf.mxu1  ;;  %6314 = vmatmul.mubr.bf16.vlgmr.msra.gmra.mxu1 %v6582_v62  ;;  %7914 = vmatpush3.bf16.msra.mxu0 %v8630_v4 }
 0x24a   :  { %v7622_v3 = vpop.f32.mrf.mxu0  ;;  %7936 = vmatpush3.bf16.msra.mxu1 %v8631_v7  ;;  %7915 = vmatprep.subr.bf16.mxu0 %v8632_v12  ;;  %v6415_v12 = vld [vmem:[%s8976_s3 + $0x68] sm:$0xff] }
 0x24b   :  { %v7623_v5 = vadd.f32 %v7622_v3, %v7621_v59  ;;  %v7644_v6 = vpop.f32.mrf.mxu1  ;;  %7937 = vmatprep.subr.bf16.mxu1 %v8633_v13  ;;  %6353 = vmatprep.mubr.bf16.mxu0 %v6585_v45  ;;  %v6414_v13 = vld [vmem:[%s8976_s3 + $0x60] sm:$0xff] }
 0x24c   :  { %v7645_v8 = vadd.f32 %v7644_v6, %v7643_v63  ;;  %v7624_v9 = vpop.f32.mrf.mxu0  ;;  %6393 = vmatprep.mubr.bf16.mxu1 %v6587_v50 }
 0x24d   :  { %v5796_v10 = vadd.f32 %v7623_v5, %v8901_v29  ;;  %v7646_v11 = vpop.f32.mrf.mxu1  ;;  %7916 = vmatpush3.bf16.msra.mxu0 %v8634_v16  ;;  %v8646_v29 = vld [vmem:[#allocation2 + $0x1118] sm:$0xff]   ;;  %v6411_v16 = vld [vmem:[%s8976_s3 + $0x48] sm:$0xff] }
 0x24e   :  { %v7625_v14 = vpop.f32.mrf.mxu0  ;;  %7938 = vmatpush3.bf16.msra.mxu1 %v8635_v18  ;;  %7917 = vmatprep.subr.bf16.mxu0 %v8636_v19  ;;  %v6417_v9 = vld [vmem:[%s8976_s3 + $0x78] sm:$0xff]  ;;  %v6416_v11 = vld [vmem:[%s8976_s3 + $0x70] sm:$0xff] }
 0x24f   :  { %v8910_v15 = vadd.f32 %v7645_v8, %v5796_v10  ;;  %v7647_v17 = vpop.f32.mrf.mxu1  ;;  %7939 = vmatprep.subr.bf16.mxu1 %v8637_v20  ;;  %v8737_v10 = vmov 0.0   ;;  %v6413_v14 = vld [vmem:[%s8976_s3 + $0x58] sm:$0xff]  ;;  %v6408_v19 = vld [vmem:[%s8976_s3 + $0x30] sm:$0xff] }
 0x250   :  { %v6410_v17 = vld [vmem:[%s8976_s3 + $0x40] sm:$0xff]  ;;  %v6409_v18 = vld [vmem:[%s8976_s3 + $0x38] sm:$0xff] }
 0x251   :  { %7918 = vmatpush3.bf16.msra.mxu0 %v8638_v21 }
 0x252   :  { %7940 = vmatpush3.bf16.msra.mxu1 %v8639_v22  ;;  %7919 = vmatprep.subr.bf16.mxu0 %v8640_v23  ;;  %v6407_v23 = vld [vmem:[%s8976_s3 + $0x28] sm:$0xff] }
 0x253   :  { %7941 = vmatprep.subr.bf16.mxu1 %v8641_v24 }
 0x255   :  { %7920 = vmatpush3.bf16.msra.mxu0 %v8642_v25 }
 0x256   :  { %7942 = vmatpush3.bf16.msra.mxu1 %v8643_v26  ;;  %7921 = vmatprep.subr.bf16.mxu0 %v8644_v27 }
 0x257   :  { %7943 = vmatprep.subr.bf16.mxu1 %v8645_v28  ;;  %v6406_v28 = vld [vmem:[%s8976_s3 + $0x20] sm:$0xff] }
 0x259   :  { %7922 = vmatpush3.bf16.msra.mxu0 %v8646_v29 }
 0x25a   :  { %7944 = vmatpush3.bf16.msra.mxu1 %v8647_v30  ;;  %7923 = vmatprep.subr.bf16.mxu0 %v8648_v31 }
 0x25b   :  { %7945 = vmatprep.subr.bf16.mxu1 %v8649_v32  ;;  %v6405_v32 = vld [vmem:[%s8976_s3 + $0x18] sm:$0xff] }
 0x25d   :  { %7924 = vmatpush3.bf16.msra.mxu0 %v8650_v33 }
 0x25e   :  { %7946 = vmatpush3.bf16.msra.mxu1 %v8651_v34  ;;  %7925 = vmatprep.subr.bf16.mxu0 %v8652_v35  ;;  %v6404_v35 = vld [vmem:[%s8976_s3 + $0x10] sm:$0xff] }
 0x25f   :  { %7947 = vmatprep.subr.bf16.mxu1 %v8653_v36  ;;  %v6403_v36 = vld [vmem:[%s8976_s3 + $0x8] sm:$0xff] }
 0x261   :  { %7926 = vmatpush3.bf16.msra.mxu0 %v8654_v37  ;;  %v6402_v37 = vld [vmem:[%s8976_s3] sm:$0xff] }
 0x262   :  { %7948 = vmatpush3.bf16.msra.mxu1 %v8655_v38  ;;  %7927 = vmatprep.subr.bf16.mxu0 %v8656_v39 }
 0x263   :  { %7949 = vmatprep.subr.bf16.mxu1 %v8657_v40 }
 0x265   :  { %7928 = vmatpush3.bf16.msra.mxu0 %v8658_v41 }
 0x266   :  { %7950 = vmatpush3.bf16.msra.mxu1 %v8659_v42  ;;  %7974 = vmatprep.subr.mxu0 %v8737_v10 }
 0x268   :  { %v7665_v47 = vpop.f32.mrf.mxu0  ;;  %6354 = vmatmul.mubr.bf16.vlgmr.msra.gmra.mxu0 %v6584_v44 }
 0x269   :  { %v7687_v48 = vpop.f32.mrf.mxu1  ;;  %6394 = vmatmul.mubr.bf16.vlgmr.msra.gmra.mxu1 %v6586_v49  ;;  %7975 = vmatpush3.msra.mxu0 %v6417_v9 }
 0x26a   :  { %v7666_v51 = vpop.f32.mrf.mxu0  ;;  %7976 = vmatprep.subr.mxu0 %v8737_v10  ;;  %8006 = vmatprep.mubr.msk.f32.mxu0 %vm8738_vm0, %v8737_v10 }
 0x26b   :  { %v7688_v52 = vpop.f32.mrf.mxu1  ;;  %v7667_v53 = vadd.f32 %v7666_v51, %v7665_v47  ;;  %7977 = vmatpush3.msra.mxu0 %v6416_v11 }
 0x26c   :  { %v7689_v54 = vadd.f32 %v7688_v52, %v7687_v48  ;;  %v7668_v55 = vpop.f32.mrf.mxu0  ;;  %7978 = vmatprep.subr.mxu0 %v8737_v10 }
 0x26d   :  { %v7690_v56 = vpop.f32.mrf.mxu1  ;;  %v5876_v57 = vadd.f32 %v7667_v53, %v8910_v15  ;;  %7979 = vmatpush3.msra.mxu0 %v6415_v12  ;;  %v6412_v15 = vld [vmem:[%s8976_s3 + $0x50] sm:$0xff] }
 0x26e   :  { %v7669_v58 = vpop.f32.mrf.mxu0  ;;  %7980 = vmatprep.subr.mxu0 %v8737_v10 }
 0x26f   :  { %v7691_v59 = vpop.f32.mrf.mxu1  ;;  %v5916_v60 = vadd.f32 %v7689_v54, %v5876_v57  ;;  %7981 = vmatpush3.msra.mxu0 %v6414_v13 }
 0x270   :  { %7982 = vmatprep.subr.mxu0 %v8737_v10 }
 0x271   :  { %7983 = vmatpush3.msra.mxu0 %v6413_v14 }
 0x272   :  { %7984 = vmatprep.subr.mxu0 %v8737_v10 }
 0x273   :  { %7985 = vmatpush3.msra.mxu0 %v6412_v15 }
 0x274   :  { %7986 = vmatprep.subr.mxu0 %v8737_v10 }
 0x275   :  { %7987 = vmatpush3.msra.mxu0 %v6411_v16 }
 0x276   :  { %7988 = vmatprep.subr.mxu0 %v8737_v10 }
 0x277   :  { %7989 = vmatpush3.msra.mxu0 %v6410_v17 }
 0x278   :  { %7990 = vmatprep.subr.mxu0 %v8737_v10 }
 0x279   :  { %7991 = vmatpush3.msra.mxu0 %v6409_v18 }
 0x27a   :  { %7992 = vmatprep.subr.mxu0 %v8737_v10 }
 0x27b   :  { %7993 = vmatpush3.msra.mxu0 %v6408_v19 }
 0x27c   :  { %7994 = vmatprep.subr.mxu0 %v8737_v10 }
 0x27d   :  { %7995 = vmatpush3.msra.mxu0 %v6407_v23  ;;  %v7164_v23 = vld [vmem:[#allocation6] ss:$0 sm:$0xff] }
 0x27e   :  { %7996 = vmatprep.subr.mxu0 %v8737_v10 }
 0x27f   :  { %7997 = vmatpush3.msra.mxu0 %v6406_v28 }
 0x280   :  { %7998 = vmatprep.subr.mxu0 %v8737_v10 }
 0x281   :  { %7999 = vmatpush3.msra.mxu0 %v6405_v32 }
 0x282   :  { %8000 = vmatprep.subr.mxu0 %v8737_v10 }
 0x283   :  { %8001 = vmatpush3.msra.mxu0 %v6404_v35 }
 0x284   :  { %8002 = vmatprep.subr.mxu0 %v8737_v10 }
 0x285   :  { %8003 = vmatpush3.msra.mxu0 %v6403_v36 }
 0x286   :  { %8004 = vmatprep.subr.mxu0 %v8737_v10 }
 0x287   :  { %8005 = vmatpush3.msra.mxu0 %v6402_v37 }
 0x288   :  { %v7709_v61 = vpop.f32.mrf.mxu0 }
 0x289   :  { %v7731_v62 = vpop.f32.mrf.mxu1 }
 0x28a   :  { %v7710_v63 = vpop.f32.mrf.mxu0 }
 0x28b   :  { %v7711_v0 = vadd.f32 %v7710_v63, %v7709_v61  ;;  %v7732_v1 = vpop.f32.mrf.mxu1 }
 0x28c   :  { %v7733_v2 = vadd.f32 %v7732_v1, %v7731_v62  ;;  %v7712_v3 = vpop.f32.mrf.mxu0 }
 0x28d   :  { %v5956_v4 = vadd.f32 %v7711_v0, %v5916_v60  ;;  %v7734_v5 = vpop.f32.mrf.mxu1 }
 0x28e   :  { %v7713_v6 = vpop.f32.mrf.mxu0 }
 0x28f   :  { %v5996_v7 = vadd.f32 %v7733_v2, %v5956_v4  ;;  %v7735_v8 = vpop.f32.mrf.mxu1 }
 0x2a8   :  { %v7753_v20 = vpop.f32.mrf.mxu0 }
 0x2a9   :  { %v7775_v21 = vpop.f32.mrf.mxu1 }
 0x2aa   :  { %v7754_v22 = vpop.f32.mrf.mxu0 }
 0x2ab   :  { %v7755_v24 = vadd.f32 %v7754_v22, %v7753_v20  ;;  %v7776_v25 = vpop.f32.mrf.mxu1 }
 0x2ac   :  { %v7777_v26 = vadd.f32 %v7776_v25, %v7775_v21  ;;  %v7756_v27 = vpop.f32.mrf.mxu0 }
 0x2ad   :  { %v6036_v29 = vadd.f32 %v7755_v24, %v5996_v7  ;;  %v7778_v30 = vpop.f32.mrf.mxu1 }
 0x2ae   :  { %v7757_v31 = vpop.f32.mrf.mxu0 }
 0x2af   :  { %v6076_v33 = vadd.f32 %v7777_v26, %v6036_v29  ;;  %v7779_v34 = vpop.f32.mrf.mxu1 }
 0x2c8   :  { %v7797_v38 = vpop.f32.mrf.mxu0 }
 0x2c9   :  { %v7819_v39 = vpop.f32.mrf.mxu1 }
 0x2ca   :  { %v7798_v40 = vpop.f32.mrf.mxu0 }
 0x2cb   :  { %v7820_v41 = vpop.f32.mrf.mxu1  ;;  %v7799_v42 = vadd.f32 %v7798_v40, %v7797_v38 }
 0x2cc   :  { %v7821_v43 = vadd.f32 %v7820_v41, %v7819_v39  ;;  %v7800_v44 = vpop.f32.mrf.mxu0 }
 0x2cd   :  { %v7822_v45 = vpop.f32.mrf.mxu1  ;;  %v6116_v46 = vadd.f32 %v7799_v42, %v6076_v33 }
 0x2ce   :  { %v7801_v47 = vpop.f32.mrf.mxu0 }
 0x2cf   :  { %v7823_v48 = vpop.f32.mrf.mxu1  ;;  %v6156_v49 = vadd.f32 %v7821_v43, %v6116_v46 }
 0x2e8   :  { %v7841_v50 = vpop.f32.mrf.mxu0 }
 0x2e9   :  { %v7863_v51 = vpop.f32.mrf.mxu1 }
 0x2ea   :  { %v7842_v52 = vpop.f32.mrf.mxu0 }
 0x2eb   :  { %v7864_v53 = vpop.f32.mrf.mxu1  ;;  %v7843_v2 = vadd.f32 %v7842_v52, %v7841_v50 }
 0x2ec   :  { %v7844_v54 = vpop.f32.mrf.mxu0  ;;  %v7865_v4 = vadd.f32 %v7864_v53, %v7863_v51 }
 0x2ed   :  { %v7866_v55 = vpop.f32.mrf.mxu1  ;;  %v6196_v3 = vadd.f32 %v7843_v2, %v6156_v49 }
 0x2ee   :  { %v7845_v56 = vpop.f32.mrf.mxu0 }
 0x2ef   :  { %v7867_v57 = vpop.f32.mrf.mxu1  ;;  %v6236_v6 = vadd.f32 %v7865_v4, %v6196_v3 }
 0x308   :  { %v7885_v58 = vpop.f32.mrf.mxu0 }
 0x309   :  { %v7907_v59 = vpop.f32.mrf.mxu1 }
 0x30a   :  { %v7886_v60 = vpop.f32.mrf.mxu0 }
 0x30b   :  { %v7908_v61 = vpop.f32.mrf.mxu1  ;;  %v7887_v5 = vadd.f32 %v7886_v60, %v7885_v58 }
 0x30c   :  { %v7888_v62 = vpop.f32.mrf.mxu0  ;;  %v7909_v8 = vadd.f32 %v7908_v61, %v7907_v59 }
 0x30d   :  { %v7910_v63 = vpop.f32.mrf.mxu1  ;;  %v6276_v7 = vadd.f32 %v7887_v5, %v6236_v6 }
 0x30e   :  { %v7889_v0 = vpop.f32.mrf.mxu0 }
 0x30f   :  { %v7911_v1 = vpop.f32.mrf.mxu1  ;;  %v6316_v13 = vadd.f32 %v7909_v8, %v6276_v7 }
 0x328   :  { %v7929_v9 = vpop.f32.mrf.mxu0 }
 0x329   :  { %v7951_v10 = vpop.f32.mrf.mxu1 }
 0x32a   :  { %v7930_v11 = vpop.f32.mrf.mxu0 }
 0x32b   :  { %v7952_v12 = vpop.f32.mrf.mxu1  ;;  %v7931_v14 = vadd.f32 %v7930_v11, %v7929_v9 }
 0x32c   :  { %v7932_v15 = vpop.f32.mrf.mxu0  ;;  %v7953_v18 = vadd.f32 %v7952_v12, %v7951_v10 }
 0x32d   :  { %v7954_v16 = vpop.f32.mrf.mxu1  ;;  %v6356_v17 = vadd.f32 %v7931_v14, %v6316_v13 }
 0x32e   :  { %v7933_v19 = vpop.f32.mrf.mxu0 }
 0x32f   :  { %v7955_v20 = vpop.f32.mrf.mxu1  ;;  %v6396_v21 = vadd.f32 %v7953_v18, %v6356_v17 }
 0x331   :  { %v6401_v22 = vmax.f32 %v6396_v21, 0.0 }
 0x333   :  { %8007 = vmatmul.mubr.f32.vlgmr.msra.gmra.mxu0 %v6401_v22 }
 0x3f3   :  { %v6491_v24 = vpop.f32.mrf.mxu0 }
 0x3f4   :  { %v6492_v25 = vadd.f32 %v7164_v23, %v6491_v24 }
 0x3f5   :  { %v8008_v26 = vpop.f32.mrf.mxu0 }
 0x3f6   :  { %v6496_v27 = vsel %vm6495_vm1, %v6492_v25, -inf }
 0x3f7   :  { %6497 = vmax.xlane.f32.xlu0 %v6496_v27 }
 0x480   :  { %v6498_v28 = vpop.xlane.xlu0 %6497 }
 0x481   :  { %v6499_v29 = vsub.f32 %v6492_v25, %v6498_v28 }
 0x483   :  { %v6500_v30 = vmul.f32 1.442695, %v6499_v29 }
 0x485   :  { %8664 = vpow2.f32 %v6500_v30 }
 0x492   :  { %v8665_v31 = vpop.eup %8664 }
 0x493   :  { %v6502_v32 = vsel %vm6495_vm1, %v8665_v31, 0.0 }
 0x494   :  { %6503 = vadd.xlane.f32.xlu0 %v6502_v32 }
 0x51d   :  { %v6504_v33 = vpop.xlane.xlu0 %6503 }
 0x51e   :  { %8666 = vlog2.f32 %v6504_v33 }
 0x52b   :  { %v8667_v34 = vpop.eup %8666 }
 0x52c   :  { %v6506_v35 = vmul.f32 0.6931472, %v8667_v34 }
 0x52e   :  { %v6507_v36 = vsub.f32 %v6499_v29, %v6506_v35 }
 0x530   :  { %6508 = vst.msk [vmem:[%s8978_s5] sm:$0xff] %vm6495_vm1, %v6507_v36 }
 0x531   :  { %6513 = vsyncpa [#allocation3], 1 }
 0x532   :  { %6514 = vsyncpa [#allocation5], 1 }

</bundles_post_ra>
